<compile_context>
chip_gen: v7x
topology: tpu7x:2x2x1
jax: 0.10.0
libtpu: 0.0.40
codegen_flags: <defaults>
</compile_context>

<pallas_src>
import functools

import jax
import jax.numpy as jnp
import numpy as np
from jax import lax
from jax.experimental import pallas as pl
from jax.experimental.pallas import tpu as pltpu

KS = (5, 9, 13)      # SPP max-pool kernel sizes (stride 1, pad = ks // 2)
PAD = 2              # halo of each cascaded 5x5 pool (5 // 2)
LANE = 128
BN_EPS = 1e-5


def _silu(v):
    return v * jax.nn.sigmoid(v)


def _round_up(x, m):
    return (x + m - 1) // m * m


def spp_kernel(x_ref, w1_ref, s1_ref, b1_ref, w2_ref, s2_ref, b2_ref,
               o_ref, pad_ref, *, H, W):
    """One batch element per grid step.

    x_ref:   (1, H*W, Cin)         bf16 input activations
    w1_ref:  (Cin, Chp)            bf16 conv1 1x1 weight (as matmul)
    s1/b1:   (1, Chp)              f32 folded BN1 scale / bias
    w2_ref:  (4, Chp, Coutp)       bf16 conv2 1x1 weight, one slab per branch
    s2/b2:   (1, Coutp)            f32 folded BN2 scale / bias
    o_ref:   (1, H*W, Coutp)       f32 output
    pad_ref: VMEM (H+4, W+4, Chp)  bf16 scratch with -inf spatial border
    """
    Chp = w1_ref.shape[1]
    Hp = H + 2 * PAD
    Wp = W + 2 * PAD
    NEG = -jnp.inf

    # ---- conv1 (1x1) + BN + SiLU: bf16 MXU matmul, f32 accumulate ----------
    h = jnp.dot(x_ref[0], w1_ref[...], preferred_element_type=jnp.float32)
    h = _silu(h * s1_ref[...] + b1_ref[...])                 # (HW, Chp) f32
    h = h.astype(jnp.bfloat16)

    # ---- -inf spatial border only (interior fully overwritten each pass) ---
    pad_ref[:PAD, :, :] = jnp.full((PAD, Wp, Chp), NEG, jnp.bfloat16)
    pad_ref[PAD + H:, :, :] = jnp.full((PAD, Wp, Chp), NEG, jnp.bfloat16)
    pad_ref[:, :PAD, :] = jnp.full((Hp, PAD, Chp), NEG, jnp.bfloat16)
    pad_ref[:, PAD + W:, :] = jnp.full((Hp, PAD, Chp), NEG, jnp.bfloat16)

    # ---- conv2 accumulated branch by branch (no concat temp) ---------------
    acc = jnp.dot(h, w2_ref[0], preferred_element_type=jnp.float32)

    # ---- SPPF cascade: 5x5 o 5x5 o 5x5 == pools of 5 / 9 / 13 --------------
    cur = h.reshape(H, W, Chp)
    for k in range(1, 4):
        pad_ref[PAD:PAD + H, PAD:PAD + W, :] = cur
        # Separable 5-tap max: W direction (ref slices), then H direction
        # (leading-dim slices of the rowmax value -> free address offsets).
        rowmax = pad_ref[:, 0:W, :]
        for dx in range(1, 2 * PAD + 1):
            rowmax = jnp.maximum(rowmax, pad_ref[:, dx:dx + W, :])
        pooled = rowmax[0:H]
        for dy in range(1, 2 * PAD + 1):
            pooled = jnp.maximum(pooled, rowmax[dy:dy + H])
        acc = acc + jnp.dot(pooled.reshape(H * W, Chp), w2_ref[k],
                            preferred_element_type=jnp.float32)
        cur = pooled                                          # feed next pool

    # ---- BN2 + SiLU ---------------------------------------------------------
    y = _silu(acc * s2_ref[...] + b2_ref[...])
    o_ref[0] = y.astype(o_ref.dtype)


def spp_bottleneck(x_nchw, params):
    """x_nchw: (N, Cin, H, W) float32 -> (N, Cout, H, W) float32."""
    w1, s1, b1, w2, s2, b2 = params
    N, Cin, H, W = x_nchw.shape
    Ch = w1.shape[1]
    Cout = w2.shape[1]
    Chp = _round_up(Ch, LANE)
    Coutp = _round_up(Cout, LANE)

    # NCHW -> (N, H*W, C) with channels in the lane dim; bf16 into the MXU.
    x = jnp.transpose(x_nchw, (0, 2, 3, 1)).reshape(N, H * W, Cin)
    x = x.astype(jnp.bfloat16)

    # Zero-pad channels to lane multiples; bf16 weights, f32 scale/bias.
    # (Padded h channels are exactly 0, pools of 0 stay 0, padded w2 rows are
    #  0 -> padding never perturbs the real output columns.)
    w1p = jnp.zeros((Cin, Chp), jnp.bfloat16).at[:, :Ch].set(
        w1.astype(jnp.bfloat16))
    s1p = jnp.zeros((1, Chp), jnp.float32).at[:, :Ch].set(s1)
    b1p = jnp.zeros((1, Chp), jnp.float32).at[:, :Ch].set(b1)
    w2p = jnp.zeros((4, Chp, Coutp), jnp.bfloat16).at[:, :Ch, :Cout].set(
        w2.reshape(4, Ch, Cout).astype(jnp.bfloat16))
    s2p = jnp.zeros((1, Coutp), jnp.float32).at[:, :Cout].set(s2)
    b2p = jnp.zeros((1, Coutp), jnp.float32).at[:, :Cout].set(b2)

    kernel = functools.partial(spp_kernel, H=H, W=W)
    out = pl.pallas_call(
        kernel,
        out_shape=jax.ShapeDtypeStruct((N, H * W, Coutp), jnp.float32),
        grid=(N,),
        in_specs=[
            pl.BlockSpec((1, H * W, Cin), lambda n: (n, 0, 0)),
            pl.BlockSpec((Cin, Chp), lambda n: (0, 0)),
            pl.BlockSpec((1, Chp), lambda n: (0, 0)),
            pl.BlockSpec((1, Chp), lambda n: (0, 0)),
            pl.BlockSpec((4, Chp, Coutp), lambda n: (0, 0, 0)),
            pl.BlockSpec((1, Coutp), lambda n: (0, 0)),
            pl.BlockSpec((1, Coutp), lambda n: (0, 0)),
        ],
        out_specs=pl.BlockSpec((1, H * W, Coutp), lambda n: (n, 0, 0)),
        scratch_shapes=[
            pltpu.VMEM((H + 2 * PAD, W + 2 * PAD, Chp), jnp.bfloat16),
        ],
        compiler_params=pltpu.CompilerParams(
            dimension_semantics=("parallel",),
            vmem_limit_bytes=64 * 1024 * 1024),
    )(x, w1p, s1p, b1p, w2p, s2p, b2p)

    out = out[:, :, :Cout].reshape(N, H, W, Cout)
    return jnp.transpose(out, (0, 3, 1, 2))


def reference(x_nchw, params):
    """Pure-JAX reference matching the kernel's bf16 matmul / pooling policy,
    using independent 5/9/13 pools (also validates the SPPF-cascade identity)."""
    w1, s1, b1, w2, s2, b2 = params
    x = jnp.transpose(x_nchw, (0, 2, 3, 1)).astype(jnp.bfloat16)   # NHWC
    h = jnp.einsum('nhwc,cd->nhwd', x, w1.astype(jnp.bfloat16),
                   preferred_element_type=jnp.float32)
    h = h * s1[0] + b1[0]
    h = h * jax.nn.sigmoid(h)
    h = h.astype(jnp.bfloat16).astype(jnp.float32)   # kernel rounds h to bf16

    def maxpool(a, ks):
        p = ks // 2
        return lax.reduce_window(a, -jnp.inf, lax.max,
                                 (1, ks, ks, 1), (1, 1, 1, 1),
                                 ((0, 0), (p, p), (p, p), (0, 0)))

    cat = jnp.concatenate([h] + [maxpool(h, ks) for ks in KS], axis=-1)
    y = jnp.einsum('nhwc,cd->nhwd', cat.astype(jnp.bfloat16),
                   w2.astype(jnp.bfloat16),
                   preferred_element_type=jnp.float32)
    y = y * s2[0] + b2[0]
    y = y * jax.nn.sigmoid(y)
    return jnp.transpose(y, (0, 3, 1, 2))


def make_params(key, in_channels, out_channels):
    """Deterministic synthetic weights; BN folded into scale/bias (eval mode)."""
    ch = in_channels // 2
    cat = ch * (len(KS) + 1)
    ks = jax.random.split(key, 10)

    def bn_fold(kg, kb, km, kv, c):
        gamma = 1.0 + 0.1 * jax.random.normal(kg, (c,), jnp.float32)
        beta = 0.1 * jax.random.normal(kb, (c,), jnp.float32)
        mean = 0.1 * jax.random.normal(km, (c,), jnp.float32)
        var = jax.random.uniform(kv, (c,), jnp.float32, 0.5, 1.5)
        scale = gamma / jnp.sqrt(var + BN_EPS)
        bias = beta - mean * scale
        return scale.reshape(1, c), bias.reshape(1, c)

    w1 = 0.5 * jax.random.normal(ks[0], (in_channels, ch), jnp.float32)
    s1, b1 = bn_fold(ks[1], ks[2], ks[3], ks[4], ch)
    w2 = 0.5 * jax.random.normal(ks[5], (cat, out_channels), jnp.float32)
    s2, b2 = bn_fold(ks[6], ks[7], ks[8], ks[9], out_channels)
    return (w1, s1, b1, w2, s2, b2)


if __name__ == "__main__":
    N, Cin, H, W = 2, 4, 16, 16
    Cout = 8

    root = jax.random.PRNGKey(0)
    kx, kp = jax.random.split(root)
    x = jax.random.normal(kx, (N, Cin, H, W), jnp.float32)
    params = make_params(kp, Cin, Cout)

    out = spp_bottleneck(x, params)
    jax.block_until_ready(out)

    ref = reference(x, params)
    np.testing.assert_allclose(np.asarray(out), np.asarray(ref),
                               rtol=5e-3, atol=5e-3)
    print("KERNEL_OK")
</pallas_src>

<mosaic_0001>
module attributes {stable_mosaic.version = 11 : i64} {
  func.func @spp_kernel(%arg0: i32, %arg1: memref<1x256x4xbf16, #tpu.memory_space<vmem>>, %arg2: memref<4x128xbf16, #tpu.memory_space<vmem>>, %arg3: memref<1x128xf32, #tpu.memory_space<vmem>>, %arg4: memref<1x128xf32, #tpu.memory_space<vmem>>, %arg5: memref<4x128x128xbf16, #tpu.memory_space<vmem>>, %arg6: memref<1x128xf32, #tpu.memory_space<vmem>>, %arg7: memref<1x128xf32, #tpu.memory_space<vmem>>, %arg8: memref<1x256x128xf32, #tpu.memory_space<vmem>>, %arg9: memref<20x20x128xbf16, #tpu.memory_space<vmem>>) attributes {dimension_semantics = [#tpu.dimension_semantics<parallel>], iteration_bounds = array<i64: 2>, scalar_prefetch = 0 : i64, scratch_operands = 1 : i64, tpu.core_type = #tpu.core_type<tc>, window_params = [{transform_indices = @transform_0, window_bounds = array<i64: 1, 256, 4>}, {pipeline_mode = #tpu.pipeline_mode<synchronous>, transform_indices = @transform_1, window_bounds = array<i64: 4, 128>}, {pipeline_mode = #tpu.pipeline_mode<synchronous>, transform_indices = @transform_2, window_bounds = array<i64: 1, 128>}, {pipeline_mode = #tpu.pipeline_mode<synchronous>, transform_indices = @transform_3, window_bounds = array<i64: 1, 128>}, {pipeline_mode = #tpu.pipeline_mode<synchronous>, transform_indices = @transform_4, window_bounds = array<i64: 4, 128, 128>}, {pipeline_mode = #tpu.pipeline_mode<synchronous>, transform_indices = @transform_5, window_bounds = array<i64: 1, 128>}, {pipeline_mode = #tpu.pipeline_mode<synchronous>, transform_indices = @transform_6, window_bounds = array<i64: 1, 128>}, {transform_indices = @transform_7, window_bounds = array<i64: 1, 256, 128>}]} {
    %c0 = arith.constant 0 : index
    %c0_0 = arith.constant 0 : index
    %c0_1 = arith.constant 0 : index
    %0 = vector.load %arg1[%c0, %c0_0, %c0_1] : memref<1x256x4xbf16, #tpu.memory_space<vmem>>, vector<1x256x4xbf16>
    %1 = vector.shape_cast %0 : vector<1x256x4xbf16> to vector<256x4xbf16>
    %c0_2 = arith.constant 0 : index
    %c0_3 = arith.constant 0 : index
    %2 = vector.load %arg2[%c0_2, %c0_3] : memref<4x128xbf16, #tpu.memory_space<vmem>>, vector<4x128xbf16>
    %cst = arith.constant dense<0.000000e+00> : vector<256x128xf32>
    %3 = tpu.matmul %1, %2, %cst {dimension_numbers = #tpu.dot_dimension_numbers<[1], [0], [0], [1], [0, 0, 1, 1], [], []>} : vector<256x4xbf16>, vector<4x128xbf16>, vector<256x128xf32> -> vector<256x128xf32>
    %c0_4 = arith.constant 0 : index
    %c0_5 = arith.constant 0 : index
    %4 = vector.load %arg3[%c0_4, %c0_5] : memref<1x128xf32, #tpu.memory_space<vmem>>, vector<1x128xf32>
    %5 = vector.broadcast %4 : vector<1x128xf32> to vector<256x128xf32>
    %6 = arith.mulf %3, %5 : vector<256x128xf32>
    %c0_6 = arith.constant 0 : index
    %c0_7 = arith.constant 0 : index
    %7 = vector.load %arg4[%c0_6, %c0_7] : memref<1x128xf32, #tpu.memory_space<vmem>>, vector<1x128xf32>
    %8 = vector.broadcast %7 : vector<1x128xf32> to vector<256x128xf32>
    %9 = arith.addf %6, %8 : vector<256x128xf32>
    %10 = arith.negf %9 : vector<256x128xf32>
    %11 = math.exp %10 : vector<256x128xf32>
    %cst_8 = arith.constant 1.000000e+00 : f32
    %12 = vector.broadcast %cst_8 : f32 to vector<256x128xf32>
    %13 = arith.addf %12, %11 : vector<256x128xf32>
    %14 = arith.divf %12, %13 : vector<256x128xf32>
    %15 = arith.mulf %9, %14 : vector<256x128xf32>
    %16 = arith.truncf %15 : vector<256x128xf32> to vector<256x128xbf16>
    %cst_9 = arith.constant 0xFF80 : bf16
    %17 = vector.broadcast %cst_9 : bf16 to vector<2x20x128xbf16>
    %c0_10 = arith.constant 0 : index
    %c0_11 = arith.constant 0 : index
    %c0_12 = arith.constant 0 : index
    %18 = vector.load %arg9[%c0_10, %c0_11, %c0_12] : memref<20x20x128xbf16, #tpu.memory_space<vmem>>, vector<2x20x128xbf16>
    tpu.vector_store %arg9[%c0_10, %c0_11, %c0_12], %17 {strides = array<i32>} : memref<20x20x128xbf16, #tpu.memory_space<vmem>>, vector<2x20x128xbf16>,
    %cst_13 = arith.constant 0xFF80 : bf16
    %19 = vector.broadcast %cst_13 : bf16 to vector<2x20x128xbf16>
    %c18 = arith.constant 18 : index
    %c0_14 = arith.constant 0 : index
    %c0_15 = arith.constant 0 : index
    %20 = vector.load %arg9[%c18, %c0_14, %c0_15] : memref<20x20x128xbf16, #tpu.memory_space<vmem>>, vector<2x20x128xbf16>
    tpu.vector_store %arg9[%c18, %c0_14, %c0_15], %19 {strides = array<i32>} : memref<20x20x128xbf16, #tpu.memory_space<vmem>>, vector<2x20x128xbf16>,
    %cst_16 = arith.constant 0xFF80 : bf16
    %21 = vector.broadcast %cst_16 : bf16 to vector<20x2x128xbf16>
    %c0_17 = arith.constant 0 : index
    %c0_18 = arith.constant 0 : index
    %c0_19 = arith.constant 0 : index
    %22 = vector.load %arg9[%c0_17, %c0_18, %c0_19] : memref<20x20x128xbf16, #tpu.memory_space<vmem>>, vector<20x2x128xbf16>
    tpu.vector_store %arg9[%c0_17, %c0_18, %c0_19], %21 {strides = array<i32>} : memref<20x20x128xbf16, #tpu.memory_space<vmem>>, vector<20x2x128xbf16>,
    %cst_20 = arith.constant 0xFF80 : bf16
    %23 = vector.broadcast %cst_20 : bf16 to vector<20x2x128xbf16>
    %c0_21 = arith.constant 0 : index
    %c18_22 = arith.constant 18 : index
    %c0_23 = arith.constant 0 : index
    %24 = vector.load %arg9[%c0_21, %c18_22, %c0_23] : memref<20x20x128xbf16, #tpu.memory_space<vmem>>, vector<20x2x128xbf16>
    tpu.vector_store %arg9[%c0_21, %c18_22, %c0_23], %23 {strides = array<i32>} : memref<20x20x128xbf16, #tpu.memory_space<vmem>>, vector<20x2x128xbf16>,
    %c0_24 = arith.constant 0 : index
    %c0_25 = arith.constant 0 : index
    %c0_26 = arith.constant 0 : index
    %25 = vector.load %arg5[%c0_24, %c0_25, %c0_26] : memref<4x128x128xbf16, #tpu.memory_space<vmem>>, vector<1x128x128xbf16>
    %26 = vector.shape_cast %25 : vector<1x128x128xbf16> to vector<128x128xbf16>
    %cst_27 = arith.constant dense<0.000000e+00> : vector<256x128xf32>
    %27 = tpu.matmul %16, %26, %cst_27 {dimension_numbers = #tpu.dot_dimension_numbers<[1], [0], [0], [1], [0, 0, 1, 1], [], []>} : vector<256x128xbf16>, vector<128x128xbf16>, vector<256x128xf32> -> vector<256x128xf32>
    %28 = vector.shape_cast %16 : vector<256x128xbf16> to vector<16x16x128xbf16>
    %c2 = arith.constant 2 : index
    %c2_28 = arith.constant 2 : index
    %c0_29 = arith.constant 0 : index
    %29 = vector.load %arg9[%c2, %c2_28, %c0_29] : memref<20x20x128xbf16, #tpu.memory_space<vmem>>, vector<16x16x128xbf16>
    tpu.vector_store %arg9[%c2, %c2_28, %c0_29], %28 {strides = array<i32>} : memref<20x20x128xbf16, #tpu.memory_space<vmem>>, vector<16x16x128xbf16>,
    %c0_30 = arith.constant 0 : index
    %c0_31 = arith.constant 0 : index
    %c0_32 = arith.constant 0 : index
    %30 = vector.load %arg9[%c0_30, %c0_31, %c0_32] : memref<20x20x128xbf16, #tpu.memory_space<vmem>>, vector<20x16x128xbf16>
    %c0_33 = arith.constant 0 : index
    %c1 = arith.constant 1 : index
    %c0_34 = arith.constant 0 : index
    %31 = vector.load %arg9[%c0_33, %c1, %c0_34] : memref<20x20x128xbf16, #tpu.memory_space<vmem>>, vector<20x16x128xbf16>
    %32 = arith.maximumf %30, %31 : vector<20x16x128xbf16>
    %c0_35 = arith.constant 0 : index
    %c2_36 = arith.constant 2 : index
    %c0_37 = arith.constant 0 : index
    %33 = vector.load %arg9[%c0_35, %c2_36, %c0_37] : memref<20x20x128xbf16, #tpu.memory_space<vmem>>, vector<20x16x128xbf16>
    %34 = arith.maximumf %32, %33 : vector<20x16x128xbf16>
    %c0_38 = arith.constant 0 : index
    %c3 = arith.constant 3 : index
    %c0_39 = arith.constant 0 : index
    %35 = vector.load %arg9[%c0_38, %c3, %c0_39] : memref<20x20x128xbf16, #tpu.memory_space<vmem>>, vector<20x16x128xbf16>
    %36 = arith.maximumf %34, %35 : vector<20x16x128xbf16>
    %c0_40 = arith.constant 0 : index
    %c4 = arith.constant 4 : index
    %c0_41 = arith.constant 0 : index
    %37 = vector.load %arg9[%c0_40, %c4, %c0_41] : memref<20x20x128xbf16, #tpu.memory_space<vmem>>, vector<20x16x128xbf16>
    %38 = arith.maximumf %36, %37 : vector<20x16x128xbf16>
    %39 = vector.extract_strided_slice %38 {offsets = [0, 0, 0], sizes = [16, 16, 128], strides = [1, 1, 1]} : vector<20x16x128xbf16> to vector<16x16x128xbf16>
    %40 = vector.extract_strided_slice %38 {offsets = [1, 0, 0], sizes = [16, 16, 128], strides = [1, 1, 1]} : vector<20x16x128xbf16> to vector<16x16x128xbf16>
    %41 = arith.maximumf %39, %40 : vector<16x16x128xbf16>
    %42 = vector.extract_strided_slice %38 {offsets = [2, 0, 0], sizes = [16, 16, 128], strides = [1, 1, 1]} : vector<20x16x128xbf16> to vector<16x16x128xbf16>
    %43 = arith.maximumf %41, %42 : vector<16x16x128xbf16>
    %44 = vector.extract_strided_slice %38 {offsets = [3, 0, 0], sizes = [16, 16, 128], strides = [1, 1, 1]} : vector<20x16x128xbf16> to vector<16x16x128xbf16>
    %45 = arith.maximumf %43, %44 : vector<16x16x128xbf16>
    %46 = vector.extract_strided_slice %38 {offsets = [4, 0, 0], sizes = [16, 16, 128], strides = [1, 1, 1]} : vector<20x16x128xbf16> to vector<16x16x128xbf16>
    %47 = arith.maximumf %45, %46 : vector<16x16x128xbf16>
    %48 = vector.shape_cast %47 : vector<16x16x128xbf16> to vector<256x128xbf16>
    %c1_42 = arith.constant 1 : index
    %c0_43 = arith.constant 0 : index
    %c0_44 = arith.constant 0 : index
    %49 = vector.load %arg5[%c1_42, %c0_43, %c0_44] : memref<4x128x128xbf16, #tpu.memory_space<vmem>>, vector<1x128x128xbf16>
    %50 = vector.shape_cast %49 : vector<1x128x128xbf16> to vector<128x128xbf16>
    %cst_45 = arith.constant dense<0.000000e+00> : vector<256x128xf32>
    %51 = tpu.matmul %48, %50, %cst_45 {dimension_numbers = #tpu.dot_dimension_numbers<[1], [0], [0], [1], [0, 0, 1, 1], [], []>} : vector<256x128xbf16>, vector<128x128xbf16>, vector<256x128xf32> -> vector<256x128xf32>
    %52 = arith.addf %27, %51 : vector<256x128xf32>
    %c2_46 = arith.constant 2 : index
    %c2_47 = arith.constant 2 : index
    %c0_48 = arith.constant 0 : index
    %53 = vector.load %arg9[%c2_46, %c2_47, %c0_48] : memref<20x20x128xbf16, #tpu.memory_space<vmem>>, vector<16x16x128xbf16>
    tpu.vector_store %arg9[%c2_46, %c2_47, %c0_48], %47 {strides = array<i32>} : memref<20x20x128xbf16, #tpu.memory_space<vmem>>, vector<16x16x128xbf16>,
    %c0_49 = arith.constant 0 : index
    %c0_50 = arith.constant 0 : index
    %c0_51 = arith.constant 0 : index
    %54 = vector.load %arg9[%c0_49, %c0_50, %c0_51] : memref<20x20x128xbf16, #tpu.memory_space<vmem>>, vector<20x16x128xbf16>
    %c0_52 = arith.constant 0 : index
    %c1_53 = arith.constant 1 : index
    %c0_54 = arith.constant 0 : index
    %55 = vector.load %arg9[%c0_52, %c1_53, %c0_54] : memref<20x20x128xbf16, #tpu.memory_space<vmem>>, vector<20x16x128xbf16>
    %56 = arith.maximumf %54, %55 : vector<20x16x128xbf16>
    %c0_55 = arith.constant 0 : index
    %c2_56 = arith.constant 2 : index
    %c0_57 = arith.constant 0 : index
    %57 = vector.load %arg9[%c0_55, %c2_56, %c0_57] : memref<20x20x128xbf16, #tpu.memory_space<vmem>>, vector<20x16x128xbf16>
    %58 = arith.maximumf %56, %57 : vector<20x16x128xbf16>
    %c0_58 = arith.constant 0 : index
    %c3_59 = arith.constant 3 : index
    %c0_60 = arith.constant 0 : index
    %59 = vector.load %arg9[%c0_58, %c3_59, %c0_60] : memref<20x20x128xbf16, #tpu.memory_space<vmem>>, vector<20x16x128xbf16>
    %60 = arith.maximumf %58, %59 : vector<20x16x128xbf16>
    %c0_61 = arith.constant 0 : index
    %c4_62 = arith.constant 4 : index
    %c0_63 = arith.constant 0 : index
    %61 = vector.load %arg9[%c0_61, %c4_62, %c0_63] : memref<20x20x128xbf16, #tpu.memory_space<vmem>>, vector<20x16x128xbf16>
    %62 = arith.maximumf %60, %61 : vector<20x16x128xbf16>
    %63 = vector.extract_strided_slice %62 {offsets = [0, 0, 0], sizes = [16, 16, 128], strides = [1, 1, 1]} : vector<20x16x128xbf16> to vector<16x16x128xbf16>
    %64 = vector.extract_strided_slice %62 {offsets = [1, 0, 0], sizes = [16, 16, 128], strides = [1, 1, 1]} : vector<20x16x128xbf16> to vector<16x16x128xbf16>
    %65 = arith.maximumf %63, %64 : vector<16x16x128xbf16>
    %66 = vector.extract_strided_slice %62 {offsets = [2, 0, 0], sizes = [16, 16, 128], strides = [1, 1, 1]} : vector<20x16x128xbf16> to vector<16x16x128xbf16>
    %67 = arith.maximumf %65, %66 : vector<16x16x128xbf16>
    %68 = vector.extract_strided_slice %62 {offsets = [3, 0, 0], sizes = [16, 16, 128], strides = [1, 1, 1]} : vector<20x16x128xbf16> to vector<16x16x128xbf16>
    %69 = arith.maximumf %67, %68 : vector<16x16x128xbf16>
    %70 = vector.extract_strided_slice %62 {offsets = [4, 0, 0], sizes = [16, 16, 128], strides = [1, 1, 1]} : vector<20x16x128xbf16> to vector<16x16x128xbf16>
    %71 = arith.maximumf %69, %70 : vector<16x16x128xbf16>
    %72 = vector.shape_cast %71 : vector<16x16x128xbf16> to vector<256x128xbf16>
    %c2_64 = arith.constant 2 : index
    %c0_65 = arith.constant 0 : index
    %c0_66 = arith.constant 0 : index
    %73 = vector.load %arg5[%c2_64, %c0_65, %c0_66] : memref<4x128x128xbf16, #tpu.memory_space<vmem>>, vector<1x128x128xbf16>
    %74 = vector.shape_cast %73 : vector<1x128x128xbf16> to vector<128x128xbf16>
    %cst_67 = arith.constant dense<0.000000e+00> : vector<256x128xf32>
    %75 = tpu.matmul %72, %74, %cst_67 {dimension_numbers = #tpu.dot_dimension_numbers<[1], [0], [0], [1], [0, 0, 1, 1], [], []>} : vector<256x128xbf16>, vector<128x128xbf16>, vector<256x128xf32> -> vector<256x128xf32>
    %76 = arith.addf %52, %75 : vector<256x128xf32>
    %c2_68 = arith.constant 2 : index
    %c2_69 = arith.constant 2 : index
    %c0_70 = arith.constant 0 : index
    %77 = vector.load %arg9[%c2_68, %c2_69, %c0_70] : memref<20x20x128xbf16, #tpu.memory_space<vmem>>, vector<16x16x128xbf16>
    tpu.vector_store %arg9[%c2_68, %c2_69, %c0_70], %71 {strides = array<i32>} : memref<20x20x128xbf16, #tpu.memory_space<vmem>>, vector<16x16x128xbf16>,
    %c0_71 = arith.constant 0 : index
    %c0_72 = arith.constant 0 : index
    %c0_73 = arith.constant 0 : index
    %78 = vector.load %arg9[%c0_71, %c0_72, %c0_73] : memref<20x20x128xbf16, #tpu.memory_space<vmem>>, vector<20x16x128xbf16>
    %c0_74 = arith.constant 0 : index
    %c1_75 = arith.constant 1 : index
    %c0_76 = arith.constant 0 : index
    %79 = vector.load %arg9[%c0_74, %c1_75, %c0_76] : memref<20x20x128xbf16, #tpu.memory_space<vmem>>, vector<20x16x128xbf16>
    %80 = arith.maximumf %78, %79 : vector<20x16x128xbf16>
    %c0_77 = arith.constant 0 : index
    %c2_78 = arith.constant 2 : index
    %c0_79 = arith.constant 0 : index
    %81 = vector.load %arg9[%c0_77, %c2_78, %c0_79] : memref<20x20x128xbf16, #tpu.memory_space<vmem>>, vector<20x16x128xbf16>
    %82 = arith.maximumf %80, %81 : vector<20x16x128xbf16>
    %c0_80 = arith.constant 0 : index
    %c3_81 = arith.constant 3 : index
    %c0_82 = arith.constant 0 : index
    %83 = vector.load %arg9[%c0_80, %c3_81, %c0_82] : memref<20x20x128xbf16, #tpu.memory_space<vmem>>, vector<20x16x128xbf16>
    %84 = arith.maximumf %82, %83 : vector<20x16x128xbf16>
    %c0_83 = arith.constant 0 : index
    %c4_84 = arith.constant 4 : index
    %c0_85 = arith.constant 0 : index
    %85 = vector.load %arg9[%c0_83, %c4_84, %c0_85] : memref<20x20x128xbf16, #tpu.memory_space<vmem>>, vector<20x16x128xbf16>
    %86 = arith.maximumf %84, %85 : vector<20x16x128xbf16>
    %87 = vector.extract_strided_slice %86 {offsets = [0, 0, 0], sizes = [16, 16, 128], strides = [1, 1, 1]} : vector<20x16x128xbf16> to vector<16x16x128xbf16>
    %88 = vector.extract_strided_slice %86 {offsets = [1, 0, 0], sizes = [16, 16, 128], strides = [1, 1, 1]} : vector<20x16x128xbf16> to vector<16x16x128xbf16>
    %89 = arith.maximumf %87, %88 : vector<16x16x128xbf16>
    %90 = vector.extract_strided_slice %86 {offsets = [2, 0, 0], sizes = [16, 16, 128], strides = [1, 1, 1]} : vector<20x16x128xbf16> to vector<16x16x128xbf16>
    %91 = arith.maximumf %89, %90 : vector<16x16x128xbf16>
    %92 = vector.extract_strided_slice %86 {offsets = [3, 0, 0], sizes = [16, 16, 128], strides = [1, 1, 1]} : vector<20x16x128xbf16> to vector<16x16x128xbf16>
    %93 = arith.maximumf %91, %92 : vector<16x16x128xbf16>
    %94 = vector.extract_strided_slice %86 {offsets = [4, 0, 0], sizes = [16, 16, 128], strides = [1, 1, 1]} : vector<20x16x128xbf16> to vector<16x16x128xbf16>
    %95 = arith.maximumf %93, %94 : vector<16x16x128xbf16>
    %96 = vector.shape_cast %95 : vector<16x16x128xbf16> to vector<256x128xbf16>
    %c3_86 = arith.constant 3 : index
    %c0_87 = arith.constant 0 : index
    %c0_88 = arith.constant 0 : index
    %97 = vector.load %arg5[%c3_86, %c0_87, %c0_88] : memref<4x128x128xbf16, #tpu.memory_space<vmem>>, vector<1x128x128xbf16>
    %98 = vector.shape_cast %97 : vector<1x128x128xbf16> to vector<128x128xbf16>
    %cst_89 = arith.constant dense<0.000000e+00> : vector<256x128xf32>
    %99 = tpu.matmul %96, %98, %cst_89 {dimension_numbers = #tpu.dot_dimension_numbers<[1], [0], [0], [1], [0, 0, 1, 1], [], []>} : vector<256x128xbf16>, vector<128x128xbf16>, vector<256x128xf32> -> vector<256x128xf32>
    %100 = arith.addf %76, %99 : vector<256x128xf32>
    %c0_90 = arith.constant 0 : index
    %c0_91 = arith.constant 0 : index
    %101 = vector.load %arg6[%c0_90, %c0_91] : memref<1x128xf32, #tpu.memory_space<vmem>>, vector<1x128xf32>
    %102 = vector.broadcast %101 : vector<1x128xf32> to vector<256x128xf32>
    %103 = arith.mulf %100, %102 : vector<256x128xf32>
    %c0_92 = arith.constant 0 : index
    %c0_93 = arith.constant 0 : index
    %104 = vector.load %arg7[%c0_92, %c0_93] : memref<1x128xf32, #tpu.memory_space<vmem>>, vector<1x128xf32>
    %105 = vector.broadcast %104 : vector<1x128xf32> to vector<256x128xf32>
    %106 = arith.addf %103, %105 : vector<256x128xf32>
    %107 = arith.negf %106 : vector<256x128xf32>
    %108 = math.exp %107 : vector<256x128xf32>
    %cst_94 = arith.constant 1.000000e+00 : f32
    %109 = vector.broadcast %cst_94 : f32 to vector<256x128xf32>
    %110 = arith.addf %109, %108 : vector<256x128xf32>
    %111 = arith.divf %109, %110 : vector<256x128xf32>
    %112 = arith.mulf %106, %111 : vector<256x128xf32>
    %c0_95 = arith.constant 0 : index
    %c0_96 = arith.constant 0 : index
    %c0_97 = arith.constant 0 : index
    %113 = vector.load %arg8[%c0_95, %c0_96, %c0_97] : memref<1x256x128xf32, #tpu.memory_space<vmem>>, vector<1x256x128xf32>
    %114 = vector.shape_cast %113 : vector<1x256x128xf32> to vector<256x128xf32>
    %115 = vector.shape_cast %112 : vector<256x128xf32> to vector<1x256x128xf32>
    tpu.vector_store %arg8[%c0_95, %c0_96, %c0_97], %115 {strides = array<i32>} : memref<1x256x128xf32, #tpu.memory_space<vmem>>, vector<1x256x128xf32>,
    return
  }
  func.func @transform_0(%arg0: i32) -> (i32, i32, i32) {
    %c0_i32 = arith.constant 0 : i32
    %c0_i32_0 = arith.constant 0 : i32
    %c0_i32_1 = arith.constant 0 : i32
    return %arg0, %c0_i32, %c0_i32_0 : i32, i32, i32
  }
  func.func @transform_1(%arg0: i32) -> (i32, i32) {
    %c0_i32 = arith.constant 0 : i32
    %c0_i32_0 = arith.constant 0 : i32
    %c0_i32_1 = arith.constant 0 : i32
    return %c0_i32, %c0_i32_0 : i32, i32
  }
  func.func @transform_2(%arg0: i32) -> (i32, i32) {
    %c0_i32 = arith.constant 0 : i32
    %c0_i32_0 = arith.constant 0 : i32
    %c0_i32_1 = arith.constant 0 : i32
    return %c0_i32, %c0_i32_0 : i32, i32
  }
  func.func @transform_3(%arg0: i32) -> (i32, i32) {
    %c0_i32 = arith.constant 0 : i32
    %c0_i32_0 = arith.constant 0 : i32
    %c0_i32_1 = arith.constant 0 : i32
    return %c0_i32, %c0_i32_0 : i32, i32
  }
  func.func @transform_4(%arg0: i32) -> (i32, i32, i32) {
    %c0_i32 = arith.constant 0 : i32
    %c0_i32_0 = arith.constant 0 : i32
    %c0_i32_1 = arith.constant 0 : i32
    %c0_i32_2 = arith.constant 0 : i32
    return %c0_i32, %c0_i32_0, %c0_i32_1 : i32, i32, i32
  }
  func.func @transform_5(%arg0: i32) -> (i32, i32) {
    %c0_i32 = arith.constant 0 : i32
    %c0_i32_0 = arith.constant 0 : i32
    %c0_i32_1 = arith.constant 0 : i32
    return %c0_i32, %c0_i32_0 : i32, i32
  }
  func.func @transform_6(%arg0: i32) -> (i32, i32) {
    %c0_i32 = arith.constant 0 : i32
    %c0_i32_0 = arith.constant 0 : i32
    %c0_i32_1 = arith.constant 0 : i32
    return %c0_i32, %c0_i32_0 : i32, i32
  }
  func.func @transform_7(%arg0: i32) -> (i32, i32, i32) {
    %c0_i32 = arith.constant 0 : i32
    %c0_i32_0 = arith.constant 0 : i32
    %c0_i32_1 = arith.constant 0 : i32
    return %arg0, %c0_i32, %c0_i32_0 : i32, i32, i32
  }
}

</mosaic_0001>

<bundles_post_ra>
// kernel: tpu_custom_call.1
= control target key start
LH: loop header
LB: loop body
LE: loop exit
PB: predicated region body
PF: predicated region fallthrough
CT: control target
= control target key end

     0   :  { %12 = vsyncpa [#allocation4], 0  ;;  %s14740_s0 = inlined_call_operand.hbm [shape: bf16[2,256,4], index: 0, kind: input, shape index: {}]   ;;  %s14741_s1 = inlined_call_operand.hbm [shape: bf16[4,128], index: 1, kind: input, shape index: {}]   ;;  %s14742_s2 = inlined_call_operand.hbm [shape: f32[1,128], index: 2, kind: input, shape index: {}]   ;;  %s14743_s3 = inlined_call_operand.hbm [shape: f32[1,128], index: 3, kind: input, shape index: {}]   ;;  %s14744_s4 = inlined_call_operand.hbm [shape: bf16[4,128,128], index: 4, kind: input, shape index: {}]   ;;  %s14745_s5 = inlined_call_operand.hbm [shape: f32[1,128], index: 5, kind: input, shape index: {}]   ;;  %s14746_s6 = inlined_call_operand.hbm [shape: f32[1,128], index: 6, kind: input, shape index: {}]   ;;  %s14747_s7 = inlined_call_operand.hbm [shape: f32[2,256,128], index: 7, kind: output, shape index: {}]  }
   0x1   :  { %14 = vsyncpa [#allocation4 + $0x1], 0 }
   0x2   :  { %15 = vsyncpa [#allocation7], 0 }
   0x3   :  { %16 = vsyncpa [#allocation10], 0 }
   0x4   :  { %17 = vsyncpa [#allocation13], 0 }
   0x5   :  { %18 = vsyncpa [#allocation5], 0 }
   0x6   :  { %20 = vsyncpa [#allocation5 + $0x1], 0  ;;  %s10688_s24 = smov 0   ;;  %s10690_s25 = smov 0  }
   0x7   :  { %s10692_s26 = smov 0   ;;  %s10694_s27 = smov 0  }
   0x8 LB: > { %s10635_s28 = smov [#allocation6]   ;;  %s10709_s30 = sadd.s32 4294967295, %s10633_s27   ;;  %s10633_s27 = sphi %s10694_s27, %s14969_s27   ;;  %s10629_s26 = sphi %s10692_s26, %s14968_s26   ;;  %s10625_s25 = sphi %s10690_s25, %s14967_s25   ;;  %s10621_s24 = sphi %s10688_s24, %s14966_s24  }
   0x9   : > { %s222_s29 = sshll.u32 %s10635_s28, 4  ;;  %p9096_p0 = scmp.ge.s32.totalorder %s10633_s27, 1  ;;  %s10714_s29 = int_to_ptr.vmem [resolvable:$true] %s222_s29 }
   0xa   : > { %p14748_p1 = scmp.eq.s32.totalorder %s10709_s30, 0  ;;  %p209_p2 = scmp.lt.s32.totalorder %s10633_s27, 3 }
   0xb   : > { %s10636_s9 = smov [#allocation9]   ;;  %s10637_s11 = smov [#allocation12]  }
   0xc   : > { %p10716_p3 = pnand %p9096_p0, %p209_p2  ;;  %s244_s10 = sshll.u32 %s10636_s9, 4  ;;  %s10723_s10 = int_to_ptr.vmem [resolvable:$true] %s244_s10 }
   0xd   : > { %s268_s12 = sshll.u32 %s10637_s11, 4  ;;  %s10638_s14 = smov [#allocation8]   ;;  %s10731_s12 = int_to_ptr.vmem [resolvable:$true] %s268_s12 }
   0xe   : > { %s14793_s8 = scalar_select %p10716_p3, 1, 0 }
   0xf   : > { %p9967_p5 = pneg %p10716_p3  ;;  %s10733_s15 = sshll.u32 %s10638_s14, 4  ;;  %s234_s15 = int_to_ptr.vmem [resolvable:$true] %s10733_s15 }
  0x10   : > { %s10357_s18 = scalar_lea.hbm %s14741_s1, 32 }
  0x11   : > { %p10727_p6 = pnand %p9967_p5, %p14748_p1  ;;  %p10358_p7 = scmp.ne.s32.totalorder %s14741_s1, %s10357_s18 }
  0x12   : > { %p10364_p11 = scmp.lt.u32.totalorder %s10357_s18, %s14741_s1 }
  0x13   : > { %p10743_p8 = pneg %p10727_p6 }
  0x15   : > { %p10360_p9 = pnand %p10743_p8, %p10358_p7 }
  0x17   : > { %p10361_p10 = pneg %p10360_p9 }
  0x19   : > { %p10366_p12 = pnand %p10364_p11, %p10361_p10 }
  0x1b   : > { %10369 = shalt.err (!%p10366_p12)
}
  0x1c   : > { %s10370_s28 = scalar_lea.vmem %s10714_s29, 32  ;;  %p10378_p5 = scmp.lt.s32.totalorder %s10714_s29, %s10714_s29 }
  0x1d   : > { %p10371_p13 = scmp.ne.s32.totalorder %s10714_s29, %s10370_s28  ;;  %p10379_p4 = scmp.lt.s32.totalorder %s10370_s28, %s10370_s28 }
  0x1f   : > { %p10373_p0 = pnand %p10371_p13, %p10743_p8  ;;  %p10380_p7 = por %p10379_p4, %p10378_p5 }
  0x21   : > { %p10374_p2 = pneg %p10373_p0 }
  0x23   : > { %p10381_p9 = pnand %p10380_p7, %p10374_p2 }
  0x25   : > { %10384 = shalt.err (!%p10381_p9)
}
  0x26   : > { %9970 = dma.hbm_to_vmem [thread:$0]  (!%p10727_p6), %s14741_s1, 32, %s10714_s29, [#allocation7]  }
  0x27   : > { %s10385_s17 = scalar_lea.hbm %s14743_s3, 16 }
  0x28   : > { %p10386_p10 = scmp.ne.s32.totalorder %s14743_s3, %s10385_s17  ;;  %p10392_p12 = scmp.lt.u32.totalorder %s10385_s17, %s14743_s3 }
  0x2a   : > { %p10388_p4 = pnand %p10386_p10, %p10743_p8 }
  0x2c   : > { %p10389_p11 = pneg %p10388_p4 }
  0x2e   : > { %p10394_p13 = pnand %p10392_p12, %p10389_p11 }
  0x30   : > { %10397 = shalt.err (!%p10394_p13)
}
  0x31   : > { %s10398_s29 = scalar_lea.vmem %s10723_s10, 16  ;;  %s10405_s23 = scalar_lea.vmem %s10723_s10, 32 }
  0x32   : > { %p10399_p0 = scmp.ne.s32.totalorder %s10723_s10, %s10398_s29  ;;  %p10406_p7 = scmp.lt.s32.totalorder %s10723_s10, %s10723_s10 }
  0x33   : > { %p10407_p9 = scmp.lt.s32.totalorder %s10405_s23, %s10398_s29 }
  0x34   : > { %p10401_p2 = pnand %p10399_p0, %p10743_p8 }
  0x35   : > { %p10408_p10 = por %p10407_p9, %p10406_p7 }
  0x36   : > { %p10402_p5 = pneg %p10401_p2 }
  0x38   : > { %p10409_p4 = pnand %p10408_p10, %p10402_p5 }
  0x3a   : > { %10412 = shalt.err (!%p10409_p4)
}
  0x3b   : > { %9976 = dma.hbm_to_vmem [thread:$0]  (!%p10727_p6), %s14743_s3, 16, %s10723_s10, [#allocation10]  }
  0x3c   : > { %s10413_s16 = scalar_lea.hbm %s14745_s5, 16 }
  0x3d   : > { %p10414_p11 = scmp.ne.s32.totalorder %s14745_s5, %s10413_s16  ;;  %p10420_p0 = scmp.lt.u32.totalorder %s10413_s16, %s14745_s5 }
  0x3f   : > { %p10416_p12 = pnand %p10414_p11, %p10743_p8 }
  0x41   : > { %p10417_p13 = pneg %p10416_p12 }
  0x43   : > { %p10422_p2 = pnand %p10420_p0, %p10417_p13 }
  0x45   : > { %10425 = shalt.err (!%p10422_p2)
}
  0x46   : > { %s10426_s10 = scalar_lea.vmem %s10731_s12, 16  ;;  %s10433_s22 = scalar_lea.vmem %s10731_s12, 32 }
  0x47   : > { %p10427_p5 = scmp.ne.s32.totalorder %s10731_s12, %s10426_s10  ;;  %p10434_p10 = scmp.lt.s32.totalorder %s10731_s12, %s10731_s12 }
  0x48   : > { %p10435_p4 = scmp.lt.s32.totalorder %s10433_s22, %s10426_s10 }
  0x49   : > { %p10429_p7 = pnand %p10427_p5, %p10743_p8 }
  0x4a   : > { %p10436_p11 = por %p10435_p4, %p10434_p10 }
  0x4b   : > { %p10430_p9 = pneg %p10429_p7 }
  0x4d   : > { %p10437_p12 = pnand %p10436_p11, %p10430_p9 }
  0x4f   : > { %10440 = shalt.err (!%p10437_p12)
}
  0x50   : > { %9982 = dma.hbm_to_vmem [thread:$0]  (!%p10727_p6), %s14745_s5, 16, %s10731_s12, [#allocation13]  }
  0x51   : > { %s10639_s28 = smov [#allocation11]   ;;  %s10441_s16 = scalar_lea.hbm %s14742_s2, 16 }
  0x52   : > { %s254_s9 = sshll.u32 %s10639_s28, 4  ;;  %p10442_p13 = scmp.ne.s32.totalorder %s14742_s2, %s10441_s16  ;;  %s255_s9 = int_to_ptr.vmem [resolvable:$true] %s254_s9 }
  0x53   : > { %p10448_p5 = scmp.lt.u32.totalorder %s10441_s16, %s14742_s2 }
  0x54   : > { %p10444_p0 = pnand %p10442_p13, %p10743_p8 }
  0x56   : > { %p10445_p2 = pneg %p10444_p0 }
  0x58   : > { %p10450_p7 = pnand %p10448_p5, %p10445_p2 }
  0x5a   : > { %10453 = shalt.err (!%p10450_p7)
}
  0x5b   : > { %s10454_s12 = scalar_lea.vmem %s234_s15, 16  ;;  %s10461_s10 = scalar_lea.vmem %s234_s15, 32 }
  0x5c   : > { %p10455_p9 = scmp.ne.s32.totalorder %s234_s15, %s10454_s12  ;;  %p10462_p11 = scmp.lt.s32.totalorder %s234_s15, %s234_s15 }
  0x5d   : > { %p10463_p12 = scmp.lt.s32.totalorder %s10461_s10, %s10454_s12 }
  0x5e   : > { %p10457_p10 = pnand %p10455_p9, %p10743_p8 }
  0x5f   : > { %p10464_p1 = por %p10463_p12, %p10462_p11 }
  0x60   : > { %p10458_p4 = pneg %p10457_p10 }
  0x62   : > { %p10465_p3 = pnand %p10464_p1, %p10458_p4 }
  0x64   : > { %10468 = shalt.err (!%p10465_p3)
}
  0x65   : > { %9973 = dma.hbm_to_vmem [thread:$0]  (!%p10727_p6), %s14742_s2, 16, %s234_s15, [#allocation7]  }
  0x66   : > { %s10469_s11 = scalar_lea.hbm %s14744_s4, 4096 }
  0x67   : > { %p10470_p13 = scmp.ne.s32.totalorder %s14744_s4, %s10469_s11  ;;  %p10476_p3 = scmp.lt.u32.totalorder %s10469_s11, %s14744_s4 }
  0x69   : > { %p10472_p0 = pnand %p10470_p13, %p10743_p8 }
  0x6b   : > { %p10473_p1 = pneg %p10472_p0 }
  0x6d   : > { %p10478_p2 = pnand %p10476_p3, %p10473_p1 }
  0x6f   : > { %10481 = shalt.err (!%p10478_p2)
}
  0x70   : > { %s10482_s19 = scalar_lea.vmem %s255_s9, 4096  ;;  %p10490_p10 = scmp.lt.s32.totalorder %s255_s9, %s255_s9 }
  0x71   : > { %p10483_p5 = scmp.ne.s32.totalorder %s255_s9, %s10482_s19  ;;  %p10491_p4 = scmp.lt.s32.totalorder %s10482_s19, %s10482_s19 }
  0x73   : > { %p10485_p7 = pnand %p10483_p5, %p10743_p8  ;;  %p10492_p11 = por %p10491_p4, %p10490_p10 }
  0x75   : > { %p10486_p9 = pneg %p10485_p7 }
  0x77   : > { %p10493_p12 = pnand %p10492_p11, %p10486_p9 }
  0x79   : > { %10496 = shalt.err (!%p10493_p12)
}
  0x7a   : > { %s14750_s15 = smov 64   ;;  %s10641_s20 = smov 4  }
  0x7b   : > { %9979 = dma.hbm_to_vmem [thread:$0]  (!%p10727_p6), %s14744_s4, 4096, %s255_s9, [#allocation10], %s14750_s15, %s14750_s15, %s10641_s20  }
  0x7c   : > { %s10642_s22 = smov [#allocation14]   ;;  %s10497_s11 = scalar_lea.hbm %s14746_s6, 16 }
  0x7d   : > { %s279_s29 = sshll.u32 %s10642_s22, 4  ;;  %p10498_p13 = scmp.ne.s32.totalorder %s14746_s6, %s10497_s11  ;;  %s280_s29 = int_to_ptr.vmem [resolvable:$true] %s279_s29 }
  0x7e   : > { %p10504_p3 = scmp.lt.u32.totalorder %s10497_s11, %s14746_s6 }
  0x7f   : > { %p10500_p0 = pnand %p10498_p13, %p10743_p8 }
  0x81   : > { %p10501_p1 = pneg %p10500_p0 }
  0x83   : > { %p10506_p2 = pnand %p10504_p3, %p10501_p1 }
  0x85   : > { %10509 = shalt.err (!%p10506_p2)
}
  0x86   : > { %s10510_s9 = scalar_lea.vmem %s280_s29, 16  ;;  %s10517_s19 = scalar_lea.vmem %s280_s29, 32 }
  0x87   : > { %p10511_p5 = scmp.ne.s32.totalorder %s280_s29, %s10510_s9  ;;  %p10518_p10 = scmp.lt.s32.totalorder %s280_s29, %s280_s29 }
  0x88   : > { %p10519_p4 = scmp.lt.s32.totalorder %s10517_s19, %s10510_s9 }
  0x89   : > { %p10513_p7 = pnand %p10511_p5, %p10743_p8 }
  0x8a   : > { %p10520_p11 = por %p10519_p4, %p10518_p10 }
  0x8b   : > { %p10514_p9 = pneg %p10513_p7 }
  0x8d   : > { %p10521_p12 = pnand %p10520_p11, %p10514_p9 }
  0x8f   : > { %10524 = shalt.err (!%p10521_p12)
}
  0x90   : > { %9985 = dma.hbm_to_vmem [thread:$0]  (!%p10727_p6), %s14746_s6, 16, %s280_s29, [#allocation13]  }
  0x91   : > { %s9095_s21 = sadd.s32 4294967294, %s10633_s27   ;;  %s10872_s13 = sadd.s32 1, %s10633_s27  }
  0x92   : > { %s30_s22 = ssub.s32 %s10633_s27, %s10872_s13  ;;  %s33_s23 = sadd.s32 1, %s10629_s26 }
  0x93   : > { %p31_p8 = scmp.eq.s32.totalorder %s30_s22, 0  ;;  %p40_p13 = scmp.ne.s32.totalorder %s10629_s26, %s10625_s25 }
  0x94   : > { %p41_p0 = scmp.eq.s32.totalorder %s10633_s27, 0  ;;  %p46_p1 = scmp.ne.s32.totalorder %s10625_s25, %s10621_s24 }
  0x95   : > { %s10883_s28 = scalar_select %p31_p8, %s10629_s26, %s33_s23  }
  0x96   : > { %p10885_p3 = por %p41_p0, %p40_p13  ;;  %p14797_p2 = scmp.eq.s32.totalorder %s10709_s30, 0 }
  0x97   : > { %p196_p5 = scmp.eq.s32.totalorder %s10709_s30, 1  ;;  %p202_p7 = scmp.eq.s32.totalorder %s9095_s21, 1 }
  0x98   : > { %p10891_p6 = por %p14797_p2, %p46_p1  ;;  %p10000_p9 = scmp.lt.s32.totalorder %s10633_s27, 2 }
  0x99   : > { %s290_s14 = sand.u32 1, %s10629_s26   ;;  %p10898_p10 = por %p196_p5, %p40_p13 }
  0x9a   : > { %p10902_p4 = por %p202_p7, %p46_p1  ;;  %s9104_s18 = sshll.u32 %s290_s14, 7 }
  0x9b   : > { %s14799_s16 = scalar_select %p10898_p10, 1, 0 }
  0x9c   : > { %s14800_s17 = scalar_select %p10902_p4, 1, 0 }
  0x9d   : > { %s9453_s9 = sshll.u32 %s10633_s27, 11  ;;  %s294_s21 = scalar_lea.vmem [#allocation3], %s9104_s18 }
  0x9e   : > { %s10910_s10 = scalar_lea.hbm %s14740_s0, %s9453_s9  ;;  %s301_s22 = sshll.u32 %s294_s21, 4  ;;  %s10912_s22 = int_to_ptr.vmem [resolvable:$true] %s301_s22 }
  0x9f   : > { %p10916_p11 = pnand %p10000_p9, %p10885_p3  ;;  %s10920_s15 = scalar_lea.sflag [#allocation4], %s290_s14 }
  0xa0   : > { %s10525_s19 = scalar_lea.hbm %s10910_s10, 2048  ;;  %s10530_s11 = scalar_lea.hbm %s14740_s0, 4096 }
  0xa1   : > { %p10526_p12 = scmp.ne.s32.totalorder %s10910_s10, %s10525_s19  ;;  %p10527_p8 = pneg %p10916_p11 }
  0xa2   : > { %p10531_p1 = scmp.lt.u32.totalorder %s10910_s10, %s14740_s0  ;;  %p10532_p3 = scmp.lt.u32.totalorder %s10530_s11, %s10525_s19 }
  0xa3   : > { %p10528_p13 = pnand %p10527_p8, %p10526_p12  ;;  %p10534_p5 = scmp.lt.u32.totalorder %s10525_s19, %s10910_s10 }
  0xa4   : > { %p10533_p2 = por %p10532_p3, %p10531_p1 }
  0xa5   : > { %p10529_p0 = pneg %p10528_p13 }
  0xa6   : > { %p10535_p7 = por %p10534_p5, %p10533_p2 }
  0xa8   : > { %p10536_p9 = pnand %p10535_p7, %p10529_p0 }
  0xaa   : > { %10539 = shalt.err (!%p10536_p9)
}
  0xab   : > { %s10540_s14 = scalar_lea.vmem %s10912_s22, 2048  ;;  %s10643_s18 = smov [#allocation3]  }
  0xac   : > { %p10541_p12 = scmp.ne.s32.totalorder %s10912_s22, %s10540_s14  ;;  %s10545_s9 = sshll.u32 %s10643_s18, 4  ;;  %s10546_s9 = int_to_ptr.vmem [resolvable:$false] %s10545_s9 }
  0xad   : > { %s10547_s12 = scalar_lea.vmem %s10546_s9, 4096  ;;  %p10548_p10 = scmp.lt.s32.totalorder %s10912_s22, %s10546_s9 }
  0xae   : > { %p10543_p13 = pnand %p10541_p12, %p10527_p8  ;;  %p10549_p1 = scmp.lt.s32.totalorder %s10547_s12, %s10540_s14 }
  0xb0   : > { %p10544_p4 = pneg %p10543_p13  ;;  %p10550_p3 = por %p10549_p1, %p10548_p10 }
  0xb2   : > { %p10551_p2 = pnand %p10550_p3, %p10544_p4 }
  0xb4   : > { %10554 = shalt.err (!%p10551_p2)
}
  0xb5   : > { %s14802_s19 = smov 64   ;;  %p14803_p8 = scmp.ne.s32.totalorder %s14793_s8, 0 }
  0xb6   : > { %9989 = dma.hbm_to_vmem [thread:$0]  (!%p10916_p11), %s10910_s10, 2048, %s10912_s22, %s10920_s15, %s14802_s19, %s14802_s19, %s10641_s20  }
  0xb7   : > { %313 = sbr.rel (%p14803_p8) target bundleno = 1712 (0x6b0), region = 48 }
  0xbe   : > { %s10954_s11 = sand.u32 1, %s10625_s25  }
  0xbf   : > { %s9108_s21 = sshll.u32 %s10954_s11, 7  ;;  %s316_s14 = scalar_lea.sflag [#allocation4], %s10954_s11 }
  0xc0   : > { %s10958_s18 = scalar_lea.vmem [#allocation3], %s9108_s21 }
  0xc1   : > { %10600 = dma.done.wait (%p10891_p6), %s316_s14, 2048  }
  0xc2   : > { %10602 = vsyncadd (%p10891_p6), %s316_s14, 4294965248  ;;  %p14804_p10 = scmp.eq.s32.totalorder %s10709_s30, 0 }
  0xc4   : > { %10604 = dma.done.wait (%p14804_p10), [#allocation7], 48   ;;  %p14805_p4 = pmov %p14804_p10 }
  0xc6   : > { %10606 = vsyncadd (%p14805_p4), [#allocation7], 4294967248  ;;  %p14806_p11 = pmov %p14805_p4 }
  0xc7   : > { %p14807_p0 = pmov %p14805_p4 }
  0xc8   : > { %10608 = dma.done.wait (%p14806_p11), [#allocation10], 4112  }
  0xc9   : > { %10610 = vsyncadd (%p14807_p0), [#allocation10], 4294963184  ;;  %p14808_p5 = pmov %p14807_p0 }
  0xca   : > { %p14809_p7 = pmov %p14807_p0 }
  0xcb   : > { %10612 = dma.done.wait (%p14808_p5), [#allocation13], 32  }
  0xcc   : > { %10614 = vsyncadd (%p14809_p7), [#allocation13], 4294967264  ;;  %vm538_vm0 = vcmask 1041408   ;;  %vm489_vm1 = vcmask 31744   ;;  %v408_v0 = vld [vmem:[#allocation6] sm:$0x3] }
  0xcd   : > { %9938 = vmatprep.subr.msk.bf16.mxu0 %vm538_vm0, %v408_v0  ;;  %v540_v1 = vsel %vm538_vm0, %v408_v0, 0  ;;  %v10051_v2 = vld [vmem:[%s10958_s18] sm:$0xff]   ;;  %v10052_v3 = vld [vmem:[%s10958_s18 + $0x8] sm:$0xff]   ;;  %v10053_v4 = vld [vmem:[%s10958_s18 + $0x10] sm:$0xff]   ;;  %v10644_v26 = vmov 4286644096  }
  0xce   : > { %9601 = vmatpush3.bf16.msra.mxu0 %v540_v1  ;;  %9602 = vmatprep.mubr.msk.bf16.mxu0 %vm489_vm1, %v10051_v2  ;;  %v10054_v5 = vld [vmem:[%s10958_s18 + $0x18] sm:$0xff]   ;;  %v10055_v6 = vld [vmem:[%s10958_s18 + $0x20] sm:$0xff]   ;;  %v10056_v7 = vld [vmem:[%s10958_s18 + $0x28] sm:$0xff]   ;;  %1021 = vst [vmem:[#allocation2] sm:$0xf] %v10644_v26  ;;  %vm2053_vm5 = vcmask 1042432  }
  0xcf   : > { %v10057_v8 = vld [vmem:[%s10958_s18 + $0x30] sm:$0xff]   ;;  %v10058_v9 = vld [vmem:[%s10958_s18 + $0x38] sm:$0xff]   ;;  %v10059_v10 = vld [vmem:[%s10958_s18 + $0x40] sm:$0xff]   ;;  %1022 = vst [vmem:[#allocation2 + $0x4] sm:$0xf] %v10644_v26  ;;  %vm2054_vm6 = vcmask 1046532  }
  0xd0   : > { %v10060_v11 = vld [vmem:[%s10958_s18 + $0x48] sm:$0xff]   ;;  %v10061_v12 = vld [vmem:[%s10958_s18 + $0x50] sm:$0xff]   ;;  %v10062_v13 = vld [vmem:[%s10958_s18 + $0x58] sm:$0xff]   ;;  %1023 = vst [vmem:[#allocation2 + $0x8] sm:$0x3] %v10644_v26  ;;  %vm2900_vm9 = vcmask 1045508  }
  0xd1   : > { %9603 = vmatmul.mubr.msk.bf16.vlgmr.msra.gmra.mrb[0].mxu0 %vm489_vm1, %v10052_v3  ;;  %v10063_v14 = vld [vmem:[%s10958_s18 + $0x60] sm:$0xff]   ;;  %v10064_v15 = vld [vmem:[%s10958_s18 + $0x68] sm:$0xff]   ;;  %v10065_v16 = vld [vmem:[%s10958_s18 + $0x70] sm:$0xff]   ;;  %1024 = vst [vmem:[#allocation2 + $0xc] sm:$0xf] %v10644_v26  ;;  %vm1170_vm13 = vcmask 1040384  }
  0xd2   : > { %9606 = vmatprep.mubr.msk.bf16.mxu0 %vm489_vm1, %v10053_v4  ;;  %v10066_v17 = vld [vmem:[%s10958_s18 + $0x78] sm:$0xff]   ;;  %v10067_v18 = vld [vmem:[#allocation11] sm:$0xff]   ;;  %v10068_v19 = vld [vmem:[#allocation11 + $0x8] sm:$0xff]   ;;  %1025 = vst [vmem:[#allocation2 + $0x10] sm:$0xf] %v10644_v26  ;;  %vm1171_vm14 = vcmask 1044484  }
  0xd3   : > { %9682 = vmatprep.subr.bf16.mxu1 %v10067_v18  ;;  %v10069_v20 = vld [vmem:[#allocation11 + $0x10] sm:$0xff]   ;;  %v10070_v21 = vld [vmem:[#allocation11 + $0x18] sm:$0xff]   ;;  %v10071_v22 = vld [vmem:[#allocation11 + $0x20] sm:$0xff]   ;;  %1026 = vst [vmem:[#allocation2 + $0x14] sm:$0x3] %v10644_v26  ;;  %s9115_s8 = sshll.u32 %s10954_s11, 8 }
  0xd4   : > { %9683 = vmatpush3.bf16.msra.mxu1 %v10067_v18  ;;  %v10072_v23 = vld [vmem:[#allocation11 + $0x28] sm:$0xff]   ;;  %v10073_v24 = vld [vmem:[#allocation11 + $0x30] sm:$0xff]   ;;  %v10074_v25 = vld [vmem:[#allocation11 + $0x38] sm:$0xff]   ;;  %1036 = vst [vmem:[#allocation2 + $0x18] sm:$0x1] %v10644_v26  ;;  %s14583_s15 = scalar_lea.vmem [#allocation15], %s9115_s8 }
  0xd5   : > { %9684 = vmatprep.subr.bf16.mxu1 %v10068_v19  ;;  %1037 = vst [vmem:[#allocation2 + $0x24] sm:$0x1] %v10644_v26  ;;  %1038 = vst [vmem:[#allocation2 + $0x30] sm:$0x1] %v10644_v26  ;;  %v10075_v27 = vld [vmem:[#allocation11 + $0x40] sm:$0xff]   ;;  %v10076_v28 = vld [vmem:[#allocation11 + $0x48] sm:$0xff]  }
  0xd6   : > { %1056 = vst [vmem:[#allocation2 + $0x20] sm:$0x2] %v10644_v26  ;;  %1057 = vst [vmem:[#allocation2 + $0x2c] sm:$0x2] %v10644_v26  ;;  %9634 = vmatprep.subr.bf16.mxu0 %v10075_v27  ;;  %v10077_v29 = vld [vmem:[#allocation11 + $0x50] sm:$0xff]   ;;  %v10078_v30 = vld [vmem:[#allocation11 + $0x58] sm:$0xff]  }
  0xd7   : > { %1058 = vst [vmem:[#allocation2 + $0x38] sm:$0x2] %v10644_v26  ;;  %1028 = vst [vmem:[#allocation2 + $0xd8] sm:$0xf] %v10644_v26  ;;  %9635 = vmatpush3.bf16.msra.mxu0 %v10075_v27  ;;  %v10080_v31 = vld [vmem:[#allocation11 + $0x60] sm:$0xff]   ;;  %v10081_v32 = vld [vmem:[#allocation11 + $0x68] sm:$0xff]  }
  0xd8   : > { %9685 = vmatpush3.bf16.msra.mxu1 %v10068_v19  ;;  %1029 = vst [vmem:[#allocation2 + $0xdc] sm:$0xf] %v10644_v26  ;;  %1030 = vst [vmem:[#allocation2 + $0xe0] sm:$0x3] %v10644_v26  ;;  %9636 = vmatprep.subr.bf16.mxu0 %v10076_v28  ;;  %v10083_v33 = vld [vmem:[#allocation11 + $0x70] sm:$0xff]   ;;  %v10084_v34 = vld [vmem:[#allocation11 + $0x78] sm:$0xff]  }
  0xd9   : > { %9607 = vmatmul.mubr.msk.bf16.gmra.mrb[4].mxu0 %vm489_vm1, %v10054_v5  ;;  %9686 = vmatprep.subr.bf16.mxu1 %v10069_v20  ;;  %1031 = vst [vmem:[#allocation2 + $0xe4] sm:$0xf] %v10644_v26  ;;  %1032 = vst [vmem:[#allocation2 + $0xe8] sm:$0xf] %v10644_v26  ;;  %v11010_v36 = vld [vmem:[#allocation2 + $0x4] sm:$0xf] }
  0xda   : > { %9610 = vmatprep.mubr.msk.bf16.mxu0 %vm489_vm1, %v10055_v6  ;;  %1033 = vst [vmem:[#allocation2 + $0xec] sm:$0x3] %v10644_v26  ;;  %1039 = vst [vmem:[#allocation2 + $0x3c] sm:$0x1] %v10644_v26  ;;  %v11012_v38 = vld [vmem:[#allocation2 + $0x10] sm:$0xf] }
  0xdb   : > { %1040 = vst [vmem:[#allocation2 + $0x48] sm:$0x1] %v10644_v26  ;;  %1041 = vst [vmem:[#allocation2 + $0x54] sm:$0x1] %v10644_v26  ;;  %9637 = vmatpush3.bf16.msra.mxu0 %v10076_v28  ;;  %v1423_v41 = vshll.u32 %v11010_v36, 16  ;;  %v1427_v42 = vshrl.u32 %v11010_v36, 16 }
  0xdc   : > { %9687 = vmatpush3.bf16.msra.mxu1 %v10069_v20  ;;  %1042 = vst [vmem:[#allocation2 + $0x60] sm:$0x1] %v10644_v26  ;;  %1043 = vst [vmem:[#allocation2 + $0x6c] sm:$0x1] %v10644_v26  ;;  %9638 = vmatprep.subr.bf16.mxu0 %v10077_v29  ;;  %v1447_v45 = vshll.u32 %v11012_v38, 16  ;;  %v1451_v46 = vshrl.u32 %v11012_v38, 16 }
  0xdd   : > { %9688 = vmatprep.subr.bf16.mxu1 %v10070_v21  ;;  %1044 = vst [vmem:[#allocation2 + $0x78] sm:$0x1] %v10644_v26  ;;  %1045 = vst [vmem:[#allocation2 + $0x84] sm:$0x1] %v10644_v26  ;;  %v11018_v49 = vld [vmem:[#allocation11 + $0x80] sm:$0xff]   ;;  %v1425_v50 = vrot.slane %v1423_v41, 5 }
  0xde   : > { %1046 = vst [vmem:[#allocation2 + $0x90] sm:$0x1] %v10644_v26  ;;  %1047 = vst [vmem:[#allocation2 + $0x9c] sm:$0x1] %v10644_v26  ;;  %v1429_v51 = vrot.slane %v1427_v42, 4  ;;  %v1449_v55 = vrot.slane %v1447_v45, 5 }
  0xdf   : > { %1048 = vst [vmem:[#allocation2 + $0xa8] sm:$0x1] %v10644_v26  ;;  %1049 = vst [vmem:[#allocation2 + $0xb4] sm:$0x1] %v10644_v26  ;;  %9639 = vmatpush3.bf16.msra.mxu0 %v10077_v29  ;;  %v11022_v54 = vld [vmem:[#allocation2 + $0x8] sm:$0x1] }
  0xe0   : > { %9689 = vmatpush3.bf16.msra.mxu1 %v10070_v21  ;;  %1050 = vst [vmem:[#allocation2 + $0xc0] sm:$0x1] %v10644_v26  ;;  %1051 = vst [vmem:[#allocation2 + $0xcc] sm:$0x1] %v10644_v26  ;;  %9640 = vmatprep.subr.bf16.mxu0 %v10078_v30  ;;  %v1453_v56 = vrot.slane %v1451_v46, 4  ;;  %v1430_v59 = vor.u32 %v1429_v51, %v1425_v50  ;;  %v1433_v60 = vshll.u32 %v11022_v54, 16 }
  0xe1   : > { %9611 = vmatmul.mubr.msk.bf16.gmra.mrb[8].mxu0 %vm489_vm1, %v10056_v7  ;;  %9690 = vmatprep.subr.bf16.mxu1 %v10071_v22  ;;  %1059 = vst [vmem:[#allocation2 + $0x44] sm:$0x2] %v10644_v26  ;;  %1060 = vst [vmem:[#allocation2 + $0x50] sm:$0x2] %v10644_v26  ;;  %v1391_v57 = vld [vmem:[#allocation2 + $0x14] sm:$0x1] }
  0xe2   : > { %9614 = vmatprep.mubr.msk.bf16.mxu0 %vm489_vm1, %v10057_v8  ;;  %1061 = vst [vmem:[#allocation2 + $0x5c] sm:$0x2] %v10644_v26  ;;  %1062 = vst [vmem:[#allocation2 + $0x68] sm:$0x2] %v10644_v26  ;;  %v1454_v62 = vor.u32 %v1453_v56, %v1449_v55  ;;  %v1457_v63 = vshll.u32 %v1391_v57, 16  ;;  %v1431_v1 = vrot.slane %v1430_v59, 4 }
  0xe3   : > { %1063 = vst [vmem:[#allocation2 + $0x74] sm:$0x2] %v10644_v26  ;;  %1064 = vst [vmem:[#allocation2 + $0x80] sm:$0x2] %v10644_v26  ;;  %9641 = vmatpush3.bf16.msra.mxu0 %v10078_v30  ;;  %vm1410_vm2 = vsmask.f32 3328 }
  0xe4   : > { %9691 = vmatpush3.bf16.msra.mxu1 %v10071_v22  ;;  %1065 = vst [vmem:[#allocation2 + $0x8c] sm:$0x2] %v10644_v26  ;;  %1066 = vst [vmem:[#allocation2 + $0x98] sm:$0x2] %v10644_v26  ;;  %9642 = vmatprep.subr.bf16.mxu0 %v10080_v31  ;;  %vm1411_vm3 = vsmask.f32 7440 }
  0xe5   : > { %9692 = vmatprep.subr.bf16.mxu1 %v10072_v23  ;;  %1067 = vst [vmem:[#allocation2 + $0xa4] sm:$0x2] %v10644_v26  ;;  %1068 = vst [vmem:[#allocation2 + $0xb0] sm:$0x2] %v10644_v26  ;;  %v1435_v2 = vrot.slane %v1433_v60, 5  ;;  %v1455_v5 = vrot.slane %v1454_v62, 4 }
  0xe6   : > { %1069 = vst [vmem:[#allocation2 + $0xbc] sm:$0x2] %v10644_v26  ;;  %1070 = vst [vmem:[#allocation2 + $0xc8] sm:$0x2] %v10644_v26  ;;  %v1459_v6 = vrot.slane %v1457_v63, 5  ;;  %v2061_v28 = vrot.slane %v11022_v54, 5 }
  0xe7   : > { %1071 = vst [vmem:[#allocation2 + $0xd4] sm:$0x2] %v10644_v26  ;;  %1034 = vst [vmem:[#allocation2] sm:$0x1] %v10644_v26  ;;  %9643 = vmatpush3.bf16.msra.mxu0 %v10080_v31  ;;  %v1973_v7 = vld [vmem:[#allocation2] sm:$0xe] }
  0xe8   : > { %9693 = vmatpush3.bf16.msra.mxu1 %v10072_v23  ;;  %1035 = vst [vmem:[#allocation2 + $0xc] sm:$0x1] %v10644_v26  ;;  %1054 = vst [vmem:[#allocation2 + $0x8] sm:$0x2] %v10644_v26  ;;  %9644 = vmatprep.subr.bf16.mxu0 %v10081_v32  ;;  %v2068_v30 = vrot.slane %v1391_v57, 5  ;;  %s9486_s20 = sshll.u32 %s10709_s30, 12 }
  0xe9   : > { %9615 = vmatmul.mubr.msk.bf16.gmra.mrb[12].mxu0 %vm489_vm1, %v10058_v9  ;;  %9694 = vmatprep.subr.bf16.mxu1 %v10073_v24  ;;  %1055 = vst [vmem:[#allocation2 + $0x14] sm:$0x2] %v10644_v26  ;;  %1052 = vst [vmem:[#allocation2 + $0xd8] sm:$0x1] %v10644_v26  ;;  %vm2296_vm8 = vsmask.f32 2304  ;;  %s14691_s23 = scalar_lea.hbm %s14747_s7, %s9486_s20 }
  0xea   : > { %9618 = vmatprep.mubr.msk.bf16.mxu0 %vm489_vm1, %v10059_v10  ;;  %1053 = vst [vmem:[#allocation2 + $0xe4] sm:$0x1] %v10644_v26  ;;  %1072 = vst [vmem:[#allocation2 + $0xe0] sm:$0x2] %v10644_v26  ;;  %vm2297_vm10 = vsmask.f32 6416 }
  0xeb   : > { %1073 = vst [vmem:[#allocation2 + $0xec] sm:$0x2] %v10644_v26  ;;  %9645 = vmatpush3.bf16.msra.mxu0 %v10081_v32  ;;  %vm11030_vm4 = vmor %vm1410_vm2, %vm1411_vm3  ;;  %s8965_s29 = sshll.u32 %s14583_s15, 4  ;;  %s8952_s30 = scalar_lea.sflag [#allocation5], %s10954_s11  ;;  %s14693_s29 = int_to_ptr.vmem [resolvable:$true] %s8965_s29 }
  0xec   : > { %9695 = vmatpush3.bf16.msra.mxu1 %v10073_v24  ;;  %9646 = vmatprep.subr.bf16.mxu0 %v10083_v33  ;;  %v1436_v9 = vsel %vm11030_vm4, %v1431_v1, %v1435_v2  ;;  %vm11057_vm7 = vmor %vm2053_vm5, %vm2054_vm6  ;;  %s10555_s9 = scalar_lea.vmem %s14693_s29, 4096  ;;  %p14963_p9 = scmp.ne.s32.totalorder %s14799_s16, 0 }
  0xed   : > { %9696 = vmatprep.subr.bf16.mxu1 %v10074_v25  ;;  %v11047_v21 = vmax.bf16 %v1436_v9, %v11010_v36  ;;  %vm11119_vm11 = vmor %vm2296_vm8, %vm2297_vm10  ;;  %p10556_p6 = scmp.ne.s32.totalorder %s14693_s29, %s10555_s9  ;;  %s10645_s12 = smov [#allocation15]  }
  0xee   : > { %v1350_v35 = vld [vmem:[#allocation2] sm:$0xf]  ;;  %vm11154_vm12 = vmor %vm538_vm0, %vm2900_vm9  ;;  %s10559_s19 = sshll.u32 %s10645_s12, 4  ;;  %s10560_s19 = int_to_ptr.vmem [resolvable:$false] %s10559_s19 }
  0xef   : > { %9647 = vmatpush3.bf16.msra.mxu0 %v10083_v33  ;;  %v1352_v37 = vld [vmem:[#allocation2 + $0xc] sm:$0xf]  ;;  %v1414_v39 = vshrl.u32 %v1350_v35, 16  ;;  %v1417_v40 = vshll.u32 %v1350_v35, 16  ;;  %vm11257_vm15 = vmor %vm1170_vm13, %vm1171_vm14  ;;  %p10557_p12 = pnand %p10556_p6, %p14963_p9  ;;  %s10561_s21 = scalar_lea.vmem %s10560_s19, 8192 }
  0xf0   : > { %9697 = vmatpush3.bf16.msra.mxu1 %v10074_v25  ;;  %9648 = vmatprep.subr.bf16.mxu0 %v10084_v34  ;;  %v1438_v43 = vshrl.u32 %v1352_v37, 16  ;;  %v1441_v44 = vshll.u32 %v1352_v37, 16  ;;  %v11054_v25 = vld [vmem:[#allocation2 + $0x8] sm:$0x3]  ;;  %v11066_v32 = vld [vmem:[#allocation2 + $0x14] sm:$0x3]  ;;  %p10562_p1 = scmp.lt.s32.totalorder %s14693_s29, %s10560_s19  ;;  %p10563_p3 = scmp.lt.s32.totalorder %s10561_s21, %s10555_s9 }
  0xf1   : > { %9619 = vmatmul.mubr.msk.bf16.gmra.mrb[16].mxu0 %vm489_vm1, %v10060_v11  ;;  %v1416_v47 = vrot.slane %v1414_v39, 4  ;;  %v1419_v48 = vrot.slane %v1417_v40, 5  ;;  %9730 = vmatprep.subr.bf16.mxu1 %v11018_v49  ;;  %v1974_v11 = vld [vmem:[#allocation2 + $0xc] sm:$0xe]  ;;  %v2309_v39 = vrot.slane %v1423_v41, 6  ;;  %v2314_v40 = vshrl.u32 %v11054_v25, 16  ;;  %p10558_p13 = pneg %p10557_p12 }
  0xf2   : > { %9622 = vmatprep.mubr.msk.bf16.mxu0 %vm489_vm1, %v10061_v12  ;;  %v1440_v52 = vrot.slane %v1438_v43, 4  ;;  %v1443_v53 = vrot.slane %v1441_v44, 5  ;;  %v1460_v12 = vsel %vm11030_vm4, %v1455_v5, %v1459_v6  ;;  %v2323_v19 = vshrl.u32 %v1974_v11, 16  ;;  %p10564_p2 = por %p10563_p3, %p10562_p1 }
  0xf3   : > { %9649 = vmatpush3.bf16.msra.mxu0 %v10084_v34  ;;  %v1420_v58 = vor.u32 %v1419_v48, %v1416_v47  ;;  %v2326_v20 = vshll.u32 %v1974_v11, 16  ;;  %v11052_v23 = vmax.bf16 %v1460_v12, %v11012_v38  ;;  %v9215_v24 = vrot.slane %v1974_v11, 9 }
  0xf4   : > { %v1444_v61 = vor.u32 %v1443_v53, %v1440_v52  ;;  %v2325_v43 = vrot.slane %v2323_v19, 5  ;;  %v2317_v48 = vshll.u32 %v11054_v25, 16  ;;  %v11082_v52 = vld [vmem:[#allocation9] ss:$0 sm:$0xff]  ;;  %v2337_v54 = vshrl.u32 %v11066_v32, 16  ;;  %p10565_p8 = pnand %p10564_p2, %p10558_p13 }
  0xf5   : > { %v1421_v0 = vrot.slane %v1420_v58, 4  ;;  %v2328_v44 = vrot.slane %v2326_v20, 6 }
  0xf6   : > { %v1445_v3 = vrot.slane %v1444_v61, 4  ;;  %v2316_v61 = vrot.slane %v2314_v40, 5  ;;  %v2319_v2 = vrot.slane %v2317_v48, 6  ;;  %v2904_v40 = vrot.slane %v11010_v36, 6 }
  0xf7   : > { %v1426_v8 = vsel %vm11030_vm4, %v1421_v0, %v1425_v50  ;;  %v2331_v50 = vrot.slane %v1451_v46, 5  ;;  %v2329_v62 = vor.u32 %v2328_v44, %v2325_v43 }
  0xf8   : > { %v1450_v10 = vsel %vm11030_vm4, %v1445_v3, %v1449_v55  ;;  %v11044_v18 = vmax.bf16 %v1426_v8, %v1350_v35  ;;  %v2308_v35 = vrot.slane %v1427_v42, 5  ;;  %v2332_v42 = vrot.slane %v1447_v45, 6 }
  0xf9   : > { %9623 = vmatmul.mubr.msk.bf16.gmra.mrb[20].mxu0 %vm489_vm1, %v10062_v13  ;;  %v2058_v13 = vrot.slane %v11010_v36, 5  ;;  %v11049_v22 = vmax.bf16 %v1450_v10, %v1352_v37  ;;  %v11068_v37 = vld [vmem:[#allocation8] ss:$0 sm:$0xff]  ;;  %v2340_v55 = vshll.u32 %v11066_v32, 16 }
  0xfa   : > { %9626 = vmatprep.mubr.msk.bf16.mxu0 %vm489_vm1, %v10063_v14  ;;  %v2065_v14 = vrot.slane %v11012_v38, 5  ;;  %v2310_v60 = vor.u32 %v2309_v39, %v2308_v35  ;;  %v2333_v3 = vor.u32 %v2332_v42, %v2331_v50 }
  0xfb   : > { %v2060_v27 = vrot.slane %v2058_v13, 4  ;;  %v2342_v8 = vrot.slane %v2340_v55, 6 }
  0xfc   : > { %v2067_v29 = vrot.slane %v2065_v14, 4  ;;  %v11075_v47 = vsel %vm11057_vm7, %v9215_v24, %v2065_v14 }
  0xfd   : > { %v11086_v41 = vsel %vm11057_vm7, %v2060_v27, %v2061_v28  ;;  %v2335_v27 = vrot.slane %v2333_v3, 4 }
  0xfe   : > { %v11090_v53 = vsel %vm11057_vm7, %v2067_v29, %v2068_v30  ;;  %v2237_v14 = vmax.bf16 %v11086_v41, %v11047_v21  ;;  %v2839_v29 = vld [vmem:[#allocation2] sm:$0xc] }
 0x101   : > { %9627 = vmatmul.mubr.msk.bf16.gmra.mrb[24].mxu0 %vm489_vm1, %v10064_v15  ;;  %v9214_v15 = vrot.slane %v1973_v7, 9 }
 0x102   : > { %9630 = vmatprep.mubr.msk.bf16.mxu0 %vm489_vm1, %v10065_v16  ;;  %v2300_v16 = vshrl.u32 %v1973_v7, 16 }
 0x103   : > { %v11064_v31 = vsel %vm11057_vm7, %v9214_v15, %v2058_v13  ;;  %v2330_v15 = vrot.slane %v2329_v62, 4 }
 0x104   : > { %v2302_v33 = vrot.slane %v2300_v16, 5  ;;  %v2236_v45 = vmax.bf16 %v11064_v31, %v11044_v18  ;;  %v2320_v18 = vor.u32 %v2319_v2, %v2316_v61  ;;  %v2238_v31 = vmax.bf16 %v11075_v47, %v11049_v22 }
 0x105   : > { %v2334_v39 = vsel %vm11119_vm11, %v2330_v15, %v2333_v3  ;;  %v2239_v22 = vmax.bf16 %v11090_v53, %v11052_v23  ;;  %v9234_v47 = vrot.slane %v2839_v29, 10  ;;  %v2840_v53 = vld [vmem:[#allocation2 + $0xc] sm:$0xc]  ;;  %v2911_v61 = vrot.slane %v11012_v38, 6 }
 0x106   : > { %v2801_v23 = vmax.bf16 %v2334_v39, %v2238_v31  ;;  %v9235_v2 = vrot.slane %v2840_v53, 10 }
 0x109   : > { %9631 = vmatmul.mubr.msk.bf16.gmra.mrb[28].mxu0 %vm489_vm1, %v10066_v17  ;;  %v2303_v17 = vshll.u32 %v1973_v7, 16  ;;  %v2339_v7 = vrot.slane %v2337_v54, 5 }
 0x10b   : > { %v2305_v34 = vrot.slane %v2303_v17, 6  ;;  %v2312_v17 = vrot.slane %v2310_v60, 4  ;;  %v2343_v28 = vor.u32 %v2342_v8, %v2339_v7  ;;  %v2914_v8 = vrot.slane %v11066_v32, 6 }
 0x10d   : > { %v2306_v57 = vor.u32 %v2305_v34, %v2302_v33  ;;  %v2344_v36 = vsel %vm11119_vm11, %v2335_v27, %v2343_v28 }
 0x10e   : > { %v2802_v7 = vmax.bf16 %v2344_v36, %v2239_v22 }
 0x10f   : > { %v2307_v11 = vrot.slane %v2306_v57, 4 }
 0x111   : > { %v2311_v33 = vsel %vm11119_vm11, %v2307_v11, %v2310_v60  ;;  %v11166_v60 = vsel %vm11154_vm12, %v9234_v47, %v2904_v40 }
 0x112   : > { %v11150_v55 = vmax.bf16 %v2311_v33, %v2236_v45 }
 0x114   : > { %v3082_v22 = vmax.bf16 %v11166_v60, %v11150_v55 }
 0x1a4   : > { %v9604_v51 = vpop.f32.mrb[0].mxu0 }
 0x1a5   : > { %v712_v46 = vmul.f32 %v9604_v51, %v11068_v37  ;;  %v576_v56 = vpop.f32.mrb[1].mxu0  ;;  %v2321_v51 = vsel %vm11119_vm11, %v2312_v17, %v2320_v18 }
 0x1a6   : > { %v710_v58 = vmul.f32 %v11068_v37, %v576_v56  ;;  %v9605_v59 = vpop.f32.mrb[2].mxu0 }
 0x1a7   : > { %v11099_v63 = vadd.f32 %v11082_v52, %v712_v46  ;;  %v713_v0 = vmul.f32 %v9605_v59, %v11068_v37  ;;  %v579_v1 = vpop.f32.mrb[3].mxu0  ;;  %v2907_v59 = vrot.slane %v11054_v25, 6 }
 0x1a8   : > { %v11103_v5 = vadd.f32 %v11082_v52, %v710_v58  ;;  %v711_v6 = vmul.f32 %v11068_v37, %v579_v1  ;;  %v2906_v58 = vrot.slane %v2904_v40, 4  ;;  %v11170_v1 = vmax.bf16 %v2321_v51, %v2237_v14 }
 0x1a9   : > { %v9152_v9 = vmul.f32 -1.442695, %v11099_v63  ;;  %v11108_v10 = vadd.f32 %v11082_v52, %v713_v0 }
 0x1aa   : > { %v9150_v12 = vmul.f32 -1.442695, %v11103_v5  ;;  %v11112_v13 = vadd.f32 %v11082_v52, %v711_v6  ;;  %v11177_v15 = vsel %vm11154_vm12, %v2906_v58, %v2907_v59 }
 0x1ab   : > { %10099 = vpow2.f32 %v9152_v9  ;;  %v9153_v16 = vmul.f32 -1.442695, %v11108_v10  ;;  %v3083_v36 = vmax.bf16 %v11177_v15, %v11170_v1 }
 0x1ac   : > { %10101 = vpow2.f32 %v9150_v12  ;;  %v9151_v19 = vmul.f32 -1.442695, %v11112_v13  ;;  %v9608_v20 = vpop.f32.mrb[4].mxu0 }
 0x1ad   : > { %10103 = vpow2.f32 %v9153_v16  ;;  %v716_v21 = vmul.f32 %v9608_v20, %v11068_v37  ;;  %v592_v30 = vpop.f32.mrb[5].mxu0  ;;  %v2913_v20 = vrot.slane %v2911_v61, 4 }
 0x1ae   : > { %10105 = vpow2.f32 %v9151_v19  ;;  %v714_v34 = vmul.f32 %v11068_v37, %v592_v30  ;;  %v9609_v35 = vpop.f32.mrb[6].mxu0 }
 0x1af   : > { %v11133_v43 = vadd.f32 %v11082_v52, %v716_v21  ;;  %v717_v44 = vmul.f32 %v9609_v35, %v11068_v37  ;;  %v595_v48 = vpop.f32.mrb[7].mxu0  ;;  %v2912_v35 = vsel %vm11154_vm12, %v9235_v2, %v2911_v61  ;;  %v2915_v40 = vsel %vm11154_vm12, %v2913_v20, %v2914_v8 }
 0x1b0   : > { %v11139_v50 = vadd.f32 %v11082_v52, %v714_v34  ;;  %v715_v42 = vmul.f32 %v11068_v37, %v595_v48 }
 0x1b1   : > { %v9156_v41 = vmul.f32 -1.442695, %v11133_v43  ;;  %v11148_v54 = vadd.f32 %v11082_v52, %v717_v44 }
 0x1b2   : > { %v9154_v56 = vmul.f32 -1.442695, %v11139_v50  ;;  %v11160_v57 = vadd.f32 %v11082_v52, %v715_v42 }
 0x1b3   : > { %10107 = vpow2.f32 %v9156_v41  ;;  %v9157_v45 = vmul.f32 -1.442695, %v11148_v54  ;;  %v11206_v41 = vmax.bf16 %v2912_v35, %v2801_v23 }
 0x1b4   : > { %10109 = vpow2.f32 %v9154_v56  ;;  %v9155_v62 = vmul.f32 -1.442695, %v11160_v57  ;;  %v9612_v0 = vpop.f32.mrb[8].mxu0 }
 0x1b5   : > { %v10100_v3 = vpop.eup %10099  ;;  %10111 = vpow2.f32 %v9157_v45  ;;  %v720_v25 = vmul.f32 %v9612_v0, %v11068_v37  ;;  %v608_v6 = vpop.f32.mrb[9].mxu0  ;;  %v11209_v45 = vmax.bf16 %v2915_v40, %v2802_v7 }
 0x1b6   : > { %v10102_v9 = vpop.eup %10101  ;;  %v879_v11 = vadd.f32 1.0, %v10100_v3  ;;  %10113 = vpow2.f32 %v9155_v62  ;;  %v718_v38 = vmul.f32 %v11068_v37, %v608_v6  ;;  %v9613_v12 = vpop.f32.mrb[10].mxu0 }
 0x1b7   : > { %v10104_v14 = vpop.eup %10103  ;;  %v877_v16 = vadd.f32 1.0, %v10102_v9  ;;  %v11180_v17 = vadd.f32 %v11082_v52, %v720_v25  ;;  %v721_v18 = vmul.f32 %v9613_v12, %v11068_v37  ;;  %v611_v19 = vpop.f32.mrb[11].mxu0 }
 0x1b8   : > { %v10106_v32 = vpop.eup %10105  ;;  %10115 = vrcp.f32 %v879_v11  ;;  %v880_v27 = vadd.f32 1.0, %v10104_v14  ;;  %v11184_v28 = vadd.f32 %v11082_v52, %v718_v38  ;;  %v719_v29 = vmul.f32 %v11068_v37, %v611_v19 }
 0x1b9   : > { %10117 = vrcp.f32 %v877_v16  ;;  %v878_v21 = vadd.f32 1.0, %v10106_v32  ;;  %v9160_v30 = vmul.f32 -1.442695, %v11180_v17  ;;  %v11189_v31 = vadd.f32 %v11082_v52, %v721_v18 }
 0x1ba   : > { %10119 = vrcp.f32 %v880_v27  ;;  %v9158_v33 = vmul.f32 -1.442695, %v11184_v28  ;;  %v11193_v34 = vadd.f32 %v11082_v52, %v719_v29  ;;  %v11232_v14 = vmax.bf16 %v11206_v41, %v3082_v22 }
 0x1bb   : > { %10121 = vrcp.f32 %v878_v21  ;;  %v9161_v39 = vmul.f32 -1.442695, %v11189_v31  ;;  %v11239_v32 = vmax.bf16 %v11209_v45, %v3083_v36 }
 0x1bc   : > { %10123 = vpow2.f32 %v9160_v30  ;;  %v9159_v44 = vmul.f32 -1.442695, %v11193_v34  ;;  %v9616_v48 = vpop.f32.mrb[12].mxu0 }
 0x1bd   : > { %v10108_v47 = vpop.eup %10107  ;;  %10125 = vpow2.f32 %v9158_v33  ;;  %v724_v42 = vmul.f32 %v9616_v48, %v11068_v37  ;;  %v624_v51 = vpop.f32.mrb[13].mxu0 }
 0x1be   : > { %v10110_v53 = vpop.eup %10109  ;;  %v883_v56 = vadd.f32 1.0, %v10108_v47  ;;  %10127 = vpow2.f32 %v9161_v39  ;;  %v722_v58 = vmul.f32 %v11068_v37, %v624_v51  ;;  %v9617_v59 = vpop.f32.mrb[14].mxu0  ;;  %v14818_v51 = vmov 0 }
 0x1bf   : > { %v10112_v55 = vpop.eup %10111  ;;  %v881_v60 = vadd.f32 1.0, %v10110_v53  ;;  %10129 = vpow2.f32 %v9159_v44  ;;  %v11212_v61 = vadd.f32 %v11082_v52, %v724_v42  ;;  %v725_v62 = vmul.f32 %v9617_v59, %v11068_v37  ;;  %v627_v0 = vpop.f32.mrb[15].mxu0 }
 0x1c0   : > { %v10114_v1 = vpop.eup %10113  ;;  %10131 = vrcp.f32 %v883_v56  ;;  %v884_v23 = vadd.f32 1.0, %v10112_v55  ;;  %v11216_v2 = vadd.f32 %v11082_v52, %v722_v58  ;;  %v723_v3 = vmul.f32 %v11068_v37, %v627_v0 }
 0x1c1   : > { %10133 = vrcp.f32 %v881_v60  ;;  %v882_v25 = vadd.f32 1.0, %v10114_v1  ;;  %v9164_v6 = vmul.f32 -1.442695, %v11212_v61  ;;  %v11221_v7 = vadd.f32 %v11082_v52, %v725_v62 }
 0x1c2   : > { %v10116_v8 = vpop.eup %10115  ;;  %10135 = vrcp.f32 %v884_v23  ;;  %v9162_v9 = vmul.f32 -1.442695, %v11216_v2  ;;  %v11225_v11 = vadd.f32 %v11082_v52, %v723_v3  ;;  %v14819_v51 = vsel %vm11257_vm15, 4294967295, %v14818_v51 }
 0x1c3   : > { %v10118_v38 = vpop.eup %10117  ;;  %v11228_v12 = vmul.f32 %v10116_v8, %v11099_v63  ;;  %10137 = vrcp.f32 %v882_v25  ;;  %v9165_v15 = vmul.f32 -1.442695, %v11221_v7  ;;  %14820 = vst [vmem:[#allocation21_spill] sm:$0xff] %v14819_v51 }
 0x1c4   : > { %v10120_v16 = vpop.eup %10119  ;;  %10139 = vpow2.f32 %v9164_v6  ;;  %v9163_v18 = vmul.f32 -1.442695, %v11225_v11  ;;  %v9620_v19 = vpop.f32.mrb[16].mxu0  ;;  %v11236_v20 = vmul.f32 %v10118_v38, %v11103_v5 }
 0x1c5   : > { %v10122_v27 = vpop.eup %10121  ;;  %v9456_v63 = vpack.c.bf16 %v11228_v12, %v11228_v12  ;;  %v11244_v29 = vmul.f32 %v10120_v16, %v11108_v10  ;;  %10141 = vpow2.f32 %v9162_v9  ;;  %v728_v21 = vmul.f32 %v9620_v19, %v11068_v37  ;;  %v640_v30 = vpop.f32.mrb[17].mxu0 }
 0x1c6   : > { %v10124_v33 = vpop.eup %10123  ;;  %10143 = vpow2.f32 %v9165_v15  ;;  %v726_v35 = vmul.f32 %v11068_v37, %v640_v30  ;;  %v9621_v5 = vpop.f32.mrb[18].mxu0  ;;  %v11249_v39 = vmul.f32 %v10122_v27, %v11112_v13  ;;  %v9454_v40 = vpack.c.bf16 %v11236_v20, %v11236_v20 }
 0x1c7   : > { %v10126_v44 = vpop.eup %10125  ;;  %v1178_v48 = vrot.slane %v9456_v63, 7  ;;  %v9457_v10 = vpack.c.bf16 %v11244_v29, %v11244_v29  ;;  %v887_v22 = vadd.f32 1.0, %v10124_v33  ;;  %10145 = vpow2.f32 %v9163_v18  ;;  %v643_v47 = vpop.f32.mrb[19].mxu0 }
 0x1c8   : > { %v10128_v42 = vpop.eup %10127  ;;  %v885_v13 = vadd.f32 1.0, %v10126_v44  ;;  %v11262_v36 = vadd.f32 %v11082_v52, %v728_v21  ;;  %v11265_v53 = vadd.f32 %v11082_v52, %v726_v35  ;;  %v729_v56 = vmul.f32 %v9621_v5, %v11068_v37 }
 0x1c9   : > { %v10130_v58 = vpop.eup %10129  ;;  %v1179_v59 = vrot.slane %v1178_v48, 4  ;;  %1305 = vst [vmem:[#allocation2 + $0x24] sm:$0xe] %v1178_v48  ;;  %v1180_v55 = vrot.slane %v9457_v10, 7  ;;  %10147 = vrcp.f32 %v887_v22  ;;  %v888_v60 = vadd.f32 1.0, %v10128_v42 }
 0x1ca   : > { %v10132_v62 = vpop.eup %10131  ;;  %10149 = vrcp.f32 %v885_v13  ;;  %v886_v0 = vadd.f32 1.0, %v10130_v58  ;;  %v9168_v1 = vmul.f32 -1.442695, %v11262_v36  ;;  %v9166_v23 = vmul.f32 -1.442695, %v11265_v53 }
 0x1cb   : > { %v10134_v3 = vpop.eup %10133  ;;  %v1181_v25 = vsel %vm11257_vm15, %v1179_v59, %v1180_v55  ;;  %v1182_v6 = vrot.slane %v1180_v55, 4  ;;  %v11273_v8 = vmul.f32 %v10132_v62, %v11133_v43  ;;  %10151 = vrcp.f32 %v888_v60 }
 0x1cc   : > { %v10136_v9 = vpop.eup %10135  ;;  %1306 = vst [vmem:[#allocation2 + $0x28] sm:$0xf] %v1181_v25  ;;  %v11276_v38 = vmul.f32 %v10134_v3, %v11139_v50  ;;  %10153 = vrcp.f32 %v886_v0  ;;  %v11279_v15 = vadd.f32 %v11082_v52, %v729_v56  ;;  %v727_v16 = vmul.f32 %v11068_v37, %v643_v47  ;;  %v9624_v18 = vpop.f32.mrb[20].mxu0 }
 0x1cd   : > { %v10138_v19 = vpop.eup %10137  ;;  %1307 = vst [vmem:[#allocation2 + $0x2c] sm:$0x1] %v1182_v6  ;;  %v9460_v27 = vpack.c.bf16 %v11273_v8, %v11273_v8  ;;  %v11285_v43 = vmul.f32 %v10136_v9, %v11148_v54  ;;  %10155 = vpow2.f32 %v9168_v1  ;;  %v1005_v50 = vpack.c.bf16 %v11249_v39, %v11236_v20  ;;  %v11289_v63 = vpop.f32.mrb[21].mxu0 }
 0x1ce   : > { %v10140_v21 = vpop.eup %10139  ;;  %v9458_v30 = vpack.c.bf16 %v11276_v38, %v11276_v38  ;;  %v11294_v33 = vmul.f32 %v10138_v19, %v11160_v57  ;;  %10157 = vpow2.f32 %v9166_v23  ;;  %v9169_v35 = vmul.f32 -1.442695, %v11279_v15  ;;  %v11297_v5 = vpop.f32.mrb[22].mxu0 }
 0x1cf   : > { %v10142_v54 = vpop.eup %10141  ;;  %v1188_v44 = vrot.slane %v9460_v27, 7  ;;  %v9461_v48 = vpack.c.bf16 %v11285_v43, %v11285_v43  ;;  %v891_v10 = vadd.f32 1.0, %v10140_v21  ;;  %v11302_v22 = vadd.f32 %v11082_v52, %v727_v16  ;;  %9698 = vmatprep.mubr.bf16.mxu1 %v1005_v50  ;;  %v11304_v47 = vpop.f32.mrb[23].mxu0 }
 0x1d0   : > { %v10144_v42 = vpop.eup %10143  ;;  %v1183_v57 = vrot.slane %v9458_v30, 7  ;;  %v9459_v13 = vpack.c.bf16 %v11294_v33, %v11294_v33  ;;  %v889_v56 = vadd.f32 1.0, %v10142_v54  ;;  %10159 = vpow2.f32 %v9169_v35 }
 0x1d1   : > { %v10146_v58 = vpop.eup %10145  ;;  %v1189_v59 = vrot.slane %v1188_v44, 4  ;;  %1311 = vst [vmem:[#allocation2 + $0x3c] sm:$0xe] %v1188_v44  ;;  %v1190_v55 = vrot.slane %v9461_v48, 7  ;;  %10161 = vrcp.f32 %v891_v10  ;;  %v892_v60 = vadd.f32 1.0, %v10144_v42 }
 0x1d2   : > { %v1184_v62 = vrot.slane %v1183_v57, 4  ;;  %1308 = vst [vmem:[#allocation2 + $0x30] sm:$0xe] %v1183_v57  ;;  %v1185_v0 = vrot.slane %v9459_v13, 7  ;;  %10163 = vrcp.f32 %v889_v56  ;;  %v890_v1 = vadd.f32 1.0, %v10146_v58  ;;  %v10082_v57 = vld [vmem:[#allocation11 + $0x88] sm:$0xff]  }
 0x1d3   : > { %v10148_v23 = vpop.eup %10147  ;;  %v1191_v3 = vsel %vm11257_vm15, %v1189_v59, %v1190_v55  ;;  %v1192_v25 = vrot.slane %v1190_v55, 4  ;;  %10165 = vrcp.f32 %v892_v60  ;;  %v9167_v6 = vmul.f32 -1.442695, %v11302_v22 }
 0x1d4   : > { %v10150_v9 = vpop.eup %10149  ;;  %1312 = vst [vmem:[#allocation2 + $0x40] sm:$0xf] %v1191_v3  ;;  %v1186_v16 = vsel %vm11257_vm15, %v1184_v62, %v1185_v0  ;;  %v1187_v19 = vrot.slane %v1185_v0, 4  ;;  %v11314_v27 = vmul.f32 %v10148_v23, %v11180_v17  ;;  %10167 = vrcp.f32 %v890_v1  ;;  %v11316_v50 = vpop.f32.mrb[24].mxu0 }
 0x1d5   : > { %v10152_v21 = vpop.eup %10151  ;;  %1313 = vst [vmem:[#allocation2 + $0x44] sm:$0x1] %v1192_v25  ;;  %1309 = vst [vmem:[#allocation2 + $0x34] sm:$0xf] %v1186_v16  ;;  %v11319_v30 = vmul.f32 %v10150_v9, %v11184_v28  ;;  %10169 = vpow2.f32 %v9167_v6  ;;  %v9455_v35 = vpack.c.bf16 %v11249_v39, %v11249_v39  ;;  %v1173_v54 = vrot.slane %v9454_v40, 7  ;;  %v11326_v44 = vpop.f32.mrb[25].mxu0 }
 0x1d6   : > { %v10154_v17 = vpop.eup %10153  ;;  %1310 = vst [vmem:[#allocation2 + $0x38] sm:$0x1] %v1187_v19  ;;  %v9464_v48 = vpack.c.bf16 %v11314_v27, %v11314_v27  ;;  %v11331_v10 = vmul.f32 %v10152_v21, %v11189_v31  ;;  %v1006_v28 = vpack.c.bf16 %v11244_v29, %v11228_v12  ;;  %v732_v42 = vmul.f32 %v9624_v18, %v11068_v37  ;;  %v11336_v39 = vpop.f32.mrb[26].mxu0  ;;  %v10085_v6 = vld [vmem:[#allocation11 + $0x90] sm:$0xff]  }
 0x1d7   : > { %v10156_v20 = vpop.eup %10155  ;;  %v9462_v40 = vpack.c.bf16 %v11319_v30, %v11319_v30  ;;  %v11341_v13 = vmul.f32 %v10154_v17, %v11193_v34  ;;  %v1174_v56 = vrot.slane %v1173_v54, 4  ;;  %v1175_v58 = vrot.slane %v9455_v35, 7  ;;  %1302 = vst [vmem:[#allocation2 + $0x18] sm:$0xe] %v1173_v54  ;;  %v11343_v31 = vpop.f32.mrb[27].mxu0 }
 0x1d8   : > { %v10158_v59 = vpop.eup %10157  ;;  %v1198_v55 = vrot.slane %v9464_v48, 7  ;;  %v9465_v12 = vpack.c.bf16 %v11331_v10, %v11331_v10  ;;  %v895_v29 = vadd.f32 1.0, %v10156_v20  ;;  %9699 = vmatmul.mubr.bf16.vlgmr.msra.gmra.mrb[0].mxu1 %v1006_v28  ;;  %v11348_v18 = vadd.f32 %v11082_v52, %v732_v42 }
 0x1d9   : > { %v1193_v60 = vrot.slane %v9462_v40, 7  ;;  %v9463_v34 = vpack.c.bf16 %v11341_v13, %v11341_v13  ;;  %v893_v62 = vadd.f32 1.0, %v10158_v59  ;;  %v1176_v0 = vsel %vm11257_vm15, %v1174_v56, %v1175_v58  ;;  %9731 = vmatpush3.bf16.msra.mxu1 %v11018_v49 }
 0x1da   : > { %v10160_v1 = vpop.eup %10159  ;;  %v1199_v23 = vrot.slane %v1198_v55, 4  ;;  %1317 = vst [vmem:[#allocation2 + $0x54] sm:$0xe] %v1198_v55  ;;  %v1200_v3 = vrot.slane %v9465_v12, 7  ;;  %10171 = vrcp.f32 %v895_v29  ;;  %v1177_v25 = vrot.slane %v1175_v58, 4  ;;  %9732 = vmatprep.subr.bf16.mxu1 %v10082_v57 }
 0x1db   : > { %1303 = vst [vmem:[#allocation2 + $0x1c] sm:$0xf] %v1176_v0  ;;  %v10162_v9 = vpop.eup %10161  ;;  %v1194_v16 = vrot.slane %v1193_v60, 4  ;;  %1314 = vst [vmem:[#allocation2 + $0x48] sm:$0xe] %v1193_v60  ;;  %v1195_v19 = vrot.slane %v9463_v34, 7  ;;  %10173 = vrcp.f32 %v893_v62  ;;  %v730_v12 = vmul.f32 %v11068_v37, %v11289_v63 }
 0x1dc   : > { %v896_v21 = vadd.f32 1.0, %v10160_v1  ;;  %v10164_v35 = vpop.eup %10163  ;;  %v1201_v54 = vsel %vm11257_vm15, %v1199_v23, %v1200_v3  ;;  %v1202_v49 = vrot.slane %v1200_v3, 4  ;;  %v11358_v17 = vmul.f32 %v10162_v9, %v11212_v61  ;;  %1304 = vst [vmem:[#allocation2 + $0x20] sm:$0x1] %v1177_v25  ;;  %v11361_v28 = vpop.f32.mrb[28].mxu0 }
 0x1dd   : > { %v9172_v48 = vmul.f32 -1.442695, %v11348_v18  ;;  %v10166_v42 = vpop.eup %10165  ;;  %1318 = vst [vmem:[#allocation2 + $0x58] sm:$0xf] %v1201_v54  ;;  %v1196_v20 = vsel %vm11257_vm15, %v1194_v16, %v1195_v19  ;;  %v1197_v40 = vrot.slane %v1195_v19, 4  ;;  %v11366_v56 = vmul.f32 %v10164_v35, %v11216_v2  ;;  %v11368_v58 = vpop.f32.mrb[29].mxu0  ;;  %9733 = vmatpush3.bf16.msra.mxu1 %v10082_v57 }
 0x1de   : > { %10175 = vrcp.f32 %v896_v21  ;;  %v10168_v61 = vpop.eup %10167  ;;  %1319 = vst [vmem:[#allocation2 + $0x5c] sm:$0x1] %v1202_v49  ;;  %1315 = vst [vmem:[#allocation2 + $0x4c] sm:$0xf] %v1196_v20  ;;  %v9468_v59 = vpack.c.bf16 %v11358_v17, %v11358_v17  ;;  %v11373_v55 = vmul.f32 %v10166_v42, %v11221_v7  ;;  %v11377_v29 = vpop.f32.mrb[30].mxu0  ;;  %9734 = vmatprep.subr.bf16.mxu1 %v10085_v6  ;;  %v10086_v2 = vld [vmem:[#allocation11 + $0x98] sm:$0xff]  }
 0x1df   : > { %10177 = vpow2.f32 %v9172_v48  ;;  %v10170_v60 = vpop.eup %10169  ;;  %1316 = vst [vmem:[#allocation2 + $0x50] sm:$0x1] %v1197_v40  ;;  %v9466_v57 = vpack.c.bf16 %v11366_v56, %v11366_v56  ;;  %v11382_v34 = vmul.f32 %v10168_v61, %v11225_v11  ;;  %v733_v7 = vmul.f32 %v11297_v5, %v11068_v37  ;;  %v11388_v0 = vpop.f32.mrb[31].mxu0 }
 0x1e0   : > { %v731_v62 = vmul.f32 %v11068_v37, %v11304_v47  ;;  %v1208_v63 = vrot.slane %v9468_v59, 7  ;;  %v9469_v1 = vpack.c.bf16 %v11373_v55, %v11373_v55  ;;  %v894_v23 = vadd.f32 1.0, %v10170_v60 }
 0x1e1   : > { %v11393_v3 = vadd.f32 %v11082_v52, %v730_v12  ;;  %v1203_v25 = vrot.slane %v9466_v57, 7  ;;  %v9467_v11 = vpack.c.bf16 %v11382_v34, %v11382_v34  ;;  %v11398_v9 = vadd.f32 %v11082_v52, %v733_v7  ;;  %9735 = vmatpush3.bf16.msra.mxu1 %v10085_v6 }
 0x1e2   : > { %v11401_v5 = vadd.f32 %v11082_v52, %v731_v62  ;;  %v1209_v47 = vrot.slane %v1208_v63, 4  ;;  %1323 = vst [vmem:[#allocation2 + $0x6c] sm:$0xe] %v1208_v63  ;;  %v1210_v16 = vrot.slane %v9469_v1, 7  ;;  %10179 = vrcp.f32 %v894_v23  ;;  %9736 = vmatprep.subr.bf16.mxu1 %v10086_v2 }
 0x1e3   : > { %v9170_v19 = vmul.f32 -1.442695, %v11393_v3  ;;  %v1204_v21 = vrot.slane %v1203_v25, 4  ;;  %1320 = vst [vmem:[#allocation2 + $0x60] sm:$0xe] %v1203_v25  ;;  %v1205_v35 = vrot.slane %v9467_v11, 7  ;;  %v1007_v6 = vpack.c.bf16 %v11294_v33, %v11276_v38 }
 0x1e4   : > { %v9173_v54 = vmul.f32 -1.442695, %v11398_v9  ;;  %v9171_v49 = vmul.f32 -1.442695, %v11401_v5  ;;  %v10172_v48 = vpop.eup %10171  ;;  %v1211_v42 = vsel %vm11257_vm15, %v1209_v47, %v1210_v16  ;;  %v1212_v20 = vrot.slane %v1210_v16, 4 }
 0x1e5   : > { %10181 = vpow2.f32 %v9170_v19  ;;  %v10174_v40 = vpop.eup %10173  ;;  %1324 = vst [vmem:[#allocation2 + $0x70] sm:$0xf] %v1211_v42  ;;  %v1206_v61 = vsel %vm11257_vm15, %v1204_v21, %v1205_v35  ;;  %v1207_v59 = vrot.slane %v1205_v35, 4  ;;  %v11413_v12 = vmul.f32 %v10172_v48, %v11262_v36  ;;  %9737 = vmatpush3.bf16.msra.mxu1 %v10086_v2  ;;  %9702 = vmatprep.mubr.bf16.mxu1 %v1007_v6 }
 0x1e6   : > { %10183 = vpow2.f32 %v9173_v54  ;;  %1325 = vst [vmem:[#allocation2 + $0x74] sm:$0x1] %v1212_v20  ;;  %1321 = vst [vmem:[#allocation2 + $0x64] sm:$0xf] %v1206_v61  ;;  %v11416_v60 = vmul.f32 %v10174_v40, %v11265_v53  ;;  %v1008_v38 = vpack.c.bf16 %v11285_v43, %v11273_v8  ;;  %v736_v33 = vmul.f32 %v11316_v50, %v11068_v37 }
 0x1e7   : > { %10185 = vpow2.f32 %v9171_v49  ;;  %1322 = vst [vmem:[#allocation2 + $0x68] sm:$0x1] %v1207_v59  ;;  %v9472_v36 = vpack.c.bf16 %v11413_v12, %v11413_v12  ;;  %v734_v2 = vmul.f32 %v11068_v37, %v11326_v44  ;;  %v737_v53 = vmul.f32 %v11336_v39, %v11068_v37 }
 0x1e8   : > { %v10176_v57 = vpop.eup %10175  ;;  %v735_v7 = vmul.f32 %v11068_v37, %v11343_v31  ;;  %v9470_v8 = vpack.c.bf16 %v11416_v60, %v11416_v60  ;;  %9703 = vmatmul.mubr.bf16.gmra.mrb[4].mxu1 %v1008_v38  ;;  %v11436_v50 = vadd.f32 %v11082_v52, %v736_v33  ;;  %v1009_v44 = vpack.c.bf16 %v11341_v13, %v11319_v30 }
 0x1e9   : > { %v10178_v62 = vpop.eup %10177  ;;  %v11433_v43 = vmul.f32 %v10176_v57, %v11279_v15  ;;  %v1218_v63 = vrot.slane %v9472_v36, 7  ;;  %v11441_v39 = vadd.f32 %v11082_v52, %v734_v2  ;;  %v11444_v31 = vadd.f32 %v11082_v52, %v737_v53 }
 0x1ea   : > { %v899_v1 = vadd.f32 1.0, %v10178_v62  ;;  %v1213_v23 = vrot.slane %v9470_v8, 7  ;;  %v9176_v25 = vmul.f32 -1.442695, %v11436_v50  ;;  %v11450_v11 = vadd.f32 %v11082_v52, %v735_v7  ;;  %9706 = vmatprep.mubr.bf16.mxu1 %v1009_v44  ;;  %v11486_v8 = vld [vmem:[#allocation2 + $0x18] sm:$0xf] }
 0x1eb   : > { %v9473_v15 = vpack.c.bf16 %v11433_v43, %v11433_v43  ;;  %v1219_v47 = vrot.slane %v1218_v63, 4  ;;  %1329 = vst [vmem:[#allocation2 + $0x84] sm:$0xe] %v1218_v63  ;;  %v9174_v30 = vmul.f32 -1.442695, %v11441_v39  ;;  %v1010_v49 = vpack.c.bf16 %v11331_v10, %v11314_v27 }
 0x1ec   : > { %10187 = vrcp.f32 %v899_v1  ;;  %v9177_v13 = vmul.f32 -1.442695, %v11444_v31  ;;  %v10180_v16 = vpop.eup %10179  ;;  %v1214_v19 = vrot.slane %v1213_v23, 4  ;;  %1326 = vst [vmem:[#allocation2 + $0x78] sm:$0xe] %v1213_v23  ;;  %v740_v48 = vmul.f32 %v11361_v28, %v11068_v37 }
 0x1ed   : > { %v1220_v21 = vrot.slane %v9473_v15, 7  ;;  %10189 = vpow2.f32 %v9176_v25  ;;  %v9175_v35 = vmul.f32 -1.442695, %v11450_v11  ;;  %v11456_v54 = vmul.f32 %v10180_v16, %v11302_v22  ;;  %v11492_v44 = vld [vmem:[#allocation2 + $0x1c] sm:$0xf] }
 0x1ee   : > { %10191 = vpow2.f32 %v9174_v30  ;;  %v738_v40 = vmul.f32 %v11068_v37, %v11368_v58  ;;  %v11469_v27 = vadd.f32 %v11082_v52, %v740_v48  ;;  %v741_v58 = vmul.f32 %v11377_v29, %v11068_v37  ;;  %v11506_v30 = vld [vmem:[#allocation2 + $0x20] sm:$0x1] }
 0x1ef   : > { %v10182_v42 = vpop.eup %10181  ;;  %v1221_v20 = vsel %vm11257_vm15, %v1219_v47, %v1220_v21  ;;  %v1222_v6 = vrot.slane %v1220_v21, 4  ;;  %10193 = vpow2.f32 %v9177_v13  ;;  %v9471_v22 = vpack.c.bf16 %v11456_v54, %v11456_v54 }
 0x1f0   : > { %v10184_v61 = vpop.eup %10183  ;;  %1330 = vst [vmem:[#allocation2 + $0x88] sm:$0xf] %v1221_v20  ;;  %v897_v59 = vadd.f32 1.0, %v10182_v42  ;;  %10195 = vpow2.f32 %v9175_v35  ;;  %9707 = vmatmul.mubr.bf16.gmra.mrb[8].mxu1 %v1010_v49  ;;  %v11472_v38 = vadd.f32 %v11082_v52, %v738_v40  ;;  %v739_v33 = vmul.f32 %v11068_v37, %v11388_v0 }
 0x1f1   : > { %v10186_v10 = vpop.eup %10185  ;;  %1331 = vst [vmem:[#allocation2 + $0x8c] sm:$0x1] %v1222_v6  ;;  %v900_v28 = vadd.f32 1.0, %v10184_v61  ;;  %v1215_v57 = vrot.slane %v9471_v22, 7  ;;  %v9180_v2 = vmul.f32 -1.442695, %v11469_v27  ;;  %v11481_v7 = vadd.f32 %v11082_v52, %v741_v58 }
 0x1f2   : > { %10197 = vrcp.f32 %v897_v59  ;;  %v898_v36 = vadd.f32 1.0, %v10186_v10  ;;  %v9178_v53 = vmul.f32 -1.442695, %v11472_v38  ;;  %v11484_v62 = vadd.f32 %v11082_v52, %v739_v33  ;;  %v11522_v59 = vld [vmem:[#allocation2 + $0x28] sm:$0xf] }
 0x1f3   : > { %10199 = vrcp.f32 %v900_v28  ;;  %v1216_v29 = vsel %vm11257_vm15, %v1214_v19, %v1215_v57  ;;  %v1217_v37 = vrot.slane %v1215_v57, 4  ;;  %v1011_v0 = vpack.c.bf16 %v11382_v34, %v11366_v56 }
 0x1f4   : > { %10201 = vrcp.f32 %v898_v36  ;;  %1327 = vst [vmem:[#allocation2 + $0x7c] sm:$0xf] %v1216_v29  ;;  %v9181_v63 = vmul.f32 -1.442695, %v11481_v7  ;;  %v9179_v1 = vmul.f32 -1.442695, %v11484_v62  ;;  %v1012_v52 = vpack.c.bf16 %v11373_v55, %v11358_v17 }
 0x1f5   : > { %10203 = vpow2.f32 %v9180_v2  ;;  %1328 = vst [vmem:[#allocation2 + $0x80] sm:$0x1] %v1217_v37  ;;  %9710 = vmatprep.mubr.bf16.mxu1 %v1011_v0  ;;  %v1013_v15 = vpack.c.bf16 %v11456_v54, %v11416_v60  ;;  %v1014_v56 = vpack.c.bf16 %v11433_v43, %v11413_v12  ;;  %v1462_v34 = vshrl.u32 %v11486_v8, 16 }
 0x1f6   : > { %v10188_v23 = vpop.eup %10187  ;;  %10205 = vpow2.f32 %v9178_v53  ;;  %v1465_v17 = vshll.u32 %v11486_v8, 16  ;;  %v1471_v55 = vshll.u32 %v11492_v44, 16  ;;  %v1475_v19 = vshrl.u32 %v11492_v44, 16 }
 0x1f7   : > { %v10190_v25 = vpop.eup %10189  ;;  %v11504_v47 = vmul.f32 %v10188_v23, %v11348_v18  ;;  %10207 = vpow2.f32 %v9181_v63  ;;  %v1464_v60 = vrot.slane %v1462_v34, 4  ;;  %v11513_v18 = vld [vmem:[#allocation2 + $0x24] sm:$0xf]  ;;  %v1481_v20 = vshll.u32 %v11506_v30, 16 }
 0x1f8   : > { %v10192_v13 = vpop.eup %10191  ;;  %v903_v16 = vadd.f32 1.0, %v10190_v25  ;;  %10209 = vpow2.f32 %v9179_v1  ;;  %9711 = vmatmul.mubr.bf16.gmra.mrb[12].mxu1 %v1012_v52  ;;  %v1467_v35 = vrot.slane %v1465_v17, 5  ;;  %v11517_v54 = vrot.slane %v1471_v55, 5 }
 0x1f9   : > { %v10194_v12 = vpop.eup %10193  ;;  %v9476_v43 = vpack.c.bf16 %v11504_v47, %v11504_v47  ;;  %v901_v21 = vadd.f32 1.0, %v10192_v13  ;;  %9714 = vmatprep.mubr.bf16.mxu1 %v1013_v15  ;;  %v1477_v42 = vrot.slane %v1475_v19, 4  ;;  %v11525_v28 = vrot.slane %v1481_v20, 5  ;;  %v10087_v15 = vld [vmem:[#allocation11 + $0xa0] sm:$0xff]  }
 0x1fa   : > { %v10196_v49 = vpop.eup %10195  ;;  %10211 = vrcp.f32 %v903_v16  ;;  %v904_v48 = vadd.f32 1.0, %v10194_v12  ;;  %v1468_v61 = vor.u32 %v1467_v35, %v1464_v60  ;;  %v1486_v58 = vshrl.u32 %v11513_v18, 16  ;;  %9738 = vmatprep.subr.bf16.mxu1 %v10087_v15 }
 0x1fb   : > { %v1228_v6 = vrot.slane %v9476_v43, 7  ;;  %10213 = vrcp.f32 %v901_v21  ;;  %v902_v40 = vadd.f32 1.0, %v10196_v49  ;;  %v1478_v10 = vor.u32 %v1477_v42, %v11517_v54  ;;  %9739 = vmatpush3.bf16.msra.mxu1 %v10087_v15 }
 0x1fc   : > { %v10198_v22 = vpop.eup %10197  ;;  %10215 = vrcp.f32 %v904_v48  ;;  %v11531_v2 = vrot.slane %v1468_v61, 4  ;;  %v1488_v0 = vrot.slane %v1486_v58, 4  ;;  %v1489_v63 = vshll.u32 %v11513_v18, 16  ;;  %v11561_v61 = vld [vmem:[#allocation2 + $0x2c] sm:$0x1] }
 0x1fd   : > { %v10200_v33 = vpop.eup %10199  ;;  %v1229_v57 = vrot.slane %v1228_v6, 4  ;;  %1335 = vst [vmem:[#allocation2 + $0x9c] sm:$0xe] %v1228_v6  ;;  %v11529_v36 = vmul.f32 %v10198_v22, %v11393_v3  ;;  %10217 = vrcp.f32 %v902_v40  ;;  %v11536_v37 = vrot.slane %v1478_v10, 4  ;;  %v11565_v58 = vld [vmem:[#allocation2 + $0x30] sm:$0xf] }
 0x1fe   : > { %v10202_v53 = vpop.eup %10201  ;;  %v11534_v29 = vmul.f32 %v10200_v33, %v11398_v9  ;;  %v1474_v3 = vsel %vm11030_vm4, %v11531_v2, %v11517_v54  ;;  %v1495_v9 = vshll.u32 %v11522_v59, 16 }
 0x1ff   : > { %v10204_v1 = vpop.eup %10203  ;;  %v9474_v52 = vpack.c.bf16 %v11529_v36, %v11529_v36  ;;  %v11542_v23 = vmul.f32 %v10202_v53, %v11401_v5  ;;  %v1484_v13 = vsel %vm11030_vm4, %v11536_v37, %v11525_v28  ;;  %v1491_v5 = vrot.slane %v1489_v63, 5 }
 0x200   : > { %v10206_v34 = vpop.eup %10205  ;;  %v9477_v25 = vpack.c.bf16 %v11534_v29, %v11534_v29  ;;  %v907_v17 = vadd.f32 1.0, %v10204_v1  ;;  %9715 = vmatmul.mubr.bf16.gmra.mrb[16].mxu1 %v1014_v56  ;;  %v11559_v21 = vrot.slane %v1495_v9, 5 }
 0x201   : > { %v10208_v16 = vpop.eup %10207  ;;  %v1223_v60 = vrot.slane %v9474_v52, 7  ;;  %v9475_v12 = vpack.c.bf16 %v11542_v23, %v11542_v23  ;;  %v905_v43 = vadd.f32 1.0, %v10206_v34  ;;  %v1492_v42 = vor.u32 %v1491_v5, %v1488_v0 }
 0x202   : > { %v10210_v35 = vpop.eup %10209  ;;  %v1230_v49 = vrot.slane %v9477_v25, 7  ;;  %10219 = vrcp.f32 %v907_v17  ;;  %v908_v48 = vadd.f32 1.0, %v10208_v16  ;;  %v1499_v34 = vshrl.u32 %v11522_v59, 16  ;;  %v11588_v16 = vld [vmem:[#allocation2 + $0x34] sm:$0xf] }
 0x203   : > { %v1224_v20 = vrot.slane %v1223_v60, 4  ;;  %1332 = vst [vmem:[#allocation2 + $0x90] sm:$0xe] %v1223_v60  ;;  %v1225_v6 = vrot.slane %v9475_v12, 7  ;;  %10221 = vrcp.f32 %v905_v43  ;;  %v906_v40 = vadd.f32 1.0, %v10210_v35 }
 0x204   : > { %v10212_v22 = vpop.eup %10211  ;;  %v1231_v56 = vsel %vm11257_vm15, %v1229_v57, %v1230_v49  ;;  %v1232_v10 = vrot.slane %v1230_v49, 4  ;;  %10223 = vrcp.f32 %v908_v48  ;;  %v11567_v33 = vrot.slane %v1492_v42, 4 }
 0x205   : > { %v10214_v53 = vpop.eup %10213  ;;  %1336 = vst [vmem:[#allocation2 + $0xa0] sm:$0xf] %v1231_v56  ;;  %v1226_v0 = vsel %vm11257_vm15, %v1224_v20, %v1225_v6  ;;  %v1227_v63 = vrot.slane %v1225_v6, 4  ;;  %v11572_v1 = vmul.f32 %v10212_v22, %v11436_v50  ;;  %10225 = vrcp.f32 %v906_v40 }
 0x206   : > { %v10216_v52 = vpop.eup %10215  ;;  %1337 = vst [vmem:[#allocation2 + $0xa4] sm:$0x1] %v1232_v10  ;;  %1333 = vst [vmem:[#allocation2 + $0x94] sm:$0xf] %v1226_v0  ;;  %v11575_v57 = vmul.f32 %v10214_v53, %v11441_v39  ;;  %v1498_v15 = vsel %vm11030_vm4, %v11567_v33, %v11559_v21  ;;  %v1505_v25 = vshll.u32 %v11561_v61, 16  ;;  %v1510_v39 = vshrl.u32 %v11565_v58, 16 }
 0x207   : > { %v10218_v17 = vpop.eup %10217  ;;  %1334 = vst [vmem:[#allocation2 + $0x98] sm:$0x1] %v1227_v63  ;;  %v9480_v50 = vpack.c.bf16 %v11572_v1, %v11572_v1  ;;  %v11586_v5 = vmul.f32 %v10216_v52, %v11444_v31  ;;  %v1513_v60 = vshll.u32 %v11565_v58, 16  ;;  %v1501_v35 = vrot.slane %v1499_v34, 4 }
 0x208   : > { %v9478_v12 = vpack.c.bf16 %v11575_v57, %v11575_v57  ;;  %v11595_v43 = vmul.f32 %v10218_v17, %v11450_v11  ;;  %v1507_v49 = vrot.slane %v1505_v25, 5  ;;  %v1512_v42 = vrot.slane %v1510_v39, 4 }
 0x209   : > { %v1238_v48 = vrot.slane %v9480_v50, 7  ;;  %v9481_v31 = vpack.c.bf16 %v11586_v5, %v11586_v5  ;;  %v1515_v20 = vrot.slane %v1513_v60, 5  ;;  %v1502_v22 = vor.u32 %v1501_v35, %v11559_v21 }
 0x20a   : > { %v1233_v6 = vrot.slane %v9478_v12, 7  ;;  %v9479_v40 = vpack.c.bf16 %v11595_v43, %v11595_v43  ;;  %v1519_v56 = vshll.u32 %v11588_v16, 16  ;;  %v1523_v0 = vshrl.u32 %v11588_v16, 16 }
 0x20b   : > { %v1239_v11 = vrot.slane %v1238_v48, 4  ;;  %1341 = vst [vmem:[#allocation2 + $0xb4] sm:$0xe] %v1238_v48  ;;  %v1240_v10 = vrot.slane %v9481_v31, 7  ;;  %v1516_v53 = vor.u32 %v1515_v20, %v1512_v42  ;;  %v1503_v17 = vrot.slane %v1502_v22, 4 }
 0x20c   : > { %v10220_v63 = vpop.eup %10219  ;;  %v1234_v52 = vrot.slane %v1233_v6, 4  ;;  %1338 = vst [vmem:[#allocation2 + $0xa8] sm:$0xe] %v1233_v6  ;;  %v1235_v25 = vrot.slane %v9479_v40, 7  ;;  %v1521_v50 = vrot.slane %v1519_v56, 5  ;;  %v11663_v2 = vmax.bf16 %v1498_v15, %v11513_v18 }
 0x20d   : > { %v10222_v39 = vpop.eup %10221  ;;  %v1241_v60 = vsel %vm11257_vm15, %v1239_v11, %v1240_v10  ;;  %v1242_v12 = vrot.slane %v1240_v10, 4  ;;  %v11611_v35 = vmul.f32 %v10220_v63, %v11469_v27  ;;  %v11613_v48 = vld [vmem:[#allocation2 + $0x38] sm:$0x1]  ;;  %v1517_v31 = vrot.slane %v1516_v53, 4  ;;  %v11675_v15 = vld [vmem:[#allocation2 + $0x30] sm:$0xe] }
 0x20e   : > { %v10224_v42 = vpop.eup %10223  ;;  %1342 = vst [vmem:[#allocation2 + $0xb8] sm:$0xf] %v1241_v60  ;;  %v1236_v20 = vsel %vm11257_vm15, %v1234_v52, %v1235_v25  ;;  %v1237_v6 = vrot.slane %v1235_v25, 4  ;;  %v11618_v40 = vmul.f32 %v10222_v39, %v11472_v38  ;;  %v1508_v22 = vsel %vm11030_vm4, %v1503_v17, %v1507_v49  ;;  %v1975_v60 = vld [vmem:[#allocation2 + $0x18] sm:$0xe] }
 0x20f   : > { %v10226_v11 = vpop.eup %10225  ;;  %1343 = vst [vmem:[#allocation2 + $0xbc] sm:$0x1] %v1242_v12  ;;  %1339 = vst [vmem:[#allocation2 + $0xac] sm:$0xf] %v1236_v20  ;;  %v9484_v27 = vpack.c.bf16 %v11611_v35, %v11611_v35  ;;  %v11625_v10 = vmul.f32 %v10224_v42, %v11481_v7  ;;  %v1522_v53 = vsel %vm11030_vm4, %v1517_v31, %v1521_v50  ;;  %v1525_v63 = vrot.slane %v1523_v0, 4 }
 0x210   : > { %1340 = vst [vmem:[#allocation2 + $0xb0] sm:$0x1] %v1237_v6  ;;  %v9482_v38 = vpack.c.bf16 %v11618_v40, %v11618_v40  ;;  %v11634_v49 = vmul.f32 %v10226_v11, %v11484_v62  ;;  %v1529_v52 = vshll.u32 %v11613_v48, 16  ;;  %v11643_v7 = vmax.bf16 %v1474_v3, %v11486_v8  ;;  %v1976_v20 = vld [vmem:[#allocation2 + $0x24] sm:$0xe] }
 0x211   : > { %v1248_v25 = vrot.slane %v9484_v27, 7  ;;  %v9485_v17 = vpack.c.bf16 %v11625_v10, %v11625_v10  ;;  %v1526_v39 = vor.u32 %v1525_v63, %v1521_v50  ;;  %v11653_v62 = vmax.bf16 %v1484_v13, %v11492_v44 }
 0x212   : > { %v1243_v12 = vrot.slane %v9482_v38, 7  ;;  %v9483_v54 = vpack.c.bf16 %v11634_v49, %v11634_v49  ;;  %v1531_v8 = vrot.slane %v1529_v52, 5  ;;  %v11666_v37 = vmax.bf16 %v1508_v22, %v11522_v59 }
 0x213   : > { %v1249_v3 = vrot.slane %v1248_v25, 4  ;;  %1347 = vst [vmem:[#allocation2 + $0xcc] sm:$0xe] %v1248_v25  ;;  %v1250_v50 = vrot.slane %v9485_v17, 7  ;;  %v1527_v28 = vrot.slane %v1526_v39, 4  ;;  %v11669_v42 = vmax.bf16 %v1522_v53, %v11565_v58 }
 0x214   : > { %v1244_v13 = vrot.slane %v1243_v12, 4  ;;  %1344 = vst [vmem:[#allocation2 + $0xc0] sm:$0xe] %v1243_v12  ;;  %v1245_v31 = vrot.slane %v9483_v54, 7  ;;  %v9216_v6 = vrot.slane %v1975_v60, 9  ;;  %v2072_v22 = vrot.slane %v11492_v44, 5 }
 0x215   : > { %v1251_v21 = vsel %vm11257_vm15, %v1249_v3, %v1250_v50  ;;  %v1252_v18 = vrot.slane %v1250_v50, 4  ;;  %v1532_v33 = vsel %vm11030_vm4, %v1527_v28, %v1531_v8  ;;  %v2075_v53 = vrot.slane %v11506_v30, 5 }
 0x216   : > { %1348 = vst [vmem:[#allocation2 + $0xd0] sm:$0xf] %v1251_v21  ;;  %v1246_v11 = vsel %vm11257_vm15, %v1244_v13, %v1245_v31  ;;  %v1247_v27 = vrot.slane %v1245_v31, 4  ;;  %v11681_v58 = vmax.bf16 %v1532_v33, %v11588_v16  ;;  %v11686_v63 = vsel %vm11057_vm7, %v9216_v6, %v2072_v22  ;;  %v11711_v31 = vld [vmem:[#allocation2 + $0x20] sm:$0x3] }
 0x217   : > { %1349 = vst [vmem:[#allocation2 + $0xd4] sm:$0x1] %v1252_v18  ;;  %1345 = vst [vmem:[#allocation2 + $0xc4] sm:$0xf] %v1246_v11  ;;  %v2074_v38 = vrot.slane %v2072_v22, 4  ;;  %v9217_v52 = vrot.slane %v1976_v20, 9  ;;  %v2240_v50 = vmax.bf16 %v11686_v63, %v11643_v7 }
 0x218   : > { %v2079_v25 = vrot.slane %v11522_v59, 5  ;;  %1346 = vst [vmem:[#allocation2 + $0xc8] sm:$0x1] %v1247_v27  ;;  %v2082_v17 = vrot.slane %v11561_v61, 5  ;;  %v9218_v39 = vrot.slane %v11675_v15, 9  ;;  %v2086_v12 = vrot.slane %v11588_v16, 5 }
 0x219   : > { %v2089_v54 = vrot.slane %v11613_v48, 5  ;;  %v11695_v30 = vsel %vm11057_vm7, %v2074_v38, %v2075_v53  ;;  %v2346_v21 = vshrl.u32 %v1975_v60, 16  ;;  %v2349_v18 = vshll.u32 %v1975_v60, 16  ;;  %v11732_v38 = vld [vmem:[#allocation2 + $0x2c] sm:$0x3] }
 0x21a   : > { %v11699_v8 = vsel %vm11057_vm7, %v9217_v52, %v2079_v25  ;;  %v2081_v3 = vrot.slane %v2079_v25, 4  ;;  %v11705_v61 = vsel %vm11057_vm7, %v9218_v39, %v2086_v12  ;;  %v2088_v28 = vrot.slane %v2086_v12, 4 }
 0x21b   : > { %v2241_v48 = vmax.bf16 %v11695_v30, %v11653_v62  ;;  %v2242_v13 = vmax.bf16 %v11699_v8, %v11663_v2  ;;  %v2244_v7 = vmax.bf16 %v11705_v61, %v11669_v42  ;;  %v2354_v22 = vrot.slane %v1475_v19, 5 }
 0x21c   : > { %v11715_v6 = vsel %vm11057_vm7, %v2081_v3, %v2082_v17  ;;  %v11721_v33 = vsel %vm11057_vm7, %v2088_v28, %v2089_v54  ;;  %v2355_v11 = vrot.slane %v1471_v55, 6  ;;  %v2348_v53 = vrot.slane %v2346_v21, 5 }
 0x21d   : > { %v2243_v62 = vmax.bf16 %v11715_v6, %v11666_v37  ;;  %v2351_v63 = vrot.slane %v2349_v18, 6  ;;  %v2360_v60 = vshrl.u32 %v11711_v31, 16  ;;  %v2363_v25 = vshll.u32 %v11711_v31, 16 }
 0x21e   : > { %v2356_v52 = vor.u32 %v2355_v11, %v2354_v22  ;;  %v2369_v17 = vshrl.u32 %v1976_v20, 16  ;;  %v2372_v37 = vshll.u32 %v1976_v20, 16  ;;  %v2377_v19 = vrot.slane %v1499_v34, 5  ;;  %v11741_v11 = vld [vmem:[#allocation2 + $0x38] sm:$0x3] }
 0x21f   : > { %v2352_v39 = vor.u32 %v2351_v63, %v2348_v53  ;;  %v2362_v12 = vrot.slane %v2360_v60, 5  ;;  %v2378_v55 = vrot.slane %v1495_v9, 6  ;;  %v2365_v30 = vrot.slane %v2363_v25, 6  ;;  %v10088_v60 = vld [vmem:[#allocation11 + $0xa8] sm:$0xff]  }
 0x220   : > { %v2358_v54 = vrot.slane %v2356_v52, 4  ;;  %v2371_v3 = vrot.slane %v2369_v17, 5  ;;  %v2374_v28 = vrot.slane %v2372_v37, 6  ;;  %v2383_v18 = vshrl.u32 %v11732_v38, 16  ;;  %9740 = vmatprep.subr.bf16.mxu1 %v10088_v60 }
 0x221   : > { %v2353_v6 = vrot.slane %v2352_v39, 4  ;;  %v2379_v21 = vor.u32 %v2378_v55, %v2377_v19  ;;  %v2386_v22 = vshll.u32 %v11732_v38, 16  ;;  %v2366_v20 = vor.u32 %v2365_v30, %v2362_v12  ;;  %9741 = vmatpush3.bf16.msra.mxu1 %v10088_v60 }
 0x222   : > { %v2375_v53 = vor.u32 %v2374_v28, %v2371_v3  ;;  %v2392_v63 = vshrl.u32 %v11675_v15, 16  ;;  %v2395_v34 = vshll.u32 %v11675_v15, 16  ;;  %v2385_v17 = vrot.slane %v2383_v18, 5  ;;  %v2841_v18 = vld [vmem:[#allocation2 + $0x18] sm:$0xc] }
 0x223   : > { %v2357_v9 = vsel %vm11119_vm11, %v2353_v6, %v2356_v52  ;;  %v2381_v25 = vrot.slane %v2379_v21, 4  ;;  %v2388_v37 = vrot.slane %v2386_v22, 6  ;;  %v2367_v39 = vsel %vm11119_vm11, %v2358_v54, %v2366_v20 }
 0x224   : > { %v2376_v19 = vrot.slane %v2375_v53, 4  ;;  %v2394_v55 = vrot.slane %v2392_v63, 5  ;;  %v2397_v27 = vrot.slane %v2395_v34, 6  ;;  %v2400_v30 = vrot.slane %v1523_v0, 5  ;;  %v2842_v63 = vld [vmem:[#allocation2 + $0x24] sm:$0xc] }
 0x225   : > { %v2389_v12 = vor.u32 %v2388_v37, %v2385_v17  ;;  %v2401_v15 = vrot.slane %v1519_v56, 6  ;;  %v2406_v3 = vshrl.u32 %v11741_v11, 16  ;;  %v2409_v54 = vshll.u32 %v11741_v11, 16 }
 0x226   : > { %v2380_v52 = vsel %vm11119_vm11, %v2376_v19, %v2379_v21  ;;  %v2398_v28 = vor.u32 %v2397_v27, %v2394_v55  ;;  %v2803_v6 = vmax.bf16 %v2357_v9, %v2240_v50  ;;  %v2804_v0 = vmax.bf16 %v2367_v39, %v2241_v48  ;;  %v2843_v27 = vld [vmem:[#allocation2 + $0x30] sm:$0xc] }
 0x227   : > { %v2390_v22 = vsel %vm11119_vm11, %v2381_v25, %v2389_v12  ;;  %v2402_v20 = vor.u32 %v2401_v15, %v2400_v30  ;;  %v2408_v53 = vrot.slane %v2406_v3, 5  ;;  %v2411_v56 = vrot.slane %v2409_v54, 6 }
 0x228   : > { %v2399_v34 = vrot.slane %v2398_v28, 4  ;;  %v2805_v60 = vmax.bf16 %v2380_v52, %v2242_v13  ;;  %v2806_v17 = vmax.bf16 %v2390_v22, %v2243_v62  ;;  %v9236_v37 = vrot.slane %v2841_v18, 10  ;;  %v1360_v28 = vld [vmem:[#allocation2 + $0x3c] sm:$0xf] }
 0x229   : > { %v2404_v21 = vrot.slane %v2402_v20, 4  ;;  %v2918_v50 = vrot.slane %v11492_v44, 6  ;;  %v2921_v9 = vrot.slane %v11711_v31, 6  ;;  %v2412_v19 = vor.u32 %v2411_v56, %v2408_v53  ;;  %v1395_v53 = vld [vmem:[#allocation2 + $0x44] sm:$0x1] }
 0x22a   : > { %v2403_v25 = vsel %vm11119_vm11, %v2399_v34, %v2402_v20  ;;  %v9237_v48 = vrot.slane %v2842_v63, 10  ;;  %v2925_v39 = vrot.slane %v11522_v59, 6  ;;  %v2928_v62 = vrot.slane %v11732_v38, 6 }
 0x22b   : > { %v2807_v2 = vmax.bf16 %v2403_v25, %v2244_v7  ;;  %v2919_v8 = vsel %vm11154_vm12, %v9236_v37, %v2918_v50  ;;  %v2920_v13 = vrot.slane %v2918_v50, 4  ;;  %v2413_v44 = vsel %vm11119_vm11, %v2404_v21, %v2412_v19 }
 0x22c   : > { %v2926_v31 = vsel %vm11154_vm12, %v9237_v48, %v2925_v39  ;;  %v2927_v55 = vrot.slane %v2925_v39, 4  ;;  %v9238_v12 = vrot.slane %v2843_v27, 10  ;;  %v14821_v59 = vmax.bf16 %v11721_v33, %v11681_v58 }
 0x22d   : > { %v2922_v42 = vsel %vm11154_vm12, %v2920_v13, %v2921_v9  ;;  %v2932_v61 = vrot.slane %v11588_v16, 6  ;;  %v2935_v7 = vrot.slane %v11741_v11, 6  ;;  %v11786_v15 = vmax.bf16 %v2919_v8, %v2803_v6  ;;  %v11798_v11 = vld [vmem:[#allocation2 + $0x40] sm:$0xf] }
 0x22e   : > { %v2808_v30 = vmax.bf16 %v2413_v44, %v14821_v59  ;;  %v2929_v38 = vsel %vm11154_vm12, %v2927_v55, %v2928_v62  ;;  %v11788_v3 = vmax.bf16 %v2922_v42, %v2804_v0  ;;  %v11790_v52 = vmax.bf16 %v2926_v31, %v2805_v60  ;;  %v1978_v0 = vld [vmem:[#allocation2 + $0x3c] sm:$0xe] }
 0x22f   : > { %v2933_v58 = vsel %vm11154_vm12, %v9238_v12, %v2932_v61  ;;  %v2934_v33 = vrot.slane %v2932_v61, 4  ;;  %v11794_v54 = vmax.bf16 %v2929_v38, %v2806_v17  ;;  %v1015_v16 = vpack.c.bf16 %v11542_v23, %v11529_v36  ;;  %v2281_v61 = vld [vmem:[#allocation2 + $0x44] sm:$0x3] }
 0x230   : > { %v11800_v18 = vmax.bf16 %v2933_v58, %v2807_v2  ;;  %v3124_v6 = vmax.bf16 %v11786_v15, %v11206_v41  ;;  %v3125_v22 = vmax.bf16 %v11788_v3, %v11209_v45  ;;  %v3154_v20 = vmax.bf16 %v11232_v14, %v11786_v15 }
 0x231   : > { %v2936_v63 = vsel %vm11154_vm12, %v2934_v33, %v2935_v7  ;;  %v3155_v36 = vmax.bf16 %v11239_v32, %v11788_v3  ;;  %9718 = vmatprep.mubr.bf16.mxu1 %v1015_v16  ;;  %v1016_v23 = vpack.c.bf16 %v11534_v29, %v11504_v47  ;;  %v1534_v34 = vshrl.u32 %v1360_v28, 16 }
 0x232   : > { %v11814_v56 = vmax.bf16 %v2936_v63, %v2808_v30  ;;  %v3186_v60 = vmax.bf16 %v3154_v20, %v11790_v52  ;;  %v1537_v17 = vshll.u32 %v1360_v28, 16  ;;  %v1543_v14 = vshll.u32 %v11798_v11, 16  ;;  %v2844_v20 = vld [vmem:[#allocation2 + $0x3c] sm:$0xc] }
 0x233   : > { %v3187_v21 = vmax.bf16 %v3155_v36, %v11794_v54  ;;  %9719 = vmatmul.mubr.bf16.gmra.mrb[20].mxu1 %v1016_v23  ;;  %v1536_v27 = vrot.slane %v1534_v34, 4  ;;  %v1547_v37 = vshrl.u32 %v11798_v11, 16  ;;  %v1553_v50 = vshll.u32 %v1395_v53, 16 }
 0x234   : > { %v3218_v32 = vmax.bf16 %v3186_v60, %v11800_v18  ;;  %v1539_v9 = vrot.slane %v1537_v17, 5  ;;  %v1545_v25 = vrot.slane %v1543_v14, 5  ;;  %v9219_v47 = vrot.slane %v1978_v0, 9 }
 0x235   : > { %v3219_v29 = vmax.bf16 %v3187_v21, %v11814_v56  ;;  %v1549_v19 = vrot.slane %v1547_v37, 4  ;;  %v1555_v48 = vrot.slane %v1553_v50, 5  ;;  %v2093_v39 = vrot.slane %v11798_v11, 5 }
 0x236   : > { %v3781_v2 = vrot.slane %v3218_v32, 7  ;;  %v1540_v8 = vor.u32 %v1539_v9, %v1536_v27  ;;  %v2096_v13 = vrot.slane %v1395_v53, 5  ;;  %v2415_v62 = vshrl.u32 %v1978_v0, 16 }
 0x237   : > { %v9254_v44 = vcombine.low %v3218_v32, %v3219_v29  ;;  %v3783_v31 = vrot.slane %v3219_v29, 7  ;;  %v1550_v55 = vor.u32 %v1549_v19, %v1545_v25  ;;  %v2094_v12 = vsel %vm11057_vm7, %v9219_v47, %v2093_v39  ;;  %v1362_v29 = vld [vmem:[#allocation2 + $0x48] sm:$0xf] }
 0x238   : > { %v3782_v59 = vrot.slane %v3781_v2, 4  ;;  %3909 = vst [vmem:[#allocation2 + $0x18] sm:$0xe] %v3781_v2  ;;  %v1541_v30 = vrot.slane %v1540_v8, 4  ;;  %v2095_v42 = vrot.slane %v2093_v39, 4  ;;  %v2417_v7 = vrot.slane %v2415_v62, 5 }
 0x239   : > { %9650 = vmatprep.mubr.bf16.mxu0 %v9254_v44  ;;  %v3785_v38 = vrot.slane %v3783_v31, 4  ;;  %v1551_v58 = vrot.slane %v1550_v55, 4  ;;  %v2418_v33 = vshll.u32 %v1978_v0, 16  ;;  %v2423_v16 = vrot.slane %v1547_v37, 5  ;;  %v11835_v8 = vld [vmem:[#allocation2 + $0x4c] sm:$0xf] }
 0x23a   : > { %v3784_v53 = vsel %vm11257_vm15, %v3782_v59, %v3783_v31  ;;  %v1546_v63 = vsel %vm11030_vm4, %v1541_v30, %v1545_v25  ;;  %v2097_v36 = vsel %vm11057_vm7, %v2095_v42, %v2096_v13  ;;  %v2424_v23 = vrot.slane %v1543_v14, 6  ;;  %v1396_v42 = vld [vmem:[#allocation2 + $0x50] sm:$0x1] }
 0x23b   : > { %3910 = vst [vmem:[#allocation2 + $0x1c] sm:$0xf] %v3784_v53  ;;  %3911 = vst [vmem:[#allocation2 + $0x20] sm:$0x1] %v3785_v38  ;;  %v1556_v34 = vsel %vm11030_vm4, %v1551_v58, %v1555_v48  ;;  %v1943_v60 = vmax.bf16 %v1546_v63, %v1360_v28  ;;  %v2420_v17 = vrot.slane %v2418_v33, 6  ;;  %v2429_v0 = vshrl.u32 %v2281_v61, 16 }
 0x23c   : > { %v1944_v21 = vmax.bf16 %v1556_v34, %v11798_v11  ;;  %v2425_v27 = vor.u32 %v2424_v23, %v2423_v16  ;;  %v2432_v37 = vshll.u32 %v2281_v61, 16  ;;  %v9239_v50 = vrot.slane %v2844_v20, 10  ;;  %v10089_v20 = vld [vmem:[#allocation11 + $0xb0] sm:$0xff]   ;;  %v11857_v53 = vld [vmem:[#allocation11 + $0xc0] sm:$0xff]  }
 0x23d   : > { %v2246_v32 = vmax.bf16 %v2094_v12, %v1943_v60  ;;  %v2421_v9 = vor.u32 %v2420_v17, %v2417_v7  ;;  %v2431_v25 = vrot.slane %v2429_v0, 5  ;;  %v2939_v47 = vrot.slane %v11798_v11, 6  ;;  %9742 = vmatprep.subr.bf16.mxu1 %v10089_v20  ;;  %9778 = vmatprep.subr.bf16.mxu0 %v11857_v53 }
 0x23e   : > { %v2247_v14 = vmax.bf16 %v2097_v36, %v1944_v21  ;;  %v2427_v19 = vrot.slane %v2425_v27, 4  ;;  %v2434_v39 = vrot.slane %v2432_v37, 6  ;;  %v2942_v2 = vrot.slane %v2281_v61, 6  ;;  %9743 = vmatpush3.bf16.msra.mxu1 %v10089_v20 }
 0x23f   : > { %v2422_v28 = vrot.slane %v2421_v9, 4  ;;  %v2940_v48 = vsel %vm11154_vm12, %v9239_v50, %v2939_v47  ;;  %v2941_v13 = vrot.slane %v2939_v47, 4  ;;  %v3156_v62 = vmax.bf16 %v3124_v6, %v11790_v52  ;;  %v1979_v6 = vld [vmem:[#allocation2 + $0x48] sm:$0xe] }
 0x240   : > { %v2435_v44 = vor.u32 %v2434_v39, %v2431_v25  ;;  %v3157_v11 = vmax.bf16 %v3125_v22, %v11794_v54  ;;  %v1558_v31 = vshrl.u32 %v1362_v29, 16  ;;  %v1561_v55 = vshll.u32 %v1362_v29, 16 }
 0x241   : > { %v2426_v12 = vsel %vm11119_vm11, %v2422_v28, %v2425_v27  ;;  %v2943_v59 = vsel %vm11154_vm12, %v2941_v13, %v2942_v2  ;;  %v3188_v30 = vmax.bf16 %v3156_v62, %v11800_v18  ;;  %v1567_v41 = vshll.u32 %v11835_v8, 16  ;;  %v2282_v2 = vld [vmem:[#allocation2 + $0x50] sm:$0x3] }
 0x242   : > { %v2436_v61 = vsel %vm11119_vm11, %v2427_v19, %v2435_v44  ;;  %v2809_v7 = vmax.bf16 %v2426_v12, %v2246_v32  ;;  %v3189_v45 = vmax.bf16 %v3157_v11, %v11814_v56  ;;  %v1560_v22 = vrot.slane %v1558_v31, 4 }
 0x243   : > { %v2810_v38 = vmax.bf16 %v2436_v61, %v2247_v14  ;;  %v1563_v58 = vrot.slane %v1561_v55, 5  ;;  %v1569_v33 = vrot.slane %v1567_v41, 5  ;;  %v1571_v16 = vshrl.u32 %v11835_v8, 16 }
 0x244   : > { %v11859_v63 = vmax.bf16 %v2940_v48, %v2809_v7  ;;  %v1577_v36 = vshll.u32 %v1396_v42, 16  ;;  %v9220_v23 = vrot.slane %v1979_v6, 9  ;;  %v2100_v34 = vrot.slane %v11835_v8, 5 }
 0x245   : > { %v11862_v60 = vmax.bf16 %v2943_v59, %v2810_v38  ;;  %v1564_v17 = vor.u32 %v1563_v58, %v1560_v22  ;;  %v1573_v0 = vrot.slane %v1571_v16, 4  ;;  %v2103_v21 = vrot.slane %v1396_v42, 5 }
 0x246   : > { %v3220_v27 = vmax.bf16 %v3188_v30, %v11859_v63  ;;  %v1579_v37 = vrot.slane %v1577_v36, 5  ;;  %v2101_v50 = vsel %vm11057_vm7, %v9220_v23, %v2100_v34  ;;  %v2102_v32 = vrot.slane %v2100_v34, 4  ;;  %v2845_v30 = vld [vmem:[#allocation2 + $0x48] sm:$0xc] }
 0x247   : > { %v3221_v9 = vmax.bf16 %v3189_v45, %v11862_v60  ;;  %v1565_v25 = vrot.slane %v1564_v17, 4  ;;  %v1574_v47 = vor.u32 %v1573_v0, %v1569_v33  ;;  %v2438_v14 = vshrl.u32 %v1979_v6, 16 }
 0x248   : > { %v3786_v19 = vrot.slane %v3220_v27, 7  ;;  %v2104_v39 = vsel %vm11057_vm7, %v2102_v32, %v2103_v21  ;;  %v2441_v28 = vshll.u32 %v1979_v6, 16  ;;  %v2446_v48 = vrot.slane %v1571_v16, 5 }
 0x249   : > { %v9255_v13 = vcombine.low %v3220_v27, %v3221_v9  ;;  %v3788_v62 = vrot.slane %v3221_v9, 7  ;;  %v1570_v44 = vsel %vm11030_vm4, %v1565_v25, %v1569_v33  ;;  %v1575_v11 = vrot.slane %v1574_v47, 4 }
 0x24a   : > { %v3787_v31 = vrot.slane %v3786_v19, 4  ;;  %3912 = vst [vmem:[#allocation2 + $0x24] sm:$0xe] %v3786_v19  ;;  %v1945_v55 = vmax.bf16 %v1570_v44, %v1362_v29  ;;  %v2440_v12 = vrot.slane %v2438_v14, 5  ;;  %v2443_v59 = vrot.slane %v2441_v28, 6 }
 0x24b   : > { %9651 = vmatmul.mubr.bf16.vlgmr.msra.gmra.mrb[32].mxu0 %v9255_v13  ;;  %v3790_v42 = vrot.slane %v3788_v62, 4  ;;  %v1580_v61 = vsel %vm11030_vm4, %v1575_v11, %v1579_v37  ;;  %v2447_v7 = vrot.slane %v1567_v41, 6  ;;  %v2452_v6 = vshrl.u32 %v2282_v2, 16  ;;  %v1364_v37 = vld [vmem:[#allocation2 + $0x54] sm:$0xf] }
 0x24c   : > { %v3789_v45 = vsel %vm11257_vm15, %v3787_v31, %v3788_v62  ;;  %v1946_v22 = vmax.bf16 %v1580_v61, %v11835_v8  ;;  %v2248_v38 = vmax.bf16 %v2101_v50, %v1945_v55  ;;  %v2444_v58 = vor.u32 %v2443_v59, %v2440_v12  ;;  %9779 = vmatpush3.bf16.msra.mxu0 %v11857_v53  ;;  %v11892_v19 = vld [vmem:[#allocation2 + $0x58] sm:$0xf]  ;;  %v1980_v13 = vld [vmem:[#allocation2 + $0x54] sm:$0xe] }
 0x24d   : > { %3913 = vst [vmem:[#allocation2 + $0x28] sm:$0xf] %v3789_v45  ;;  %3914 = vst [vmem:[#allocation2 + $0x2c] sm:$0x1] %v3790_v42  ;;  %v2448_v29 = vor.u32 %v2447_v7, %v2446_v48  ;;  %v2454_v33 = vrot.slane %v2452_v6, 5  ;;  %v2455_v16 = vshll.u32 %v2282_v2, 16  ;;  %v3126_v21 = vmax.bf16 %v11790_v52, %v11786_v15 }
 0x24e   : > { %v9240_v20 = vrot.slane %v2845_v30, 10  ;;  %v2249_v36 = vmax.bf16 %v2104_v39, %v1946_v22  ;;  %v2445_v23 = vrot.slane %v2444_v58, 4  ;;  %v2946_v41 = vrot.slane %v11835_v8, 6 }
 0x24f   : > { %v2949_v34 = vrot.slane %v2282_v2, 6  ;;  %v2450_v17 = vrot.slane %v2448_v29, 4  ;;  %v2457_v0 = vrot.slane %v2455_v16, 6  ;;  %v3127_v27 = vmax.bf16 %v11794_v54, %v11788_v3  ;;  %v1397_v2 = vld [vmem:[#allocation2 + $0x5c] sm:$0x1] }
 0x250   : > { %v2449_v50 = vsel %vm11119_vm11, %v2445_v23, %v2448_v29  ;;  %v2947_v32 = vsel %vm11154_vm12, %v9240_v20, %v2946_v41  ;;  %v2948_v9 = vrot.slane %v2946_v41, 4  ;;  %v1017_v8 = vpack.c.bf16 %v11595_v43, %v11575_v57 }
 0x251   : > { %v2458_v25 = vor.u32 %v2457_v0, %v2454_v33  ;;  %v2811_v47 = vmax.bf16 %v2449_v50, %v2248_v38  ;;  %v3158_v14 = vmax.bf16 %v3126_v21, %v11800_v18  ;;  %v3159_v15 = vmax.bf16 %v3127_v27, %v11814_v56 }
 0x252   : > { %v2950_v3 = vsel %vm11154_vm12, %v2948_v9, %v2949_v34  ;;  %9722 = vmatprep.mubr.bf16.mxu1 %v1017_v8  ;;  %v1018_v39 = vpack.c.bf16 %v11586_v5, %v11572_v1  ;;  %v1582_v28 = vshrl.u32 %v1364_v37, 16  ;;  %v1585_v48 = vshll.u32 %v1364_v37, 16  ;;  %v10091_v1 = vld [vmem:[#allocation11 + $0xb8] sm:$0xff]  }
 0x253   : > { %v2459_v57 = vsel %vm11119_vm11, %v2450_v17, %v2458_v25  ;;  %v11900_v43 = vmax.bf16 %v2947_v32, %v2811_v47  ;;  %v3190_v62 = vmax.bf16 %v3158_v14, %v11859_v63  ;;  %v3191_v44 = vmax.bf16 %v3159_v15, %v11862_v60  ;;  %9744 = vmatprep.subr.bf16.mxu1 %v10091_v1  ;;  %v2283_v32 = vld [vmem:[#allocation2 + $0x5c] sm:$0x3]  ;;  %v2846_v14 = vld [vmem:[#allocation2 + $0x54] sm:$0xc] }
 0x254   : > { %v2812_v11 = vmax.bf16 %v2459_v57, %v2249_v36  ;;  %9723 = vmatmul.mubr.bf16.gmra.mrb[24].mxu1 %v1018_v39  ;;  %v1584_v31 = vrot.slane %v1582_v28, 4  ;;  %v1587_v55 = vrot.slane %v1585_v48, 5  ;;  %v1591_v12 = vshll.u32 %v11892_v19, 16 }
 0x255   : > { %v3222_v5 = vmax.bf16 %v3190_v62, %v11900_v43  ;;  %v1595_v59 = vshrl.u32 %v11892_v19, 16  ;;  %v1601_v30 = vshll.u32 %v1397_v2, 16  ;;  %v9221_v42 = vrot.slane %v1980_v13, 9  ;;  %9745 = vmatpush3.bf16.msra.mxu1 %v10091_v1 }
 0x256   : > { %v11907_v61 = vmax.bf16 %v2950_v3, %v2812_v11  ;;  %v1588_v7 = vor.u32 %v1587_v55, %v1584_v31  ;;  %v1593_v6 = vrot.slane %v1591_v12, 5  ;;  %v2107_v45 = vrot.slane %v11892_v19, 5  ;;  %9826 = vmatprep.subr.bf16.mxu1 %v11857_v53 }
 0x257   : > { %v3791_v22 = vrot.slane %v3222_v5, 7  ;;  %v1597_v38 = vrot.slane %v1595_v59, 4  ;;  %v1603_v58 = vrot.slane %v1601_v30, 5  ;;  %v2110_v29 = vrot.slane %v1397_v2, 5 }
 0x258   : > { %v3223_v33 = vmax.bf16 %v3191_v44, %v11907_v61  ;;  %v1589_v16 = vrot.slane %v1588_v7, 4  ;;  %v2108_v20 = vsel %vm11057_vm7, %v9221_v42, %v2107_v45  ;;  %v2109_v36 = vrot.slane %v2107_v45, 4  ;;  %v11926_v7 = vld [vmem:[#allocation2 + $0x64] sm:$0xf] }
 0x259   : > { %v3792_v23 = vrot.slane %v3791_v22, 4  ;;  %3915 = vst [vmem:[#allocation2 + $0x30] sm:$0xe] %v3791_v22  ;;  %v1598_v41 = vor.u32 %v1597_v38, %v1593_v6  ;;  %v2461_v34 = vshrl.u32 %v1980_v13, 16  ;;  %v2464_v17 = vshll.u32 %v1980_v13, 16 }
 0x25a   : > { %v9256_v0 = vcombine.low %v3222_v5, %v3223_v33  ;;  %v3793_v21 = vrot.slane %v3223_v33, 7  ;;  %v1594_v27 = vsel %vm11030_vm4, %v1589_v16, %v1593_v6  ;;  %v2111_v50 = vsel %vm11057_vm7, %v2109_v36, %v2110_v29  ;;  %v1366_v5 = vld [vmem:[#allocation2 + $0x60] sm:$0xf] }
 0x25b   : > { %v1599_v9 = vrot.slane %v1598_v41, 4  ;;  %v1947_v8 = vmax.bf16 %v1594_v27, %v1364_v37  ;;  %v2463_v25 = vrot.slane %v2461_v34, 5  ;;  %v2466_v47 = vrot.slane %v2464_v17, 6  ;;  %v1981_v41 = vld [vmem:[#allocation2 + $0x60] sm:$0xe] }
 0x25c   : > { %9654 = vmatprep.mubr.bf16.mxu0 %v9256_v0  ;;  %v3794_v53 = vsel %vm11257_vm15, %v3792_v23, %v3793_v21  ;;  %v3795_v15 = vrot.slane %v3793_v21, 4  ;;  %v2469_v3 = vrot.slane %v1595_v59, 5  ;;  %v2470_v39 = vrot.slane %v1591_v12, 6 }
 0x25d   : > { %3916 = vst [vmem:[#allocation2 + $0x34] sm:$0xf] %v3794_v53  ;;  %v1604_v2 = vsel %vm11030_vm4, %v1599_v9, %v1603_v58  ;;  %v2250_v28 = vmax.bf16 %v2108_v20, %v1947_v8  ;;  %v2467_v48 = vor.u32 %v2466_v47, %v2463_v25  ;;  %v2475_v13 = vshrl.u32 %v2283_v32, 16  ;;  %v1398_v20 = vld [vmem:[#allocation2 + $0x68] sm:$0x1] }
 0x25e   : > { %3917 = vst [vmem:[#allocation2 + $0x38] sm:$0x1] %v3795_v15  ;;  %v1948_v37 = vmax.bf16 %v1604_v2, %v11892_v19  ;;  %v2471_v57 = vor.u32 %v2470_v39, %v2469_v3  ;;  %v2478_v62 = vshll.u32 %v2283_v32, 16  ;;  %v9241_v44 = vrot.slane %v2846_v14, 10 }
 0x25f   : > { %v2468_v11 = vrot.slane %v2467_v48, 4  ;;  %v2477_v31 = vrot.slane %v2475_v13, 5  ;;  %v2953_v55 = vrot.slane %v11892_v19, 6  ;;  %v2956_v1 = vrot.slane %v2283_v32, 6 }
 0x260   : > { %v2251_v12 = vmax.bf16 %v2111_v50, %v1948_v37  ;;  %v2473_v59 = vrot.slane %v2471_v57, 4  ;;  %v2480_v30 = vrot.slane %v2478_v62, 6  ;;  %v3128_v42 = vmax.bf16 %v11800_v18, %v11790_v52 }
 0x261   : > { %v2472_v6 = vsel %vm11119_vm11, %v2468_v11, %v2471_v57  ;;  %v2954_v45 = vsel %vm11154_vm12, %v9241_v44, %v2953_v55  ;;  %v2955_v22 = vrot.slane %v2953_v55, 4  ;;  %v3129_v19 = vmax.bf16 %v11814_v56, %v11794_v54 }
 0x262   : > { %v2481_v38 = vor.u32 %v2480_v30, %v2477_v31  ;;  %v2813_v58 = vmax.bf16 %v2472_v6, %v2250_v28  ;;  %v3160_v29 = vmax.bf16 %v3128_v42, %v11859_v63  ;;  %v1606_v33 = vshrl.u32 %v1366_v5, 16  ;;  %v2284_v31 = vld [vmem:[#allocation2 + $0x68] sm:$0x3] }
 0x263   : > { %v2957_v52 = vsel %vm11154_vm12, %v2955_v22, %v2956_v1  ;;  %v3161_v16 = vmax.bf16 %v3129_v19, %v11862_v60  ;;  %v1609_v36 = vshll.u32 %v1366_v5, 16  ;;  %v1615_v23 = vshll.u32 %v11926_v7, 16 }
 0x264   : > { %v2482_v34 = vsel %vm11119_vm11, %v2473_v59, %v2481_v38  ;;  %v11941_v17 = vmax.bf16 %v2954_v45, %v2813_v58  ;;  %v3192_v54 = vmax.bf16 %v3160_v29, %v11900_v43  ;;  %v1608_v0 = vrot.slane %v1606_v33, 4  ;;  %v2847_v38 = vld [vmem:[#allocation2 + $0x60] sm:$0xc] }
 0x265   : > { %v2814_v21 = vmax.bf16 %v2482_v34, %v2251_v12  ;;  %v3193_v27 = vmax.bf16 %v3161_v16, %v11907_v61  ;;  %v1611_v50 = vrot.slane %v1609_v36, 5  ;;  %v1617_v32 = vrot.slane %v1615_v23, 5 }
 0x266   : > { %v3224_v9 = vmax.bf16 %v3192_v54, %v11941_v17  ;;  %v1619_v8 = vshrl.u32 %v11926_v7, 16  ;;  %v1625_v25 = vshll.u32 %v1398_v20, 16  ;;  %v9222_v47 = vrot.slane %v1981_v41, 9 }
 0x267   : > { %v11947_v14 = vmax.bf16 %v2957_v52, %v2814_v21  ;;  %v1612_v53 = vor.u32 %v1611_v50, %v1608_v0  ;;  %v2114_v15 = vrot.slane %v11926_v7, 5  ;;  %v2117_v3 = vrot.slane %v1398_v20, 5 }
 0x268   : > { %v3796_v39 = vrot.slane %v3224_v9, 7  ;;  %v1621_v2 = vrot.slane %v1619_v8, 4  ;;  %v1627_v28 = vrot.slane %v1625_v25, 5  ;;  %v2484_v48 = vshrl.u32 %v1981_v41, 16 }
 0x269   : > { %v3225_v13 = vmax.bf16 %v3193_v27, %v11947_v14  ;;  %v1613_v37 = vrot.slane %v1612_v53, 4  ;;  %v2115_v57 = vsel %vm11057_vm7, %v9222_v47, %v2114_v15  ;;  %v2116_v62 = vrot.slane %v2114_v15, 4  ;;  %v11967_v47 = vld [vmem:[#allocation2 + $0x6c] sm:$0xf] }
 0x26a   : > { %v3797_v44 = vrot.slane %v3796_v39, 4  ;;  %3918 = vst [vmem:[#allocation2 + $0x3c] sm:$0xe] %v3796_v39  ;;  %v1622_v11 = vor.u32 %v1621_v2, %v1617_v32  ;;  %v2486_v55 = vrot.slane %v2484_v48, 5  ;;  %v2487_v1 = vshll.u32 %v1981_v41, 16 }
 0x26b   : > { %v9257_v12 = vcombine.low %v3224_v9, %v3225_v13  ;;  %v3798_v59 = vrot.slane %v3225_v13, 7  ;;  %v1618_v30 = vsel %vm11030_vm4, %v1613_v37, %v1617_v32  ;;  %v2118_v42 = vsel %vm11057_vm7, %v2116_v62, %v2117_v3  ;;  %v11977_v48 = vld [vmem:[#allocation2 + $0x70] sm:$0xf] }
 0x26c   : > { %v1623_v6 = vrot.slane %v1622_v11, 4  ;;  %v1949_v45 = vmax.bf16 %v1618_v30, %v1366_v5  ;;  %v2489_v22 = vrot.slane %v2487_v1, 6  ;;  %v2492_v19 = vrot.slane %v1619_v8, 5 }
 0x26d   : > { %9655 = vmatmul.mubr.bf16.gmra.mrb[36].mxu0 %v9257_v12  ;;  %v3799_v58 = vsel %vm11257_vm15, %v3797_v44, %v3798_v59  ;;  %v3800_v29 = vrot.slane %v3798_v59, 4  ;;  %v2493_v33 = vrot.slane %v1615_v23, 6  ;;  %v2498_v52 = vshrl.u32 %v2284_v31, 16  ;;  %v1982_v44 = vld [vmem:[#allocation2 + $0x6c] sm:$0xe] }
 0x26e   : > { %3919 = vst [vmem:[#allocation2 + $0x40] sm:$0xf] %v3799_v58  ;;  %v1628_v16 = vsel %vm11030_vm4, %v1623_v6, %v1627_v28  ;;  %v2252_v20 = vmax.bf16 %v2115_v57, %v1949_v45  ;;  %v2490_v36 = vor.u32 %v2489_v22, %v2486_v55  ;;  %v2501_v41 = vshll.u32 %v2284_v31, 16  ;;  %v1399_v57 = vld [vmem:[#allocation2 + $0x74] sm:$0x1] }
 0x26f   : > { %3920 = vst [vmem:[#allocation2 + $0x44] sm:$0x1] %v3800_v29  ;;  %v1950_v5 = vmax.bf16 %v1628_v16, %v11926_v7  ;;  %v2494_v34 = vor.u32 %v2493_v33, %v2492_v19  ;;  %v2500_v54 = vrot.slane %v2498_v52, 5  ;;  %v9242_v0 = vrot.slane %v2847_v38, 10 }
 0x270   : > { %v2491_v21 = vrot.slane %v2490_v36, 4  ;;  %v2503_v27 = vrot.slane %v2501_v41, 6  ;;  %v2960_v50 = vrot.slane %v11926_v7, 6  ;;  %v2963_v32 = vrot.slane %v2284_v31, 6 }
 0x271   : > { %v2253_v23 = vmax.bf16 %v2118_v42, %v1950_v5  ;;  %v2496_v9 = vrot.slane %v2494_v34, 4  ;;  %v3130_v8 = vmax.bf16 %v11859_v63, %v11800_v18  ;;  %v3131_v25 = vmax.bf16 %v11862_v60, %v11814_v56 }
 0x272   : > { %v2495_v53 = vsel %vm11119_vm11, %v2491_v21, %v2494_v34  ;;  %v2504_v15 = vor.u32 %v2503_v27, %v2500_v54  ;;  %v2961_v3 = vsel %vm11154_vm12, %v9242_v0, %v2960_v50  ;;  %v2962_v39 = vrot.slane %v2960_v50, 4  ;;  %v2285_v50 = vld [vmem:[#allocation2 + $0x74] sm:$0x3] }
 0x273   : > { %v2815_v7 = vmax.bf16 %v2495_v53, %v2252_v20  ;;  %v3162_v2 = vmax.bf16 %v3130_v8, %v11900_v43  ;;  %v3163_v28 = vmax.bf16 %v3131_v25, %v11907_v61  ;;  %v1019_v18 = vpack.c.bf16 %v11634_v49, %v11618_v40  ;;  %v2848_v53 = vld [vmem:[#allocation2 + $0x6c] sm:$0xc] }
 0x274   : > { %v2505_v56 = vsel %vm11119_vm11, %v2496_v9, %v2504_v15  ;;  %v2964_v13 = vsel %vm11154_vm12, %v2962_v39, %v2963_v32  ;;  %v1020_v37 = vpack.c.bf16 %v11625_v10, %v11611_v35  ;;  %v1630_v62 = vshrl.u32 %v11967_v47, 16 }
 0x275   : > { %v2816_v11 = vmax.bf16 %v2505_v56, %v2253_v23  ;;  %v11986_v31 = vmax.bf16 %v2961_v3, %v2815_v7  ;;  %v3194_v40 = vmax.bf16 %v3162_v2, %v11941_v17  ;;  %v3195_v49 = vmax.bf16 %v3163_v28, %v11947_v14  ;;  %9726 = vmatprep.mubr.bf16.mxu1 %v1019_v18 }
 0x276   : > { %9727 = vmatmul.mubr.bf16.gmra.mrb[28].mxu1 %v1020_v37  ;;  %v1632_v55 = vrot.slane %v1630_v62, 4  ;;  %v1633_v1 = vshll.u32 %v11967_v47, 16  ;;  %v1639_v12 = vshll.u32 %v11977_v48, 16  ;;  %v1643_v35 = vshrl.u32 %v11977_v48, 16 }
 0x277   : > { %v11993_v10 = vmax.bf16 %v2964_v13, %v2816_v11  ;;  %v3226_v59 = vmax.bf16 %v3194_v40, %v11986_v31  ;;  %v1649_v30 = vshll.u32 %v1399_v57, 16  ;;  %v9223_v42 = vrot.slane %v1982_v44, 9 }
 0x278   : > { %v1635_v6 = vrot.slane %v1633_v1, 5  ;;  %v1641_v45 = vrot.slane %v1639_v12, 5  ;;  %v1645_v22 = vrot.slane %v1643_v35, 4  ;;  %v2121_v19 = vrot.slane %v11977_v48, 5  ;;  %v12011_v1 = vld [vmem:[#allocation2 + $0x7c] sm:$0xf] }
 0x279   : > { %v3227_v38 = vmax.bf16 %v3195_v49, %v11993_v10  ;;  %v3801_v58 = vrot.slane %v3226_v59, 7  ;;  %v1651_v29 = vrot.slane %v1649_v30, 5  ;;  %v2124_v33 = vrot.slane %v1399_v57, 5 }
 0x27a   : > { %v1636_v52 = vor.u32 %v1635_v6, %v1632_v55  ;;  %v1646_v16 = vor.u32 %v1645_v22, %v1641_v45  ;;  %v2122_v20 = vsel %vm11057_vm7, %v9223_v42, %v2121_v19  ;;  %v2123_v36 = vrot.slane %v2121_v19, 4  ;;  %v1370_v55 = vld [vmem:[#allocation2 + $0x78] sm:$0xf] }
 0x27b   : > { %v9258_v41 = vcombine.low %v3226_v59, %v3227_v38  ;;  %v3802_v5 = vrot.slane %v3801_v58, 4  ;;  %v3803_v34 = vrot.slane %v3227_v38, 7  ;;  %3921 = vst [vmem:[#allocation2 + $0x48] sm:$0xe] %v3801_v58  ;;  %v2507_v54 = vshrl.u32 %v1982_v44, 16 }
 0x27c   : > { %v1637_v0 = vrot.slane %v1636_v52, 4  ;;  %v1647_v21 = vrot.slane %v1646_v16, 4  ;;  %v2125_v27 = vsel %vm11057_vm7, %v2123_v36, %v2124_v33  ;;  %v2510_v32 = vshll.u32 %v1982_v44, 16 }
 0x27d   : > { %9658 = vmatprep.mubr.bf16.mxu0 %v9258_v41  ;;  %v3804_v23 = vsel %vm11257_vm15, %v3802_v5, %v3803_v34  ;;  %v3805_v9 = vrot.slane %v3803_v34, 4  ;;  %v2509_v8 = vrot.slane %v2507_v54, 5  ;;  %v2515_v25 = vrot.slane %v1643_v35, 5  ;;  %v1983_v41 = vld [vmem:[#allocation2 + $0x78] sm:$0xe] }
 0x27e   : > { %3922 = vst [vmem:[#allocation2 + $0x4c] sm:$0xf] %v3804_v23  ;;  %v1642_v15 = vsel %vm11030_vm4, %v1637_v0, %v1641_v45  ;;  %v1652_v3 = vsel %vm11030_vm4, %v1647_v21, %v1651_v29  ;;  %v2512_v39 = vrot.slane %v2510_v32, 6  ;;  %v2516_v7 = vrot.slane %v1639_v12, 6 }
 0x27f   : > { %3923 = vst [vmem:[#allocation2 + $0x50] sm:$0x1] %v3805_v9  ;;  %v1951_v2 = vmax.bf16 %v1642_v15, %v11967_v47  ;;  %v1952_v28 = vmax.bf16 %v1652_v3, %v11977_v48  ;;  %v2521_v18 = vshrl.u32 %v2285_v50, 16  ;;  %v2524_v56 = vshll.u32 %v2285_v50, 16 }
 0x280   : > { %v2513_v13 = vor.u32 %v2512_v39, %v2509_v8  ;;  %v2517_v37 = vor.u32 %v2516_v7, %v2515_v25  ;;  %v9243_v57 = vrot.slane %v2848_v53, 10  ;;  %v2967_v62 = vrot.slane %v11977_v48, 6 }
 0x281   : > { %v2254_v44 = vmax.bf16 %v2122_v20, %v1951_v2  ;;  %v2255_v11 = vmax.bf16 %v2125_v27, %v1952_v28  ;;  %v2523_v40 = vrot.slane %v2521_v18, 5  ;;  %v2526_v49 = vrot.slane %v2524_v56, 6 }
 0x282   : > { %v2514_v12 = vrot.slane %v2513_v13, 4  ;;  %v2519_v35 = vrot.slane %v2517_v37, 4  ;;  %v2968_v47 = vsel %vm11154_vm12, %v9243_v57, %v2967_v62  ;;  %v2969_v59 = vrot.slane %v2967_v62, 4 }
 0x283   : > { %v2527_v30 = vor.u32 %v2526_v49, %v2523_v40  ;;  %v2970_v42 = vrot.slane %v2285_v50, 6  ;;  %v3132_v6 = vmax.bf16 %v11900_v43, %v11859_v63  ;;  %v3133_v48 = vmax.bf16 %v11907_v61, %v11862_v60  ;;  %v1400_v63 = vld [vmem:[#allocation2 + $0x80] sm:$0x1] }
 0x284   : > { %v2518_v45 = vsel %vm11119_vm11, %v2514_v12, %v2517_v37  ;;  %v1654_v22 = vshrl.u32 %v1370_v55, 16  ;;  %v1657_v19 = vshll.u32 %v1370_v55, 16  ;;  %v1663_v38 = vshll.u32 %v12011_v1, 16  ;;  %v2286_v49 = vld [vmem:[#allocation2 + $0x80] sm:$0x3] }
 0x285   : > { %v2528_v58 = vsel %vm11119_vm11, %v2519_v35, %v2527_v30  ;;  %v2817_v29 = vmax.bf16 %v2518_v45, %v2254_v44  ;;  %v2971_v33 = vsel %vm11154_vm12, %v2969_v59, %v2970_v42  ;;  %v3164_v52 = vmax.bf16 %v3132_v6, %v11941_v17  ;;  %v2849_v30 = vld [vmem:[#allocation2 + $0x78] sm:$0xc] }
 0x286   : > { %v2818_v16 = vmax.bf16 %v2528_v58, %v2255_v11  ;;  %v3165_v60 = vmax.bf16 %v3133_v48, %v11947_v14  ;;  %v1656_v20 = vrot.slane %v1654_v22, 4  ;;  %v1659_v36 = vrot.slane %v1657_v19, 5 }
 0x287   : > { %v12028_v5 = vmax.bf16 %v2968_v47, %v2817_v29  ;;  %v3196_v34 = vmax.bf16 %v3164_v52, %v11986_v31  ;;  %v1665_v54 = vrot.slane %v1663_v38, 5  ;;  %v1667_v0 = vshrl.u32 %v12011_v1, 16 }
 0x288   : > { %v12032_v21 = vmax.bf16 %v2971_v33, %v2818_v16  ;;  %v3197_v27 = vmax.bf16 %v3165_v60, %v11993_v10  ;;  %v1660_v50 = vor.u32 %v1659_v36, %v1656_v20  ;;  %v1673_v32 = vshll.u32 %v1400_v63, 16  ;;  %v1372_v16 = vld [vmem:[#allocation2 + $0x84] sm:$0xf] }
 0x289   : > { %v3228_v23 = vmax.bf16 %v3196_v34, %v12028_v5  ;;  %v1669_v9 = vrot.slane %v1667_v0, 4  ;;  %v9224_v8 = vrot.slane %v1983_v41, 9  ;;  %v2128_v25 = vrot.slane %v12011_v1, 5  ;;  %v12050_v34 = vld [vmem:[#allocation2 + $0x88] sm:$0xf] }
 0x28a   : > { %v3229_v53 = vmax.bf16 %v3197_v27, %v12032_v21  ;;  %v1661_v15 = vrot.slane %v1660_v50, 4  ;;  %v1675_v3 = vrot.slane %v1673_v32, 5  ;;  %v2131_v39 = vrot.slane %v1400_v63, 5 }
 0x28b   : > { %v3806_v7 = vrot.slane %v3228_v23, 7  ;;  %v1670_v2 = vor.u32 %v1669_v9, %v1665_v54  ;;  %v2129_v28 = vsel %vm11057_vm7, %v9224_v8, %v2128_v25  ;;  %v2130_v18 = vrot.slane %v2128_v25, 4  ;;  %v1401_v25 = vld [vmem:[#allocation2 + $0x8c] sm:$0x1] }
 0x28c   : > { %v9259_v56 = vcombine.low %v3228_v23, %v3229_v53  ;;  %v3808_v13 = vrot.slane %v3229_v53, 7  ;;  %v1666_v37 = vsel %vm11030_vm4, %v1661_v15, %v1665_v54  ;;  %v2530_v57 = vshrl.u32 %v1983_v41, 16 }
 0x28d   : > { %v3807_v62 = vrot.slane %v3806_v7, 4  ;;  %3924 = vst [vmem:[#allocation2 + $0x54] sm:$0xe] %v3806_v7  ;;  %v1671_v44 = vrot.slane %v1670_v2, 4  ;;  %v1953_v11 = vmax.bf16 %v1666_v37, %v1370_v55  ;;  %v2132_v40 = vsel %vm11057_vm7, %v2130_v18, %v2131_v39 }
 0x28e   : > { %9659 = vmatmul.mubr.bf16.gmra.mrb[40].mxu0 %v9259_v56  ;;  %v3810_v12 = vrot.slane %v3808_v13, 4  ;;  %v2532_v35 = vrot.slane %v2530_v57, 5  ;;  %v2533_v47 = vshll.u32 %v1983_v41, 16  ;;  %v2538_v59 = vrot.slane %v1667_v0, 5 }
 0x28f   : > { %v3809_v42 = vsel %vm11257_vm15, %v3807_v62, %v3808_v13  ;;  %v1676_v6 = vsel %vm11030_vm4, %v1671_v44, %v1675_v3  ;;  %v2256_v48 = vmax.bf16 %v2129_v28, %v1953_v11  ;;  %v2539_v45 = vrot.slane %v1663_v38, 6 }
 0x290   : > { %3925 = vst [vmem:[#allocation2 + $0x58] sm:$0xf] %v3809_v42  ;;  %3926 = vst [vmem:[#allocation2 + $0x5c] sm:$0x1] %v3810_v12  ;;  %v1954_v55 = vmax.bf16 %v1676_v6, %v12011_v1  ;;  %v2535_v22 = vrot.slane %v2533_v47, 6  ;;  %v2544_v19 = vshrl.u32 %v2286_v49, 16  ;;  %v3134_v27 = vmax.bf16 %v11941_v17, %v11900_v43 }
 0x291   : > { %v2547_v58 = vshll.u32 %v2286_v49, 16  ;;  %v2540_v29 = vor.u32 %v2539_v45, %v2538_v59  ;;  %v9244_v33 = vrot.slane %v2849_v30, 10  ;;  %v2974_v52 = vrot.slane %v12011_v1, 6 }
 0x292   : > { %v2977_v63 = vrot.slane %v2286_v49, 6  ;;  %v2257_v60 = vmax.bf16 %v2132_v40, %v1954_v55  ;;  %v2536_v20 = vor.u32 %v2535_v22, %v2532_v35  ;;  %v2546_v36 = vrot.slane %v2544_v19, 5 }
 0x293   : > { %v2549_v41 = vrot.slane %v2547_v58, 6  ;;  %v2542_v38 = vrot.slane %v2540_v29, 4  ;;  %v2975_v54 = vsel %vm11154_vm12, %v9244_v33, %v2974_v52  ;;  %v2976_v0 = vrot.slane %v2974_v52, 4 }
 0x294   : > { %v2537_v50 = vrot.slane %v2536_v20, 4  ;;  %v3135_v1 = vmax.bf16 %v11947_v14, %v11907_v61  ;;  %v1678_v23 = vshrl.u32 %v1372_v16, 16  ;;  %v3166_v8 = vmax.bf16 %v3134_v27, %v11986_v31  ;;  %v1984_v61 = vld [vmem:[#allocation2 + $0x84] sm:$0xe] }
 0x295   : > { %v2550_v32 = vor.u32 %v2549_v41, %v2546_v36  ;;  %v2978_v9 = vsel %vm11154_vm12, %v2976_v0, %v2977_v63  ;;  %v1681_v53 = vshll.u32 %v1372_v16, 16  ;;  %v1687_v15 = vshll.u32 %v12050_v34, 16  ;;  %v2287_v63 = vld [vmem:[#allocation2 + $0x8c] sm:$0x3] }
 0x296   : > { %v2541_v3 = vsel %vm11119_vm11, %v2537_v50, %v2540_v29  ;;  %v3167_v39 = vmax.bf16 %v3135_v1, %v11993_v10  ;;  %v1680_v7 = vrot.slane %v1678_v23, 4  ;;  %v3198_v18 = vmax.bf16 %v3166_v8, %v12028_v5  ;;  %v2850_v50 = vld [vmem:[#allocation2 + $0x84] sm:$0xc] }
 0x297   : > { %v2551_v43 = vsel %vm11119_vm11, %v2542_v38, %v2550_v32  ;;  %v2819_v2 = vmax.bf16 %v2541_v3, %v2256_v48  ;;  %v1683_v56 = vrot.slane %v1681_v53, 5  ;;  %v1689_v37 = vrot.slane %v1687_v15, 5 }
 0x298   : > { %v2820_v28 = vmax.bf16 %v2551_v43, %v2257_v60  ;;  %v3199_v13 = vmax.bf16 %v3167_v39, %v12032_v21  ;;  %v1691_v57 = vshrl.u32 %v12050_v34, 16  ;;  %v1697_v62 = vshll.u32 %v1401_v25, 16 }
 0x299   : > { %v12070_v44 = vmax.bf16 %v2975_v54, %v2819_v2  ;;  %v1684_v40 = vor.u32 %v1683_v56, %v1680_v7  ;;  %v9225_v49 = vrot.slane %v1984_v61, 9  ;;  %v2135_v47 = vrot.slane %v12050_v34, 5 }
 0x29a   : > { %v12072_v11 = vmax.bf16 %v2978_v9, %v2820_v28  ;;  %v1693_v12 = vrot.slane %v1691_v57, 4  ;;  %v1699_v35 = vrot.slane %v1697_v62, 5  ;;  %v2138_v59 = vrot.slane %v1401_v25, 5  ;;  %v12093_v62 = vld [vmem:[#allocation2 + $0x94] sm:$0xf] }
 0x29b   : > { %14822 = vst [vmem:[#allocation22_spill] sm:$0xff] %v12070_v44  ;;  %v3230_v30 = vmax.bf16 %v3198_v18, %v12070_v44  ;;  %v1685_v6 = vrot.slane %v1684_v40, 4  ;;  %v2553_v48 = vshrl.u32 %v1984_v61, 16  ;;  %v2136_v55 = vsel %vm11057_vm7, %v9225_v49, %v2135_v47 }
 0x29c   : > { %14823 = vst [vmem:[#allocation23_spill] sm:$0xff] %v12072_v11  ;;  %v3231_v42 = vmax.bf16 %v3199_v13, %v12072_v11  ;;  %v1694_v45 = vor.u32 %v1693_v12, %v1689_v37  ;;  %v2137_v22 = vrot.slane %v2135_v47, 4  ;;  %v2556_v19 = vshll.u32 %v1984_v61, 16  ;;  %v1374_v61 = vld [vmem:[#allocation2 + $0x90] sm:$0xf] }
 0x29d   : > { %v3811_v29 = vrot.slane %v3230_v30, 7  ;;  %v1690_v52 = vsel %vm11030_vm4, %v1685_v6, %v1689_v37  ;;  %v2555_v41 = vrot.slane %v2553_v48, 5  ;;  %v2561_v27 = vrot.slane %v1691_v57, 5 }
 0x29e   : > { %v9260_v58 = vcombine.low %v3230_v30, %v3231_v42  ;;  %v3813_v33 = vrot.slane %v3231_v42, 7  ;;  %v1695_v60 = vrot.slane %v1694_v45, 4  ;;  %v1955_v20 = vmax.bf16 %v1690_v52, %v1372_v16  ;;  %v1402_v30 = vld [vmem:[#allocation2 + $0x98] sm:$0x1] }
 0x29f   : > { %v2139_v36 = vsel %vm11057_vm7, %v2137_v22, %v2138_v59  ;;  %v3812_v38 = vrot.slane %v3811_v29, 4  ;;  %3927 = vst [vmem:[#allocation2 + $0x60] sm:$0xe] %v3811_v29  ;;  %v2558_v0 = vrot.slane %v2556_v19, 6  ;;  %v2562_v23 = vrot.slane %v1687_v15, 6 }
 0x2a0   : > { %9662 = vmatprep.mubr.bf16.mxu0 %v9260_v58  ;;  %v3815_v54 = vrot.slane %v3813_v33, 4  ;;  %v1700_v32 = vsel %vm11030_vm4, %v1695_v60, %v1699_v35  ;;  %v2258_v1 = vmax.bf16 %v2136_v55, %v1955_v20  ;;  %v2567_v9 = vshrl.u32 %v2287_v63, 16  ;;  %v1985_v55 = vld [vmem:[#allocation2 + $0x90] sm:$0xe] }
 0x2a1   : > { %v3814_v16 = vsel %vm11257_vm15, %v3812_v38, %v3813_v33  ;;  %v1956_v8 = vmax.bf16 %v1700_v32, %v12050_v34  ;;  %v2559_v25 = vor.u32 %v2558_v0, %v2555_v41  ;;  %v2570_v53 = vshll.u32 %v2287_v63, 16 }
 0x2a2   : > { %3929 = vst [vmem:[#allocation2 + $0x68] sm:$0x1] %v3815_v54  ;;  %3928 = vst [vmem:[#allocation2 + $0x64] sm:$0xf] %v3814_v16  ;;  %v2563_v3 = vor.u32 %v2562_v23, %v2561_v27  ;;  %v2569_v43 = vrot.slane %v2567_v9, 5  ;;  %v9245_v39 = vrot.slane %v2850_v50, 10  ;;  %v3136_v57 = vmax.bf16 %v11986_v31, %v11941_v17 }
 0x2a3   : > { %v2981_v7 = vrot.slane %v12050_v34, 6  ;;  %v2259_v2 = vmax.bf16 %v2139_v36, %v1956_v8  ;;  %v2560_v28 = vrot.slane %v2559_v25, 4  ;;  %v2572_v18 = vrot.slane %v2570_v53, 6 }
 0x2a4   : > { %v2984_v15 = vrot.slane %v2287_v63, 6  ;;  %v2565_v56 = vrot.slane %v2563_v3, 4  ;;  %v3137_v34 = vmax.bf16 %v11993_v10, %v11947_v14  ;;  %v1702_v12 = vshrl.u32 %v1374_v61, 16 }
 0x2a5   : > { %v2982_v13 = vsel %vm11154_vm12, %v9245_v39, %v2981_v7  ;;  %v2983_v37 = vrot.slane %v2981_v7, 4  ;;  %v2564_v40 = vsel %vm11119_vm11, %v2560_v28, %v2563_v3  ;;  %v2573_v49 = vor.u32 %v2572_v18, %v2569_v43  ;;  %v2288_v7 = vld [vmem:[#allocation2 + $0x98] sm:$0x3] }
 0x2a6   : > { %v2821_v35 = vmax.bf16 %v2564_v40, %v2258_v1  ;;  %v3168_v59 = vmax.bf16 %v3136_v57, %v12028_v5  ;;  %v1705_v42 = vshll.u32 %v1374_v61, 16  ;;  %v3169_v6 = vmax.bf16 %v3137_v34, %v12032_v21 }
 0x2a7   : > { %v2985_v47 = vsel %vm11154_vm12, %v2983_v37, %v2984_v15  ;;  %v2574_v17 = vsel %vm11119_vm11, %v2565_v56, %v2573_v49  ;;  %v1704_v48 = vrot.slane %v1702_v12, 4  ;;  %v1711_v45 = vshll.u32 %v12093_v62, 16  ;;  %v2851_v56 = vld [vmem:[#allocation2 + $0x90] sm:$0xc] }
 0x2a8   : > { %v2822_v22 = vmax.bf16 %v2574_v17, %v2259_v2  ;;  %v12106_v14 = vmax.bf16 %v2982_v13, %v2821_v35  ;;  %v3200_v19 = vmax.bf16 %v3168_v59, %v12070_v44  ;;  %v1707_v58 = vrot.slane %v1705_v42, 5 }
 0x2a9   : > { %v3201_v29 = vmax.bf16 %v3169_v6, %v12072_v11  ;;  %v1713_v33 = vrot.slane %v1711_v45, 5  ;;  %v1715_v52 = vshrl.u32 %v12093_v62, 16  ;;  %v1721_v63 = vshll.u32 %v1402_v30, 16 }
 0x2aa   : > { %14824 = vst [vmem:[#allocation24_spill] sm:$0xff] %v12106_v14  ;;  %v12111_v60 = vmax.bf16 %v2985_v47, %v2822_v22  ;;  %v3232_v20 = vmax.bf16 %v3200_v19, %v12106_v14  ;;  %v1708_v36 = vor.u32 %v1707_v58, %v1704_v48  ;;  %v9226_v41 = vrot.slane %v1985_v55, 9 }
 0x2ab   : > { %v1717_v38 = vrot.slane %v1715_v52, 4  ;;  %v1723_v54 = vrot.slane %v1721_v63, 5  ;;  %v2142_v0 = vrot.slane %v12093_v62, 5  ;;  %v2145_v27 = vrot.slane %v1402_v30, 5 }
 0x2ac   : > { %14825 = vst [vmem:[#allocation25_spill] sm:$0xff] %v12111_v60  ;;  %v3233_v50 = vmax.bf16 %v3201_v29, %v12111_v60  ;;  %v3816_v32 = vrot.slane %v3232_v20, 7  ;;  %v1709_v1 = vrot.slane %v1708_v36, 4  ;;  %v2576_v23 = vshrl.u32 %v1985_v55, 16 }
 0x2ad   : > { %v1718_v9 = vor.u32 %v1717_v38, %v1713_v33  ;;  %v2143_v16 = vsel %vm11057_vm7, %v9226_v41, %v2142_v0  ;;  %v2144_v8 = vrot.slane %v2142_v0, 4  ;;  %v2579_v25 = vshll.u32 %v1985_v55, 16  ;;  %v1376_v55 = vld [vmem:[#allocation2 + $0x9c] sm:$0xf] }
 0x2ae   : > { %v9261_v53 = vcombine.low %v3232_v20, %v3233_v50  ;;  %v3817_v3 = vrot.slane %v3816_v32, 4  ;;  %v3818_v43 = vrot.slane %v3233_v50, 7  ;;  %3930 = vst [vmem:[#allocation2 + $0x6c] sm:$0xe] %v3816_v32  ;;  %v1714_v39 = vsel %vm11030_vm4, %v1709_v1, %v1713_v33  ;;  %v12134_v20 = vld [vmem:[#allocation2 + $0xa0] sm:$0xf] }
 0x2af   : > { %v1719_v2 = vrot.slane %v1718_v9, 4  ;;  %v1957_v28 = vmax.bf16 %v1714_v39, %v1374_v61  ;;  %v2146_v18 = vsel %vm11057_vm7, %v2144_v8, %v2145_v27  ;;  %v2578_v15 = vrot.slane %v2576_v23, 5  ;;  %v1403_v27 = vld [vmem:[#allocation2 + $0xa4] sm:$0x1]  ;;  %v1986_v32 = vld [vmem:[#allocation2 + $0x9c] sm:$0xe] }
 0x2b0   : > { %9663 = vmatmul.mubr.bf16.gmra.mrb[44].mxu0 %v9261_v53  ;;  %v3819_v13 = vsel %vm11257_vm15, %v3817_v3, %v3818_v43  ;;  %v3820_v37 = vrot.slane %v3818_v43, 4  ;;  %v2581_v57 = vrot.slane %v2579_v25, 6  ;;  %v2584_v40 = vrot.slane %v1715_v52, 5 }
 0x2b1   : > { %3931 = vst [vmem:[#allocation2 + $0x70] sm:$0xf] %v3819_v13  ;;  %v1724_v49 = vsel %vm11030_vm4, %v1719_v2, %v1723_v54  ;;  %v2260_v34 = vmax.bf16 %v2143_v16, %v1957_v28  ;;  %v2585_v12 = vrot.slane %v1711_v45, 6  ;;  %v2590_v35 = vshrl.u32 %v2288_v7, 16 }
 0x2b2   : > { %3932 = vst [vmem:[#allocation2 + $0x74] sm:$0x1] %v3820_v37  ;;  %v1958_v61 = vmax.bf16 %v1724_v49, %v12093_v62  ;;  %v2582_v47 = vor.u32 %v2581_v57, %v2578_v15  ;;  %v2593_v59 = vshll.u32 %v2288_v7, 16  ;;  %v9246_v30 = vrot.slane %v2851_v56, 10  ;;  %v10092_v56 = vld [vmem:[#allocation11 + $0xc8] sm:$0xff]  }
 0x2b3   : > { %v2586_v42 = vor.u32 %v2585_v12, %v2584_v40  ;;  %v2592_v17 = vrot.slane %v2590_v35, 5  ;;  %v2988_v6 = vrot.slane %v12093_v62, 6  ;;  %v2991_v48 = vrot.slane %v2288_v7, 6  ;;  %9780 = vmatprep.subr.bf16.mxu0 %v10092_v56 }
 0x2b4   : > { %v2261_v22 = vmax.bf16 %v2146_v18, %v1958_v61  ;;  %v2583_v19 = vrot.slane %v2582_v47, 4  ;;  %v2595_v58 = vrot.slane %v2593_v59, 6  ;;  %v3138_v29 = vmax.bf16 %v12028_v5, %v11986_v31  ;;  %9781 = vmatpush3.bf16.msra.mxu0 %v10092_v56 }
 0x2b5   : > { %v2588_v45 = vrot.slane %v2586_v42, 4  ;;  %v2989_v33 = vsel %vm11154_vm12, %v9246_v30, %v2988_v6  ;;  %v2990_v52 = vrot.slane %v2988_v6, 4  ;;  %v3139_v63 = vmax.bf16 %v12032_v21, %v11993_v10 }
 0x2b6   : > { %v2587_v62 = vsel %vm11119_vm11, %v2583_v19, %v2586_v42  ;;  %v2596_v36 = vor.u32 %v2595_v58, %v2592_v17  ;;  %v3170_v41 = vmax.bf16 %v3138_v29, %v12070_v44  ;;  %v1726_v38 = vshrl.u32 %v1376_v55, 16 }
 0x2b7   : > { %v2823_v54 = vmax.bf16 %v2587_v62, %v2260_v34  ;;  %v2992_v31 = vsel %vm11154_vm12, %v2990_v52, %v2991_v48  ;;  %v3171_v0 = vmax.bf16 %v3139_v63, %v12072_v11  ;;  %v1729_v50 = vshll.u32 %v1376_v55, 16 }
 0x2b8   : > { %v2597_v10 = vsel %vm11119_vm11, %v2588_v45, %v2596_v36  ;;  %v3202_v1 = vmax.bf16 %v3170_v41, %v12106_v14  ;;  %v1728_v23 = vrot.slane %v1726_v38, 4  ;;  %v1735_v9 = vshll.u32 %v12134_v20, 16 }
 0x2b9   : > { %v2824_v16 = vmax.bf16 %v2597_v10, %v2261_v22  ;;  %v12146_v8 = vmax.bf16 %v2989_v33, %v2823_v54  ;;  %v3203_v25 = vmax.bf16 %v3171_v0, %v12111_v60  ;;  %v1731_v53 = vrot.slane %v1729_v50, 5  ;;  %v2289_v22 = vld [vmem:[#allocation2 + $0xa4] sm:$0x3]  ;;  %v2852_v33 = vld [vmem:[#allocation2 + $0x9c] sm:$0xc] }
 0x2ba   : > { %v1737_v3 = vrot.slane %v1735_v9, 5  ;;  %v1739_v43 = vshrl.u32 %v12134_v20, 16  ;;  %v1745_v39 = vshll.u32 %v1403_v27, 16  ;;  %v9227_v7 = vrot.slane %v1986_v32, 9 }
 0x2bb   : > { %14826 = vst [vmem:[#allocation26_spill] sm:$0xff] %v12146_v8  ;;  %v12150_v2 = vmax.bf16 %v2992_v31, %v2824_v16  ;;  %v3234_v28 = vmax.bf16 %v3202_v1, %v12146_v8  ;;  %v1732_v18 = vor.u32 %v1731_v53, %v1728_v23  ;;  %v2149_v15 = vrot.slane %v12134_v20, 5  ;;  %v12167_v16 = vld [vmem:[#allocation2] sm:$0xf] }
 0x2bc   : > { %v1741_v13 = vrot.slane %v1739_v43, 4  ;;  %v1747_v37 = vrot.slane %v1745_v39, 5  ;;  %v2152_v57 = vrot.slane %v1403_v27, 5  ;;  %v2599_v40 = vshrl.u32 %v1986_v32, 16 }
 0x2bd   : > { %14827 = vst [vmem:[#allocation27_spill] sm:$0xff] %v12150_v2  ;;  %v3235_v49 = vmax.bf16 %v3203_v25, %v12150_v2  ;;  %v3821_v34 = vrot.slane %v3234_v28, 7  ;;  %v1733_v12 = vrot.slane %v1732_v18, 4  ;;  %v2150_v35 = vsel %vm11057_vm7, %v9227_v7, %v2149_v15 }
 0x2be   : > { %v1742_v61 = vor.u32 %v1741_v13, %v1737_v3  ;;  %v2151_v47 = vrot.slane %v2149_v15, 4  ;;  %v2601_v59 = vrot.slane %v2599_v40, 5  ;;  %v2602_v30 = vshll.u32 %v1986_v32, 16  ;;  %v12186_v40 = vld [vmem:[#allocation2 + $0x8] sm:$0x1] }
 0x2bf   : > { %v9262_v42 = vcombine.low %v3234_v28, %v3235_v49  ;;  %v3822_v17 = vrot.slane %v3821_v34, 4  ;;  %v3823_v6 = vrot.slane %v3235_v49, 7  ;;  %3933 = vst [vmem:[#allocation2 + $0x78] sm:$0xe] %v3821_v34  ;;  %v1738_v48 = vsel %vm11030_vm4, %v1733_v12, %v1737_v3 }
 0x2c0   : > { %v1743_v19 = vrot.slane %v1742_v61, 4  ;;  %v1959_v58 = vmax.bf16 %v1738_v48, %v1376_v55  ;;  %v2153_v29 = vsel %vm11057_vm7, %v2151_v47, %v2152_v57  ;;  %v2604_v45 = vrot.slane %v2602_v30, 6  ;;  %v12184_v57 = vld [vmem:[#allocation2 + $0xc] sm:$0xf]  ;;  %v12195_v61 = vld [vmem:[#allocation2 + $0x10] sm:$0xf] }
 0x2c1   : > { %9666 = vmatprep.mubr.bf16.mxu0 %v9262_v42  ;;  %v3824_v52 = vsel %vm11257_vm15, %v3822_v17, %v3823_v6  ;;  %v3825_v63 = vrot.slane %v3823_v6, 4  ;;  %v2607_v62 = vrot.slane %v1739_v43, 5  ;;  %v2608_v36 = vrot.slane %v1735_v9, 6  ;;  %v12171_v43 = vld [vmem:[#allocation2 + $0x4] sm:$0xf] }
 0x2c2   : > { %3934 = vst [vmem:[#allocation2 + $0x7c] sm:$0xf] %v3824_v52  ;;  %v1748_v41 = vsel %vm11030_vm4, %v1743_v19, %v1747_v37  ;;  %v2262_v38 = vmax.bf16 %v2150_v35, %v1959_v58  ;;  %v2605_v54 = vor.u32 %v2604_v45, %v2601_v59  ;;  %v2613_v31 = vshrl.u32 %v2289_v22, 16 }
 0x2c3   : > { %3935 = vst [vmem:[#allocation2 + $0x80] sm:$0x1] %v3825_v63  ;;  %v1960_v55 = vmax.bf16 %v1748_v41, %v12134_v20  ;;  %v2609_v0 = vor.u32 %v2608_v36, %v2607_v62  ;;  %v2616_v27 = vshll.u32 %v2289_v22, 16  ;;  %v9247_v50 = vrot.slane %v2852_v33, 10 }
 0x2c4   : > { %v2606_v32 = vrot.slane %v2605_v54, 4  ;;  %v2615_v10 = vrot.slane %v2613_v31, 5  ;;  %v2995_v1 = vrot.slane %v12134_v20, 6  ;;  %v2998_v23 = vrot.slane %v2289_v22, 6  ;;  %v12217_v54 = vld [vmem:[#allocation2 + $0x18] sm:$0xf] }
 0x2c5   : > { %v2263_v9 = vmax.bf16 %v2153_v29, %v1960_v55  ;;  %v2611_v25 = vrot.slane %v2609_v0, 4  ;;  %v2618_v53 = vrot.slane %v2616_v27, 6  ;;  %v3140_v3 = vmax.bf16 %v12070_v44, %v12028_v5  ;;  %v12208_v29 = vld [vmem:[#allocation2 + $0x14] sm:$0x1] }
 0x2c6   : > { %v2610_v39 = vsel %vm11119_vm11, %v2606_v32, %v2609_v0  ;;  %v2996_v7 = vsel %vm11154_vm12, %v9247_v50, %v2995_v1  ;;  %v2997_v28 = vrot.slane %v2995_v1, 4  ;;  %v3141_v20 = vmax.bf16 %v12072_v11, %v12032_v21 }
 0x2c7   : > { %v2619_v18 = vor.u32 %v2618_v53, %v2615_v10  ;;  %v2825_v15 = vmax.bf16 %v2610_v39, %v2262_v38  ;;  %v3172_v56 = vmax.bf16 %v3140_v3, %v12106_v14  ;;  %v4018_v13 = vshrl.u32 %v12167_v16, 16  ;;  %v12234_v3 = vld [vmem:[#allocation2 + $0x20] sm:$0x1] }
 0x2c8   : > { %v2999_v5 = vsel %vm11154_vm12, %v2997_v28, %v2998_v23  ;;  %v3173_v37 = vmax.bf16 %v3141_v20, %v12111_v60  ;;  %v4021_v49 = vshll.u32 %v12167_v16, 16  ;;  %v4027_v34 = vshll.u32 %v12171_v43, 16 }
 0x2c9   : > { %v2620_v21 = vsel %vm11119_vm11, %v2611_v25, %v2619_v18  ;;  %v12192_v12 = vmax.bf16 %v2996_v7, %v2825_v15  ;;  %v3204_v35 = vmax.bf16 %v3172_v56, %v12146_v8  ;;  %v4020_v47 = vrot.slane %v4018_v13, 4  ;;  %v12245_v56 = vld [vmem:[#allocation2 + $0x24] sm:$0xf] }
 0x2ca   : > { %v2826_v59 = vmax.bf16 %v2620_v21, %v2263_v9  ;;  %v3205_v30 = vmax.bf16 %v3173_v37, %v12150_v2  ;;  %v4023_v42 = vrot.slane %v4021_v49, 5  ;;  %v12200_v17 = vrot.slane %v4027_v34, 5  ;;  %v12228_v9 = vld [vmem:[#allocation2 + $0x1c] sm:$0xf]  ;;  %v12248_v37 = vld [vmem:[#allocation2 + $0x28] sm:$0xf] }
 0x2cb   : > { %14828 = vst [vmem:[#allocation28_spill] sm:$0xff] %v12192_v12  ;;  %v3236_v6 = vmax.bf16 %v3204_v35, %v12192_v12  ;;  %v4031_v48 = vshrl.u32 %v12171_v43, 16  ;;  %v4037_v22 = vshll.u32 %v12186_v40, 16  ;;  %v4042_v19 = vshrl.u32 %v12184_v57, 16 }
 0x2cc   : > { %v12206_v58 = vmax.bf16 %v2999_v5, %v2826_v59  ;;  %v4024_v45 = vor.u32 %v4023_v42, %v4020_v47  ;;  %v4045_v33 = vshll.u32 %v12184_v57, 16  ;;  %v4051_v52 = vshll.u32 %v12195_v61, 16 }
 0x2cd   : > { %v3826_v63 = vrot.slane %v3236_v6, 7  ;;  %v4033_v62 = vrot.slane %v4031_v48, 4  ;;  %v12214_v36 = vrot.slane %v4037_v22, 5  ;;  %v4044_v41 = vrot.slane %v4042_v19, 4  ;;  %v12261_v22 = vld [vmem:[#allocation2 + $0x2c] sm:$0x1] }
 0x2ce   : > { %14829 = vst [vmem:[#allocation29_spill] sm:$0xff] %v12206_v58  ;;  %v3237_v38 = vmax.bf16 %v3205_v30, %v12206_v58  ;;  %v12219_v31 = vrot.slane %v4024_v45, 4  ;;  %v4047_v55 = vrot.slane %v4045_v33, 5  ;;  %v12223_v0 = vrot.slane %v4051_v52, 5 }
 0x2cf   : > { %v3827_v27 = vrot.slane %v3826_v63, 4  ;;  %3936 = vst [vmem:[#allocation2 + $0x84] sm:$0xe] %v3826_v63  ;;  %v4034_v50 = vor.u32 %v4033_v62, %v12200_v17  ;;  %v4055_v32 = vshrl.u32 %v12195_v61, 16  ;;  %v4061_v10 = vshll.u32 %v12208_v29, 16 }
 0x2d0   : > { %v9263_v1 = vcombine.low %v3236_v6, %v3237_v38  ;;  %v3828_v23 = vrot.slane %v3237_v38, 7  ;;  %v4030_v25 = vsel %vm11030_vm4, %v12219_v31, %v12200_v17  ;;  %v4048_v53 = vor.u32 %v4047_v55, %v4044_v41  ;;  %v3965_v62 = vld [vmem:[#allocation2 + $0x30] sm:$0xf] }
 0x2d1   : > { %v12236_v39 = vrot.slane %v4034_v50, 4  ;;  %v4057_v7 = vrot.slane %v4055_v32, 4  ;;  %v12240_v28 = vrot.slane %v4061_v10, 5  ;;  %v4066_v20 = vshrl.u32 %v12217_v54, 16 }
 0x2d2   : > { %9667 = vmatmul.mubr.bf16.gmra.mrb[48].mxu0 %v9263_v1  ;;  %v3829_v18 = vsel %vm11257_vm15, %v3827_v27, %v3828_v23  ;;  %v3830_v15 = vrot.slane %v3828_v23, 4  ;;  %v4049_v13 = vrot.slane %v4048_v53, 4  ;;  %v4069_v5 = vshll.u32 %v12217_v54, 16 }
 0x2d3   : > { %3937 = vst [vmem:[#allocation2 + $0x88] sm:$0xf] %v3829_v18  ;;  %v4040_v49 = vsel %vm11030_vm4, %v12236_v39, %v12214_v36  ;;  %v4058_v21 = vor.u32 %v4057_v7, %v12223_v0  ;;  %v4068_v35 = vrot.slane %v4066_v20, 4  ;;  %v14756_v47 = vshll.u32 %v12228_v9, 16  ;;  %v12279_v20 = vld [vmem:[#allocation2 + $0x38] sm:$0x1] }
 0x2d4   : > { %3938 = vst [vmem:[#allocation2 + $0x8c] sm:$0x1] %v3830_v15  ;;  %v4054_v59 = vsel %vm11030_vm4, %v4049_v13, %v12223_v0  ;;  %v4071_v30 = vrot.slane %v4069_v5, 5  ;;  %v14757_v42 = vshrl.u32 %v12228_v9, 16  ;;  %v4085_v6 = vshll.u32 %v12234_v3, 16 }
 0x2d5   : > { %v4059_v19 = vrot.slane %v4058_v21, 4  ;;  %v4077_v45 = vrot.slane %v14756_v47, 5  ;;  %v4090_v33 = vshrl.u32 %v12245_v56, 16  ;;  %v4093_v63 = vshll.u32 %v12245_v56, 16  ;;  %v12270_v0 = vld [vmem:[#allocation2 + $0x34] sm:$0xf] }
 0x2d6   : > { %v4072_v36 = vor.u32 %v4071_v30, %v4068_v35  ;;  %v4081_v41 = vrot.slane %v14757_v42, 4  ;;  %v4087_v38 = vrot.slane %v4085_v6, 5  ;;  %v14754_v55 = vshll.u32 %v12248_v37, 16 }
 0x2d7   : > { %v4064_v27 = vsel %vm11030_vm4, %v4059_v19, %v12240_v28  ;;  %v4092_v50 = vrot.slane %v4090_v33, 4  ;;  %v4095_v10 = vrot.slane %v4093_v63, 5  ;;  %v14755_v1 = vshrl.u32 %v12248_v37, 16 }
 0x2d8   : > { %v4073_v23 = vrot.slane %v4072_v36, 4  ;;  %v4082_v53 = vor.u32 %v4081_v41, %v4077_v45  ;;  %v4101_v39 = vrot.slane %v14754_v55, 5  ;;  %v4109_v7 = vshll.u32 %v12261_v22, 16 }
 0x2d9   : > { %v4096_v18 = vor.u32 %v4095_v10, %v4092_v50  ;;  %v4105_v15 = vrot.slane %v14755_v1, 4  ;;  %v4114_v13 = vshrl.u32 %v3965_v62, 16  ;;  %v4117_v5 = vshll.u32 %v3965_v62, 16 }
 0x2da   : > { %v4078_v28 = vsel %vm11030_vm4, %v4073_v23, %v4077_v45  ;;  %v4083_v21 = vrot.slane %v4082_v53, 4  ;;  %v4111_v35 = vrot.slane %v4109_v7, 5  ;;  %v14752_v30 = vshll.u32 %v12270_v0, 16 }
 0x2db   : > { %v4097_v6 = vrot.slane %v4096_v18, 4  ;;  %v4106_v19 = vor.u32 %v4105_v15, %v4101_v39  ;;  %v4116_v33 = vrot.slane %v4114_v13, 4  ;;  %v4119_v63 = vrot.slane %v4117_v5, 5 }
 0x2dc   : > { %v4088_v36 = vsel %vm11030_vm4, %v4083_v21, %v4087_v38  ;;  %v4125_v41 = vrot.slane %v14752_v30, 5  ;;  %v14753_v50 = vshrl.u32 %v12270_v0, 16  ;;  %v4133_v10 = vshll.u32 %v12279_v20, 16 }
 0x2dd   : > { %v4102_v45 = vsel %vm11030_vm4, %v4097_v6, %v4101_v39  ;;  %v4107_v23 = vrot.slane %v4106_v19, 4  ;;  %v4120_v53 = vor.u32 %v4119_v63, %v4116_v33  ;;  %v12300_v7 = vmax.bf16 %v4030_v25, %v12167_v16 }
 0x2de   : > { %v4129_v38 = vrot.slane %v14753_v50, 4  ;;  %v4135_v18 = vrot.slane %v4133_v10, 5  ;;  %v12305_v15 = vmax.bf16 %v4040_v49, %v12171_v43  ;;  %v12308_v13 = vmax.bf16 %v4054_v59, %v12184_v57  ;;  %v4577_v49 = vld [vmem:[#allocation2] sm:$0xe]  ;;  %v12327_v59 = vld [vmem:[#allocation2 + $0x18] sm:$0xe] }
 0x2df   : > { %v4112_v39 = vsel %vm11030_vm4, %v4107_v23, %v4111_v35  ;;  %v4121_v5 = vrot.slane %v4120_v53, 4  ;;  %v12313_v21 = vmax.bf16 %v4064_v27, %v12195_v61  ;;  %v12316_v16 = vmax.bf16 %v4078_v28, %v12217_v54  ;;  %v12331_v35 = vld [vmem:[#allocation2 + $0xc] sm:$0xe] }
 0x2e0   : > { %v4130_v17 = vor.u32 %v4129_v38, %v4125_v41  ;;  %v12319_v31 = vmax.bf16 %v4088_v36, %v12228_v9  ;;  %v12322_v25 = vmax.bf16 %v4102_v45, %v12245_v56  ;;  %v12325_v57 = vmax.bf16 %v4112_v39, %v12248_v37  ;;  %v12337_v56 = vld [vmem:[#allocation2 + $0x24] sm:$0xe] }
 0x2e1   : > { %v4126_v27 = vsel %vm11030_vm4, %v4121_v5, %v4125_v41  ;;  %v9286_v54 = vrot.slane %v4577_v49, 9  ;;  %v4659_v28 = vrot.slane %v12171_v43, 5  ;;  %v4662_v6 = vrot.slane %v12186_v40, 5 }
 0x2e2   : > { %v4131_v19 = vrot.slane %v4130_v17, 4  ;;  %v12335_v33 = vmax.bf16 %v4126_v27, %v3965_v62  ;;  %v9287_v63 = vrot.slane %v12331_v35, 9  ;;  %v4666_v36 = vrot.slane %v12195_v61, 5  ;;  %v12349_v62 = vld [vmem:[#allocation2 + $0x30] sm:$0xe] }
 0x2e3   : > { %v12343_v10 = vsel %vm11057_vm7, %v9286_v54, %v4659_v28  ;;  %v4661_v41 = vrot.slane %v4659_v28, 4  ;;  %v4669_v45 = vrot.slane %v12208_v29, 5  ;;  %v9288_v23 = vrot.slane %v12327_v59, 9 }
 0x2e4   : > { %v4136_v40 = vsel %vm11030_vm4, %v4131_v19, %v4135_v18  ;;  %v12353_v53 = vsel %vm11057_vm7, %v9287_v63, %v4666_v36  ;;  %v4668_v38 = vrot.slane %v4666_v36, 4  ;;  %v4673_v39 = vrot.slane %v12228_v9, 5 }
 0x2e5   : > { %v12357_v5 = vmax.bf16 %v4136_v40, %v12270_v0  ;;  %v12361_v29 = vsel %vm11057_vm7, %v4661_v41, %v4662_v6  ;;  %v4676_v17 = vrot.slane %v12234_v3, 5  ;;  %v9289_v18 = vrot.slane %v12337_v56, 9  ;;  %v12422_v40 = vld [vmem:[#allocation2 + $0x14] sm:$0x3] }
 0x2e6   : > { %v12367_v27 = vsel %vm11057_vm7, %v4668_v38, %v4669_v45  ;;  %v12371_v54 = vsel %vm11057_vm7, %v9288_v23, %v4673_v39  ;;  %v4675_v28 = vrot.slane %v4673_v39, 4  ;;  %v4680_v19 = vrot.slane %v12248_v37, 5 }
 0x2e7   : > { %v4683_v63 = vrot.slane %v12261_v22, 5  ;;  %v9290_v6 = vrot.slane %v12349_v62, 9  ;;  %v4687_v36 = vrot.slane %v12270_v0, 5  ;;  %v4690_v3 = vrot.slane %v12279_v20, 5 }
 0x2e8   : > { %v12380_v41 = vsel %vm11057_vm7, %v4675_v28, %v4676_v17  ;;  %v12384_v45 = vsel %vm11057_vm7, %v9289_v18, %v4680_v19  ;;  %v4682_v23 = vrot.slane %v4680_v19, 4  ;;  %v4898_v18 = vshrl.u32 %v4577_v49, 16 }
 0x2e9   : > { %v12390_v22 = vsel %vm11057_vm7, %v9290_v6, %v4687_v36  ;;  %v4689_v38 = vrot.slane %v4687_v36, 4  ;;  %v12406_v6 = vld [vmem:[#allocation2 + $0x8] sm:$0x3]  ;;  %v4901_v19 = vshll.u32 %v4577_v49, 16  ;;  %v4906_v20 = vrot.slane %v4031_v48, 5 }
 0x2ea   : > { %v12398_v17 = vsel %vm11057_vm7, %v4682_v23, %v4683_v63  ;;  %v4915_v63 = vshll.u32 %v12406_v6, 16  ;;  %v4921_v39 = vshrl.u32 %v12331_v35, 16  ;;  %v4900_v23 = vrot.slane %v4898_v18, 5 }
 0x2eb   : > { %v12410_v36 = vsel %vm11057_vm7, %v4689_v38, %v4690_v3  ;;  %v4907_v3 = vrot.slane %v4027_v34, 6  ;;  %v4912_v38 = vshrl.u32 %v12406_v6, 16  ;;  %v4903_v30 = vrot.slane %v4901_v19, 6 }
 0x2ec   : > { %v4924_v28 = vshll.u32 %v12331_v35, 16  ;;  %v4929_v49 = vrot.slane %v4055_v32, 5  ;;  %v4917_v55 = vrot.slane %v4915_v63, 6  ;;  %v4923_v1 = vrot.slane %v4921_v39, 5  ;;  %v12440_v32 = vld [vmem:[#allocation2 + $0x20] sm:$0x3] }
 0x2ed   : > { %v12432_v50 = vor.u32 %v4907_v3, %v4906_v20  ;;  %v4914_v48 = vrot.slane %v4912_v38, 5  ;;  %v4904_v47 = vor.u32 %v4903_v30, %v4900_v23  ;;  %v4930_v42 = vrot.slane %v4051_v52, 6 }
 0x2ee   : > { %v4926_v34 = vrot.slane %v4924_v28, 6  ;;  %v4935_v58 = vshrl.u32 %v12422_v40, 16  ;;  %v4938_v35 = vshll.u32 %v12422_v40, 16  ;;  %v4944_v12 = vshrl.u32 %v12327_v59, 16 }
 0x2ef   : > { %v4910_v18 = vrot.slane %v12432_v50, 4  ;;  %v4918_v19 = vor.u32 %v4917_v55, %v4914_v48  ;;  %v4905_v20 = vrot.slane %v4904_v47, 4  ;;  %v4931_v63 = vor.u32 %v4930_v42, %v4929_v49 }
 0x2f0   : > { %v4927_v3 = vor.u32 %v4926_v34, %v4923_v1  ;;  %v4937_v39 = vrot.slane %v4935_v58, 5  ;;  %v4940_v28 = vrot.slane %v4938_v35, 6  ;;  %v4946_v52 = vrot.slane %v4944_v12, 5  ;;  %v12453_v34 = vld [vmem:[#allocation2 + $0x2c] sm:$0x3] }
 0x2f1   : > { %v4919_v30 = vsel %vm11119_vm11, %v4910_v18, %v4918_v19  ;;  %v4947_v23 = vshll.u32 %v12327_v59, 16  ;;  %v4909_v55 = vsel %vm11119_vm11, %v4905_v20, %v12432_v50  ;;  %v4933_v48 = vrot.slane %v4931_v63, 4 }
 0x2f2   : > { %v4928_v38 = vrot.slane %v4927_v3, 4  ;;  %v14830_v2 = vshrl.u32 %v12228_v9, 16  ;;  %v4941_v47 = vor.u32 %v4940_v28, %v4937_v39  ;;  %v14831_v58 = vshll.u32 %v12228_v9, 16 }
 0x2f3   : > { %v4949_v1 = vrot.slane %v4947_v23, 6  ;;  %v4958_v49 = vshrl.u32 %v12440_v32, 16  ;;  %v4961_v59 = vshll.u32 %v12440_v32, 16  ;;  %v4967_v50 = vshrl.u32 %v12337_v56, 16 }
 0x2f4   : > { %v4952_v8 = vrot.slane %v14830_v2, 5  ;;  %v4953_v42 = vrot.slane %v14831_v58, 6  ;;  %v4932_v12 = vsel %vm11119_vm11, %v4928_v38, %v4931_v63  ;;  %v4970_v18 = vshll.u32 %v12337_v56, 16 }
 0x2f5   : > { %v4942_v2 = vsel %vm11119_vm11, %v4933_v48, %v4941_v47  ;;  %v4950_v19 = vor.u32 %v4949_v1, %v4946_v52  ;;  %v4960_v20 = vrot.slane %v4958_v49, 5  ;;  %v4963_v3 = vrot.slane %v4961_v59, 6  ;;  %v12469_v52 = vld [vmem:[#allocation2 + $0x38] sm:$0x3] }
 0x2f6   : > { %v4954_v35 = vor.u32 %v4953_v42, %v4952_v8  ;;  %v4969_v39 = vrot.slane %v4967_v50, 5  ;;  %v4972_v28 = vrot.slane %v4970_v18, 6  ;;  %v14832_v23 = vshrl.u32 %v12248_v37, 16 }
 0x2f7   : > { %v4951_v60 = vrot.slane %v4950_v19, 4  ;;  %v14833_v38 = vshll.u32 %v12248_v37, 16  ;;  %v4981_v14 = vshrl.u32 %v12453_v34, 16  ;;  %v4964_v56 = vor.u32 %v4963_v3, %v4960_v20 }
 0x2f8   : > { %v4975_v58 = vrot.slane %v14832_v23, 5  ;;  %v4956_v63 = vrot.slane %v4954_v35, 4  ;;  %v4973_v44 = vor.u32 %v4972_v28, %v4969_v39  ;;  %v4984_v48 = vshll.u32 %v12453_v34, 16 }
 0x2f9   : > { %v4976_v11 = vrot.slane %v14833_v38, 6  ;;  %v4990_v8 = vshrl.u32 %v12349_v62, 16  ;;  %v4955_v47 = vsel %vm11119_vm11, %v4951_v60, %v4954_v35  ;;  %v4983_v42 = vrot.slane %v4981_v14, 5  ;;  %v12484_v35 = vld [vmem:[#allocation11 + $0xd0] sm:$0xff]  }
 0x2fa   : > { %v4993_v49 = vshll.u32 %v12349_v62, 16  ;;  %v4965_v59 = vsel %vm11119_vm11, %v4956_v63, %v4964_v56  ;;  %v4974_v50 = vrot.slane %v4973_v44, 4  ;;  %v4986_v18 = vrot.slane %v4984_v48, 6  ;;  %9782 = vmatprep.subr.bf16.mxu0 %v12484_v35 }
 0x2fb   : > { %v4977_v1 = vor.u32 %v4976_v11, %v4975_v58  ;;  %v4992_v19 = vrot.slane %v4990_v8, 5  ;;  %v14834_v39 = vshrl.u32 %v12270_v0, 16  ;;  %v14835_v23 = vshll.u32 %v12270_v0, 16  ;;  %9783 = vmatpush3.bf16.msra.mxu0 %v12484_v35 }
 0x2fc   : > { %v4995_v3 = vrot.slane %v4993_v49, 6  ;;  %v4987_v14 = vor.u32 %v4986_v18, %v4983_v42  ;;  %v5004_v60 = vshrl.u32 %v12469_v52, 16  ;;  %v5007_v62 = vshll.u32 %v12469_v52, 16 }
 0x2fd   : > { %v4979_v20 = vrot.slane %v4977_v1, 4  ;;  %v4998_v28 = vrot.slane %v14834_v39, 5  ;;  %v4999_v38 = vrot.slane %v14835_v23, 6  ;;  %v4978_v11 = vsel %vm11119_vm11, %v4974_v50, %v4977_v1 }
 0x2fe   : > { %v4996_v44 = vor.u32 %v4995_v3, %v4992_v19  ;;  %v14836_v63 = vmax.bf16 %v12343_v10, %v12300_v7  ;;  %v14837_v48 = vmax.bf16 %v12361_v29, %v12305_v15  ;;  %v5006_v42 = vrot.slane %v5004_v60, 5  ;;  %v5437_v19 = vld [vmem:[#allocation2] sm:$0xc] }
 0x2ff   : > { %v5000_v58 = vor.u32 %v4999_v38, %v4998_v28  ;;  %v4988_v1 = vsel %vm11119_vm11, %v4979_v20, %v4987_v14  ;;  %v5009_v49 = vrot.slane %v5007_v62, 6  ;;  %v14838_v50 = vmax.bf16 %v12353_v53, %v12308_v13  ;;  %v5438_v20 = vld [vmem:[#allocation2 + $0xc] sm:$0xc] }
 0x300   : > { %v12489_v56 = vmax.bf16 %v4909_v55, %v14836_v63  ;;  %v12494_v8 = vmax.bf16 %v4919_v30, %v14837_v48  ;;  %v4997_v7 = vrot.slane %v4996_v44, 4  ;;  %v14839_v55 = vmax.bf16 %v12367_v27, %v12313_v21 }
 0x301   : > { %v5399_v18 = vmax.bf16 %v4932_v12, %v14838_v50  ;;  %v5002_v10 = vrot.slane %v5000_v58, 4  ;;  %v14840_v29 = vmax.bf16 %v12371_v54, %v12316_v16  ;;  %v5010_v3 = vor.u32 %v5009_v49, %v5006_v42  ;;  %v5439_v54 = vld [vmem:[#allocation2 + $0x18] sm:$0xc] }
 0x302   : > { %v5400_v15 = vmax.bf16 %v4942_v2, %v14839_v55  ;;  %v14841_v13 = vmax.bf16 %v12380_v41, %v12319_v31  ;;  %v14842_v12 = vmax.bf16 %v12384_v45, %v12322_v25  ;;  %v14843_v21 = vmax.bf16 %v12398_v17, %v12325_v57  ;;  %v5440_v45 = vld [vmem:[#allocation2 + $0x24] sm:$0xc] }
 0x303   : > { %v5401_v30 = vmax.bf16 %v4955_v47, %v14840_v29  ;;  %v5001_v16 = vsel %vm11119_vm11, %v4997_v7, %v5000_v58  ;;  %v9306_v2 = vrot.slane %v5437_v19, 10  ;;  %v5499_v47 = vrot.slane %v12171_v43, 6 }
 0x304   : > { %v5402_v53 = vmax.bf16 %v4965_v59, %v14841_v13  ;;  %v5403_v39 = vmax.bf16 %v4978_v11, %v14842_v12  ;;  %v5404_v27 = vmax.bf16 %v4988_v1, %v14843_v21  ;;  %v5502_v28 = vrot.slane %v12406_v6, 6  ;;  %v5441_v11 = vld [vmem:[#allocation2 + $0x30] sm:$0xc]  ;;  %v1987_v12 = vld [vmem:[#allocation2 + $0xa8] sm:$0xe] }
 0x305   : > { %v5011_v31 = vsel %vm11119_vm11, %v5002_v10, %v5010_v3  ;;  %v14844_v25 = vmax.bf16 %v12390_v22, %v12335_v33  ;;  %v9307_v59 = vrot.slane %v5438_v20, 10  ;;  %v5506_v57 = vrot.slane %v12195_v61, 6  ;;  %v12568_v20 = vld [vmem:[#allocation2 + $0xac] sm:$0xf] }
 0x306   : > { %v14845_v17 = vmax.bf16 %v12410_v36, %v12357_v5  ;;  %v5500_v43 = vsel %vm11154_vm12, %v9306_v2, %v5499_v47  ;;  %v5501_v38 = vrot.slane %v5499_v47, 4  ;;  %v5509_v6 = vrot.slane %v12422_v40, 6 }
 0x307   : > { %v5405_v41 = vmax.bf16 %v5001_v16, %v14844_v25  ;;  %v5507_v14 = vsel %vm11154_vm12, %v9307_v59, %v5506_v57  ;;  %v5508_v33 = vrot.slane %v5506_v57, 4  ;;  %v9308_v22 = vrot.slane %v5439_v54, 10 }
 0x308   : > { %v5406_v23 = vmax.bf16 %v5011_v31, %v14845_v17  ;;  %v5513_v60 = vrot.slane %v12228_v9, 6  ;;  %v5503_v61 = vsel %vm11154_vm12, %v5501_v38, %v5502_v28  ;;  %v5516_v5 = vrot.slane %v12440_v32, 6 }
 0x309   : > { %v9309_v36 = vrot.slane %v5440_v45, 10  ;;  %v5520_v62 = vrot.slane %v12248_v37, 6  ;;  %v5510_v44 = vsel %vm11154_vm12, %v5508_v33, %v5509_v6  ;;  %v5523_v63 = vrot.slane %v12453_v34, 6 }
 0x30a   : > { %v5514_v40 = vsel %vm11154_vm12, %v9308_v22, %v5513_v60  ;;  %v5515_v58 = vrot.slane %v5513_v60, 4  ;;  %v9310_v1 = vrot.slane %v5441_v11, 10  ;;  %v5527_v42 = vrot.slane %v12270_v0, 6 }
 0x30b   : > { %v5521_v9 = vsel %vm11154_vm12, %v9309_v36, %v5520_v62  ;;  %v5522_v48 = vrot.slane %v5520_v62, 4  ;;  %v5530_v37 = vrot.slane %v12469_v52, 6  ;;  %v5677_v49 = vmax.bf16 %v5500_v43, %v12489_v56  ;;  %v1378_v56 = vld [vmem:[#allocation2 + $0xa8] sm:$0xf] }
 0x30c   : > { %v5517_v32 = vsel %vm11154_vm12, %v5515_v58, %v5516_v5  ;;  %v5678_v50 = vmax.bf16 %v5503_v61, %v12494_v8  ;;  %v5528_v34 = vsel %vm11154_vm12, %v9310_v1, %v5527_v42  ;;  %v5529_v7 = vrot.slane %v5527_v42, 4  ;;  %v2290_v1 = vld [vmem:[#allocation2 + $0xb0] sm:$0x3] }
 0x30d   : > { %v5524_v19 = vsel %vm11154_vm12, %v5522_v48, %v5523_v63  ;;  %v12558_v10 = vmax.bf16 %v5507_v14, %v5399_v18  ;;  %v12560_v55 = vmax.bf16 %v5510_v44, %v5400_v15  ;;  %v12562_v0 = vmax.bf16 %v5514_v40, %v5401_v30  ;;  %v1404_v15 = vld [vmem:[#allocation2 + $0xb0] sm:$0x1] }
 0x30e   : > { %v12564_v29 = vmax.bf16 %v5517_v32, %v5402_v53  ;;  %v12566_v52 = vmax.bf16 %v5521_v9, %v5403_v39  ;;  %v5531_v8 = vsel %vm11154_vm12, %v5529_v7, %v5530_v37  ;;  %v12572_v3 = vmax.bf16 %v5524_v19, %v5404_v27 }
 0x30f   : > { %v12574_v13 = vmax.bf16 %v5528_v34, %v5405_v41  ;;  %v5717_v18 = vmax.bf16 %v12558_v10, %v5677_v49  ;;  %v12577_v30 = vmax.bf16 %v5531_v8, %v5406_v23  ;;  %v5718_v53 = vmax.bf16 %v12560_v55, %v5678_v50  ;;  %v2853_v50 = vld [vmem:[#allocation2 + $0xa8] sm:$0xc] }
 0x310   : > { %v5719_v39 = vmax.bf16 %v12562_v0, %v12558_v10  ;;  %v5720_v21 = vmax.bf16 %v12564_v29, %v12560_v55  ;;  %v1750_v27 = vshrl.u32 %v1378_v56, 16  ;;  %v1753_v54 = vshll.u32 %v1378_v56, 16 }
 0x311   : > { %v5749_v16 = vmax.bf16 %v5717_v18, %v12562_v0  ;;  %v1759_v2 = vshll.u32 %v12568_v20, 16  ;;  %v5750_v47 = vmax.bf16 %v5718_v53, %v12564_v29  ;;  %v1763_v28 = vshrl.u32 %v12568_v20, 16 }
 0x312   : > { %v1769_v31 = vshll.u32 %v1404_v15, 16  ;;  %v9228_v25 = vrot.slane %v1987_v12, 9  ;;  %v1752_v45 = vrot.slane %v1750_v27, 4  ;;  %v1755_v59 = vrot.slane %v1753_v54, 5 }
 0x313   : > { %v5781_v41 = vmax.bf16 %v5749_v16, %v12566_v52  ;;  %v1761_v57 = vrot.slane %v1759_v2, 5  ;;  %v5782_v17 = vmax.bf16 %v5750_v47, %v12572_v3  ;;  %v1765_v23 = vrot.slane %v1763_v28, 4 }
 0x314   : > { %v1771_v43 = vrot.slane %v1769_v31, 5  ;;  %v2156_v38 = vrot.slane %v12568_v20, 5  ;;  %v1756_v11 = vor.u32 %v1755_v59, %v1752_v45  ;;  %v2159_v14 = vrot.slane %v1404_v15, 5 }
 0x315   : > { %v5813_v6 = vmax.bf16 %v5781_v41, %v12574_v13  ;;  %v2622_v33 = vshrl.u32 %v1987_v12, 16  ;;  %v5814_v22 = vmax.bf16 %v5782_v17, %v12577_v30  ;;  %v1766_v60 = vor.u32 %v1765_v23, %v1761_v57  ;;  %v14847_v17 = vld [vmem:[#allocation24_spill] sm:$0xff] }
 0x316   : > { %v2157_v61 = vsel %vm11057_vm7, %v9228_v25, %v2156_v38  ;;  %v2158_v5 = vrot.slane %v2156_v38, 4  ;;  %v1757_v62 = vrot.slane %v1756_v11, 4  ;;  %v2625_v40 = vshll.u32 %v1987_v12, 16 }
 0x317   : > { %v6199_v36 = vrot.slane %v5813_v6, 7  ;;  %v2624_v44 = vrot.slane %v2622_v33, 5  ;;  %v9326_v58 = vcombine.low %v5813_v6, %v5814_v22  ;;  %v6201_v63 = vrot.slane %v5814_v22, 7  ;;  %v14849_v33 = vld [vmem:[#allocation25_spill] sm:$0xff] }
 0x318   : > { %v1767_v9 = vrot.slane %v1766_v60, 4  ;;  %v2160_v48 = vsel %vm11057_vm7, %v2158_v5, %v2159_v14  ;;  %v1762_v32 = vsel %vm11030_vm4, %v1757_v62, %v1761_v57  ;;  %v2627_v37 = vrot.slane %v2625_v40, 6  ;;  %v14846_v57 = vld [vmem:[#allocation22_spill] sm:$0xff]  ;;  %v14848_v14 = vld [vmem:[#allocation23_spill] sm:$0xff] }
 0x319   : > { %v6200_v42 = vrot.slane %v6199_v36, 4  ;;  %6327 = vst [vmem:[#allocation2 + $0x18] sm:$0xe] %v6199_v36  ;;  %v2630_v49 = vrot.slane %v1763_v28, 5  ;;  %9746 = vmatprep.mubr.bf16.mxu1 %v9326_v58  ;;  %v6203_v19 = vrot.slane %v6201_v63, 4  ;;  %v1961_v7 = vmax.bf16 %v1762_v32, %v1378_v56  ;;  %v14852_v32 = vld [vmem:[#allocation28_spill] sm:$0xff] }
 0x31a   : > { %v1772_v34 = vsel %vm11030_vm4, %v1767_v9, %v1771_v43  ;;  %v2631_v8 = vrot.slane %v1759_v2, 6  ;;  %v2628_v12 = vor.u32 %v2627_v37, %v2624_v44  ;;  %v2636_v53 = vshrl.u32 %v2290_v1, 16  ;;  %v3967_v56 = vld [vmem:[#allocation2 + $0x3c] sm:$0xf]  ;;  %v12607_v43 = vld [vmem:[#allocation2 + $0x40] sm:$0xf] }
 0x31b   : > { %v6202_v18 = vsel %vm11257_vm15, %v6200_v42, %v6201_v63  ;;  %v1962_v15 = vmax.bf16 %v1772_v34, %v12568_v20  ;;  %6329 = vst [vmem:[#allocation2 + $0x20] sm:$0x1] %v6203_v19  ;;  %v2264_v16 = vmax.bf16 %v2157_v61, %v1961_v7  ;;  %v2639_v54 = vshll.u32 %v2290_v1, 16  ;;  %v14850_v61 = vld [vmem:[#allocation26_spill] sm:$0xff]  ;;  %v14851_v44 = vld [vmem:[#allocation27_spill] sm:$0xff]  ;;  %v14853_v19 = vld [vmem:[#allocation29_spill] sm:$0xff] }
 0x31c   : > { %6328 = vst [vmem:[#allocation2 + $0x1c] sm:$0xf] %v6202_v18  ;;  %v2632_v27 = vor.u32 %v2631_v8, %v2630_v49  ;;  %v9248_v47 = vrot.slane %v2853_v50, 10  ;;  %v2629_v31 = vrot.slane %v2628_v12, 4  ;;  %v2638_v25 = vrot.slane %v2636_v53, 5 }
 0x31d   : > { %v2265_v28 = vmax.bf16 %v2160_v48, %v1962_v15  ;;  %v3002_v41 = vrot.slane %v12568_v20, 6  ;;  %v2641_v45 = vrot.slane %v2639_v54, 6  ;;  %v3005_v59 = vrot.slane %v2290_v1, 6  ;;  %v4002_v58 = vld [vmem:[#allocation2 + $0x44] sm:$0x1] }
 0x31e   : > { %v2634_v2 = vrot.slane %v2632_v27, 4  ;;  %v3142_v23 = vmax.bf16 %v14847_v17, %v14846_v57  ;;  %v2633_v38 = vsel %vm11119_vm11, %v2629_v31, %v2632_v27  ;;  %v3143_v22 = vmax.bf16 %v14849_v33, %v14848_v14  ;;  %v4582_v48 = vld [vmem:[#allocation2 + $0x3c] sm:$0xe] }
 0x31f   : > { %v3003_v6 = vsel %vm11154_vm12, %v9248_v47, %v3002_v41  ;;  %v3004_v11 = vrot.slane %v3002_v41, 4  ;;  %v2642_v20 = vor.u32 %v2641_v45, %v2638_v25  ;;  %v2827_v60 = vmax.bf16 %v2633_v38, %v2264_v16 }
 0x320   : > { %v3174_v5 = vmax.bf16 %v3142_v23, %v14850_v61  ;;  %v4138_v36 = vshrl.u32 %v3967_v56, 16  ;;  %v3175_v40 = vmax.bf16 %v3143_v22, %v14851_v44  ;;  %v4141_v63 = vshll.u32 %v3967_v56, 16 }
 0x321   : > { %v3006_v62 = vsel %vm11154_vm12, %v3004_v11, %v3005_v59  ;;  %v4147_v9 = vshll.u32 %v12607_v43, 16  ;;  %v2643_v1 = vsel %vm11119_vm11, %v2634_v2, %v2642_v20  ;;  %v12622_v42 = vmax.bf16 %v3003_v6, %v2827_v60  ;;  %v4882_v6 = vld [vmem:[#allocation2 + $0x44] sm:$0x3] }
 0x322   : > { %v3206_v37 = vmax.bf16 %v3174_v5, %v14852_v32  ;;  %v4140_v49 = vrot.slane %v4138_v36, 4  ;;  %v2828_v50 = vmax.bf16 %v2643_v1, %v2265_v28  ;;  %v3207_v34 = vmax.bf16 %v3175_v40, %v14853_v19 }
 0x323   : > { %v4143_v7 = vrot.slane %v4141_v63, 5  ;;  %v4149_v8 = vrot.slane %v4147_v9, 5  ;;  %v4151_v15 = vshrl.u32 %v12607_v43, 16  ;;  %v4157_v12 = vshll.u32 %v4002_v58, 16  ;;  %v5442_v63 = vld [vmem:[#allocation2 + $0x3c] sm:$0xc] }
 0x324   : > { %v3238_v18 = vmax.bf16 %v3206_v37, %v12622_v42  ;;  %v9291_v53 = vrot.slane %v4582_v48, 9  ;;  %v12628_v16 = vmax.bf16 %v3006_v62, %v2828_v50  ;;  %v4694_v54 = vrot.slane %v12607_v43, 5 }
 0x325   : > { %v4144_v27 = vor.u32 %v4143_v7, %v4140_v49  ;;  %v4697_v47 = vrot.slane %v4002_v58, 5  ;;  %v4153_v25 = vrot.slane %v4151_v15, 4  ;;  %v4159_v41 = vrot.slane %v4157_v12, 5 }
 0x326   : > { %v3831_v31 = vrot.slane %v3238_v18, 7  ;;  %v5013_v28 = vshrl.u32 %v4582_v48, 16  ;;  %v3239_v2 = vmax.bf16 %v3207_v34, %v12628_v16  ;;  %v4695_v59 = vsel %vm11057_vm7, %v9291_v53, %v4694_v54 }
 0x327   : > { %v4145_v45 = vrot.slane %v4144_v27, 4  ;;  %v4696_v57 = vrot.slane %v4694_v54, 4  ;;  %v4154_v38 = vor.u32 %v4153_v25, %v4149_v8  ;;  %v5016_v14 = vshll.u32 %v4582_v48, 16 }
 0x328   : > { %v3832_v23 = vrot.slane %v3831_v31, 4  ;;  %3939 = vst [vmem:[#allocation2 + $0x90] sm:$0xe] %v3831_v31  ;;  %v5015_v11 = vrot.slane %v5013_v28, 5  ;;  %v9264_v22 = vcombine.low %v3238_v18, %v3239_v2  ;;  %v3833_v20 = vrot.slane %v3239_v2, 7 }
 0x329   : > { %v4150_v60 = vsel %vm11030_vm4, %v4145_v45, %v4149_v8  ;;  %v4698_v5 = vsel %vm11057_vm7, %v4696_v57, %v4697_v47  ;;  %v4155_v36 = vrot.slane %v4154_v38, 4  ;;  %v5018_v40 = vrot.slane %v5016_v14, 6  ;;  %v12652_v2 = vld [vmem:[#allocation2 + $0xb8] sm:$0xf] }
 0x32a   : > { %v4547_v62 = vmax.bf16 %v4150_v60, %v3967_v56  ;;  %v5021_v58 = vrot.slane %v4151_v15, 5  ;;  %9670 = vmatprep.mubr.bf16.mxu0 %v9264_v22  ;;  %v3834_v1 = vsel %vm11257_vm15, %v3832_v23, %v3833_v20  ;;  %v3835_v37 = vrot.slane %v3833_v20, 4 }
 0x32b   : > { %v5022_v49 = vrot.slane %v4147_v9, 6  ;;  %v5027_v48 = vshrl.u32 %v4882_v6, 16  ;;  %3940 = vst [vmem:[#allocation2 + $0x94] sm:$0xf] %v3834_v1  ;;  %v4160_v50 = vsel %vm11030_vm4, %v4155_v36, %v4159_v41  ;;  %v5019_v7 = vor.u32 %v5018_v40, %v5015_v11  ;;  %v1380_v9 = vld [vmem:[#allocation2 + $0xb4] sm:$0xf] }
 0x32c   : > { %v4847_v34 = vmax.bf16 %v4695_v59, %v4547_v62  ;;  %v5030_v8 = vshll.u32 %v4882_v6, 16  ;;  %3941 = vst [vmem:[#allocation2 + $0x98] sm:$0x1] %v3835_v37  ;;  %v4548_v56 = vmax.bf16 %v4160_v50, %v12607_v43  ;;  %v9311_v12 = vrot.slane %v5442_v63, 10  ;;  %v1988_v11 = vld [vmem:[#allocation2 + $0xb4] sm:$0xe] }
 0x32d   : > { %v5023_v18 = vor.u32 %v5022_v49, %v5021_v58  ;;  %v5029_v15 = vrot.slane %v5027_v48, 5  ;;  %v5020_v53 = vrot.slane %v5019_v7, 4  ;;  %v5534_v54 = vrot.slane %v12607_v43, 6 }
 0x32e   : > { %v5032_v27 = vrot.slane %v5030_v8, 6  ;;  %v5537_v47 = vrot.slane %v4882_v6, 6  ;;  %v4848_v31 = vmax.bf16 %v4698_v5, %v4548_v56  ;;  %v5751_v41 = vmax.bf16 %v5719_v39, %v12566_v52  ;;  %v1405_v39 = vld [vmem:[#allocation2 + $0xbc] sm:$0x1] }
 0x32f   : > { %v5025_v25 = vrot.slane %v5023_v18, 4  ;;  %v5752_v28 = vmax.bf16 %v5720_v21, %v12572_v3  ;;  %v5024_v45 = vsel %vm11119_vm11, %v5020_v53, %v5023_v18  ;;  %v5535_v59 = vsel %vm11154_vm12, %v9311_v12, %v5534_v54 }
 0x330   : > { %v5033_v43 = vor.u32 %v5032_v27, %v5029_v15  ;;  %v5536_v57 = vrot.slane %v5534_v54, 4  ;;  %v5407_v23 = vmax.bf16 %v5024_v45, %v4847_v34  ;;  %v5783_v38 = vmax.bf16 %v5751_v41, %v12574_v13  ;;  %v2291_v45 = vld [vmem:[#allocation2 + $0xbc] sm:$0x3] }
 0x331   : > { %v5784_v10 = vmax.bf16 %v5752_v28, %v12577_v30  ;;  %v1774_v6 = vshrl.u32 %v1380_v9, 16  ;;  %v1777_v14 = vshll.u32 %v1380_v9, 16  ;;  %v1783_v22 = vshll.u32 %v12652_v2, 16 }
 0x332   : > { %v5034_v55 = vsel %vm11119_vm11, %v5025_v25, %v5033_v43  ;;  %v5538_v21 = vsel %vm11154_vm12, %v5536_v57, %v5537_v47  ;;  %v12665_v60 = vmax.bf16 %v5535_v59, %v5407_v23  ;;  %v1787_v36 = vshrl.u32 %v12652_v2, 16 }
 0x333   : > { %v5408_v20 = vmax.bf16 %v5034_v55, %v4848_v31  ;;  %v1776_v5 = vrot.slane %v1774_v6, 4  ;;  %v1779_v62 = vrot.slane %v1777_v14, 5  ;;  %v1785_v40 = vrot.slane %v1783_v22, 5 }
 0x334   : > { %v1793_v58 = vshll.u32 %v1405_v39, 16  ;;  %v9229_v63 = vrot.slane %v1988_v11, 9  ;;  %v5815_v37 = vmax.bf16 %v5783_v38, %v12665_v60  ;;  %v1789_v49 = vrot.slane %v1787_v36, 4  ;;  %v2854_v38 = vld [vmem:[#allocation2 + $0xb4] sm:$0xc] }
 0x335   : > { %v12668_v1 = vmax.bf16 %v5538_v21, %v5408_v20  ;;  %v2163_v48 = vrot.slane %v12652_v2, 5  ;;  %v1780_v50 = vor.u32 %v1779_v62, %v1776_v5  ;;  %v2166_v7 = vrot.slane %v1405_v39, 5  ;;  %v10355_v5 = vld [vmem:[#allocation11 + $0xc0] sm:$0xff]  }
 0x336   : > { %v1795_v34 = vrot.slane %v1793_v58, 5  ;;  %v2645_v8 = vshrl.u32 %v1988_v11, 16  ;;  %v6204_v18 = vrot.slane %v5815_v37, 7  ;;  %v1790_v15 = vor.u32 %v1789_v49, %v1785_v40 }
 0x337   : > { %v5816_v56 = vmax.bf16 %v5784_v10, %v12668_v1  ;;  %v2164_v12 = vsel %vm11057_vm7, %v9229_v63, %v2163_v48  ;;  %v1781_v53 = vrot.slane %v1780_v50, 4  ;;  %v2165_v27 = vrot.slane %v2163_v48, 4  ;;  %v10356_v63 = vld [vmem:[#allocation11 + $0xc8] sm:$0xff]   ;;  %v12685_v50 = vld [vmem:[#allocation2 + $0x48] sm:$0xf] }
 0x338   : > { %v2647_v54 = vrot.slane %v2645_v8, 5  ;;  %v2648_v47 = vshll.u32 %v1988_v11, 16  ;;  %v6205_v25 = vrot.slane %v6204_v18, 4  ;;  %6330 = vst [vmem:[#allocation2 + $0x24] sm:$0xe] %v6204_v18  ;;  %v1791_v28 = vrot.slane %v1790_v15, 4 }
 0x339   : > { %v9327_v31 = vcombine.low %v5815_v37, %v5816_v56  ;;  %v6206_v41 = vrot.slane %v5816_v56, 7  ;;  %v1786_v43 = vsel %vm11030_vm4, %v1781_v53, %v1785_v40  ;;  %v2167_v59 = vsel %vm11057_vm7, %v2165_v27, %v2166_v7  ;;  %v12689_v56 = vld [vmem:[#allocation2 + $0x4c] sm:$0xf] }
 0x33a   : > { %v2650_v57 = vrot.slane %v2648_v47, 6  ;;  %v2653_v23 = vrot.slane %v1787_v36, 5  ;;  %v1796_v6 = vsel %vm11030_vm4, %v1791_v28, %v1795_v34  ;;  %v1963_v11 = vmax.bf16 %v1786_v43, %v1380_v9 }
 0x33b   : > { %9747 = vmatmul.mubr.bf16.vlgmr.msra.gmra.mrb[0].mxu1 %v9327_v31  ;;  %v6207_v10 = vsel %vm11257_vm15, %v6205_v25, %v6206_v41  ;;  %v6208_v39 = vrot.slane %v6206_v41, 4  ;;  %v1964_v55 = vmax.bf16 %v1796_v6, %v12652_v2  ;;  %v2654_v14 = vrot.slane %v1783_v22, 6  ;;  %v4003_v41 = vld [vmem:[#allocation2 + $0x50] sm:$0x1] }
 0x33c   : > { %6331 = vst [vmem:[#allocation2 + $0x28] sm:$0xf] %v6207_v10  ;;  %v2651_v21 = vor.u32 %v2650_v57, %v2647_v54  ;;  %v2659_v20 = vshrl.u32 %v2291_v45, 16  ;;  %9834 = vmatpush3.bf16.msra.mxu1 %v10355_v5  ;;  %v2266_v36 = vmax.bf16 %v2164_v12, %v1963_v11  ;;  %v2662_v62 = vshll.u32 %v2291_v45, 16 }
 0x33d   : > { %6332 = vst [vmem:[#allocation2 + $0x2c] sm:$0x1] %v6208_v39  ;;  %v9249_v40 = vrot.slane %v2854_v38, 10  ;;  %v3009_v58 = vrot.slane %v12652_v2, 6  ;;  %9827 = vmatprep.subr.bf16.mxu1 %v10356_v63  ;;  %v2267_v37 = vmax.bf16 %v2167_v59, %v1964_v55  ;;  %v2655_v48 = vor.u32 %v2654_v14, %v2653_v23  ;;  %v10094_v23 = vld [vmem:[#allocation11 + $0xd8] sm:$0xff]  }
 0x33e   : > { %v2652_v49 = vrot.slane %v2651_v21, 4  ;;  %v2661_v9 = vrot.slane %v2659_v20, 5  ;;  %v2664_v34 = vrot.slane %v2662_v62, 6  ;;  %v3012_v8 = vrot.slane %v2291_v45, 6  ;;  %9784 = vmatprep.subr.bf16.mxu0 %v10094_v23 }
 0x33f   : > { %v3010_v22 = vsel %vm11154_vm12, %v9249_v40, %v3009_v58  ;;  %v3011_v7 = vrot.slane %v3009_v58, 4  ;;  %v2657_v2 = vrot.slane %v2655_v48, 4  ;;  %v3144_v15 = vmax.bf16 %v14850_v61, %v14847_v17  ;;  %9785 = vmatpush3.bf16.msra.mxu0 %v10094_v23 }
 0x340   : > { %v2656_v18 = vsel %vm11119_vm11, %v2652_v49, %v2655_v48  ;;  %v3145_v12 = vmax.bf16 %v14851_v44, %v14849_v33  ;;  %9835 = vmatpush3.bf16.msra.mxu1 %v10356_v63  ;;  %v2665_v53 = vor.u32 %v2664_v34, %v2661_v9  ;;  %v4162_v47 = vshrl.u32 %v12685_v50, 16  ;;  %v4583_v33 = vld [vmem:[#allocation2 + $0x48] sm:$0xe] }
 0x341   : > { %v2829_v27 = vmax.bf16 %v2656_v18, %v2266_v36  ;;  %v3013_v54 = vsel %vm11154_vm12, %v3011_v7, %v3012_v8  ;;  %9828 = vmatprep.subr.bf16.mxu1 %v12484_v35  ;;  %v3176_v31 = vmax.bf16 %v3144_v15, %v14852_v32  ;;  %v4165_v17 = vshll.u32 %v12685_v50, 16 }
 0x342   : > { %v3177_v25 = vmax.bf16 %v3145_v12, %v14853_v19  ;;  %v4171_v28 = vshll.u32 %v12689_v56, 16  ;;  %v2666_v45 = vsel %vm11119_vm11, %v2657_v2, %v2665_v53  ;;  %v4164_v59 = vrot.slane %v4162_v47, 4  ;;  %v4883_v53 = vld [vmem:[#allocation2 + $0x50] sm:$0x3] }
 0x343   : > { %v12707_v43 = vmax.bf16 %v3010_v22, %v2829_v27  ;;  %v4175_v57 = vshrl.u32 %v12689_v56, 16  ;;  %v2830_v38 = vmax.bf16 %v2666_v45, %v2267_v37  ;;  %v3208_v10 = vmax.bf16 %v3176_v31, %v12622_v42 }
 0x344   : > { %v3209_v39 = vmax.bf16 %v3177_v25, %v12628_v16  ;;  %v4167_v6 = vrot.slane %v4165_v17, 5  ;;  %9836 = vmatpush3.bf16.msra.mxu1 %v12484_v35  ;;  %v4173_v11 = vrot.slane %v4171_v28, 5  ;;  %v4181_v21 = vshll.u32 %v4003_v41, 16  ;;  %v5443_v25 = vld [vmem:[#allocation2 + $0x48] sm:$0xc] }
 0x345   : > { %v4177_v55 = vrot.slane %v4175_v57, 4  ;;  %v9292_v14 = vrot.slane %v4583_v33, 9  ;;  %9829 = vmatprep.subr.bf16.mxu1 %v10094_v23  ;;  %v12713_v20 = vmax.bf16 %v3013_v54, %v2830_v38  ;;  %v3240_v5 = vmax.bf16 %v3208_v10, %v12707_v43 }
 0x346   : > { %v4168_v36 = vor.u32 %v4167_v6, %v4164_v59  ;;  %v4701_v62 = vrot.slane %v12689_v56, 5  ;;  %v4183_v58 = vrot.slane %v4181_v21, 5  ;;  %v4704_v63 = vrot.slane %v4003_v41, 5 }
 0x347   : > { %v4178_v40 = vor.u32 %v4177_v55, %v4173_v11  ;;  %v5036_v37 = vshrl.u32 %v4583_v33, 16  ;;  %v3241_v35 = vmax.bf16 %v3209_v39, %v12713_v20  ;;  %v3836_v49 = vrot.slane %v3240_v5, 7  ;;  %v1382_v55 = vld [vmem:[#allocation2 + $0xc0] sm:$0xf] }
 0x348   : > { %v4169_v48 = vrot.slane %v4168_v36, 4  ;;  %v4702_v9 = vsel %vm11057_vm7, %v9292_v14, %v4701_v62  ;;  %9837 = vmatpush3.bf16.msra.mxu1 %v10094_v23  ;;  %v4703_v22 = vrot.slane %v4701_v62, 4  ;;  %v5039_v8 = vshll.u32 %v4583_v33, 16 }
 0x349   : > { %v4179_v34 = vrot.slane %v4178_v40, 4  ;;  %v5038_v7 = vrot.slane %v5036_v37, 5  ;;  %v9265_v18 = vcombine.low %v3240_v5, %v3241_v35  ;;  %v3837_v2 = vrot.slane %v3836_v49, 4  ;;  %3942 = vst [vmem:[#allocation2 + $0x9c] sm:$0xe] %v3836_v49 }
 0x34a   : > { %v3838_v15 = vrot.slane %v3241_v35, 7  ;;  %v4174_v12 = vsel %vm11030_vm4, %v4169_v48, %v4173_v11  ;;  %v4705_v47 = vsel %vm11057_vm7, %v4703_v22, %v4704_v63  ;;  %v5041_v31 = vrot.slane %v5039_v8, 6  ;;  %v1989_v22 = vld [vmem:[#allocation2 + $0xc0] sm:$0xe] }
 0x34b   : > { %v4184_v27 = vsel %vm11030_vm4, %v4179_v34, %v4183_v58  ;;  %v4549_v54 = vmax.bf16 %v4174_v12, %v12685_v50  ;;  %9671 = vmatmul.mubr.bf16.gmra.mrb[52].mxu0 %v9265_v18  ;;  %v5044_v45 = vrot.slane %v4175_v57, 5  ;;  %v5045_v38 = vrot.slane %v4171_v28, 6  ;;  %v12735_v58 = vld [vmem:[#allocation2 + $0xc4] sm:$0xf] }
 0x34c   : > { %v3839_v41 = vsel %vm11257_vm15, %v3837_v2, %v3838_v15  ;;  %v3840_v17 = vrot.slane %v3838_v15, 4  ;;  %v4550_v33 = vmax.bf16 %v4184_v27, %v12689_v56  ;;  %v5042_v23 = vor.u32 %v5041_v31, %v5038_v7  ;;  %v1406_v7 = vld [vmem:[#allocation2 + $0xc8] sm:$0x1] }
 0x34d   : > { %3943 = vst [vmem:[#allocation2 + $0xa0] sm:$0xf] %v3839_v41  ;;  %v4849_v59 = vmax.bf16 %v4702_v9, %v4549_v54  ;;  %v5050_v10 = vshrl.u32 %v4883_v53, 16  ;;  %v5053_v39 = vshll.u32 %v4883_v53, 16  ;;  %v9312_v6 = vrot.slane %v5443_v25, 10 }
 0x34e   : > { %3944 = vst [vmem:[#allocation2 + $0xa4] sm:$0x1] %v3840_v17  ;;  %v4850_v50 = vmax.bf16 %v4705_v47, %v4550_v33  ;;  %v5541_v11 = vrot.slane %v12689_v56, 6  ;;  %v5043_v21 = vrot.slane %v5042_v23, 4  ;;  %v5046_v14 = vor.u32 %v5045_v38, %v5044_v45 }
 0x34f   : > { %v5052_v5 = vrot.slane %v5050_v10, 5  ;;  %v5544_v36 = vrot.slane %v4883_v53, 6  ;;  %v5055_v62 = vrot.slane %v5053_v39, 6  ;;  %v5721_v28 = vmax.bf16 %v12566_v52, %v12562_v0 }
 0x350   : > { %v5542_v57 = vsel %vm11154_vm12, %v9312_v6, %v5541_v11  ;;  %v5543_v40 = vrot.slane %v5541_v11, 4  ;;  %v5047_v63 = vsel %vm11119_vm11, %v5043_v21, %v5046_v14  ;;  %v5048_v37 = vrot.slane %v5046_v14, 4 }
 0x351   : > { %v5722_v56 = vmax.bf16 %v12572_v3, %v12564_v29  ;;  %v1798_v35 = vshrl.u32 %v1382_v55, 16  ;;  %v5056_v49 = vor.u32 %v5055_v62, %v5052_v5  ;;  %v5409_v48 = vmax.bf16 %v5047_v63, %v4849_v59 }
 0x352   : > { %v5545_v9 = vsel %vm11154_vm12, %v5543_v40, %v5544_v36  ;;  %v5753_v34 = vmax.bf16 %v5721_v28, %v12574_v13  ;;  %v1801_v18 = vshll.u32 %v1382_v55, 16  ;;  %v1807_v2 = vshll.u32 %v12735_v58, 16 }
 0x353   : > { %v5754_v0 = vmax.bf16 %v5722_v56, %v12577_v30  ;;  %v1800_v8 = vrot.slane %v1798_v35, 4  ;;  %v5057_v15 = vsel %vm11119_vm11, %v5048_v37, %v5056_v49  ;;  %v12748_v29 = vmax.bf16 %v5542_v57, %v5409_v48  ;;  %v2292_v35 = vld [vmem:[#allocation2 + $0xc8] sm:$0x3] }
 0x354   : > { %v5785_v12 = vmax.bf16 %v5753_v34, %v12665_v60  ;;  %v1811_v53 = vshrl.u32 %v12735_v58, 16  ;;  %v5410_v27 = vmax.bf16 %v5057_v15, %v4850_v50  ;;  %v1803_v47 = vrot.slane %v1801_v18, 5 }
 0x355   : > { %v5786_v54 = vmax.bf16 %v5754_v0, %v12668_v1  ;;  %v1809_v31 = vrot.slane %v1807_v2, 5  ;;  %v1817_v17 = vshll.u32 %v1406_v7, 16  ;;  %v9230_v33 = vrot.slane %v1989_v22, 9  ;;  %v2855_v0 = vld [vmem:[#allocation2 + $0xc0] sm:$0xc] }
 0x356   : > { %v5817_v25 = vmax.bf16 %v5785_v12, %v12748_v29  ;;  %v1813_v41 = vrot.slane %v1811_v53, 4  ;;  %v12754_v45 = vmax.bf16 %v5545_v9, %v5410_v27  ;;  %v1804_v59 = vor.u32 %v1803_v47, %v1800_v8 }
 0x357   : > { %v2170_v23 = vrot.slane %v12735_v58, 5  ;;  %v2173_v38 = vrot.slane %v1406_v7, 5  ;;  %v1819_v6 = vrot.slane %v1817_v17, 5  ;;  %v2668_v11 = vshrl.u32 %v1989_v22, 16 }
 0x358   : > { %v6209_v10 = vrot.slane %v5817_v25, 7  ;;  %v1814_v39 = vor.u32 %v1813_v41, %v1809_v31  ;;  %v5818_v50 = vmax.bf16 %v5786_v54, %v12754_v45  ;;  %v1805_v21 = vrot.slane %v1804_v59, 4 }
 0x359   : > { %v2171_v14 = vsel %vm11057_vm7, %v9230_v33, %v2170_v23  ;;  %v2172_v5 = vrot.slane %v2170_v23, 4  ;;  %v2670_v57 = vrot.slane %v2668_v11, 5  ;;  %v2671_v40 = vshll.u32 %v1989_v22, 16 }
 0x35a   : > { %v6210_v36 = vrot.slane %v6209_v10, 4  ;;  %6333 = vst [vmem:[#allocation2 + $0x30] sm:$0xe] %v6209_v10  ;;  %v1815_v62 = vrot.slane %v1814_v39, 4  ;;  %v9328_v28 = vcombine.low %v5817_v25, %v5818_v50  ;;  %v6211_v63 = vrot.slane %v5818_v50, 7 }
 0x35b   : > { %v1810_v37 = vsel %vm11030_vm4, %v1805_v21, %v1809_v31  ;;  %v2174_v56 = vsel %vm11057_vm7, %v2172_v5, %v2173_v38  ;;  %v2673_v9 = vrot.slane %v2671_v40, 6  ;;  %v2676_v34 = vrot.slane %v1811_v53, 5  ;;  %v3971_v25 = vld [vmem:[#allocation2 + $0x54] sm:$0xf]  ;;  %v12774_v39 = vld [vmem:[#allocation2 + $0x58] sm:$0xf] }
 0x35c   : > { %v1820_v49 = vsel %vm11030_vm4, %v1815_v62, %v1819_v6  ;;  %v1965_v48 = vmax.bf16 %v1810_v37, %v1382_v55  ;;  %9750 = vmatprep.mubr.bf16.mxu1 %v9328_v28  ;;  %v6212_v22 = vsel %vm11257_vm15, %v6210_v36, %v6211_v63  ;;  %v6213_v7 = vrot.slane %v6211_v63, 4  ;;  %v4004_v36 = vld [vmem:[#allocation2 + $0x5c] sm:$0x1]  ;;  %v4584_v63 = vld [vmem:[#allocation2 + $0x54] sm:$0xe] }
 0x35d   : > { %v1966_v8 = vmax.bf16 %v1820_v49, %v12735_v58  ;;  %v2677_v18 = vrot.slane %v1807_v2, 6  ;;  %6334 = vst [vmem:[#allocation2 + $0x34] sm:$0xf] %v6212_v22  ;;  %v2674_v12 = vor.u32 %v2673_v9, %v2670_v57  ;;  %v2682_v27 = vshrl.u32 %v2292_v35, 16  ;;  %v10095_v49 = vld [vmem:[#allocation11 + $0xe0] sm:$0xff]  }
 0x35e   : > { %v2268_v15 = vmax.bf16 %v2171_v14, %v1965_v48  ;;  %v2685_v54 = vshll.u32 %v2292_v35, 16  ;;  %6335 = vst [vmem:[#allocation2 + $0x38] sm:$0x1] %v6213_v7  ;;  %v9250_v55 = vrot.slane %v2855_v0, 10  ;;  %v3016_v53 = vrot.slane %v12735_v58, 6  ;;  %9786 = vmatprep.subr.bf16.mxu0 %v10095_v49  ;;  %9830 = vmatprep.subr.bf16.mxu1 %v10095_v49 }
 0x35f   : > { %v2269_v47 = vmax.bf16 %v2174_v56, %v1966_v8  ;;  %v2678_v31 = vor.u32 %v2677_v18, %v2676_v34  ;;  %v2675_v41 = vrot.slane %v2674_v12, 4  ;;  %v2684_v17 = vrot.slane %v2682_v27, 5  ;;  %9787 = vmatpush3.bf16.msra.mxu0 %v10095_v49  ;;  %9838 = vmatpush3.bf16.msra.mxu1 %v10095_v49 }
 0x360   : > { %v2687_v33 = vrot.slane %v2685_v54, 6  ;;  %v3019_v59 = vrot.slane %v2292_v35, 6  ;;  %v3017_v2 = vsel %vm11154_vm12, %v9250_v55, %v3016_v53  ;;  %v3018_v38 = vrot.slane %v3016_v53, 4 }
 0x361   : > { %v2680_v23 = vrot.slane %v2678_v31, 4  ;;  %v3146_v10 = vmax.bf16 %v14852_v32, %v14850_v61  ;;  %v2679_v6 = vsel %vm11119_vm11, %v2675_v41, %v2678_v31  ;;  %v3147_v58 = vmax.bf16 %v14853_v19, %v14851_v44 }
 0x362   : > { %v2688_v11 = vor.u32 %v2687_v33, %v2684_v17  ;;  %v4186_v50 = vshrl.u32 %v3971_v25, 16  ;;  %v2831_v21 = vmax.bf16 %v2679_v6, %v2268_v15  ;;  %v3020_v14 = vsel %vm11154_vm12, %v3018_v38, %v3019_v59  ;;  %v4884_v6 = vld [vmem:[#allocation2 + $0x5c] sm:$0x3] }
 0x363   : > { %v3178_v5 = vmax.bf16 %v3146_v10, %v12622_v42  ;;  %v4189_v62 = vshll.u32 %v3971_v25, 16  ;;  %v3179_v57 = vmax.bf16 %v3147_v58, %v12628_v16  ;;  %v4195_v28 = vshll.u32 %v12774_v39, 16 }
 0x364   : > { %v2689_v61 = vsel %vm11119_vm11, %v2680_v23, %v2688_v11  ;;  %v4188_v40 = vrot.slane %v4186_v50, 4  ;;  %v12787_v44 = vmax.bf16 %v3017_v2, %v2831_v21  ;;  %v4199_v34 = vshrl.u32 %v12774_v39, 16 }
 0x365   : > { %v2832_v37 = vmax.bf16 %v2689_v61, %v2269_v47  ;;  %v3210_v56 = vmax.bf16 %v3178_v5, %v12707_v43  ;;  %v4191_v35 = vrot.slane %v4189_v62, 5  ;;  %v3211_v48 = vmax.bf16 %v3179_v57, %v12713_v20 }
 0x366   : > { %v4197_v9 = vrot.slane %v4195_v28, 5  ;;  %v4205_v0 = vshll.u32 %v4004_v36, 16  ;;  %v9293_v18 = vrot.slane %v4584_v63, 9  ;;  %v4201_v15 = vrot.slane %v4199_v34, 4 }
 0x367   : > { %v12792_v22 = vmax.bf16 %v3020_v14, %v2832_v37  ;;  %v3242_v7 = vmax.bf16 %v3210_v56, %v12787_v44  ;;  %v4192_v8 = vor.u32 %v4191_v35, %v4188_v40  ;;  %v4708_v27 = vrot.slane %v12774_v39, 5  ;;  %v5444_v14 = vld [vmem:[#allocation2 + $0x54] sm:$0xc] }
 0x368   : > { %v4207_v12 = vrot.slane %v4205_v0, 5  ;;  %v4711_v54 = vrot.slane %v4004_v36, 5  ;;  %v5059_v53 = vshrl.u32 %v4584_v63, 16  ;;  %v4202_v41 = vor.u32 %v4201_v15, %v4197_v9 }
 0x369   : > { %v3243_v47 = vmax.bf16 %v3211_v48, %v12792_v22  ;;  %v3841_v31 = vrot.slane %v3242_v7, 7  ;;  %v4193_v55 = vrot.slane %v4192_v8, 4  ;;  %v4709_v17 = vsel %vm11057_vm7, %v9293_v18, %v4708_v27  ;;  %v1384_v8 = vld [vmem:[#allocation2 + $0xcc] sm:$0xf] }
 0x36a   : > { %v4710_v33 = vrot.slane %v4708_v27, 4  ;;  %v5062_v59 = vshll.u32 %v4584_v63, 16  ;;  %v4203_v11 = vrot.slane %v4202_v41, 4  ;;  %v5061_v21 = vrot.slane %v5059_v53, 5 }
 0x36b   : > { %v9266_v23 = vcombine.low %v3242_v7, %v3243_v47  ;;  %v3842_v2 = vrot.slane %v3841_v31, 4  ;;  %v3843_v38 = vrot.slane %v3243_v47, 7  ;;  %3945 = vst [vmem:[#allocation2 + $0xa8] sm:$0xe] %v3841_v31  ;;  %v4198_v10 = vsel %vm11030_vm4, %v4193_v55, %v4197_v9  ;;  %v12815_v31 = vld [vmem:[#allocation2 + $0xd0] sm:$0xf] }
 0x36c   : > { %v4551_v58 = vmax.bf16 %v4198_v10, %v3971_v25  ;;  %v4712_v50 = vsel %vm11057_vm7, %v4710_v33, %v4711_v54  ;;  %v5064_v62 = vrot.slane %v5062_v59, 6  ;;  %v5067_v61 = vrot.slane %v4199_v34, 5  ;;  %v1407_v59 = vld [vmem:[#allocation2 + $0xd4] sm:$0x1] }
 0x36d   : > { %9674 = vmatprep.mubr.bf16.mxu0 %v9266_v23  ;;  %v3844_v5 = vsel %vm11257_vm15, %v3842_v2, %v3843_v38  ;;  %v3845_v36 = vrot.slane %v3843_v38, 4  ;;  %v4208_v57 = vsel %vm11030_vm4, %v4203_v11, %v4207_v12  ;;  %v5068_v63 = vrot.slane %v4195_v28, 6  ;;  %v1990_v2 = vld [vmem:[#allocation2 + $0xcc] sm:$0xe]  ;;  %v10096_v11 = vld [vmem:[#allocation11 + $0xe8] sm:$0xff]  }
 0x36e   : > { %3946 = vst [vmem:[#allocation2 + $0xac] sm:$0xf] %v3844_v5  ;;  %v4851_v40 = vmax.bf16 %v4709_v17, %v4551_v58  ;;  %v5073_v37 = vshrl.u32 %v4884_v6, 16  ;;  %v4552_v25 = vmax.bf16 %v4208_v57, %v12774_v39  ;;  %v5065_v56 = vor.u32 %v5064_v62, %v5061_v21  ;;  %9788 = vmatprep.subr.bf16.mxu0 %v10096_v11 }
 0x36f   : > { %3947 = vst [vmem:[#allocation2 + $0xb0] sm:$0x1] %v3845_v36  ;;  %v5076_v35 = vshll.u32 %v4884_v6, 16  ;;  %v9313_v49 = vrot.slane %v5444_v14, 10  ;;  %v5069_v48 = vor.u32 %v5068_v63, %v5067_v61  ;;  %v5548_v0 = vrot.slane %v12774_v39, 6  ;;  %9831 = vmatprep.subr.bf16.mxu1 %v10096_v11  ;;  %9789 = vmatpush3.bf16.msra.mxu0 %v10096_v11 }
 0x370   : > { %v5075_v9 = vrot.slane %v5073_v37, 5  ;;  %v5551_v7 = vrot.slane %v4884_v6, 6  ;;  %v4852_v34 = vmax.bf16 %v4712_v50, %v4552_v25  ;;  %v5066_v18 = vrot.slane %v5065_v56, 4  ;;  %9839 = vmatpush3.bf16.msra.mxu1 %v10096_v11 }
 0x371   : > { %v5078_v15 = vrot.slane %v5076_v35, 6  ;;  %v5723_v12 = vmax.bf16 %v12574_v13, %v12566_v52  ;;  %v5071_v28 = vrot.slane %v5069_v48, 4  ;;  %v5549_v27 = vsel %vm11154_vm12, %v9313_v49, %v5548_v0 }
 0x372   : > { %v5550_v54 = vrot.slane %v5548_v0, 4  ;;  %v5724_v47 = vmax.bf16 %v12577_v30, %v12572_v3  ;;  %v5070_v39 = vsel %vm11119_vm11, %v5066_v18, %v5069_v48  ;;  %v1822_v41 = vshrl.u32 %v1384_v8, 16 }
 0x373   : > { %v5079_v55 = vor.u32 %v5078_v15, %v5075_v9  ;;  %v5755_v53 = vmax.bf16 %v5723_v12, %v12665_v60  ;;  %v5411_v17 = vmax.bf16 %v5070_v39, %v4851_v40  ;;  %v1825_v23 = vshll.u32 %v1384_v8, 16  ;;  %v2293_v39 = vld [vmem:[#allocation2 + $0xd4] sm:$0x3] }
 0x374   : > { %v5552_v52 = vsel %vm11154_vm12, %v5550_v54, %v5551_v7  ;;  %v5756_v33 = vmax.bf16 %v5724_v47, %v12668_v1  ;;  %v1824_v10 = vrot.slane %v1822_v41, 4  ;;  %v1831_v6 = vshll.u32 %v12815_v31, 16 }
 0x375   : > { %v5080_v3 = vsel %vm11119_vm11, %v5071_v28, %v5079_v55  ;;  %v5787_v38 = vmax.bf16 %v5755_v53, %v12748_v29  ;;  %v12827_v50 = vmax.bf16 %v5549_v27, %v5411_v17  ;;  %v1827_v14 = vrot.slane %v1825_v23, 5 }
 0x376   : > { %v5412_v58 = vmax.bf16 %v5080_v3, %v4852_v34  ;;  %v5788_v21 = vmax.bf16 %v5756_v33, %v12754_v45  ;;  %v1833_v5 = vrot.slane %v1831_v6, 5  ;;  %v1835_v36 = vshrl.u32 %v12815_v31, 16 }
 0x377   : > { %v1841_v62 = vshll.u32 %v1407_v59, 16  ;;  %v9231_v61 = vrot.slane %v1990_v2, 9  ;;  %v5819_v40 = vmax.bf16 %v5787_v38, %v12827_v50  ;;  %v1828_v63 = vor.u32 %v1827_v14, %v1824_v10 }
 0x378   : > { %v12831_v57 = vmax.bf16 %v5552_v52, %v5412_v58  ;;  %v2177_v37 = vrot.slane %v12815_v31, 5  ;;  %v1837_v25 = vrot.slane %v1835_v36, 4  ;;  %v2180_v35 = vrot.slane %v1407_v59, 5  ;;  %v2856_v52 = vld [vmem:[#allocation2 + $0xcc] sm:$0xc] }
 0x379   : > { %v1843_v56 = vrot.slane %v1841_v62, 5  ;;  %v2691_v49 = vshrl.u32 %v1990_v2, 16  ;;  %v6214_v9 = vrot.slane %v5819_v40, 7  ;;  %v1829_v0 = vrot.slane %v1828_v63, 4 }
 0x37a   : > { %v5820_v48 = vmax.bf16 %v5788_v21, %v12831_v57  ;;  %v2178_v7 = vsel %vm11057_vm7, %v9231_v61, %v2177_v37  ;;  %v1838_v34 = vor.u32 %v1837_v25, %v1833_v5  ;;  %v2179_v18 = vrot.slane %v2177_v37, 4 }
 0x37b   : > { %v2693_v15 = vrot.slane %v2691_v49, 5  ;;  %v2694_v12 = vshll.u32 %v1990_v2, 16  ;;  %v6215_v27 = vrot.slane %v6214_v9, 4  ;;  %6336 = vst [vmem:[#allocation2 + $0x3c] sm:$0xe] %v6214_v9  ;;  %v1834_v47 = vsel %vm11030_vm4, %v1829_v0, %v1833_v5 }
 0x37c   : > { %v9329_v28 = vcombine.low %v5819_v40, %v5820_v48  ;;  %v6216_v54 = vrot.slane %v5820_v48, 7  ;;  %v1839_v55 = vrot.slane %v1838_v34, 4  ;;  %v1967_v53 = vmax.bf16 %v1834_v47, %v1384_v8 }
 0x37d   : > { %v2181_v41 = vsel %vm11057_vm7, %v2179_v18, %v2180_v35  ;;  %v2696_v17 = vrot.slane %v2694_v12, 6  ;;  %v2699_v23 = vrot.slane %v1835_v36, 5  ;;  %v2700_v2 = vrot.slane %v1831_v6, 6  ;;  %v1386_v36 = vld [vmem:[#allocation2 + $0xd8] sm:$0xf] }
 0x37e   : > { %9751 = vmatmul.mubr.bf16.gmra.mrb[4].mxu1 %v9329_v28  ;;  %v6217_v33 = vsel %vm11257_vm15, %v6215_v27, %v6216_v54  ;;  %v6218_v59 = vrot.slane %v6216_v54, 4  ;;  %v1844_v3 = vsel %vm11030_vm4, %v1839_v55, %v1843_v56  ;;  %v2270_v38 = vmax.bf16 %v2178_v7, %v1967_v53  ;;  %v12850_v56 = vld [vmem:[#allocation2 + $0xdc] sm:$0xf] }
 0x37f   : > { %6337 = vst [vmem:[#allocation2 + $0x40] sm:$0xf] %v6217_v33  ;;  %v2697_v10 = vor.u32 %v2696_v17, %v2693_v15  ;;  %v2705_v11 = vshrl.u32 %v2293_v39, 16  ;;  %v1968_v8 = vmax.bf16 %v1844_v3, %v12815_v31  ;;  %v2701_v58 = vor.u32 %v2700_v2, %v2699_v23  ;;  %v1408_v15 = vld [vmem:[#allocation2 + $0xe0] sm:$0x1] }
 0x380   : > { %6338 = vst [vmem:[#allocation2 + $0x44] sm:$0x1] %v6218_v59  ;;  %v2708_v21 = vshll.u32 %v2293_v39, 16  ;;  %v9251_v14 = vrot.slane %v2856_v52, 10  ;;  %v3023_v61 = vrot.slane %v12815_v31, 6  ;;  %v3026_v40 = vrot.slane %v2293_v39, 6 }
 0x381   : > { %v2698_v5 = vrot.slane %v2697_v10, 4  ;;  %v2707_v62 = vrot.slane %v2705_v11, 5  ;;  %v2271_v6 = vmax.bf16 %v2181_v41, %v1968_v8  ;;  %v2703_v63 = vrot.slane %v2701_v58, 4  ;;  %v10097_v39 = vld [vmem:[#allocation11 + $0xf0] sm:$0xff]   ;;  %v1991_v52 = vld [vmem:[#allocation2 + $0xd8] sm:$0xe] }
 0x382   : > { %v2710_v37 = vrot.slane %v2708_v21, 6  ;;  %v3148_v25 = vmax.bf16 %v12622_v42, %v14852_v32  ;;  %v3024_v49 = vsel %vm11154_vm12, %v9251_v14, %v3023_v61  ;;  %v3025_v48 = vrot.slane %v3023_v61, 4  ;;  %9790 = vmatprep.subr.bf16.mxu0 %v10097_v39  ;;  %9832 = vmatprep.subr.bf16.mxu1 %v10097_v39 }
 0x383   : > { %v2702_v35 = vsel %vm11119_vm11, %v2698_v5, %v2701_v58  ;;  %v3149_v31 = vmax.bf16 %v12628_v16, %v14853_v19  ;;  %v1846_v34 = vshrl.u32 %v1386_v36, 16  ;;  %v1849_v12 = vshll.u32 %v1386_v36, 16  ;;  %9791 = vmatpush3.bf16.msra.mxu0 %v10097_v39  ;;  %9840 = vmatpush3.bf16.msra.mxu1 %v10097_v39 }
 0x384   : > { %v2711_v9 = vor.u32 %v2710_v37, %v2707_v62  ;;  %v2833_v0 = vmax.bf16 %v2702_v35, %v2270_v38  ;;  %v3180_v7 = vmax.bf16 %v3148_v25, %v12707_v43  ;;  %v3027_v32 = vsel %vm11154_vm12, %v3025_v48, %v3026_v40  ;;  %v2294_v37 = vld [vmem:[#allocation2 + $0xe0] sm:$0x3] }
 0x385   : > { %v3181_v18 = vmax.bf16 %v3149_v31, %v12713_v20  ;;  %v1855_v28 = vshll.u32 %v12850_v56, 16  ;;  %v1848_v47 = vrot.slane %v1846_v34, 4  ;;  %v1851_v41 = vrot.slane %v1849_v12, 5 }
 0x386   : > { %v2712_v27 = vsel %vm11119_vm11, %v2703_v63, %v2711_v9  ;;  %v12865_v54 = vmax.bf16 %v3024_v49, %v2833_v0  ;;  %v3212_v19 = vmax.bf16 %v3180_v7, %v12787_v44  ;;  %v1859_v59 = vshrl.u32 %v12850_v56, 16 }
 0x387   : > { %v2834_v55 = vmax.bf16 %v2712_v27, %v2271_v6  ;;  %v3213_v53 = vmax.bf16 %v3181_v18, %v12792_v22  ;;  %v1857_v17 = vrot.slane %v1855_v28, 5  ;;  %v1865_v23 = vshll.u32 %v1408_v15, 16  ;;  %v2857_v18 = vld [vmem:[#allocation2 + $0xd8] sm:$0xc] }
 0x388   : > { %v3244_v33 = vmax.bf16 %v3212_v19, %v12865_v54  ;;  %v9232_v2 = vrot.slane %v1991_v52, 9  ;;  %v1852_v38 = vor.u32 %v1851_v41, %v1848_v47  ;;  %v2184_v10 = vrot.slane %v12850_v56, 5 }
 0x389   : > { %v12871_v3 = vmax.bf16 %v3027_v32, %v2834_v55  ;;  %v2187_v11 = vrot.slane %v1408_v15, 5  ;;  %v1861_v58 = vrot.slane %v1859_v59, 4  ;;  %v1867_v21 = vrot.slane %v1865_v23, 5 }
 0x38a   : > { %v3846_v8 = vrot.slane %v3244_v33, 7  ;;  %v2714_v14 = vshrl.u32 %v1991_v52, 16  ;;  %v1853_v62 = vrot.slane %v1852_v38, 4  ;;  %v2185_v61 = vsel %vm11057_vm7, %v9232_v2, %v2184_v10 }
 0x38b   : > { %v3245_v5 = vmax.bf16 %v3213_v53, %v12871_v3  ;;  %v2186_v40 = vrot.slane %v2184_v10, 4  ;;  %v1862_v63 = vor.u32 %v1861_v58, %v1857_v17  ;;  %v2717_v35 = vshll.u32 %v1991_v52, 16  ;;  %v12893_v58 = vld [vmem:[#allocation2 + $0x64] sm:$0xf] }
 0x38c   : > { %v3847_v6 = vrot.slane %v3846_v8, 4  ;;  %3948 = vst [vmem:[#allocation2 + $0xb4] sm:$0xe] %v3846_v8  ;;  %v2716_v25 = vrot.slane %v2714_v14, 5  ;;  %v1858_v31 = vsel %vm11030_vm4, %v1853_v62, %v1857_v17  ;;  %v2722_v32 = vrot.slane %v1859_v59, 5 }
 0x38d   : > { %v9267_v49 = vcombine.low %v3244_v33, %v3245_v5  ;;  %v3848_v48 = vrot.slane %v3245_v5, 7  ;;  %v2188_v9 = vsel %vm11057_vm7, %v2186_v40, %v2187_v11  ;;  %v1863_v0 = vrot.slane %v1862_v63, 4  ;;  %v4005_v63 = vld [vmem:[#allocation2 + $0x68] sm:$0x1] }
 0x38e   : > { %v1969_v7 = vmax.bf16 %v1858_v31, %v1386_v36  ;;  %v2719_v34 = vrot.slane %v2717_v35, 6  ;;  %v2723_v27 = vrot.slane %v1855_v28, 6  ;;  %v2728_v19 = vshrl.u32 %v2294_v37, 16  ;;  %v12887_v28 = vld [vmem:[#allocation2 + $0x60] sm:$0xf] }
 0x38f   : > { %9675 = vmatmul.mubr.bf16.gmra.mrb[56].mxu0 %v9267_v49  ;;  %v3849_v15 = vsel %vm11257_vm15, %v3847_v6, %v3848_v48  ;;  %v3850_v12 = vrot.slane %v3848_v48, 4  ;;  %v1868_v47 = vsel %vm11030_vm4, %v1863_v0, %v1867_v21  ;;  %v2731_v53 = vshll.u32 %v2294_v37, 16  ;;  %v4585_v35 = vld [vmem:[#allocation2 + $0x60] sm:$0xe]  ;;  %v10098_v0 = vld [vmem:[#allocation11 + $0xf8] sm:$0xff]  }
 0x390   : > { %3949 = vst [vmem:[#allocation2 + $0xb8] sm:$0xf] %v3849_v15  ;;  %v2272_v39 = vmax.bf16 %v2185_v61, %v1969_v7  ;;  %v2720_v55 = vor.u32 %v2719_v34, %v2716_v25  ;;  %v1970_v36 = vmax.bf16 %v1868_v47, %v12850_v56  ;;  %v2724_v41 = vor.u32 %v2723_v27, %v2722_v32 }
 0x391   : > { %3950 = vst [vmem:[#allocation2 + $0xbc] sm:$0x1] %v3850_v12  ;;  %v2730_v17 = vrot.slane %v2728_v19, 5  ;;  %v9252_v52 = vrot.slane %v2857_v18, 10  ;;  %v2733_v59 = vrot.slane %v2731_v53, 6  ;;  %v3030_v23 = vrot.slane %v12850_v56, 6  ;;  %9792 = vmatprep.subr.bf16.mxu0 %v10098_v0  ;;  %9833 = vmatprep.subr.bf16.mxu1 %v10098_v0 }
 0x392   : > { %v2721_v33 = vrot.slane %v2720_v55, 4  ;;  %v3033_v2 = vrot.slane %v2294_v37, 6  ;;  %v2273_v38 = vmax.bf16 %v2188_v9, %v1970_v36  ;;  %v2726_v10 = vrot.slane %v2724_v41, 4  ;;  %9793 = vmatpush3.bf16.msra.mxu0 %v10098_v0  ;;  %9841 = vmatpush3.bf16.msra.mxu1 %v10098_v0 }
 0x393   : > { %v3150_v11 = vmax.bf16 %v12707_v43, %v12622_v42  ;;  %v3151_v8 = vmax.bf16 %v12713_v20, %v12628_v16  ;;  %v2734_v14 = vor.u32 %v2733_v59, %v2730_v17  ;;  %v3031_v56 = vsel %vm11154_vm12, %v9252_v52, %v3030_v23 }
 0x394   : > { %v2725_v21 = vsel %vm11119_vm11, %v2721_v33, %v2724_v41  ;;  %v3032_v5 = vrot.slane %v3030_v23, 4  ;;  %v4210_v42 = vshrl.u32 %v12887_v28, 16  ;;  %v4213_v37 = vshll.u32 %v12887_v28, 16 }
 0x395   : > { %v2835_v62 = vmax.bf16 %v2725_v21, %v2272_v39  ;;  %v3182_v61 = vmax.bf16 %v3150_v11, %v12787_v44  ;;  %v3183_v40 = vmax.bf16 %v3151_v8, %v12792_v22  ;;  %v2735_v16 = vsel %vm11119_vm11, %v2726_v10, %v2734_v14  ;;  %v4885_v8 = vld [vmem:[#allocation2 + $0x68] sm:$0x3] }
 0x396   : > { %v3034_v6 = vsel %vm11154_vm12, %v3032_v5, %v3033_v2  ;;  %v4219_v25 = vshll.u32 %v12893_v58, 16  ;;  %v2836_v49 = vmax.bf16 %v2735_v16, %v2273_v38  ;;  %v4212_v7 = vrot.slane %v4210_v42, 4 }
 0x397   : > { %v12908_v48 = vmax.bf16 %v3031_v56, %v2835_v62  ;;  %v3214_v31 = vmax.bf16 %v3182_v61, %v12865_v54  ;;  %v3215_v9 = vmax.bf16 %v3183_v40, %v12871_v3  ;;  %v4215_v34 = vrot.slane %v4213_v37, 5  ;;  %v5445_v61 = vld [vmem:[#allocation2 + $0x60] sm:$0xc] }
 0x398   : > { %v4221_v32 = vrot.slane %v4219_v25, 5  ;;  %v4223_v18 = vshrl.u32 %v12893_v58, 16  ;;  %v12913_v15 = vmax.bf16 %v3034_v6, %v2836_v49  ;;  %v4229_v27 = vshll.u32 %v4005_v63, 16 }
 0x399   : > { %v3246_v12 = vmax.bf16 %v3214_v31, %v12908_v48  ;;  %v9294_v19 = vrot.slane %v4585_v35, 9  ;;  %v4216_v47 = vor.u32 %v4215_v34, %v4212_v7  ;;  %v4715_v55 = vrot.slane %v12893_v58, 5 }
 0x39a   : > { %v4225_v39 = vrot.slane %v4223_v18, 4  ;;  %v4718_v53 = vrot.slane %v4005_v63, 5  ;;  %v3247_v36 = vmax.bf16 %v3215_v9, %v12913_v15  ;;  %v4231_v17 = vrot.slane %v4229_v27, 5 }
 0x39b   : > { %v3851_v41 = vrot.slane %v3246_v12, 7  ;;  %v5082_v52 = vshrl.u32 %v4585_v35, 16  ;;  %v4217_v33 = vrot.slane %v4216_v47, 4  ;;  %v4716_v23 = vsel %vm11057_vm7, %v9294_v19, %v4715_v55 }
 0x39c   : > { %v4226_v59 = vor.u32 %v4225_v39, %v4221_v32  ;;  %v4717_v2 = vrot.slane %v4715_v55, 4  ;;  %v9268_v38 = vcombine.low %v3246_v12, %v3247_v36  ;;  %v3853_v11 = vrot.slane %v3247_v36, 7 }
 0x39d   : > { %v3852_v10 = vrot.slane %v3851_v41, 4  ;;  %3951 = vst [vmem:[#allocation2 + $0xc0] sm:$0xe] %v3851_v41  ;;  %v5084_v21 = vrot.slane %v5082_v52, 5  ;;  %v4222_v14 = vsel %vm11030_vm4, %v4217_v33, %v4221_v32  ;;  %v5085_v62 = vshll.u32 %v4585_v35, 16 }
 0x39e   : > { %v4227_v56 = vrot.slane %v4226_v59, 4  ;;  %v4719_v5 = vsel %vm11057_vm7, %v4717_v2, %v4718_v53  ;;  %9678 = vmatprep.mubr.bf16.mxu0 %v9268_v38  ;;  %v3855_v42 = vrot.slane %v3853_v11, 4  ;;  %v4553_v16 = vmax.bf16 %v4222_v14, %v12887_v28  ;;  %v3975_v28 = vld [vmem:[#allocation2 + $0x6c] sm:$0xf] }
 0x39f   : > { %v3854_v40 = vsel %vm11257_vm15, %v3852_v10, %v3853_v11  ;;  %v5090_v6 = vrot.slane %v4223_v18, 5  ;;  %v5087_v37 = vrot.slane %v5085_v62, 6  ;;  %v5091_v49 = vrot.slane %v4219_v25, 6  ;;  %v12933_v25 = vld [vmem:[#allocation2 + $0x70] sm:$0xf] }
 0x3a0   : > { %3952 = vst [vmem:[#allocation2 + $0xc4] sm:$0xf] %v3854_v40  ;;  %v4232_v63 = vsel %vm11030_vm4, %v4227_v56, %v4231_v17  ;;  %v5096_v31 = vshrl.u32 %v4885_v8, 16  ;;  %3953 = vst [vmem:[#allocation2 + $0xc8] sm:$0x1] %v3855_v42  ;;  %v4853_v35 = vmax.bf16 %v4716_v23, %v4553_v16  ;;  %v5099_v0 = vshll.u32 %v4885_v8, 16 }
 0x3a1   : > { %v4554_v9 = vmax.bf16 %v4232_v63, %v12893_v58  ;;  %v9314_v7 = vrot.slane %v5445_v61, 10  ;;  %v5088_v34 = vor.u32 %v5087_v37, %v5084_v21  ;;  %v5092_v32 = vor.u32 %v5091_v49, %v5090_v6  ;;  %v4006_v23 = vld [vmem:[#allocation2 + $0x74] sm:$0x1]  ;;  %v4586_v21 = vld [vmem:[#allocation2 + $0x6c] sm:$0xe] }
 0x3a2   : > { %v5098_v12 = vrot.slane %v5096_v31, 5  ;;  %v5555_v27 = vrot.slane %v12893_v58, 6  ;;  %v5101_v19 = vrot.slane %v5099_v0, 6  ;;  %v5558_v47 = vrot.slane %v4885_v8, 6 }
 0x3a3   : > { %v4854_v18 = vmax.bf16 %v4719_v5, %v4554_v9  ;;  %v5725_v39 = vmax.bf16 %v12665_v60, %v12574_v13  ;;  %v5089_v55 = vrot.slane %v5088_v34, 4  ;;  %v5094_v53 = vrot.slane %v5092_v32, 4 }
 0x3a4   : > { %v5556_v36 = vsel %vm11154_vm12, %v9314_v7, %v5555_v27  ;;  %v5557_v41 = vrot.slane %v5555_v27, 4  ;;  %v5102_v17 = vor.u32 %v5101_v19, %v5098_v12  ;;  %v5726_v52 = vmax.bf16 %v12668_v1, %v12577_v30 }
 0x3a5   : > { %v5757_v58 = vmax.bf16 %v5725_v39, %v12748_v29  ;;  %v4234_v33 = vshrl.u32 %v3975_v28, 16  ;;  %v5093_v59 = vsel %vm11119_vm11, %v5089_v55, %v5092_v32  ;;  %v4237_v2 = vshll.u32 %v3975_v28, 16 }
 0x3a6   : > { %v5559_v13 = vsel %vm11154_vm12, %v5557_v41, %v5558_v47  ;;  %v4243_v38 = vshll.u32 %v12933_v25, 16  ;;  %v5103_v10 = vsel %vm11119_vm11, %v5094_v53, %v5102_v17  ;;  %v5413_v11 = vmax.bf16 %v5093_v59, %v4853_v35  ;;  %v4886_v41 = vld [vmem:[#allocation2 + $0x74] sm:$0x3] }
 0x3a7   : > { %v5758_v8 = vmax.bf16 %v5726_v52, %v12754_v45  ;;  %v5789_v30 = vmax.bf16 %v5757_v58, %v12827_v50  ;;  %v5414_v14 = vmax.bf16 %v5103_v10, %v4854_v18  ;;  %v4236_v56 = vrot.slane %v4234_v33, 4  ;;  %v5446_v10 = vld [vmem:[#allocation2 + $0x6c] sm:$0xc] }
 0x3a8   : > { %v4239_v5 = vrot.slane %v4237_v2, 5  ;;  %v4245_v62 = vrot.slane %v4243_v38, 5  ;;  %v12949_v61 = vmax.bf16 %v5556_v36, %v5413_v11  ;;  %v4247_v42 = vshrl.u32 %v12933_v25, 16 }
 0x3a9   : > { %v5790_v40 = vmax.bf16 %v5758_v8, %v12831_v57  ;;  %v4253_v16 = vshll.u32 %v4006_v23, 16  ;;  %v12953_v6 = vmax.bf16 %v5559_v13, %v5414_v14  ;;  %v9295_v37 = vrot.slane %v4586_v21, 9 }
 0x3aa   : > { %v4240_v63 = vor.u32 %v4239_v5, %v4236_v56  ;;  %v4722_v49 = vrot.slane %v12933_v25, 5  ;;  %v5821_v31 = vmax.bf16 %v5789_v30, %v12949_v61  ;;  %v4249_v9 = vrot.slane %v4247_v42, 4 }
 0x3ab   : > { %v4255_v35 = vrot.slane %v4253_v16, 5  ;;  %v4725_v0 = vrot.slane %v4006_v23, 5  ;;  %v5822_v7 = vmax.bf16 %v5790_v40, %v12953_v6  ;;  %v5105_v19 = vshrl.u32 %v4586_v21, 16  ;;  %v1388_v16 = vld [vmem:[#allocation2 + $0xe4] sm:$0xf] }
 0x3ac   : > { %v4241_v34 = vrot.slane %v4240_v63, 4  ;;  %v4723_v32 = vsel %vm11057_vm7, %v9295_v37, %v4722_v49  ;;  %v4724_v12 = vrot.slane %v4722_v49, 4  ;;  %v6219_v27 = vrot.slane %v5821_v31, 7 }
 0x3ad   : > { %v4250_v18 = vor.u32 %v4249_v9, %v4245_v62  ;;  %v5108_v47 = vshll.u32 %v4586_v21, 16  ;;  %v9330_v39 = vcombine.low %v5821_v31, %v5822_v7  ;;  %v6221_v55 = vrot.slane %v5822_v7, 7 }
 0x3ae   : > { %v4246_v53 = vsel %vm11030_vm4, %v4241_v34, %v4245_v62  ;;  %v4726_v36 = vsel %vm11057_vm7, %v4724_v12, %v4725_v0  ;;  %v6220_v17 = vrot.slane %v6219_v27, 4  ;;  %6339 = vst [vmem:[#allocation2 + $0x48] sm:$0xe] %v6219_v27  ;;  %v5107_v33 = vrot.slane %v5105_v19, 5  ;;  %v12976_v34 = vld [vmem:[#allocation2 + $0xe8] sm:$0xf] }
 0x3af   : > { %v4251_v52 = vrot.slane %v4250_v18, 4  ;;  %v4555_v58 = vmax.bf16 %v4246_v53, %v3975_v28  ;;  %9754 = vmatprep.mubr.bf16.mxu1 %v9330_v39  ;;  %v6223_v59 = vrot.slane %v6221_v55, 4  ;;  %v5110_v13 = vrot.slane %v5108_v47, 6 }
 0x3b0   : > { %v5113_v23 = vrot.slane %v4247_v42, 5  ;;  %v5114_v2 = vrot.slane %v4243_v38, 6  ;;  %v6222_v11 = vsel %vm11257_vm15, %v6220_v17, %v6221_v55  ;;  %v5119_v21 = vshrl.u32 %v4886_v41, 16 }
 0x3b1   : > { %v4256_v8 = vsel %vm11030_vm4, %v4251_v52, %v4255_v35  ;;  %v4855_v30 = vmax.bf16 %v4723_v32, %v4555_v58  ;;  %6340 = vst [vmem:[#allocation2 + $0x4c] sm:$0xf] %v6222_v11  ;;  %6341 = vst [vmem:[#allocation2 + $0x50] sm:$0x1] %v6223_v59  ;;  %v5111_v28 = vor.u32 %v5110_v13, %v5107_v33  ;;  %v5122_v5 = vshll.u32 %v4886_v41, 16 }
 0x3b2   : > { %v4556_v14 = vmax.bf16 %v4256_v8, %v12933_v25  ;;  %v5115_v56 = vor.u32 %v5114_v2, %v5113_v23  ;;  %v5121_v62 = vrot.slane %v5119_v21, 5  ;;  %v9315_v40 = vrot.slane %v5446_v10, 10  ;;  %v1992_v2 = vld [vmem:[#allocation2 + $0xe4] sm:$0xe] }
 0x3b3   : > { %v5562_v38 = vrot.slane %v12933_v25, 6  ;;  %v5565_v42 = vrot.slane %v4886_v41, 6  ;;  %v5112_v37 = vrot.slane %v5111_v28, 4  ;;  %v5124_v31 = vrot.slane %v5122_v5, 6 }
 0x3b4   : > { %v4856_v63 = vmax.bf16 %v4726_v36, %v4556_v14  ;;  %v5117_v49 = vrot.slane %v5115_v56, 4  ;;  %v5727_v0 = vmax.bf16 %v12748_v29, %v12665_v60  ;;  %v5728_v7 = vmax.bf16 %v12754_v45, %v12668_v1  ;;  %v1409_v60 = vld [vmem:[#allocation2 + $0xec] sm:$0x1] }
 0x3b5   : > { %v5563_v9 = vsel %vm11154_vm12, %v9315_v40, %v5562_v38  ;;  %v5564_v35 = vrot.slane %v5562_v38, 4  ;;  %v5116_v25 = vsel %vm11119_vm11, %v5112_v37, %v5115_v56  ;;  %v5125_v32 = vor.u32 %v5124_v31, %v5121_v62 }
 0x3b6   : > { %v1870_v12 = vshrl.u32 %v1388_v16, 16  ;;  %v1873_v27 = vshll.u32 %v1388_v16, 16  ;;  %v5415_v18 = vmax.bf16 %v5116_v25, %v4855_v30  ;;  %v5759_v47 = vmax.bf16 %v5727_v0, %v12827_v50 }
 0x3b7   : > { %v5566_v19 = vsel %vm11154_vm12, %v5564_v35, %v5565_v42  ;;  %v5760_v39 = vmax.bf16 %v5728_v7, %v12831_v57  ;;  %v5126_v1 = vsel %vm11119_vm11, %v5117_v49, %v5125_v32  ;;  %v1879_v36 = vshll.u32 %v12976_v34, 16  ;;  %v2295_v7 = vld [vmem:[#allocation2 + $0xec] sm:$0x3] }
 0x3b8   : > { %v1872_v55 = vrot.slane %v1870_v12, 4  ;;  %v1875_v53 = vrot.slane %v1873_v27, 5  ;;  %v5416_v41 = vmax.bf16 %v5126_v1, %v4856_v63  ;;  %v12987_v17 = vmax.bf16 %v5563_v9, %v5415_v18  ;;  %v2858_v18 = vld [vmem:[#allocation2 + $0xe4] sm:$0xc] }
 0x3b9   : > { %v5791_v52 = vmax.bf16 %v5759_v47, %v12949_v61  ;;  %v5792_v58 = vmax.bf16 %v5760_v39, %v12953_v6  ;;  %v1881_v59 = vrot.slane %v1879_v36, 5  ;;  %v1883_v13 = vshrl.u32 %v12976_v34, 16 }
 0x3ba   : > { %v1876_v33 = vor.u32 %v1875_v53, %v1872_v55  ;;  %v1889_v23 = vshll.u32 %v1409_v60, 16  ;;  %v12992_v10 = vmax.bf16 %v5566_v19, %v5416_v41  ;;  %v9233_v8 = vrot.slane %v1992_v2, 9 }
 0x3bb   : > { %v5823_v11 = vmax.bf16 %v5791_v52, %v12987_v17  ;;  %v2191_v30 = vrot.slane %v12976_v34, 5  ;;  %v1885_v14 = vrot.slane %v1883_v13, 4  ;;  %v2194_v56 = vrot.slane %v1409_v60, 5 }
 0x3bc   : > { %v1877_v21 = vrot.slane %v1876_v33, 4  ;;  %v1891_v28 = vrot.slane %v1889_v23, 5  ;;  %v5824_v5 = vmax.bf16 %v5792_v58, %v12992_v10  ;;  %v2737_v37 = vshrl.u32 %v1992_v2, 16 }
 0x3bd   : > { %v6224_v62 = vrot.slane %v5823_v11, 7  ;;  %v2192_v40 = vsel %vm11057_vm7, %v9233_v8, %v2191_v30  ;;  %v2193_v38 = vrot.slane %v2191_v30, 4  ;;  %v1886_v63 = vor.u32 %v1885_v14, %v1881_v59  ;;  %v3977_v8 = vld [vmem:[#allocation2 + $0x78] sm:$0xf] }
 0x3be   : > { %v1882_v42 = vsel %vm11030_vm4, %v1877_v21, %v1881_v59  ;;  %v2740_v49 = vshll.u32 %v1992_v2, 16  ;;  %v9331_v31 = vcombine.low %v5823_v11, %v5824_v5  ;;  %v6226_v35 = vrot.slane %v5824_v5, 7 }
 0x3bf   : > { %v6225_v9 = vrot.slane %v6224_v62, 4  ;;  %6342 = vst [vmem:[#allocation2 + $0x54] sm:$0xe] %v6224_v62  ;;  %v1971_v0 = vmax.bf16 %v1882_v42, %v1388_v16  ;;  %v1887_v25 = vrot.slane %v1886_v63, 4  ;;  %v2195_v32 = vsel %vm11057_vm7, %v2193_v38, %v2194_v56 }
 0x3c0   : > { %v2739_v12 = vrot.slane %v2737_v37, 5  ;;  %v2742_v27 = vrot.slane %v2740_v49, 6  ;;  %9755 = vmatmul.mubr.bf16.gmra.mrb[8].mxu1 %v9331_v31  ;;  %v6228_v47 = vrot.slane %v6226_v35, 4  ;;  %v2745_v60 = vrot.slane %v1883_v13, 5  ;;  %v4007_v49 = vld [vmem:[#allocation2 + $0x80] sm:$0x1] }
 0x3c1   : > { %v6227_v19 = vsel %vm11257_vm15, %v6225_v9, %v6226_v35  ;;  %v2274_v39 = vmax.bf16 %v2192_v40, %v1971_v0  ;;  %v1892_v1 = vsel %vm11030_vm4, %v1887_v25, %v1891_v28  ;;  %v2746_v55 = vrot.slane %v1879_v36, 6  ;;  %v13011_v36 = vld [vmem:[#allocation2 + $0x7c] sm:$0xf]  ;;  %v4587_v35 = vld [vmem:[#allocation2 + $0x78] sm:$0xe] }
 0x3c2   : > { %6343 = vst [vmem:[#allocation2 + $0x58] sm:$0xf] %v6227_v19  ;;  %v2743_v16 = vor.u32 %v2742_v27, %v2739_v12  ;;  %v2751_v53 = vshrl.u32 %v2295_v7, 16  ;;  %6344 = vst [vmem:[#allocation2 + $0x5c] sm:$0x1] %v6228_v47  ;;  %v1972_v41 = vmax.bf16 %v1892_v1, %v12976_v34  ;;  %v2754_v52 = vshll.u32 %v2295_v7, 16 }
 0x3c3   : > { %v9253_v58 = vrot.slane %v2858_v18, 10  ;;  %v3037_v33 = vrot.slane %v12976_v34, 6  ;;  %v2747_v23 = vor.u32 %v2746_v55, %v2745_v60  ;;  %v3040_v11 = vrot.slane %v2295_v7, 6 }
 0x3c4   : > { %v2744_v59 = vrot.slane %v2743_v16, 4  ;;  %v2753_v2 = vrot.slane %v2751_v53, 5  ;;  %v2275_v13 = vmax.bf16 %v2195_v32, %v1972_v41  ;;  %v2756_v30 = vrot.slane %v2754_v52, 6 }
 0x3c5   : > { %v3038_v21 = vsel %vm11154_vm12, %v9253_v58, %v3037_v33  ;;  %v3039_v14 = vrot.slane %v3037_v33, 4  ;;  %v2749_v56 = vrot.slane %v2747_v23, 4  ;;  %v3152_v34 = vmax.bf16 %v12787_v44, %v12707_v43 }
 0x3c6   : > { %v2748_v28 = vsel %vm11119_vm11, %v2744_v59, %v2747_v23  ;;  %v3153_v5 = vmax.bf16 %v12792_v22, %v12713_v20  ;;  %v2757_v62 = vor.u32 %v2756_v30, %v2753_v2  ;;  %v4258_v42 = vshrl.u32 %v3977_v8, 16  ;;  %v4887_v30 = vld [vmem:[#allocation2 + $0x80] sm:$0x3] }
 0x3c7   : > { %v2837_v40 = vmax.bf16 %v2748_v28, %v2274_v39  ;;  %v3041_v38 = vsel %vm11154_vm12, %v3039_v14, %v3040_v11  ;;  %v3184_v63 = vmax.bf16 %v3152_v34, %v12865_v54  ;;  %v4261_v31 = vshll.u32 %v3977_v8, 16  ;;  %v5447_v34 = vld [vmem:[#allocation2 + $0x78] sm:$0xc] }
 0x3c8   : > { %v3185_v37 = vmax.bf16 %v3153_v5, %v12871_v3  ;;  %v4267_v9 = vshll.u32 %v13011_v36, 16  ;;  %v2758_v43 = vsel %vm11119_vm11, %v2749_v56, %v2757_v62  ;;  %v4260_v20 = vrot.slane %v4258_v42, 4 }
 0x3c9   : > { %v3120_v44 = vmax.bf16 %v3038_v21, %v2837_v40  ;;  %v4271_v22 = vshrl.u32 %v13011_v36, 16  ;;  %v2838_v0 = vmax.bf16 %v2758_v43, %v2275_v13  ;;  %v3216_v7 = vmax.bf16 %v3184_v63, %v12908_v48 }
 0x3ca   : > { %v3217_v25 = vmax.bf16 %v3185_v37, %v12913_v15  ;;  %v4263_v54 = vrot.slane %v4261_v31, 5  ;;  %v4269_v32 = vrot.slane %v4267_v9, 5  ;;  %v4277_v12 = vshll.u32 %v4007_v49, 16 }
 0x3cb   : > { %v4273_v3 = vrot.slane %v4271_v22, 4  ;;  %v9296_v27 = vrot.slane %v4587_v35, 9  ;;  %v3121_v18 = vmax.bf16 %v3041_v38, %v2838_v0  ;;  %v3248_v19 = vmax.bf16 %v3216_v7, %v3120_v44  ;;  %v3979_v44 = vld [vmem:[#allocation2 + $0x84] sm:$0xf] }
 0x3cc   : > { %v4264_v47 = vor.u32 %v4263_v54, %v4260_v20  ;;  %v4729_v39 = vrot.slane %v13011_v36, 5  ;;  %v4279_v1 = vrot.slane %v4277_v12, 5  ;;  %v4732_v16 = vrot.slane %v4007_v49, 5 }
 0x3cd   : > { %v4274_v60 = vor.u32 %v4273_v3, %v4269_v32  ;;  %v5128_v55 = vshrl.u32 %v4587_v35, 16  ;;  %v3249_v53 = vmax.bf16 %v3217_v25, %v3121_v18  ;;  %v3856_v41 = vrot.slane %v3248_v19, 7  ;;  %v13046_v3 = vld [vmem:[#allocation2 + $0x88] sm:$0xf] }
 0x3ce   : > { %v4265_v52 = vrot.slane %v4264_v47, 4  ;;  %v4730_v48 = vsel %vm11057_vm7, %v9296_v27, %v4729_v39  ;;  %v4731_v58 = vrot.slane %v4729_v39, 4  ;;  %v5131_v59 = vshll.u32 %v4587_v35, 16 }
 0x3cf   : > { %v4275_v15 = vrot.slane %v4274_v60, 4  ;;  %v5130_v33 = vrot.slane %v5128_v55, 5  ;;  %v9269_v23 = vcombine.low %v3248_v19, %v3249_v53  ;;  %v3857_v2 = vrot.slane %v3856_v41, 4  ;;  %3954 = vst [vmem:[#allocation2 + $0xcc] sm:$0xe] %v3856_v41 }
 0x3d0   : > { %v3858_v11 = vrot.slane %v3249_v53, 7  ;;  %v4270_v13 = vsel %vm11030_vm4, %v4265_v52, %v4269_v32  ;;  %v4733_v28 = vsel %vm11057_vm7, %v4731_v58, %v4732_v16  ;;  %v5133_v56 = vrot.slane %v5131_v59, 6  ;;  %v4008_v16 = vld [vmem:[#allocation2 + $0x8c] sm:$0x1] }
 0x3d1   : > { %v4280_v21 = vsel %vm11030_vm4, %v4275_v15, %v4279_v1  ;;  %v4557_v14 = vmax.bf16 %v4270_v13, %v3977_v8  ;;  %9679 = vmatmul.mubr.bf16.gmra.mrb[60].mxu0 %v9269_v23  ;;  %v5136_v38 = vrot.slane %v4271_v22, 5  ;;  %v5137_v37 = vrot.slane %v4267_v9, 6  ;;  %v4588_v1 = vld [vmem:[#allocation2 + $0x84] sm:$0xe] }
 0x3d2   : > { %v3859_v5 = vsel %vm11257_vm15, %v3857_v2, %v3858_v11  ;;  %v3860_v62 = vrot.slane %v3858_v11, 4  ;;  %v4558_v40 = vmax.bf16 %v4280_v21, %v13011_v36  ;;  %v5134_v63 = vor.u32 %v5133_v56, %v5130_v33 }
 0x3d3   : > { %3955 = vst [vmem:[#allocation2 + $0xd0] sm:$0xf] %v3859_v5  ;;  %v4857_v42 = vmax.bf16 %v4730_v48, %v4557_v14  ;;  %v5142_v49 = vshrl.u32 %v4887_v30, 16  ;;  %v5145_v31 = vshll.u32 %v4887_v30, 16  ;;  %v9316_v35 = vrot.slane %v5447_v34, 10 }
 0x3d4   : > { %3956 = vst [vmem:[#allocation2 + $0xd4] sm:$0x1] %v3860_v62  ;;  %v4858_v8 = vmax.bf16 %v4733_v28, %v4558_v40  ;;  %v5569_v43 = vrot.slane %v13011_v36, 6  ;;  %v5135_v20 = vrot.slane %v5134_v63, 4  ;;  %v5138_v0 = vor.u32 %v5137_v37, %v5136_v38 }
 0x3d5   : > { %v5144_v7 = vrot.slane %v5142_v49, 5  ;;  %v5572_v25 = vrot.slane %v4887_v30, 6  ;;  %v5147_v54 = vrot.slane %v5145_v31, 6  ;;  %v5729_v9 = vmax.bf16 %v12827_v50, %v12748_v29 }
 0x3d6   : > { %v5570_v22 = vsel %vm11154_vm12, %v9316_v35, %v5569_v43  ;;  %v5571_v32 = vrot.slane %v5569_v43, 4  ;;  %v5139_v12 = vsel %vm11119_vm11, %v5135_v20, %v5138_v0  ;;  %v5140_v27 = vrot.slane %v5138_v0, 4 }
 0x3d7   : > { %v5730_v36 = vmax.bf16 %v12831_v57, %v12754_v45  ;;  %v4282_v18 = vshrl.u32 %v3979_v44, 16  ;;  %v5148_v19 = vor.u32 %v5147_v54, %v5144_v7  ;;  %v5417_v47 = vmax.bf16 %v5139_v12, %v4857_v42  ;;  %v5448_v12 = vld [vmem:[#allocation2 + $0x84] sm:$0xc] }
 0x3d8   : > { %v5573_v39 = vsel %vm11154_vm12, %v5571_v32, %v5572_v25  ;;  %v5761_v60 = vmax.bf16 %v5729_v9, %v12949_v61  ;;  %v4285_v53 = vshll.u32 %v3979_v44, 16  ;;  %v4291_v41 = vshll.u32 %v13046_v3, 16  ;;  %v4888_v25 = vld [vmem:[#allocation2 + $0x8c] sm:$0x3] }
 0x3d9   : > { %v5762_v29 = vmax.bf16 %v5730_v36, %v12953_v6  ;;  %v4284_v55 = vrot.slane %v4282_v18, 4  ;;  %v5149_v52 = vsel %vm11119_vm11, %v5140_v27, %v5148_v19  ;;  %v13059_v45 = vmax.bf16 %v5570_v22, %v5417_v47 }
 0x3da   : > { %v5793_v48 = vmax.bf16 %v5761_v60, %v12987_v17  ;;  %v4295_v15 = vshrl.u32 %v13046_v3, 16  ;;  %v5418_v58 = vmax.bf16 %v5149_v52, %v4858_v8  ;;  %v4287_v59 = vrot.slane %v4285_v53, 5  ;;  %v3981_v53 = vld [vmem:[#allocation2 + $0x90] sm:$0xf] }
 0x3db   : > { %v5794_v33 = vmax.bf16 %v5762_v29, %v12992_v10  ;;  %v4293_v23 = vrot.slane %v4291_v41, 5  ;;  %v4301_v13 = vshll.u32 %v4008_v16, 16  ;;  %v9297_v30 = vrot.slane %v4588_v1, 9 }
 0x3dc   : > { %v5825_v2 = vmax.bf16 %v5793_v48, %v13059_v45  ;;  %v4297_v11 = vrot.slane %v4295_v15, 4  ;;  %v13065_v21 = vmax.bf16 %v5573_v39, %v5418_v58  ;;  %v4288_v14 = vor.u32 %v4287_v59, %v4284_v55 }
 0x3dd   : > { %v4736_v28 = vrot.slane %v13046_v3, 5  ;;  %v4739_v56 = vrot.slane %v4008_v16, 5  ;;  %v4303_v62 = vrot.slane %v4301_v13, 5  ;;  %v5151_v40 = vshrl.u32 %v4588_v1, 16 }
 0x3de   : > { %14854 = vst [vmem:[#allocation22_spill] sm:$0xff] %v13065_v21  ;;  %v6229_v34 = vrot.slane %v5825_v2, 7  ;;  %v4298_v5 = vor.u32 %v4297_v11, %v4293_v23  ;;  %v5826_v38 = vmax.bf16 %v5794_v33, %v13065_v21  ;;  %v4289_v42 = vrot.slane %v4288_v14, 4 }
 0x3df   : > { %v4737_v63 = vsel %vm11057_vm7, %v9297_v30, %v4736_v28  ;;  %v4738_v37 = vrot.slane %v4736_v28, 4  ;;  %v5153_v31 = vrot.slane %v5151_v40, 5  ;;  %v5154_v35 = vshll.u32 %v4588_v1, 16 }
 0x3e0   : > { %v6230_v49 = vrot.slane %v6229_v34, 4  ;;  %6345 = vst [vmem:[#allocation2 + $0x60] sm:$0xe] %v6229_v34  ;;  %v4299_v8 = vrot.slane %v4298_v5, 4  ;;  %v9332_v43 = vcombine.low %v5825_v2, %v5826_v38  ;;  %v6231_v20 = vrot.slane %v5826_v38, 7 }
 0x3e1   : > { %v4294_v0 = vsel %vm11030_vm4, %v4289_v42, %v4293_v23  ;;  %v4740_v7 = vsel %vm11057_vm7, %v4738_v37, %v4739_v56  ;;  %v5156_v32 = vrot.slane %v5154_v35, 6  ;;  %v5159_v9 = vrot.slane %v4295_v15, 5  ;;  %v13085_v2 = vld [vmem:[#allocation2 + $0x94] sm:$0xf]  ;;  %v4009_v34 = vld [vmem:[#allocation2 + $0x98] sm:$0x1] }
 0x3e2   : > { %v4304_v54 = vsel %vm11030_vm4, %v4299_v8, %v4303_v62  ;;  %v4559_v22 = vmax.bf16 %v4294_v0, %v3979_v44  ;;  %9758 = vmatprep.mubr.bf16.mxu1 %v9332_v43  ;;  %v6232_v27 = vsel %vm11257_vm15, %v6230_v49, %v6231_v20  ;;  %v6233_v36 = vrot.slane %v6231_v20, 4  ;;  %v4589_v42 = vld [vmem:[#allocation2 + $0x90] sm:$0xe] }
 0x3e3   : > { %v4560_v18 = vmax.bf16 %v4304_v54, %v13046_v3  ;;  %v5160_v19 = vrot.slane %v4291_v41, 6  ;;  %6346 = vst [vmem:[#allocation2 + $0x64] sm:$0xf] %v6232_v27  ;;  %v5157_v39 = vor.u32 %v5156_v32, %v5153_v31  ;;  %v5165_v60 = vshrl.u32 %v4888_v25, 16 }
 0x3e4   : > { %v4859_v47 = vmax.bf16 %v4737_v63, %v4559_v22  ;;  %v5168_v1 = vshll.u32 %v4888_v25, 16  ;;  %6347 = vst [vmem:[#allocation2 + $0x68] sm:$0x1] %v6233_v36  ;;  %v9317_v44 = vrot.slane %v5448_v12, 10  ;;  %v5576_v55 = vrot.slane %v13046_v3, 6 }
 0x3e5   : > { %v4860_v29 = vmax.bf16 %v4740_v7, %v4560_v18  ;;  %v5161_v16 = vor.u32 %v5160_v19, %v5159_v9  ;;  %v5158_v52 = vrot.slane %v5157_v39, 4  ;;  %v5167_v48 = vrot.slane %v5165_v60, 5 }
 0x3e6   : > { %v5170_v15 = vrot.slane %v5168_v1, 6  ;;  %v5579_v58 = vrot.slane %v4888_v25, 6  ;;  %v5577_v41 = vsel %vm11154_vm12, %v9317_v44, %v5576_v55  ;;  %v5578_v59 = vrot.slane %v5576_v55, 4  ;;  %v4889_v55 = vld [vmem:[#allocation2 + $0x98] sm:$0x3] }
 0x3e7   : > { %v5163_v33 = vrot.slane %v5161_v16, 4  ;;  %v5731_v23 = vmax.bf16 %v12949_v61, %v12827_v50  ;;  %v5162_v11 = vsel %vm11119_vm11, %v5158_v52, %v5161_v16  ;;  %v5732_v3 = vmax.bf16 %v12953_v6, %v12831_v57 }
 0x3e8   : > { %v5171_v13 = vor.u32 %v5170_v15, %v5167_v48  ;;  %v4306_v30 = vshrl.u32 %v3981_v53, 16  ;;  %v5419_v14 = vmax.bf16 %v5162_v11, %v4859_v47  ;;  %v5580_v28 = vsel %vm11154_vm12, %v5578_v59, %v5579_v58 }
 0x3e9   : > { %v5763_v56 = vmax.bf16 %v5731_v23, %v12987_v17  ;;  %v4309_v5 = vshll.u32 %v3981_v53, 16  ;;  %v5764_v62 = vmax.bf16 %v5732_v3, %v12992_v10  ;;  %v4315_v38 = vshll.u32 %v13085_v2, 16 }
 0x3ea   : > { %v5172_v50 = vsel %vm11119_vm11, %v5163_v33, %v5171_v13  ;;  %v4308_v40 = vrot.slane %v4306_v30, 4  ;;  %v13098_v57 = vmax.bf16 %v5577_v41, %v5419_v14  ;;  %v4319_v35 = vshrl.u32 %v13085_v2, 16  ;;  %v5449_v33 = vld [vmem:[#allocation2 + $0x90] sm:$0xc] }
 0x3eb   : > { %v5420_v63 = vmax.bf16 %v5172_v50, %v4860_v29  ;;  %v5795_v37 = vmax.bf16 %v5763_v56, %v13059_v45  ;;  %v4311_v49 = vrot.slane %v4309_v5, 5  ;;  %v5796_v8 = vmax.bf16 %v5764_v62, %v13065_v21 }
 0x3ec   : > { %14855 = vst [vmem:[#allocation24_spill] sm:$0xff] %v13098_v57  ;;  %v4317_v31 = vrot.slane %v4315_v38, 5  ;;  %v4325_v43 = vshll.u32 %v4009_v34, 16  ;;  %v9298_v25 = vrot.slane %v4589_v42, 9  ;;  %v4321_v54 = vrot.slane %v4319_v35, 4 }
 0x3ed   : > { %v13103_v20 = vmax.bf16 %v5580_v28, %v5420_v63  ;;  %v5827_v0 = vmax.bf16 %v5795_v37, %v13098_v57  ;;  %v4312_v7 = vor.u32 %v4311_v49, %v4308_v40  ;;  %v4743_v32 = vrot.slane %v13085_v2, 5 }
 0x3ee   : > { %v4327_v22 = vrot.slane %v4325_v43, 5  ;;  %v4746_v9 = vrot.slane %v4009_v34, 5  ;;  %v5174_v18 = vshrl.u32 %v4589_v42, 16  ;;  %v4322_v19 = vor.u32 %v4321_v54, %v4317_v31 }
 0x3ef   : > { %14856 = vst [vmem:[#allocation23_spill] sm:$0xff] %v13103_v20  ;;  %v5828_v12 = vmax.bf16 %v5796_v8, %v13103_v20  ;;  %v6234_v27 = vrot.slane %v5827_v0, 7  ;;  %v4313_v36 = vrot.slane %v4312_v7, 4  ;;  %v4744_v47 = vsel %vm11057_vm7, %v9298_v25, %v4743_v32 }
 0x3f0   : > { %v4745_v39 = vrot.slane %v4743_v32, 4  ;;  %v5177_v60 = vshll.u32 %v4589_v42, 16  ;;  %v4323_v52 = vrot.slane %v4322_v19, 4  ;;  %v5176_v58 = vrot.slane %v5174_v18, 5  ;;  %v3983_v42 = vld [vmem:[#allocation2 + $0x9c] sm:$0xf] }
 0x3f1   : > { %v9333_v1 = vcombine.low %v5827_v0, %v5828_v12  ;;  %v6235_v29 = vrot.slane %v6234_v27, 4  ;;  %v6236_v16 = vrot.slane %v5828_v12, 7  ;;  %6348 = vst [vmem:[#allocation2 + $0x6c] sm:$0xe] %v6234_v27  ;;  %v4318_v44 = vsel %vm11030_vm4, %v4313_v36, %v4317_v31  ;;  %v13126_v0 = vld [vmem:[#allocation2 + $0xa0] sm:$0xf] }
 0x3f2   : > { %v4561_v48 = vmax.bf16 %v4318_v44, %v3981_v53  ;;  %v4747_v15 = vsel %vm11057_vm7, %v4745_v39, %v4746_v9  ;;  %v5179_v23 = vrot.slane %v5177_v60, 6  ;;  %v5182_v11 = vrot.slane %v4319_v35, 5  ;;  %v4010_v9 = vld [vmem:[#allocation2 + $0xa4] sm:$0x1]  ;;  %v4590_v27 = vld [vmem:[#allocation2 + $0x9c] sm:$0xe] }
 0x3f3   : > { %9759 = vmatmul.mubr.bf16.gmra.mrb[12].mxu1 %v9333_v1  ;;  %v6237_v41 = vsel %vm11257_vm15, %v6235_v29, %v6236_v16  ;;  %v6238_v59 = vrot.slane %v6236_v16, 4  ;;  %v4328_v13 = vsel %vm11030_vm4, %v4323_v52, %v4327_v22  ;;  %v5183_v30 = vrot.slane %v4315_v38, 6 }
 0x3f4   : > { %6349 = vst [vmem:[#allocation2 + $0x70] sm:$0xf] %v6237_v41  ;;  %v4861_v3 = vmax.bf16 %v4744_v47, %v4561_v48  ;;  %v5188_v14 = vshrl.u32 %v4889_v55, 16  ;;  %v4562_v53 = vmax.bf16 %v4328_v13, %v13085_v2  ;;  %v5180_v28 = vor.u32 %v5179_v23, %v5176_v58 }
 0x3f5   : > { %6350 = vst [vmem:[#allocation2 + $0x74] sm:$0x1] %v6238_v59  ;;  %v5191_v56 = vshll.u32 %v4889_v55, 16  ;;  %v9318_v34 = vrot.slane %v5449_v33, 10  ;;  %v5184_v5 = vor.u32 %v5183_v30, %v5182_v11  ;;  %v5583_v62 = vrot.slane %v13085_v2, 6 }
 0x3f6   : > { %v5190_v50 = vrot.slane %v5188_v14, 5  ;;  %v5586_v40 = vrot.slane %v4889_v55, 6  ;;  %v4862_v63 = vmax.bf16 %v4747_v15, %v4562_v53  ;;  %v5181_v37 = vrot.slane %v5180_v28, 4 }
 0x3f7   : > { %v5193_v49 = vrot.slane %v5191_v56, 6  ;;  %v5733_v8 = vmax.bf16 %v12987_v17, %v12949_v61  ;;  %v5186_v38 = vrot.slane %v5184_v5, 4  ;;  %v5584_v31 = vsel %vm11154_vm12, %v9318_v34, %v5583_v62 }
 0x3f8   : > { %v5585_v35 = vrot.slane %v5583_v62, 4  ;;  %v5734_v43 = vmax.bf16 %v12992_v10, %v12953_v6  ;;  %v5185_v2 = vsel %vm11119_vm11, %v5181_v37, %v5184_v5  ;;  %v4330_v54 = vshrl.u32 %v3983_v42, 16 }
 0x3f9   : > { %v5194_v7 = vor.u32 %v5193_v49, %v5190_v50  ;;  %v5765_v25 = vmax.bf16 %v5733_v8, %v13059_v45  ;;  %v5421_v22 = vmax.bf16 %v5185_v2, %v4861_v3  ;;  %v4333_v12 = vshll.u32 %v3983_v42, 16 }
 0x3fa   : > { %v5587_v61 = vsel %vm11154_vm12, %v5585_v35, %v5586_v40  ;;  %v5766_v32 = vmax.bf16 %v5734_v43, %v13065_v21  ;;  %v4332_v18 = vrot.slane %v4330_v54, 4  ;;  %v4339_v19 = vshll.u32 %v13126_v0, 16  ;;  %v4890_v40 = vld [vmem:[#allocation2 + $0xa4] sm:$0x3] }
 0x3fb   : > { %v5195_v6 = vsel %vm11119_vm11, %v5186_v38, %v5194_v7  ;;  %v5797_v36 = vmax.bf16 %v5765_v25, %v13098_v57  ;;  %v13138_v39 = vmax.bf16 %v5584_v31, %v5421_v22  ;;  %v4335_v1 = vrot.slane %v4333_v12, 5  ;;  %v5450_v38 = vld [vmem:[#allocation2 + $0x9c] sm:$0xc] }
 0x3fc   : > { %v5422_v47 = vmax.bf16 %v5195_v6, %v4862_v63  ;;  %v5798_v60 = vmax.bf16 %v5766_v32, %v13103_v20  ;;  %v4341_v29 = vrot.slane %v4339_v19, 5  ;;  %v4343_v16 = vshrl.u32 %v13126_v0, 16 }
 0x3fd   : > { %14857 = vst [vmem:[#allocation25_spill] sm:$0xff] %v13138_v39  ;;  %v4349_v44 = vshll.u32 %v4010_v9, 16  ;;  %v9299_v55 = vrot.slane %v4590_v27, 9  ;;  %v5829_v48 = vmax.bf16 %v5797_v36, %v13138_v39  ;;  %v4336_v15 = vor.u32 %v4335_v1, %v4332_v18  ;;  %v13159_v18 = vld [vmem:[#allocation2] sm:$0xf] }
 0x3fe   : > { %v13142_v52 = vmax.bf16 %v5587_v61, %v5422_v47  ;;  %v4750_v58 = vrot.slane %v13126_v0, 5  ;;  %v4345_v33 = vrot.slane %v4343_v16, 4  ;;  %v4753_v59 = vrot.slane %v4010_v9, 5 }
 0x3ff   : > { %v4351_v41 = vrot.slane %v4349_v44, 5  ;;  %v5197_v23 = vshrl.u32 %v4590_v27, 16  ;;  %v6239_v13 = vrot.slane %v5829_v48, 7  ;;  %v4337_v3 = vrot.slane %v4336_v15, 4 }
 0x400   : > { %14858 = vst [vmem:[#allocation26_spill] sm:$0xff] %v13142_v52  ;;  %v5830_v11 = vmax.bf16 %v5798_v60, %v13142_v52  ;;  %v4751_v30 = vsel %vm11057_vm7, %v9299_v55, %v4750_v58  ;;  %v4346_v14 = vor.u32 %v4345_v33, %v4341_v29  ;;  %v4752_v53 = vrot.slane %v4750_v58, 4 }
 0x401   : > { %v5199_v28 = vrot.slane %v5197_v23, 5  ;;  %v5200_v56 = vshll.u32 %v4590_v27, 16  ;;  %v6240_v5 = vrot.slane %v6239_v13, 4  ;;  %6351 = vst [vmem:[#allocation2 + $0x78] sm:$0xe] %v6239_v13  ;;  %v4342_v62 = vsel %vm11030_vm4, %v4337_v3, %v4341_v29 }
 0x402   : > { %v9334_v34 = vcombine.low %v5829_v48, %v5830_v11  ;;  %v6241_v50 = vrot.slane %v5830_v11, 7  ;;  %v4347_v63 = vrot.slane %v4346_v14, 4  ;;  %v4563_v37 = vmax.bf16 %v4342_v62, %v3983_v42  ;;  %v13163_v29 = vld [vmem:[#allocation2 + $0x4] sm:$0xf]  ;;  %v13178_v23 = vld [vmem:[#allocation2 + $0x8] sm:$0x1] }
 0x403   : > { %v4754_v49 = vsel %vm11057_vm7, %v4752_v53, %v4753_v59  ;;  %v5202_v8 = vrot.slane %v5200_v56, 6  ;;  %v5205_v43 = vrot.slane %v4343_v16, 5  ;;  %v5206_v2 = vrot.slane %v4339_v19, 6  ;;  %v13176_v59 = vld [vmem:[#allocation2 + $0xc] sm:$0xf] }
 0x404   : > { %9762 = vmatprep.mubr.bf16.mxu1 %v9334_v34  ;;  %v6242_v31 = vsel %vm11257_vm15, %v6240_v5, %v6241_v50  ;;  %v6243_v35 = vrot.slane %v6241_v50, 4  ;;  %v4352_v7 = vsel %vm11030_vm4, %v4347_v63, %v4351_v41  ;;  %v4863_v25 = vmax.bf16 %v4751_v30, %v4563_v37  ;;  %v13187_v14 = vld [vmem:[#allocation2 + $0x10] sm:$0xf] }
 0x405   : > { %6352 = vst [vmem:[#allocation2 + $0x7c] sm:$0xf] %v6242_v31  ;;  %v5203_v54 = vor.u32 %v5202_v8, %v5199_v28  ;;  %v5211_v22 = vshrl.u32 %v4890_v40, 16  ;;  %v4564_v42 = vmax.bf16 %v4352_v7, %v13126_v0  ;;  %v5207_v61 = vor.u32 %v5206_v2, %v5205_v43 }
 0x406   : > { %6353 = vst [vmem:[#allocation2 + $0x80] sm:$0x1] %v6243_v35  ;;  %v5214_v32 = vshll.u32 %v4890_v40, 16  ;;  %v9319_v9 = vrot.slane %v5450_v38, 10  ;;  %v5590_v6 = vrot.slane %v13126_v0, 6  ;;  %v5593_v36 = vrot.slane %v4890_v40, 6 }
 0x407   : > { %v5204_v12 = vrot.slane %v5203_v54, 4  ;;  %v5213_v27 = vrot.slane %v5211_v22, 5  ;;  %v4864_v19 = vmax.bf16 %v4754_v49, %v4564_v42  ;;  %v5209_v47 = vrot.slane %v5207_v61, 4  ;;  %v13200_v49 = vld [vmem:[#allocation2 + $0x14] sm:$0x1] }
 0x408   : > { %v5216_v60 = vrot.slane %v5214_v32, 6  ;;  %v5735_v1 = vmax.bf16 %v13059_v45, %v12987_v17  ;;  %v5591_v44 = vsel %vm11154_vm12, %v9319_v9, %v5590_v6  ;;  %v5592_v55 = vrot.slane %v5590_v6, 4  ;;  %v13209_v54 = vld [vmem:[#allocation2 + $0x18] sm:$0xf] }
 0x409   : > { %v5208_v16 = vsel %vm11119_vm11, %v5204_v12, %v5207_v61  ;;  %v5736_v0 = vmax.bf16 %v13065_v21, %v12992_v10  ;;  %v6436_v33 = vshrl.u32 %v13159_v18, 16  ;;  %v6439_v11 = vshll.u32 %v13159_v18, 16 }
 0x40a   : > { %v5217_v48 = vor.u32 %v5216_v60, %v5213_v27  ;;  %v5423_v15 = vmax.bf16 %v5208_v16, %v4863_v25  ;;  %v5767_v58 = vmax.bf16 %v5735_v1, %v13098_v57  ;;  %v5594_v17 = vsel %vm11154_vm12, %v5592_v55, %v5593_v36  ;;  %v13226_v1 = vld [vmem:[#allocation2 + $0x20] sm:$0x1] }
 0x40b   : > { %v5768_v41 = vmax.bf16 %v5736_v0, %v13103_v20  ;;  %v6445_v13 = vshll.u32 %v13163_v29, 16  ;;  %v6438_v53 = vrot.slane %v6436_v33, 4  ;;  %v6441_v34 = vrot.slane %v6439_v11, 5 }
 0x40c   : > { %v5218_v10 = vsel %vm11119_vm11, %v5209_v47, %v5217_v48  ;;  %v13184_v3 = vmax.bf16 %v5591_v44, %v5423_v15  ;;  %v5799_v30 = vmax.bf16 %v5767_v58, %v13138_v39  ;;  %v6449_v62 = vshrl.u32 %v13163_v29, 16  ;;  %v13237_v58 = vld [vmem:[#allocation2 + $0x24] sm:$0xf] }
 0x40d   : > { %v5424_v28 = vmax.bf16 %v5218_v10, %v4864_v19  ;;  %v5800_v56 = vmax.bf16 %v5768_v41, %v13142_v52  ;;  %v13192_v5 = vrot.slane %v6445_v13, 5  ;;  %v6455_v40 = vshll.u32 %v13178_v23, 16  ;;  %v13220_v19 = vld [vmem:[#allocation2 + $0x1c] sm:$0xf]  ;;  %v13240_v41 = vld [vmem:[#allocation2 + $0x28] sm:$0xf] }
 0x40e   : > { %14859 = vst [vmem:[#allocation27_spill] sm:$0xff] %v13184_v3  ;;  %v5831_v50 = vmax.bf16 %v5799_v30, %v13184_v3  ;;  %v6460_v63 = vshrl.u32 %v13176_v59, 16  ;;  %v6442_v8 = vor.u32 %v6441_v34, %v6438_v53  ;;  %v6463_v38 = vshll.u32 %v13176_v59, 16 }
 0x40f   : > { %v13198_v37 = vmax.bf16 %v5594_v17, %v5424_v28  ;;  %v6469_v31 = vshll.u32 %v13187_v14, 16  ;;  %v6451_v43 = vrot.slane %v6449_v62, 4  ;;  %v13206_v2 = vrot.slane %v6455_v40, 5  ;;  %v13253_v40 = vld [vmem:[#allocation2 + $0x2c] sm:$0x1] }
 0x410   : > { %v6244_v35 = vrot.slane %v5831_v50, 7  ;;  %v6462_v7 = vrot.slane %v6460_v63, 4  ;;  %v13211_v22 = vrot.slane %v6442_v8, 4  ;;  %v6465_v42 = vrot.slane %v6463_v38, 5 }
 0x411   : > { %14860 = vst [vmem:[#allocation28_spill] sm:$0xff] %v13198_v37  ;;  %v5832_v25 = vmax.bf16 %v5800_v56, %v13198_v37  ;;  %v13215_v61 = vrot.slane %v6469_v31, 5  ;;  %v6452_v9 = vor.u32 %v6451_v43, %v13192_v5  ;;  %v6473_v12 = vshrl.u32 %v13187_v14, 16  ;;  %v6383_v43 = vld [vmem:[#allocation2 + $0x30] sm:$0xf] }
 0x412   : > { %v6245_v32 = vrot.slane %v6244_v35, 4  ;;  %6354 = vst [vmem:[#allocation2 + $0x84] sm:$0xe] %v6244_v35  ;;  %v6479_v27 = vshll.u32 %v13200_v49, 16  ;;  %v6448_v47 = vsel %vm11030_vm4, %v13211_v22, %v13192_v5  ;;  %v6466_v60 = vor.u32 %v6465_v42, %v6462_v7 }
 0x413   : > { %v9335_v6 = vcombine.low %v5831_v50, %v5832_v25  ;;  %v6246_v36 = vrot.slane %v5832_v25, 7  ;;  %v13228_v16 = vrot.slane %v6452_v9, 4  ;;  %v6475_v44 = vrot.slane %v6473_v12, 4 }
 0x414   : > { %v13232_v55 = vrot.slane %v6479_v27, 5  ;;  %v6484_v0 = vshrl.u32 %v13209_v54, 16  ;;  %v6467_v33 = vrot.slane %v6466_v60, 4  ;;  %v6487_v17 = vshll.u32 %v13209_v54, 16 }
 0x415   : > { %9763 = vmatmul.mubr.bf16.gmra.mrb[16].mxu1 %v9335_v6  ;;  %v6247_v48 = vsel %vm11257_vm15, %v6245_v32, %v6246_v36  ;;  %v6248_v15 = vrot.slane %v6246_v36, 4  ;;  %v6458_v11 = vsel %vm11030_vm4, %v13228_v16, %v13206_v2  ;;  %v6476_v10 = vor.u32 %v6475_v44, %v13215_v61 }
 0x416   : > { %6355 = vst [vmem:[#allocation2 + $0x88] sm:$0xf] %v6247_v48  ;;  %v6486_v30 = vrot.slane %v6484_v0, 4  ;;  %v14776_v53 = vshll.u32 %v13220_v19, 16  ;;  %v6472_v28 = vsel %vm11030_vm4, %v6467_v33, %v13215_v61  ;;  %v6489_v56 = vrot.slane %v6487_v17, 5 }
 0x417   : > { %6356 = vst [vmem:[#allocation2 + $0x8c] sm:$0x1] %v6248_v15  ;;  %v14777_v34 = vshrl.u32 %v13220_v19, 16  ;;  %v6503_v50 = vshll.u32 %v13226_v1, 16  ;;  %v6477_v63 = vrot.slane %v6476_v10, 4  ;;  %v6508_v38 = vshrl.u32 %v13237_v58, 16 }
 0x418   : > { %v6495_v8 = vrot.slane %v14776_v53, 5  ;;  %v6511_v35 = vshll.u32 %v13237_v58, 16  ;;  %v6490_v2 = vor.u32 %v6489_v56, %v6486_v30  ;;  %v14774_v42 = vshll.u32 %v13240_v41, 16  ;;  %v13262_v61 = vld [vmem:[#allocation2 + $0x34] sm:$0xf] }
 0x419   : > { %v6499_v7 = vrot.slane %v14777_v34, 4  ;;  %v6505_v25 = vrot.slane %v6503_v50, 5  ;;  %v6482_v32 = vsel %vm11030_vm4, %v6477_v63, %v13232_v55  ;;  %v6510_v9 = vrot.slane %v6508_v38, 4  ;;  %v13271_v0 = vld [vmem:[#allocation2 + $0x38] sm:$0x1] }
 0x41a   : > { %v6513_v27 = vrot.slane %v6511_v35, 5  ;;  %v14775_v6 = vshrl.u32 %v13240_v41, 16  ;;  %v6491_v36 = vrot.slane %v6490_v2, 4  ;;  %v6519_v16 = vrot.slane %v14774_v42, 5 }
 0x41b   : > { %v6500_v60 = vor.u32 %v6499_v7, %v6495_v8  ;;  %v6527_v44 = vshll.u32 %v13253_v40, 16  ;;  %v6532_v33 = vshrl.u32 %v6383_v43, 16  ;;  %v6535_v17 = vshll.u32 %v6383_v43, 16 }
 0x41c   : > { %v6514_v48 = vor.u32 %v6513_v27, %v6510_v9  ;;  %v6523_v15 = vrot.slane %v14775_v6, 4  ;;  %v6496_v55 = vsel %vm11030_vm4, %v6491_v36, %v6495_v8  ;;  %v14772_v56 = vshll.u32 %v13262_v61, 16 }
 0x41d   : > { %v6501_v10 = vrot.slane %v6500_v60, 4  ;;  %v6529_v30 = vrot.slane %v6527_v44, 5  ;;  %v6534_v38 = vrot.slane %v6532_v33, 4  ;;  %v6537_v35 = vrot.slane %v6535_v17, 5 }
 0x41e   : > { %v6515_v50 = vrot.slane %v6514_v48, 4  ;;  %v6524_v63 = vor.u32 %v6523_v15, %v6519_v16  ;;  %v6543_v7 = vrot.slane %v14772_v56, 5  ;;  %v14773_v9 = vshrl.u32 %v13262_v61, 16 }
 0x41f   : > { %v6506_v2 = vsel %vm11030_vm4, %v6501_v10, %v6505_v25  ;;  %v6551_v27 = vshll.u32 %v13271_v0, 16  ;;  %v6538_v60 = vor.u32 %v6537_v35, %v6534_v38  ;;  %v13292_v44 = vmax.bf16 %v6448_v47, %v13159_v18 }
 0x420   : > { %v6520_v8 = vsel %vm11030_vm4, %v6515_v50, %v6519_v16  ;;  %v6525_v36 = vrot.slane %v6524_v63, 4  ;;  %v6547_v25 = vrot.slane %v14773_v9, 4  ;;  %v13297_v15 = vmax.bf16 %v6458_v11, %v13163_v29  ;;  %v6995_v11 = vld [vmem:[#allocation2] sm:$0xe] }
 0x421   : > { %v6553_v48 = vrot.slane %v6551_v27, 5  ;;  %v13300_v33 = vmax.bf16 %v6472_v28, %v13176_v59  ;;  %v6539_v17 = vrot.slane %v6538_v60, 4  ;;  %v13305_v10 = vmax.bf16 %v6482_v32, %v13187_v14  ;;  %v13319_v28 = vld [vmem:[#allocation2 + $0x18] sm:$0xe] }
 0x422   : > { %v6530_v16 = vsel %vm11030_vm4, %v6525_v36, %v6529_v30  ;;  %v13308_v18 = vmax.bf16 %v6496_v55, %v13209_v54  ;;  %v6548_v5 = vor.u32 %v6547_v25, %v6543_v7  ;;  %v13311_v22 = vmax.bf16 %v6506_v2, %v13220_v19  ;;  %v13323_v30 = vld [vmem:[#allocation2 + $0xc] sm:$0xe] }
 0x423   : > { %v13314_v47 = vmax.bf16 %v6520_v8, %v13237_v58  ;;  %v13317_v59 = vmax.bf16 %v6530_v16, %v13240_v41  ;;  %v6544_v32 = vsel %vm11030_vm4, %v6539_v17, %v6543_v7  ;;  %v9350_v54 = vrot.slane %v6995_v11, 9  ;;  %v13329_v58 = vld [vmem:[#allocation2 + $0x24] sm:$0xe] }
 0x424   : > { %v7077_v55 = vrot.slane %v13163_v29, 5  ;;  %v7080_v50 = vrot.slane %v13178_v23, 5  ;;  %v6549_v63 = vrot.slane %v6548_v5, 4  ;;  %v13327_v38 = vmax.bf16 %v6544_v32, %v6383_v43  ;;  %v13341_v43 = vld [vmem:[#allocation2 + $0x30] sm:$0xe] }
 0x425   : > { %v9351_v35 = vrot.slane %v13323_v30, 9  ;;  %v7084_v2 = vrot.slane %v13187_v14, 5  ;;  %v7087_v8 = vrot.slane %v13200_v49, 5  ;;  %v9352_v36 = vrot.slane %v13319_v28, 9 }
 0x426   : > { %v13335_v27 = vsel %vm11057_vm7, %v9350_v54, %v7077_v55  ;;  %v7079_v7 = vrot.slane %v7077_v55, 4  ;;  %v6554_v23 = vsel %vm11030_vm4, %v6549_v63, %v6553_v48  ;;  %v7091_v16 = vrot.slane %v13220_v19, 5 }
 0x427   : > { %v13345_v60 = vsel %vm11057_vm7, %v9351_v35, %v7084_v2  ;;  %v7086_v25 = vrot.slane %v7084_v2, 4  ;;  %v13349_v17 = vmax.bf16 %v6554_v23, %v13262_v61  ;;  %v7094_v5 = vrot.slane %v13226_v1, 5  ;;  %v13414_v23 = vld [vmem:[#allocation2 + $0x14] sm:$0x3] }
 0x428   : > { %v13353_v49 = vsel %vm11057_vm7, %v7079_v7, %v7080_v50  ;;  %v9353_v48 = vrot.slane %v13329_v58, 9  ;;  %v13363_v54 = vsel %vm11057_vm7, %v9352_v36, %v7091_v16  ;;  %v7093_v55 = vrot.slane %v7091_v16, 4 }
 0x429   : > { %v13359_v32 = vsel %vm11057_vm7, %v7086_v25, %v7087_v8  ;;  %v7098_v63 = vrot.slane %v13240_v41, 5  ;;  %v7101_v35 = vrot.slane %v13253_v40, 5  ;;  %v9354_v50 = vrot.slane %v13341_v43, 9 }
 0x42a   : > { %v7105_v2 = vrot.slane %v13262_v61, 5  ;;  %v7108_v1 = vrot.slane %v13271_v0, 5  ;;  %v13372_v7 = vsel %vm11057_vm7, %v7093_v55, %v7094_v5  ;;  %v7324_v0 = vrot.slane %v6449_v62, 5 }
 0x42b   : > { %v13376_v8 = vsel %vm11057_vm7, %v9353_v48, %v7098_v63  ;;  %v7100_v36 = vrot.slane %v7098_v63, 4  ;;  %v7316_v48 = vshrl.u32 %v6995_v11, 16  ;;  %v7319_v63 = vshll.u32 %v6995_v11, 16 }
 0x42c   : > { %v13382_v40 = vsel %vm11057_vm7, %v9354_v50, %v7105_v2  ;;  %v7107_v25 = vrot.slane %v7105_v2, 4  ;;  %v13398_v50 = vld [vmem:[#allocation2 + $0x8] sm:$0x3]  ;;  %v7339_v16 = vshrl.u32 %v13323_v30, 16  ;;  %v7342_v55 = vshll.u32 %v13323_v30, 16 }
 0x42d   : > { %v13390_v5 = vsel %vm11057_vm7, %v7100_v36, %v7101_v35  ;;  %v7333_v35 = vshll.u32 %v13398_v50, 16  ;;  %v7318_v36 = vrot.slane %v7316_v48, 5  ;;  %v7321_v56 = vrot.slane %v7319_v63, 6 }
 0x42e   : > { %v13402_v2 = vsel %vm11057_vm7, %v7107_v25, %v7108_v1  ;;  %v7325_v1 = vrot.slane %v6445_v13, 6  ;;  %v7330_v25 = vshrl.u32 %v13398_v50, 16  ;;  %v7347_v11 = vrot.slane %v6473_v12, 5  ;;  %v13432_v12 = vld [vmem:[#allocation2 + $0x20] sm:$0x3] }
 0x42f   : > { %v7335_v42 = vrot.slane %v7333_v35, 6  ;;  %v7341_v6 = vrot.slane %v7339_v16, 5  ;;  %v7322_v53 = vor.u32 %v7321_v56, %v7318_v36  ;;  %v7344_v13 = vrot.slane %v7342_v55, 6 }
 0x430   : > { %v13424_v9 = vor.u32 %v7325_v1, %v7324_v0  ;;  %v7332_v62 = vrot.slane %v7330_v25, 5  ;;  %v7348_v34 = vrot.slane %v6469_v31, 6  ;;  %v7353_v51 = vshrl.u32 %v13414_v23, 16 }
 0x431   : > { %v7356_v30 = vshll.u32 %v13414_v23, 16  ;;  %v7362_v37 = vshrl.u32 %v13319_v28, 16  ;;  %v7323_v0 = vrot.slane %v7322_v53, 4  ;;  %v7345_v1 = vor.u32 %v7344_v13, %v7341_v6  ;;  %v13445_v13 = vld [vmem:[#allocation2 + $0x2c] sm:$0x3] }
 0x432   : > { %v7328_v48 = vrot.slane %v13424_v9, 4  ;;  %v7336_v63 = vor.u32 %v7335_v42, %v7332_v62  ;;  %v7349_v35 = vor.u32 %v7348_v34, %v7347_v11  ;;  %v7355_v16 = vrot.slane %v7353_v51, 5 }
 0x433   : > { %v7358_v55 = vrot.slane %v7356_v30, 6  ;;  %v7364_v31 = vrot.slane %v7362_v37, 5  ;;  %v7365_v36 = vshll.u32 %v13319_v28, 16  ;;  %v7327_v42 = vsel %vm11119_vm11, %v7323_v0, %v13424_v9 }
 0x434   : > { %v7337_v56 = vsel %vm11119_vm11, %v7328_v48, %v7336_v63  ;;  %v7346_v25 = vrot.slane %v7345_v1, 4  ;;  %v7351_v62 = vrot.slane %v7349_v35, 4  ;;  %v14861_v3 = vshrl.u32 %v13220_v19, 16 }
 0x435   : > { %v7359_v53 = vor.u32 %v7358_v55, %v7355_v16  ;;  %v7367_v6 = vrot.slane %v7365_v36, 6  ;;  %v14862_v51 = vshll.u32 %v13220_v19, 16  ;;  %v7376_v11 = vshrl.u32 %v13432_v12, 16 }
 0x436   : > { %v7370_v52 = vrot.slane %v14861_v3, 5  ;;  %v7350_v37 = vsel %vm11119_vm11, %v7346_v25, %v7349_v35  ;;  %v7379_v28 = vshll.u32 %v13432_v12, 16  ;;  %v7385_v9 = vshrl.u32 %v13329_v58, 16 }
 0x437   : > { %v7371_v34 = vrot.slane %v14862_v51, 6  ;;  %v7388_v48 = vshll.u32 %v13329_v58, 16  ;;  %v7360_v3 = vsel %vm11119_vm11, %v7351_v62, %v7359_v53  ;;  %v7368_v63 = vor.u32 %v7367_v6, %v7364_v31  ;;  %v13461_v31 = vld [vmem:[#allocation2 + $0x38] sm:$0x3] }
 0x438   : > { %v7378_v0 = vrot.slane %v7376_v11, 5  ;;  %v7381_v1 = vrot.slane %v7379_v28, 6  ;;  %v7387_v16 = vrot.slane %v7385_v9, 5  ;;  %v14863_v36 = vshrl.u32 %v13240_v41, 16 }
 0x439   : > { %v7372_v30 = vor.u32 %v7371_v34, %v7370_v52  ;;  %v7390_v55 = vrot.slane %v7388_v48, 6  ;;  %v7369_v39 = vrot.slane %v7368_v63, 4  ;;  %v14864_v25 = vshll.u32 %v13240_v41, 16 }
 0x43a   : > { %v7393_v51 = vrot.slane %v14863_v36, 5  ;;  %v7399_v21 = vshrl.u32 %v13445_v13, 16  ;;  %v7382_v58 = vor.u32 %v7381_v1, %v7378_v0  ;;  %v7402_v62 = vshll.u32 %v13445_v13, 16 }
 0x43b   : > { %v7374_v35 = vrot.slane %v7372_v30, 4  ;;  %v7394_v20 = vrot.slane %v14864_v25, 6  ;;  %v7391_v57 = vor.u32 %v7390_v55, %v7387_v16  ;;  %v7408_v52 = vshrl.u32 %v13341_v43, 16 }
 0x43c   : > { %v7373_v53 = vsel %vm11119_vm11, %v7369_v39, %v7372_v30  ;;  %v7401_v34 = vrot.slane %v7399_v21, 5  ;;  %v7411_v11 = vshll.u32 %v13341_v43, 16  ;;  %v7404_v48 = vrot.slane %v7402_v62, 6 }
 0x43d   : > { %v7395_v6 = vor.u32 %v7394_v20, %v7393_v51  ;;  %v7383_v28 = vsel %vm11119_vm11, %v7374_v35, %v7382_v58  ;;  %v7392_v9 = vrot.slane %v7391_v57, 4  ;;  %v7410_v63 = vrot.slane %v7408_v52, 5 }
 0x43e   : > { %v7413_v1 = vrot.slane %v7411_v11, 6  ;;  %v14865_v16 = vshrl.u32 %v13262_v61, 16  ;;  %v14866_v36 = vshll.u32 %v13262_v61, 16  ;;  %v7405_v21 = vor.u32 %v7404_v48, %v7401_v34  ;;  %v7855_v48 = vld [vmem:[#allocation2] sm:$0xc] }
 0x43f   : > { %v7397_v0 = vrot.slane %v7395_v6, 4  ;;  %v7396_v20 = vsel %vm11119_vm11, %v7392_v9, %v7395_v6  ;;  %v7422_v39 = vshrl.u32 %v13461_v31, 16  ;;  %v7425_v43 = vshll.u32 %v13461_v31, 16 }
 0x440   : > { %v7416_v55 = vrot.slane %v14865_v16, 5  ;;  %v7417_v25 = vrot.slane %v14866_v36, 6  ;;  %v7414_v30 = vor.u32 %v7413_v1, %v7410_v63  ;;  %v14867_v51 = vmax.bf16 %v13335_v27, %v13292_v44 }
 0x441   : > { %v14868_v58 = vmax.bf16 %v13353_v49, %v13297_v15  ;;  %v7406_v52 = vsel %vm11119_vm11, %v7397_v0, %v7405_v21  ;;  %v7424_v6 = vrot.slane %v7422_v39, 5  ;;  %v7427_v34 = vrot.slane %v7425_v43, 6 }
 0x442   : > { %v7418_v57 = vor.u32 %v7417_v25, %v7416_v55  ;;  %v13479_v35 = vmax.bf16 %v7327_v42, %v14867_v51  ;;  %v14869_v11 = vmax.bf16 %v13345_v60, %v13300_v33  ;;  %v7415_v63 = vrot.slane %v7414_v30, 4  ;;  %v7859_v25 = vld [vmem:[#allocation2 + $0x30] sm:$0xc] }
 0x443   : > { %v13484_v62 = vmax.bf16 %v7337_v56, %v14868_v58  ;;  %v14870_v44 = vmax.bf16 %v13359_v32, %v13305_v10  ;;  %v14871_v15 = vmax.bf16 %v13363_v54, %v13308_v18  ;;  %v7856_v56 = vld [vmem:[#allocation2 + $0xc] sm:$0xc]  ;;  %v7428_v42 = vor.u32 %v7427_v34, %v7424_v6  ;;  %v7857_v32 = vld [vmem:[#allocation2 + $0x18] sm:$0xc] }
 0x444   : > { %v7817_v9 = vmax.bf16 %v7350_v37, %v14869_v11  ;;  %v7420_v1 = vrot.slane %v7418_v57, 4  ;;  %v14872_v0 = vmax.bf16 %v13372_v7, %v13311_v22  ;;  %v14873_v33 = vmax.bf16 %v13376_v8, %v13314_v47  ;;  %v7858_v8 = vld [vmem:[#allocation2 + $0x24] sm:$0xc] }
 0x445   : > { %v7818_v27 = vmax.bf16 %v7360_v3, %v14870_v44  ;;  %v7819_v49 = vmax.bf16 %v7373_v53, %v14871_v15  ;;  %v14874_v37 = vmax.bf16 %v13390_v5, %v13317_v59  ;;  %v7419_v10 = vsel %vm11119_vm11, %v7415_v63, %v7418_v57  ;;  %v13556_v15 = vld [vmem:[#allocation2 + $0xac] sm:$0xf] }
 0x446   : > { %v7820_v16 = vmax.bf16 %v7383_v28, %v14872_v0  ;;  %v7821_v60 = vmax.bf16 %v7396_v20, %v14873_v33  ;;  %v9370_v18 = vrot.slane %v7855_v48, 10  ;;  %v7917_v54 = vrot.slane %v13163_v29, 6  ;;  %v4591_v0 = vld [vmem:[#allocation2 + $0xa8] sm:$0xe] }
 0x447   : > { %v7822_v55 = vmax.bf16 %v7406_v52, %v14874_v37  ;;  %v7920_v3 = vrot.slane %v13398_v50, 6  ;;  %v7429_v22 = vsel %vm11119_vm11, %v7420_v1, %v7428_v42  ;;  %v14875_v47 = vmax.bf16 %v13382_v40, %v13327_v38 }
 0x448   : > { %v9371_v53 = vrot.slane %v7856_v56, 10  ;;  %v7924_v59 = vrot.slane %v13187_v14, 6  ;;  %v14876_v5 = vmax.bf16 %v13402_v2, %v13349_v17  ;;  %v7918_v29 = vsel %vm11154_vm12, %v9370_v18, %v7917_v54 }
 0x449   : > { %v7823_v7 = vmax.bf16 %v7419_v10, %v14875_v47  ;;  %v7919_v36 = vrot.slane %v7917_v54, 4  ;;  %v7927_v50 = vrot.slane %v13414_v23, 6  ;;  %v9372_v40 = vrot.slane %v7857_v32, 10 }
 0x44a   : > { %v7824_v28 = vmax.bf16 %v7429_v22, %v14876_v5  ;;  %v7925_v20 = vsel %vm11154_vm12, %v9371_v53, %v7924_v59  ;;  %v7926_v38 = vrot.slane %v7924_v59, 4  ;;  %v7931_v21 = vrot.slane %v13220_v19, 6 }
 0x44b   : > { %v7921_v14 = vsel %vm11154_vm12, %v7919_v36, %v7920_v3  ;;  %v7934_v17 = vrot.slane %v13432_v12, 6  ;;  %v9373_v2 = vrot.slane %v7858_v8, 10  ;;  %v7938_v39 = vrot.slane %v13240_v41, 6 }
 0x44c   : > { %v7928_v43 = vsel %vm11154_vm12, %v7926_v38, %v7927_v50  ;;  %v7932_v23 = vsel %vm11154_vm12, %v9372_v40, %v7931_v21  ;;  %v7933_v30 = vrot.slane %v7931_v21, 4  ;;  %v7941_v57 = vrot.slane %v13445_v13, 6 }
 0x44d   : > { %v7939_v19 = vsel %vm11154_vm12, %v9373_v2, %v7938_v39  ;;  %v7940_v51 = vrot.slane %v7938_v39, 4  ;;  %v9374_v58 = vrot.slane %v7859_v25, 10  ;;  %v7945_v52 = vrot.slane %v13262_v61, 6 }
 0x44e   : > { %v7935_v12 = vsel %vm11154_vm12, %v7933_v30, %v7934_v17  ;;  %v7948_v41 = vrot.slane %v13461_v31, 6  ;;  %v8095_v6 = vmax.bf16 %v7918_v29, %v13479_v35  ;;  %v8096_v34 = vmax.bf16 %v7921_v14, %v13484_v62  ;;  %v3985_v35 = vld [vmem:[#allocation2 + $0xa8] sm:$0xf]  ;;  %v4891_v17 = vld [vmem:[#allocation2 + $0xb0] sm:$0x3] }
 0x44f   : > { %v7942_v11 = vsel %vm11154_vm12, %v7940_v51, %v7941_v57  ;;  %v7946_v13 = vsel %vm11154_vm12, %v9374_v58, %v7945_v52  ;;  %v7947_v48 = vrot.slane %v7945_v52, 4  ;;  %v13546_v63 = vmax.bf16 %v7925_v20, %v7817_v9  ;;  %v5451_v30 = vld [vmem:[#allocation2 + $0xa8] sm:$0xc] }
 0x450   : > { %v13548_v1 = vmax.bf16 %v7928_v43, %v7818_v27  ;;  %v13550_v61 = vmax.bf16 %v7932_v23, %v7819_v49  ;;  %v13552_v44 = vmax.bf16 %v7935_v12, %v7820_v16  ;;  %v13554_v31 = vmax.bf16 %v7939_v19, %v7821_v60  ;;  %v4011_v27 = vld [vmem:[#allocation2 + $0xb0] sm:$0x1] }
 0x451   : > { %v7949_v62 = vsel %vm11154_vm12, %v7947_v48, %v7948_v41  ;;  %v13560_v56 = vmax.bf16 %v7942_v11, %v7822_v55  ;;  %v13562_v42 = vmax.bf16 %v7946_v13, %v7823_v7  ;;  %v8135_v9 = vmax.bf16 %v13546_v63, %v8095_v6 }
 0x452   : > { %v13565_v49 = vmax.bf16 %v7949_v62, %v7824_v28  ;;  %v8136_v16 = vmax.bf16 %v13548_v1, %v8096_v34  ;;  %v8137_v33 = vmax.bf16 %v13550_v61, %v13546_v63  ;;  %v8138_v60 = vmax.bf16 %v13552_v44, %v13548_v1 }
 0x453   : > { %v8167_v37 = vmax.bf16 %v8135_v9, %v13550_v61  ;;  %v4354_v55 = vshrl.u32 %v3985_v35, 16  ;;  %v4357_v10 = vshll.u32 %v3985_v35, 16  ;;  %v4363_v32 = vshll.u32 %v13556_v15, 16 }
 0x454   : > { %v8168_v18 = vmax.bf16 %v8136_v16, %v13552_v44  ;;  %v4367_v54 = vshrl.u32 %v13556_v15, 16  ;;  %v4373_v3 = vshll.u32 %v4011_v27, 16  ;;  %v9300_v22 = vrot.slane %v4591_v0, 9  ;;  %v6385_v16 = vld [vmem:[#allocation2 + $0x3c] sm:$0xf] }
 0x455   : > { %v8199_v47 = vmax.bf16 %v8167_v37, %v13554_v31  ;;  %v4356_v7 = vrot.slane %v4354_v55, 4  ;;  %v4359_v8 = vrot.slane %v4357_v10, 5  ;;  %v4365_v53 = vrot.slane %v4363_v32, 5 }
 0x456   : > { %v8200_v59 = vmax.bf16 %v8168_v18, %v13560_v56  ;;  %v4369_v5 = vrot.slane %v4367_v54, 4  ;;  %v4375_v28 = vrot.slane %v4373_v3, 5  ;;  %v4757_v29 = vrot.slane %v13556_v15, 5 }
 0x457   : > { %v8231_v36 = vmax.bf16 %v8199_v47, %v13562_v42  ;;  %v4360_v50 = vor.u32 %v4359_v8, %v4356_v7  ;;  %v4760_v25 = vrot.slane %v4011_v27, 5  ;;  %v5220_v20 = vshrl.u32 %v4591_v0, 16  ;;  %v14878_v8 = vld [vmem:[#allocation22_spill] sm:$0xff] }
 0x458   : > { %v8232_v38 = vmax.bf16 %v8200_v59, %v13565_v49  ;;  %v4370_v40 = vor.u32 %v4369_v5, %v4365_v53  ;;  %v4758_v21 = vsel %vm11057_vm7, %v9300_v22, %v4757_v29  ;;  %v4759_v14 = vrot.slane %v4757_v29, 4  ;;  %v14877_v22 = vld [vmem:[#allocation24_spill] sm:$0xff]  ;;  %v13597_v5 = vld [vmem:[#allocation2 + $0x40] sm:$0xf] }
 0x459   : > { %v4361_v2 = vrot.slane %v4360_v50, 4  ;;  %v5222_v39 = vrot.slane %v5220_v20, 5  ;;  %v5223_v43 = vshll.u32 %v4591_v0, 16  ;;  %v5228_v23 = vrot.slane %v4367_v54, 5 }
 0x45a   : > { %v9390_v57 = vcombine.low %v8231_v36, %v8232_v38  ;;  %v4371_v19 = vrot.slane %v4370_v40, 4  ;;  %v4761_v51 = vsel %vm11057_vm7, %v4759_v14, %v4760_v25  ;;  %v5229_v58 = vrot.slane %v4363_v32, 6  ;;  %v14880_v36 = vld [vmem:[#allocation25_spill] sm:$0xff]  ;;  %v14881_v40 = vld [vmem:[#allocation26_spill] sm:$0xff] }
 0x45b   : > { %v4366_v52 = vsel %vm11030_vm4, %v4361_v2, %v4365_v53  ;;  %v5225_v12 = vrot.slane %v5223_v43, 6  ;;  %v5234_v41 = vshrl.u32 %v4891_v17, 16  ;;  %v5237_v6 = vshll.u32 %v4891_v17, 16  ;;  %v14879_v53 = vld [vmem:[#allocation23_spill] sm:$0xff]  ;;  %v6420_v14 = vld [vmem:[#allocation2 + $0x44] sm:$0x1] }
 0x45c   : > { %9794 = vmatprep.mubr.bf16.mxu0 %v9390_v57  ;;  %v4376_v34 = vsel %vm11030_vm4, %v4371_v19, %v4375_v28  ;;  %v4565_v11 = vmax.bf16 %v4366_v52, %v3985_v35  ;;  %v5230_v13 = vor.u32 %v5229_v58, %v5228_v23  ;;  %v9320_v48 = vrot.slane %v5451_v30, 10  ;;  %v14882_v2 = vld [vmem:[#allocation27_spill] sm:$0xff] }
 0x45d   : > { %v4566_v62 = vmax.bf16 %v4376_v34, %v13556_v15  ;;  %v5226_v9 = vor.u32 %v5225_v12, %v5222_v39  ;;  %v5236_v27 = vrot.slane %v5234_v41, 5  ;;  %v5239_v0 = vrot.slane %v5237_v6, 6 }
 0x45e   : > { %v4865_v37 = vmax.bf16 %v4758_v21, %v4565_v11  ;;  %v5232_v55 = vrot.slane %v5230_v13, 4  ;;  %v5597_v10 = vrot.slane %v13556_v15, 6  ;;  %v5600_v32 = vrot.slane %v4891_v17, 6  ;;  %v7000_v17 = vld [vmem:[#allocation2 + $0x3c] sm:$0xe] }
 0x45f   : > { %v4866_v18 = vmax.bf16 %v4761_v51, %v4566_v62  ;;  %v5227_v54 = vrot.slane %v5226_v9, 4  ;;  %v5240_v3 = vor.u32 %v5239_v0, %v5236_v27  ;;  %v5737_v47 = vmax.bf16 %v14877_v22, %v13059_v45  ;;  %v14883_v51 = vld [vmem:[#allocation28_spill] sm:$0xff] }
 0x460   : > { %v5598_v35 = vsel %vm11154_vm12, %v9320_v48, %v5597_v10  ;;  %v5599_v7 = vrot.slane %v5597_v10, 4  ;;  %v5738_v59 = vmax.bf16 %v14879_v53, %v14878_v8  ;;  %v6556_v28 = vshrl.u32 %v6385_v16, 16 }
 0x461   : > { %v5231_v15 = vsel %vm11119_vm11, %v5227_v54, %v5230_v13  ;;  %v5241_v29 = vsel %vm11119_vm11, %v5232_v55, %v5240_v3  ;;  %v5769_v50 = vmax.bf16 %v5737_v47, %v14880_v36  ;;  %v6559_v25 = vshll.u32 %v6385_v16, 16 }
 0x462   : > { %v5425_v45 = vmax.bf16 %v5231_v15, %v4865_v37  ;;  %v5426_v20 = vmax.bf16 %v5241_v29, %v4866_v18  ;;  %v5601_v38 = vsel %vm11154_vm12, %v5599_v7, %v5600_v32  ;;  %v5770_v21 = vmax.bf16 %v5738_v59, %v14881_v40 }
 0x463   : > { %v5801_v39 = vmax.bf16 %v5769_v50, %v14882_v2  ;;  %v6558_v43 = vrot.slane %v6556_v28, 4  ;;  %v6561_v23 = vrot.slane %v6559_v25, 5  ;;  %v6565_v30 = vshll.u32 %v13597_v5, 16 }
 0x464   : > { %v13609_v57 = vmax.bf16 %v5598_v35, %v5425_v45  ;;  %v13611_v19 = vmax.bf16 %v5601_v38, %v5426_v20  ;;  %v5802_v58 = vmax.bf16 %v5770_v21, %v14883_v51  ;;  %v6569_v52 = vshrl.u32 %v13597_v5, 16  ;;  %v7300_v35 = vld [vmem:[#allocation2 + $0x44] sm:$0x3]  ;;  %v7860_v20 = vld [vmem:[#allocation2 + $0x3c] sm:$0xc] }
 0x465   : > { %v6562_v12 = vor.u32 %v6561_v23, %v6558_v43  ;;  %v6567_v41 = vrot.slane %v6565_v30, 5  ;;  %v6575_v6 = vshll.u32 %v6420_v14, 16  ;;  %v9355_v34 = vrot.slane %v7000_v17, 9 }
 0x466   : > { %v5833_v11 = vmax.bf16 %v5801_v39, %v13609_v57  ;;  %v5834_v13 = vmax.bf16 %v5802_v58, %v13611_v19  ;;  %v6571_v48 = vrot.slane %v6569_v52, 4  ;;  %v7112_v62 = vrot.slane %v13597_v5, 5 }
 0x467   : > { %v6563_v9 = vrot.slane %v6562_v12, 4  ;;  %v6577_v27 = vrot.slane %v6575_v6, 5  ;;  %v7115_v0 = vrot.slane %v6420_v14, 5  ;;  %v7431_v37 = vshrl.u32 %v7000_v17, 16  ;;  %v3987_v6 = vld [vmem:[#allocation2 + $0xb4] sm:$0xf] }
 0x468   : > { %v9336_v55 = vcombine.low %v5833_v11, %v5834_v13  ;;  %v6249_v10 = vrot.slane %v5833_v11, 7  ;;  %v6251_v32 = vrot.slane %v5834_v13, 7  ;;  %v6572_v18 = vor.u32 %v6571_v48, %v6567_v41 }
 0x469   : > { %v6568_v54 = vsel %vm11030_vm4, %v6563_v9, %v6567_v41  ;;  %v7113_v3 = vsel %vm11057_vm7, %v9355_v34, %v7112_v62  ;;  %v7114_v47 = vrot.slane %v7112_v62, 4  ;;  %v7433_v7 = vrot.slane %v7431_v37, 5  ;;  %v13630_v62 = vld [vmem:[#allocation2 + $0xb8] sm:$0xf] }
 0x46a   : > { %9766 = vmatprep.mubr.bf16.mxu1 %v9336_v55  ;;  %v6250_v8 = vrot.slane %v6249_v10, 4  ;;  %v6253_v59 = vrot.slane %v6251_v32, 4  ;;  %6357 = vst [vmem:[#allocation2 + $0x90] sm:$0xe] %v6249_v10  ;;  %v6573_v28 = vrot.slane %v6572_v18, 4  ;;  %v6965_v15 = vmax.bf16 %v6568_v54, %v6385_v16 }
 0x46b   : > { %v7116_v29 = vsel %vm11057_vm7, %v7114_v47, %v7115_v0  ;;  %v7434_v50 = vshll.u32 %v7000_v17, 16  ;;  %v7439_v25 = vrot.slane %v6569_v52, 5  ;;  %v7440_v45 = vrot.slane %v6565_v30, 6  ;;  %v4012_v47 = vld [vmem:[#allocation2 + $0xbc] sm:$0x1] }
 0x46c   : > { %v6252_v21 = vsel %vm11257_vm15, %v6250_v8, %v6251_v32  ;;  %6359 = vst [vmem:[#allocation2 + $0x98] sm:$0x1] %v6253_v59  ;;  %v6578_v14 = vsel %vm11030_vm4, %v6573_v28, %v6577_v27  ;;  %v7265_v39 = vmax.bf16 %v7113_v3, %v6965_v15  ;;  %v7445_v43 = vshrl.u32 %v7300_v35, 16 }
 0x46d   : > { %6358 = vst [vmem:[#allocation2 + $0x94] sm:$0xf] %v6252_v21  ;;  %v6966_v23 = vmax.bf16 %v6578_v14, %v13597_v5  ;;  %v7436_v16 = vrot.slane %v7434_v50, 6  ;;  %v7441_v58 = vor.u32 %v7440_v45, %v7439_v25  ;;  %v7448_v12 = vshll.u32 %v7300_v35, 16 }
 0x46e   : > { %v7447_v41 = vrot.slane %v7445_v43, 5  ;;  %v9375_v17 = vrot.slane %v7860_v20, 10  ;;  %v7952_v30 = vrot.slane %v13597_v5, 6  ;;  %v7955_v52 = vrot.slane %v7300_v35, 6 }
 0x46f   : > { %v7266_v34 = vmax.bf16 %v7116_v29, %v6966_v23  ;;  %v7437_v11 = vor.u32 %v7436_v16, %v7433_v7  ;;  %v7443_v13 = vrot.slane %v7441_v58, 4  ;;  %v7450_v48 = vrot.slane %v7448_v12, 6 }
 0x470   : > { %v7953_v9 = vsel %vm11154_vm12, %v9375_v17, %v7952_v30  ;;  %v7954_v27 = vrot.slane %v7952_v30, 4  ;;  %v8169_v0 = vmax.bf16 %v8137_v33, %v13554_v31  ;;  %v8170_v5 = vmax.bf16 %v8138_v60, %v13560_v56  ;;  %v4592_v33 = vld [vmem:[#allocation2 + $0xb4] sm:$0xe]  ;;  %v4892_v30 = vld [vmem:[#allocation2 + $0xbc] sm:$0x3] }
 0x471   : > { %v7438_v37 = vrot.slane %v7437_v11, 4  ;;  %v7451_v55 = vor.u32 %v7450_v48, %v7447_v41  ;;  %v4378_v10 = vshrl.u32 %v3987_v6, 16  ;;  %v4381_v32 = vshll.u32 %v3987_v6, 16 }
 0x472   : > { %v7956_v18 = vsel %vm11154_vm12, %v7954_v27, %v7955_v52  ;;  %v8201_v54 = vmax.bf16 %v8169_v0, %v13562_v42  ;;  %v8202_v3 = vmax.bf16 %v8170_v5, %v13565_v49  ;;  %v4387_v63 = vshll.u32 %v13630_v62, 16 }
 0x473   : > { %v7442_v35 = vsel %vm11119_vm11, %v7438_v37, %v7441_v58  ;;  %v7452_v1 = vsel %vm11119_vm11, %v7443_v13, %v7451_v55  ;;  %v4380_v60 = vrot.slane %v4378_v10, 4  ;;  %v4383_v7 = vrot.slane %v4381_v32, 5 }
 0x474   : > { %v7825_v8 = vmax.bf16 %v7442_v35, %v7265_v39  ;;  %v7826_v59 = vmax.bf16 %v7452_v1, %v7266_v34  ;;  %v4389_v28 = vrot.slane %v4387_v63, 5  ;;  %v4391_v15 = vshrl.u32 %v13630_v62, 16 }
 0x475   : > { %v4384_v29 = vor.u32 %v4383_v7, %v4380_v60  ;;  %v4397_v50 = vshll.u32 %v4012_v47, 16  ;;  %v9301_v25 = vrot.slane %v4592_v33, 9  ;;  %v4764_v45 = vrot.slane %v13630_v62, 5 }
 0x476   : > { %v13653_v20 = vmax.bf16 %v7953_v9, %v7825_v8  ;;  %v13655_v21 = vmax.bf16 %v7956_v18, %v7826_v59  ;;  %v4393_v14 = vrot.slane %v4391_v15, 4  ;;  %v4767_v43 = vrot.slane %v4012_v47, 5  ;;  %v5452_v9 = vld [vmem:[#allocation2 + $0xb4] sm:$0xc]  ;;  %v3989_v8 = vld [vmem:[#allocation2 + $0xc0] sm:$0xf] }
 0x477   : > { %v4385_v23 = vrot.slane %v4384_v29, 4  ;;  %v4399_v16 = vrot.slane %v4397_v50, 5  ;;  %v4765_v39 = vsel %vm11057_vm7, %v9301_v25, %v4764_v45  ;;  %v4766_v58 = vrot.slane %v4764_v45, 4 }
 0x478   : > { %v8233_v12 = vmax.bf16 %v8201_v54, %v13653_v20  ;;  %v8234_v41 = vmax.bf16 %v8202_v3, %v13655_v21  ;;  %v4394_v17 = vor.u32 %v4393_v14, %v4389_v28  ;;  %v5243_v52 = vshrl.u32 %v4592_v33, 16 }
 0x479   : > { %v4390_v34 = vsel %vm11030_vm4, %v4385_v23, %v4389_v28  ;;  %v4768_v11 = vsel %vm11057_vm7, %v4766_v58, %v4767_v43  ;;  %v5246_v13 = vshll.u32 %v4592_v33, 16  ;;  %v5251_v48 = vrot.slane %v4391_v15, 5  ;;  %v13671_v15 = vld [vmem:[#allocation2 + $0xc4] sm:$0xf]  ;;  %v4013_v58 = vld [vmem:[#allocation2 + $0xc8] sm:$0x1] }
 0x47a   : > { %v9391_v27 = vcombine.low %v8233_v12, %v8234_v41  ;;  %v4395_v0 = vrot.slane %v4394_v17, 4  ;;  %v4567_v5 = vmax.bf16 %v4390_v34, %v3987_v6  ;;  %v5245_v37 = vrot.slane %v5243_v52, 5  ;;  %v4593_v34 = vld [vmem:[#allocation2 + $0xc0] sm:$0xe] }
 0x47b   : > { %v5248_v55 = vrot.slane %v5246_v13, 6  ;;  %v5252_v10 = vrot.slane %v4387_v63, 6  ;;  %v5257_v32 = vshrl.u32 %v4892_v30, 16  ;;  %v5260_v18 = vshll.u32 %v4892_v30, 16 }
 0x47c   : > { %9795 = vmatmul.mubr.bf16.vlgmr.msra.gmra.mrb[64].mxu0 %v9391_v27  ;;  %v4400_v54 = vsel %vm11030_vm4, %v4395_v0, %v4399_v16  ;;  %v4867_v3 = vmax.bf16 %v4765_v39, %v4567_v5  ;;  %v9321_v47 = vrot.slane %v5452_v9, 10  ;;  %v5604_v35 = vrot.slane %v13630_v62, 6 }
 0x47d   : > { %v4568_v33 = vmax.bf16 %v4400_v54, %v13630_v62  ;;  %v5249_v1 = vor.u32 %v5248_v55, %v5245_v37  ;;  %v5253_v60 = vor.u32 %v5252_v10, %v5251_v48  ;;  %v5259_v7 = vrot.slane %v5257_v32, 5 }
 0x47e   : > { %v5262_v6 = vrot.slane %v5260_v18, 6  ;;  %v5605_v63 = vsel %vm11154_vm12, %v9321_v47, %v5604_v35  ;;  %v5606_v59 = vrot.slane %v5604_v35, 4  ;;  %v5607_v28 = vrot.slane %v4892_v30, 6 }
 0x47f   : > { %v4868_v29 = vmax.bf16 %v4768_v11, %v4568_v33  ;;  %v5250_v50 = vrot.slane %v5249_v1, 4  ;;  %v5255_v25 = vrot.slane %v5253_v60, 4  ;;  %v5739_v45 = vmax.bf16 %v14880_v36, %v14877_v22 }
 0x480   : > { %v5263_v14 = vor.u32 %v5262_v6, %v5259_v7  ;;  %v5608_v62 = vsel %vm11154_vm12, %v5606_v59, %v5607_v28  ;;  %v5740_v43 = vmax.bf16 %v14881_v40, %v14879_v53  ;;  %v4402_v23 = vshrl.u32 %v3989_v8, 16 }
 0x481   : > { %v5254_v16 = vsel %vm11119_vm11, %v5250_v50, %v5253_v60  ;;  %v5771_v39 = vmax.bf16 %v5739_v45, %v14882_v2  ;;  %v4405_v12 = vshll.u32 %v3989_v8, 16  ;;  %v4411_v41 = vshll.u32 %v13671_v15, 16  ;;  %v4893_v45 = vld [vmem:[#allocation2 + $0xc8] sm:$0x3] }
 0x482   : > { %v5264_v22 = vsel %vm11119_vm11, %v5255_v25, %v5263_v14  ;;  %v5427_v17 = vmax.bf16 %v5254_v16, %v4867_v3  ;;  %v5772_v30 = vmax.bf16 %v5740_v43, %v14883_v51  ;;  %v4404_v52 = vrot.slane %v4402_v23, 4 }
 0x483   : > { %v5428_v11 = vmax.bf16 %v5264_v22, %v4868_v29  ;;  %v5803_v53 = vmax.bf16 %v5771_v39, %v13609_v57  ;;  %v4407_v13 = vrot.slane %v4405_v12, 5  ;;  %v4413_v48 = vrot.slane %v4411_v41, 5  ;;  %v5453_v22 = vld [vmem:[#allocation2 + $0xc0] sm:$0xc] }
 0x484   : > { %v13687_v9 = vmax.bf16 %v5605_v63, %v5427_v17  ;;  %v5804_v27 = vmax.bf16 %v5772_v30, %v13611_v19  ;;  %v4415_v0 = vshrl.u32 %v13671_v15, 16  ;;  %v4421_v5 = vshll.u32 %v4013_v58, 16 }
 0x485   : > { %v13691_v37 = vmax.bf16 %v5608_v62, %v5428_v11  ;;  %v4408_v55 = vor.u32 %v4407_v13, %v4404_v52  ;;  %v9302_v10 = vrot.slane %v4593_v34, 9  ;;  %v4771_v32 = vrot.slane %v13671_v15, 5 }
 0x486   : > { %v5835_v18 = vmax.bf16 %v5803_v53, %v13687_v9  ;;  %v4417_v54 = vrot.slane %v4415_v0, 4  ;;  %v4423_v3 = vrot.slane %v4421_v5, 5  ;;  %v4774_v47 = vrot.slane %v4013_v58, 5  ;;  %v6387_v5 = vld [vmem:[#allocation2 + $0x48] sm:$0xf] }
 0x487   : > { %v5836_v35 = vmax.bf16 %v5804_v27, %v13691_v37  ;;  %v4409_v33 = vrot.slane %v4408_v55, 4  ;;  %v4772_v1 = vsel %vm11057_vm7, %v9302_v10, %v4771_v32  ;;  %v4773_v60 = vrot.slane %v4771_v32, 4 }
 0x488   : > { %v6254_v7 = vrot.slane %v5835_v18, 7  ;;  %v4418_v6 = vor.u32 %v4417_v54, %v4413_v48  ;;  %v5266_v63 = vshrl.u32 %v4593_v34, 16  ;;  %v5269_v59 = vshll.u32 %v4593_v34, 16 }
 0x489   : > { %v9337_v28 = vcombine.low %v5835_v18, %v5836_v35  ;;  %v6256_v29 = vrot.slane %v5836_v35, 7  ;;  %v4414_v50 = vsel %vm11030_vm4, %v4409_v33, %v4413_v48  ;;  %v4775_v25 = vsel %vm11057_vm7, %v4773_v60, %v4774_v47  ;;  %v13714_v33 = vld [vmem:[#allocation2 + $0x4c] sm:$0xf] }
 0x48a   : > { %v6255_v14 = vrot.slane %v6254_v7, 4  ;;  %6360 = vst [vmem:[#allocation2 + $0x9c] sm:$0xe] %v6254_v7  ;;  %v4419_v62 = vrot.slane %v4418_v6, 4  ;;  %v4569_v43 = vmax.bf16 %v4414_v50, %v3989_v8  ;;  %v5268_v23 = vrot.slane %v5266_v63, 5 }
 0x48b   : > { %9767 = vmatmul.mubr.bf16.gmra.mrb[20].mxu1 %v9337_v28  ;;  %v6258_v16 = vrot.slane %v6256_v29, 4  ;;  %v5271_v39 = vrot.slane %v5269_v59, 6  ;;  %v5274_v58 = vrot.slane %v4415_v0, 5  ;;  %v5275_v12 = vrot.slane %v4411_v41, 6 }
 0x48c   : > { %v6257_v17 = vsel %vm11257_vm15, %v6255_v14, %v6256_v29  ;;  %v4424_v30 = vsel %vm11030_vm4, %v4419_v62, %v4423_v3  ;;  %v4869_v52 = vmax.bf16 %v4772_v1, %v4569_v43  ;;  %v5280_v34 = vshrl.u32 %v4893_v45, 16 }
 0x48d   : > { %6361 = vst [vmem:[#allocation2 + $0xa0] sm:$0xf] %v6257_v17  ;;  %6362 = vst [vmem:[#allocation2 + $0xa4] sm:$0x1] %v6258_v16  ;;  %v4570_v11 = vmax.bf16 %v4424_v30, %v13671_v15  ;;  %v5272_v8 = vor.u32 %v5271_v39, %v5268_v23  ;;  %v5276_v53 = vor.u32 %v5275_v12, %v5274_v58  ;;  %v5283_v13 = vshll.u32 %v4893_v45, 16 }
 0x48e   : > { %v5282_v48 = vrot.slane %v5280_v34, 5  ;;  %v9322_v27 = vrot.slane %v5453_v22, 10  ;;  %v5611_v41 = vrot.slane %v13671_v15, 6  ;;  %v5614_v0 = vrot.slane %v4893_v45, 6  ;;  %v7001_v45 = vld [vmem:[#allocation2 + $0x48] sm:$0xe] }
 0x48f   : > { %v4870_v55 = vmax.bf16 %v4775_v25, %v4570_v11  ;;  %v5273_v10 = vrot.slane %v5272_v8, 4  ;;  %v5278_v32 = vrot.slane %v5276_v53, 4  ;;  %v5285_v18 = vrot.slane %v5283_v13, 6 }
 0x490   : > { %v5612_v54 = vsel %vm11154_vm12, %v9322_v27, %v5611_v41  ;;  %v5613_v3 = vrot.slane %v5611_v41, 4  ;;  %v5741_v47 = vmax.bf16 %v14882_v2, %v14880_v36  ;;  %v5742_v35 = vmax.bf16 %v14883_v51, %v14881_v40  ;;  %v6421_v36 = vld [vmem:[#allocation2 + $0x50] sm:$0x1] }
 0x491   : > { %v5277_v15 = vsel %vm11119_vm11, %v5273_v10, %v5276_v53  ;;  %v5286_v1 = vor.u32 %v5285_v18, %v5282_v48  ;;  %v6580_v60 = vshrl.u32 %v6387_v5, 16  ;;  %v6583_v7 = vshll.u32 %v6387_v5, 16 }
 0x492   : > { %v5429_v6 = vmax.bf16 %v5277_v15, %v4869_v52  ;;  %v5615_v63 = vsel %vm11154_vm12, %v5613_v3, %v5614_v0  ;;  %v5773_v59 = vmax.bf16 %v5741_v47, %v13609_v57  ;;  %v5774_v28 = vmax.bf16 %v5742_v35, %v13611_v19  ;;  %v7301_v35 = vld [vmem:[#allocation2 + $0x50] sm:$0x3] }
 0x493   : > { %v5287_v40 = vsel %vm11119_vm11, %v5278_v32, %v5286_v1  ;;  %v6582_v29 = vrot.slane %v6580_v60, 4  ;;  %v6585_v50 = vrot.slane %v6583_v7, 5  ;;  %v6589_v25 = vshll.u32 %v13714_v33, 16 }
 0x494   : > { %v5430_v14 = vmax.bf16 %v5287_v40, %v4870_v55  ;;  %v13725_v62 = vmax.bf16 %v5612_v54, %v5429_v6  ;;  %v5805_v43 = vmax.bf16 %v5773_v59, %v13687_v9  ;;  %v5806_v23 = vmax.bf16 %v5774_v28, %v13691_v37  ;;  %v7861_v6 = vld [vmem:[#allocation2 + $0x48] sm:$0xc] }
 0x495   : > { %v6586_v16 = vor.u32 %v6585_v50, %v6582_v29  ;;  %v6591_v39 = vrot.slane %v6589_v25, 5  ;;  %v6593_v58 = vshrl.u32 %v13714_v33, 16  ;;  %v6599_v12 = vshll.u32 %v6421_v36, 16 }
 0x496   : > { %v13730_v22 = vmax.bf16 %v5615_v63, %v5430_v14  ;;  %v5837_v17 = vmax.bf16 %v5805_v43, %v13725_v62  ;;  %v9356_v30 = vrot.slane %v7001_v45, 9  ;;  %v7119_v52 = vrot.slane %v13714_v33, 5 }
 0x497   : > { %v6587_v34 = vrot.slane %v6586_v16, 4  ;;  %v6595_v11 = vrot.slane %v6593_v58, 4  ;;  %v6601_v8 = vrot.slane %v6599_v12, 5  ;;  %v7122_v53 = vrot.slane %v6421_v36, 5 }
 0x498   : > { %v5838_v13 = vmax.bf16 %v5806_v23, %v13730_v22  ;;  %v6259_v48 = vrot.slane %v5837_v17, 7  ;;  %v7120_v27 = vsel %vm11057_vm7, %v9356_v30, %v7119_v52  ;;  %v7121_v41 = vrot.slane %v7119_v52, 4  ;;  %v6389_v30 = vld [vmem:[#allocation2 + $0x54] sm:$0xf] }
 0x499   : > { %v6592_v0 = vsel %vm11030_vm4, %v6587_v34, %v6591_v39  ;;  %v6596_v55 = vor.u32 %v6595_v11, %v6591_v39  ;;  %v7454_v10 = vshrl.u32 %v7001_v45, 16  ;;  %v7457_v32 = vshll.u32 %v7001_v45, 16 }
 0x49a   : > { %v9338_v18 = vcombine.low %v5837_v17, %v5838_v13  ;;  %v6260_v54 = vrot.slane %v6259_v48, 4  ;;  %v6261_v3 = vrot.slane %v5838_v13, 7  ;;  %6363 = vst [vmem:[#allocation2 + $0xa8] sm:$0xe] %v6259_v48  ;;  %v6967_v47 = vmax.bf16 %v6592_v0, %v6387_v5 }
 0x49b   : > { %v6597_v15 = vrot.slane %v6596_v55, 4  ;;  %v7123_v1 = vsel %vm11057_vm7, %v7121_v41, %v7122_v53  ;;  %v7456_v60 = vrot.slane %v7454_v10, 5  ;;  %v7459_v7 = vrot.slane %v7457_v32, 6  ;;  %v6422_v32 = vld [vmem:[#allocation2 + $0x5c] sm:$0x1] }
 0x49c   : > { %9770 = vmatprep.mubr.bf16.mxu1 %v9338_v18  ;;  %v6262_v63 = vsel %vm11257_vm15, %v6260_v54, %v6261_v3  ;;  %v6263_v59 = vrot.slane %v6261_v3, 4  ;;  %v7267_v28 = vmax.bf16 %v7120_v27, %v6967_v47  ;;  %v7462_v36 = vrot.slane %v6593_v58, 5  ;;  %v7002_v3 = vld [vmem:[#allocation2 + $0x54] sm:$0xe] }
 0x49d   : > { %6364 = vst [vmem:[#allocation2 + $0xac] sm:$0xf] %v6262_v63  ;;  %v6602_v40 = vsel %vm11030_vm4, %v6597_v15, %v6601_v8  ;;  %v7460_v5 = vor.u32 %v7459_v7, %v7456_v60  ;;  %v7463_v29 = vrot.slane %v6589_v25, 6  ;;  %v7468_v50 = vshrl.u32 %v7301_v35, 16  ;;  %v13749_v25 = vld [vmem:[#allocation2 + $0x58] sm:$0xf] }
 0x49e   : > { %6365 = vst [vmem:[#allocation2 + $0xb0] sm:$0x1] %v6263_v59  ;;  %v6968_v45 = vmax.bf16 %v6602_v40, %v13714_v33  ;;  %v7471_v14 = vshll.u32 %v7301_v35, 16  ;;  %v9376_v43 = vrot.slane %v7861_v6, 10  ;;  %v7959_v23 = vrot.slane %v13714_v33, 6 }
 0x49f   : > { %v7461_v16 = vrot.slane %v7460_v5, 4  ;;  %v7464_v39 = vor.u32 %v7463_v29, %v7462_v36  ;;  %v7470_v12 = vrot.slane %v7468_v50, 5  ;;  %v7962_v17 = vrot.slane %v7301_v35, 6 }
 0x4a0   : > { %v7268_v58 = vmax.bf16 %v7123_v1, %v6968_v45  ;;  %v7473_v52 = vrot.slane %v7471_v14, 6  ;;  %v7960_v34 = vsel %vm11154_vm12, %v9376_v43, %v7959_v23  ;;  %v7961_v11 = vrot.slane %v7959_v23, 4 }
 0x4a1   : > { %v7465_v8 = vsel %vm11119_vm11, %v7461_v16, %v7464_v39  ;;  %v7466_v53 = vrot.slane %v7464_v39, 4  ;;  %v8139_v33 = vmax.bf16 %v13554_v31, %v13550_v61  ;;  %v8140_v13 = vmax.bf16 %v13560_v56, %v13552_v44 }
 0x4a2   : > { %v7474_v48 = vor.u32 %v7473_v52, %v7470_v12  ;;  %v7827_v27 = vmax.bf16 %v7465_v8, %v7267_v28  ;;  %v7963_v41 = vsel %vm11154_vm12, %v7961_v11, %v7962_v17  ;;  %v6604_v0 = vshrl.u32 %v6389_v30, 16  ;;  %v7302_v17 = vld [vmem:[#allocation2 + $0x5c] sm:$0x3]  ;;  %v7862_v8 = vld [vmem:[#allocation2 + $0x54] sm:$0xc] }
 0x4a3   : > { %v8171_v55 = vmax.bf16 %v8139_v33, %v13562_v42  ;;  %v8172_v10 = vmax.bf16 %v8140_v13, %v13565_v49  ;;  %v6607_v18 = vshll.u32 %v6389_v30, 16  ;;  %v6613_v54 = vshll.u32 %v13749_v25, 16 }
 0x4a4   : > { %v7475_v61 = vsel %vm11119_vm11, %v7466_v53, %v7474_v48  ;;  %v13764_v47 = vmax.bf16 %v7960_v34, %v7827_v27  ;;  %v6606_v44 = vrot.slane %v6604_v0, 4  ;;  %v6617_v35 = vshrl.u32 %v13749_v25, 16 }
 0x4a5   : > { %v7828_v15 = vmax.bf16 %v7475_v61, %v7268_v58  ;;  %v8203_v1 = vmax.bf16 %v8171_v55, %v13653_v20  ;;  %v8204_v60 = vmax.bf16 %v8172_v10, %v13655_v21  ;;  %v6609_v7 = vrot.slane %v6607_v18, 5 }
 0x4a6   : > { %v6615_v6 = vrot.slane %v6613_v54, 5  ;;  %v6619_v63 = vrot.slane %v6617_v35, 4  ;;  %v6623_v59 = vshll.u32 %v6422_v32, 16  ;;  %v9357_v28 = vrot.slane %v7002_v3, 9 }
 0x4a7   : > { %v13769_v36 = vmax.bf16 %v7963_v41, %v7828_v15  ;;  %v8235_v40 = vmax.bf16 %v8203_v1, %v13764_v47  ;;  %v6610_v5 = vor.u32 %v6609_v7, %v6606_v44  ;;  %v7126_v29 = vrot.slane %v13749_v25, 5  ;;  %v3991_v1 = vld [vmem:[#allocation2 + $0xcc] sm:$0xf] }
 0x4a8   : > { %v6620_v50 = vor.u32 %v6619_v63, %v6615_v6  ;;  %v6625_v45 = vrot.slane %v6623_v59, 5  ;;  %v7129_v14 = vrot.slane %v6422_v32, 5  ;;  %v7477_v43 = vshrl.u32 %v7002_v3, 16  ;;  %v13784_v63 = vld [vmem:[#allocation2 + $0xd0] sm:$0xf] }
 0x4a9   : > { %v8236_v23 = vmax.bf16 %v8204_v60, %v13769_v36  ;;  %v6611_v16 = vrot.slane %v6610_v5, 4  ;;  %v7127_v39 = vsel %vm11057_vm7, %v9357_v28, %v7126_v29  ;;  %v7128_v12 = vrot.slane %v7126_v29, 4 }
 0x4aa   : > { %v6621_v58 = vrot.slane %v6620_v50, 4  ;;  %v7479_v52 = vrot.slane %v7477_v43, 5  ;;  %v7480_v34 = vshll.u32 %v7002_v3, 16  ;;  %v7485_v11 = vrot.slane %v6617_v35, 5 }
 0x4ab   : > { %v9392_v53 = vcombine.low %v8235_v40, %v8236_v23  ;;  %v6616_v33 = vsel %vm11030_vm4, %v6611_v16, %v6615_v6  ;;  %v7130_v13 = vsel %vm11057_vm7, %v7128_v12, %v7129_v14  ;;  %v7486_v48 = vrot.slane %v6613_v54, 6  ;;  %v4014_v23 = vld [vmem:[#allocation2 + $0xd4] sm:$0x1] }
 0x4ac   : > { %v6626_v27 = vsel %vm11030_vm4, %v6621_v58, %v6625_v45  ;;  %v6969_v41 = vmax.bf16 %v6616_v33, %v6389_v30  ;;  %v7482_v0 = vrot.slane %v7480_v34, 6  ;;  %v7491_v55 = vshrl.u32 %v7302_v17, 16 }
 0x4ad   : > { %9798 = vmatprep.mubr.bf16.mxu0 %v9392_v53  ;;  %v6970_v10 = vmax.bf16 %v6626_v27, %v13749_v25  ;;  %v7487_v32 = vor.u32 %v7486_v48, %v7485_v11  ;;  %v7494_v18 = vshll.u32 %v7302_v17, 16  ;;  %v9377_v3 = vrot.slane %v7862_v8, 10 }
 0x4ae   : > { %v7269_v61 = vmax.bf16 %v7127_v39, %v6969_v41  ;;  %v7483_v44 = vor.u32 %v7482_v0, %v7479_v52  ;;  %v7493_v35 = vrot.slane %v7491_v55, 5  ;;  %v7966_v15 = vrot.slane %v13749_v25, 6 }
 0x4af   : > { %v7270_v60 = vmax.bf16 %v7130_v13, %v6970_v10  ;;  %v7489_v54 = vrot.slane %v7487_v32, 4  ;;  %v7496_v7 = vrot.slane %v7494_v18, 6  ;;  %v7969_v6 = vrot.slane %v7302_v17, 6  ;;  %v4594_v17 = vld [vmem:[#allocation2 + $0xcc] sm:$0xe] }
 0x4b0   : > { %v7484_v30 = vrot.slane %v7483_v44, 4  ;;  %v7967_v59 = vsel %vm11154_vm12, %v9377_v3, %v7966_v15  ;;  %v7968_v28 = vrot.slane %v7966_v15, 4  ;;  %v8141_v40 = vmax.bf16 %v13562_v42, %v13554_v31  ;;  %v5454_v15 = vld [vmem:[#allocation2 + $0xcc] sm:$0xc] }
 0x4b1   : > { %v7497_v5 = vor.u32 %v7496_v7, %v7493_v35  ;;  %v8142_v29 = vmax.bf16 %v13565_v49, %v13560_v56  ;;  %v4426_v25 = vshrl.u32 %v3991_v1, 16  ;;  %v4429_v50 = vshll.u32 %v3991_v1, 16 }
 0x4b2   : > { %v7488_v45 = vsel %vm11119_vm11, %v7484_v30, %v7487_v32  ;;  %v7970_v14 = vsel %vm11154_vm12, %v7968_v28, %v7969_v6  ;;  %v8173_v43 = vmax.bf16 %v8141_v40, %v13653_v20  ;;  %v4435_v16 = vshll.u32 %v13784_v63, 16 }
 0x4b3   : > { %v7498_v31 = vsel %vm11119_vm11, %v7489_v54, %v7497_v5  ;;  %v7829_v39 = vmax.bf16 %v7488_v45, %v7269_v61  ;;  %v8174_v12 = vmax.bf16 %v8142_v29, %v13655_v21  ;;  %v4428_v56 = vrot.slane %v4426_v25, 4  ;;  %v4894_v54 = vld [vmem:[#allocation2 + $0xd4] sm:$0x3] }
 0x4b4   : > { %v7830_v58 = vmax.bf16 %v7498_v31, %v7270_v60  ;;  %v8205_v52 = vmax.bf16 %v8173_v43, %v13764_v47  ;;  %v4431_v34 = vrot.slane %v4429_v50, 5  ;;  %v4437_v11 = vrot.slane %v4435_v16, 5 }
 0x4b5   : > { %v13802_v8 = vmax.bf16 %v7967_v59, %v7829_v39  ;;  %v8206_v53 = vmax.bf16 %v8174_v12, %v13769_v36  ;;  %v4439_v33 = vshrl.u32 %v13784_v63, 16  ;;  %v4445_v13 = vshll.u32 %v4014_v23, 16 }
 0x4b6   : > { %v13806_v48 = vmax.bf16 %v7970_v14, %v7830_v58  ;;  %v4432_v27 = vor.u32 %v4431_v34, %v4428_v56  ;;  %v9303_v41 = vrot.slane %v4594_v17, 9  ;;  %v4778_v0 = vrot.slane %v13784_v63, 5 }
 0x4b7   : > { %v8237_v55 = vmax.bf16 %v8205_v52, %v13802_v8  ;;  %v4441_v10 = vrot.slane %v4439_v33, 4  ;;  %v4447_v32 = vrot.slane %v4445_v13, 5  ;;  %v4781_v18 = vrot.slane %v4014_v23, 5 }
 0x4b8   : > { %v8238_v3 = vmax.bf16 %v8206_v53, %v13806_v48  ;;  %v4433_v61 = vrot.slane %v4432_v27, 4  ;;  %v4779_v44 = vsel %vm11057_vm7, %v9303_v41, %v4778_v0  ;;  %v4780_v35 = vrot.slane %v4778_v0, 4 }
 0x4b9   : > { %v4442_v60 = vor.u32 %v4441_v10, %v4437_v11  ;;  %v5289_v7 = vshrl.u32 %v4594_v17, 16  ;;  %v5292_v6 = vshll.u32 %v4594_v17, 16  ;;  %v5297_v30 = vrot.slane %v4439_v33, 5  ;;  %v13827_v10 = vld [vmem:[#allocation2 + $0xdc] sm:$0xf] }
 0x4ba   : > { %v9393_v59 = vcombine.low %v8237_v55, %v8238_v3  ;;  %v4438_v28 = vsel %vm11030_vm4, %v4433_v61, %v4437_v11  ;;  %v4782_v40 = vsel %vm11057_vm7, %v4780_v35, %v4781_v18  ;;  %v5298_v5 = vrot.slane %v4435_v16, 6 }
 0x4bb   : > { %v4443_v29 = vrot.slane %v4442_v60, 4  ;;  %v4571_v25 = vmax.bf16 %v4438_v28, %v3991_v1  ;;  %v5291_v50 = vrot.slane %v5289_v7, 5  ;;  %v5294_v45 = vrot.slane %v5292_v6, 6  ;;  %v3993_v1 = vld [vmem:[#allocation2 + $0xd8] sm:$0xf] }
 0x4bc   : > { %9799 = vmatmul.mubr.bf16.gmra.mrb[68].mxu0 %v9393_v59  ;;  %v5299_v14 = vor.u32 %v5298_v5, %v5297_v30  ;;  %v5303_v43 = vshrl.u32 %v4894_v54, 16  ;;  %v5306_v23 = vshll.u32 %v4894_v54, 16  ;;  %v9323_v31 = vrot.slane %v5454_v15, 10  ;;  %v4015_v15 = vld [vmem:[#allocation2 + $0xe0] sm:$0x1] }
 0x4bd   : > { %v4448_v39 = vsel %vm11030_vm4, %v4443_v29, %v4447_v32  ;;  %v4871_v12 = vmax.bf16 %v4779_v44, %v4571_v25  ;;  %v5295_v56 = vor.u32 %v5294_v45, %v5291_v50  ;;  %v5618_v17 = vrot.slane %v13784_v63, 6  ;;  %v4595_v50 = vld [vmem:[#allocation2 + $0xd8] sm:$0xe] }
 0x4be   : > { %v4572_v58 = vmax.bf16 %v4448_v39, %v13784_v63  ;;  %v5301_v52 = vrot.slane %v5299_v14, 4  ;;  %v5305_v16 = vrot.slane %v5303_v43, 5  ;;  %v5308_v34 = vrot.slane %v5306_v23, 6 }
 0x4bf   : > { %v5296_v11 = vrot.slane %v5295_v56, 4  ;;  %v5619_v53 = vsel %vm11154_vm12, %v9323_v31, %v5618_v17  ;;  %v5620_v33 = vrot.slane %v5618_v17, 4  ;;  %v5621_v13 = vrot.slane %v4894_v54, 6 }
 0x4c0   : > { %v4872_v27 = vmax.bf16 %v4782_v40, %v4572_v58  ;;  %v5309_v41 = vor.u32 %v5308_v34, %v5305_v16  ;;  %v5743_v0 = vmax.bf16 %v13609_v57, %v14882_v2  ;;  %v5744_v55 = vmax.bf16 %v13611_v19, %v14883_v51 }
 0x4c1   : > { %v5300_v63 = vsel %vm11119_vm11, %v5296_v11, %v5299_v14  ;;  %v5622_v32 = vsel %vm11154_vm12, %v5620_v33, %v5621_v13  ;;  %v4450_v18 = vshrl.u32 %v3993_v1, 16  ;;  %v4453_v3 = vshll.u32 %v3993_v1, 16 }
 0x4c2   : > { %v5310_v61 = vsel %vm11119_vm11, %v5301_v52, %v5309_v41  ;;  %v5431_v44 = vmax.bf16 %v5300_v63, %v4871_v12  ;;  %v5775_v35 = vmax.bf16 %v5743_v0, %v13687_v9  ;;  %v5776_v2 = vmax.bf16 %v5744_v55, %v13691_v37  ;;  %v4895_v55 = vld [vmem:[#allocation2 + $0xe0] sm:$0x3] }
 0x4c3   : > { %v5432_v51 = vmax.bf16 %v5310_v61, %v4872_v27  ;;  %v4452_v60 = vrot.slane %v4450_v18, 4  ;;  %v4455_v54 = vrot.slane %v4453_v3, 5  ;;  %v4459_v7 = vshll.u32 %v13827_v10, 16  ;;  %v5455_v61 = vld [vmem:[#allocation2 + $0xd8] sm:$0xc] }
 0x4c4   : > { %v13838_v6 = vmax.bf16 %v5619_v53, %v5431_v44  ;;  %v5807_v30 = vmax.bf16 %v5775_v35, %v13725_v62  ;;  %v5808_v59 = vmax.bf16 %v5776_v2, %v13730_v22  ;;  %v4463_v28 = vshrl.u32 %v13827_v10, 16 }
 0x4c5   : > { %v13843_v40 = vmax.bf16 %v5622_v32, %v5432_v51  ;;  %v4456_v5 = vor.u32 %v4455_v54, %v4452_v60  ;;  %v4461_v29 = vrot.slane %v4459_v7, 5  ;;  %v4469_v25 = vshll.u32 %v4015_v15, 16 }
 0x4c6   : > { %v5839_v45 = vmax.bf16 %v5807_v30, %v13838_v6  ;;  %v4465_v14 = vrot.slane %v4463_v28, 4  ;;  %v9304_v43 = vrot.slane %v4595_v50, 9  ;;  %v4785_v23 = vrot.slane %v13827_v10, 5 }
 0x4c7   : > { %v5840_v31 = vmax.bf16 %v5808_v59, %v13843_v40  ;;  %v4457_v39 = vrot.slane %v4456_v5, 4  ;;  %v4471_v12 = vrot.slane %v4469_v25, 5  ;;  %v4788_v56 = vrot.slane %v4015_v15, 5 }
 0x4c8   : > { %v6264_v17 = vrot.slane %v5839_v45, 7  ;;  %v4466_v58 = vor.u32 %v4465_v14, %v4461_v29  ;;  %v4786_v52 = vsel %vm11057_vm7, %v9304_v43, %v4785_v23  ;;  %v4787_v16 = vrot.slane %v4785_v23, 4  ;;  %v13860_v43 = vld [vmem:[#allocation2 + $0x64] sm:$0xf] }
 0x4c9   : > { %v9339_v34 = vcombine.low %v5839_v45, %v5840_v31  ;;  %v6266_v11 = vrot.slane %v5840_v31, 7  ;;  %v4462_v53 = vsel %vm11030_vm4, %v4457_v39, %v4461_v29  ;;  %v5312_v33 = vshrl.u32 %v4595_v50, 16  ;;  %v6391_v29 = vld [vmem:[#allocation2 + $0x60] sm:$0xf] }
 0x4ca   : > { %v6265_v13 = vrot.slane %v6264_v17, 4  ;;  %6366 = vst [vmem:[#allocation2 + $0xb4] sm:$0xe] %v6264_v17  ;;  %v4467_v27 = vrot.slane %v4466_v58, 4  ;;  %v4573_v41 = vmax.bf16 %v4462_v53, %v3993_v1  ;;  %v4789_v0 = vsel %vm11057_vm7, %v4787_v16, %v4788_v56  ;;  %v6423_v16 = vld [vmem:[#allocation2 + $0x68] sm:$0x1] }
 0x4cb   : > { %9771 = vmatmul.mubr.bf16.gmra.mrb[24].mxu1 %v9339_v34  ;;  %v6268_v63 = vrot.slane %v6266_v11, 4  ;;  %v5314_v32 = vrot.slane %v5312_v33, 5  ;;  %v5315_v18 = vshll.u32 %v4595_v50, 16  ;;  %v5320_v3 = vrot.slane %v4463_v28, 5 }
 0x4cc   : > { %v6267_v44 = vsel %vm11257_vm15, %v6265_v13, %v6266_v11  ;;  %v4472_v35 = vsel %vm11030_vm4, %v4467_v27, %v4471_v12  ;;  %v4873_v2 = vmax.bf16 %v4786_v52, %v4573_v41  ;;  %v5321_v15 = vrot.slane %v4459_v7, 6 }
 0x4cd   : > { %6367 = vst [vmem:[#allocation2 + $0xb8] sm:$0xf] %v6267_v44  ;;  %6368 = vst [vmem:[#allocation2 + $0xbc] sm:$0x1] %v6268_v63  ;;  %v4574_v1 = vmax.bf16 %v4472_v35, %v13827_v10  ;;  %v5317_v51 = vrot.slane %v5315_v18, 6  ;;  %v5326_v60 = vshrl.u32 %v4895_v55, 16  ;;  %v5745_v39 = vmax.bf16 %v13687_v9, %v13609_v57 }
 0x4ce   : > { %v5329_v54 = vshll.u32 %v4895_v55, 16  ;;  %v5322_v30 = vor.u32 %v5321_v15, %v5320_v3  ;;  %v9324_v59 = vrot.slane %v5455_v61, 10  ;;  %v5625_v28 = vrot.slane %v13827_v10, 6 }
 0x4cf   : > { %v5628_v5 = vrot.slane %v4895_v55, 6  ;;  %v4874_v25 = vmax.bf16 %v4789_v0, %v4574_v1  ;;  %v5318_v50 = vor.u32 %v5317_v51, %v5314_v32  ;;  %v5328_v45 = vrot.slane %v5326_v60, 5 }
 0x4d0   : > { %v5331_v14 = vrot.slane %v5329_v54, 6  ;;  %v5324_v7 = vrot.slane %v5322_v30, 4  ;;  %v5626_v23 = vsel %vm11154_vm12, %v9324_v59, %v5625_v28  ;;  %v5627_v31 = vrot.slane %v5625_v28, 4 }
 0x4d1   : > { %v5319_v12 = vrot.slane %v5318_v50, 4  ;;  %v5746_v10 = vmax.bf16 %v13691_v37, %v13611_v19  ;;  %v6628_v17 = vshrl.u32 %v6391_v29, 16  ;;  %v5777_v52 = vmax.bf16 %v5745_v39, %v13725_v62  ;;  %v7003_v19 = vld [vmem:[#allocation2 + $0x60] sm:$0xe]  ;;  %v7303_v39 = vld [vmem:[#allocation2 + $0x68] sm:$0x3] }
 0x4d2   : > { %v5332_v56 = vor.u32 %v5331_v14, %v5328_v45  ;;  %v5629_v58 = vsel %vm11154_vm12, %v5627_v31, %v5628_v5  ;;  %v6631_v34 = vshll.u32 %v6391_v29, 16  ;;  %v6637_v11 = vshll.u32 %v13860_v43, 16 }
 0x4d3   : > { %v5323_v53 = vsel %vm11119_vm11, %v5319_v12, %v5322_v30  ;;  %v5778_v33 = vmax.bf16 %v5746_v10, %v13730_v22  ;;  %v6630_v13 = vrot.slane %v6628_v17, 4  ;;  %v5809_v0 = vmax.bf16 %v5777_v52, %v13838_v6 }
 0x4d4   : > { %v5333_v57 = vsel %vm11119_vm11, %v5324_v7, %v5332_v56  ;;  %v5433_v27 = vmax.bf16 %v5323_v53, %v4873_v2  ;;  %v6633_v55 = vrot.slane %v6631_v34, 5  ;;  %v6639_v32 = vrot.slane %v6637_v11, 5  ;;  %v7863_v53 = vld [vmem:[#allocation2 + $0x60] sm:$0xc] }
 0x4d5   : > { %v5434_v41 = vmax.bf16 %v5333_v57, %v4874_v25  ;;  %v5810_v63 = vmax.bf16 %v5778_v33, %v13843_v40  ;;  %v6641_v18 = vshrl.u32 %v13860_v43, 16  ;;  %v6647_v3 = vshll.u32 %v6423_v16, 16 }
 0x4d6   : > { %v13880_v61 = vmax.bf16 %v5626_v23, %v5433_v27  ;;  %v6634_v35 = vor.u32 %v6633_v55, %v6630_v13  ;;  %v9358_v15 = vrot.slane %v7003_v19, 9  ;;  %v7133_v2 = vrot.slane %v13860_v43, 5 }
 0x4d7   : > { %v13882_v44 = vmax.bf16 %v5629_v58, %v5434_v41  ;;  %v6643_v1 = vrot.slane %v6641_v18, 4  ;;  %v6649_v51 = vrot.slane %v6647_v3, 5  ;;  %v7136_v60 = vrot.slane %v6423_v16, 5  ;;  %v6393_v3 = vld [vmem:[#allocation2 + $0x6c] sm:$0xf] }
 0x4d8   : > { %v5841_v54 = vmax.bf16 %v5809_v0, %v13880_v61  ;;  %v6635_v59 = vrot.slane %v6634_v35, 4  ;;  %v7500_v28 = vshrl.u32 %v7003_v19, 16  ;;  %v7134_v25 = vsel %vm11057_vm7, %v9358_v15, %v7133_v2 }
 0x4d9   : > { %v5842_v30 = vmax.bf16 %v5810_v63, %v13882_v44  ;;  %v6644_v5 = vor.u32 %v6643_v1, %v6639_v32  ;;  %v7135_v50 = vrot.slane %v7133_v2, 4  ;;  %v7503_v45 = vshll.u32 %v7003_v19, 16 }
 0x4da   : > { %v6269_v7 = vrot.slane %v5841_v54, 7  ;;  %v6640_v31 = vsel %vm11030_vm4, %v6635_v59, %v6639_v32  ;;  %v7502_v17 = vrot.slane %v7500_v28, 5  ;;  %v7508_v34 = vrot.slane %v6641_v18, 5 }
 0x4db   : > { %v9340_v14 = vcombine.low %v5841_v54, %v5842_v30  ;;  %v6271_v23 = vrot.slane %v5842_v30, 7  ;;  %v6645_v12 = vrot.slane %v6644_v5, 4  ;;  %v6971_v56 = vmax.bf16 %v6640_v31, %v6391_v29  ;;  %v13903_v30 = vld [vmem:[#allocation2 + $0x70] sm:$0xf] }
 0x4dc   : > { %v7137_v10 = vsel %vm11057_vm7, %v7135_v50, %v7136_v60  ;;  %v6270_v58 = vrot.slane %v6269_v7, 4  ;;  %6369 = vst [vmem:[#allocation2 + $0xc0] sm:$0xe] %v6269_v7  ;;  %v7505_v16 = vrot.slane %v7503_v45, 6  ;;  %v7509_v13 = vrot.slane %v6637_v11, 6 }
 0x4dd   : > { %9774 = vmatprep.mubr.bf16.mxu1 %v9340_v14  ;;  %v6273_v52 = vrot.slane %v6271_v23, 4  ;;  %v6650_v57 = vsel %vm11030_vm4, %v6645_v12, %v6649_v51  ;;  %v7271_v33 = vmax.bf16 %v7134_v25, %v6971_v56  ;;  %v7514_v19 = vshrl.u32 %v7303_v39, 16  ;;  %v6424_v14 = vld [vmem:[#allocation2 + $0x74] sm:$0x1]  ;;  %v7004_v12 = vld [vmem:[#allocation2 + $0x6c] sm:$0xe] }
 0x4de   : > { %v6272_v29 = vsel %vm11257_vm15, %v6270_v58, %v6271_v23  ;;  %v6972_v27 = vmax.bf16 %v6650_v57, %v13860_v43  ;;  %v7506_v41 = vor.u32 %v7505_v16, %v7502_v17  ;;  %v7517_v0 = vshll.u32 %v7303_v39, 16 }
 0x4df   : > { %6371 = vst [vmem:[#allocation2 + $0xc8] sm:$0x1] %v6273_v52  ;;  %6370 = vst [vmem:[#allocation2 + $0xc4] sm:$0xf] %v6272_v29  ;;  %v7510_v55 = vor.u32 %v7509_v13, %v7508_v34  ;;  %v7516_v63 = vrot.slane %v7514_v19, 5  ;;  %v9378_v32 = vrot.slane %v7863_v53, 10  ;;  %v8143_v54 = vmax.bf16 %v13653_v20, %v13562_v42 }
 0x4e0   : > { %v7973_v18 = vrot.slane %v13860_v43, 6  ;;  %v7272_v35 = vmax.bf16 %v7137_v10, %v6972_v27  ;;  %v7507_v15 = vrot.slane %v7506_v41, 4  ;;  %v7519_v1 = vrot.slane %v7517_v0, 6 }
 0x4e1   : > { %v7976_v11 = vrot.slane %v7303_v39, 6  ;;  %v7512_v51 = vrot.slane %v7510_v55, 4  ;;  %v8144_v43 = vmax.bf16 %v13655_v21, %v13565_v49  ;;  %v6652_v5 = vshrl.u32 %v6393_v3, 16 }
 0x4e2   : > { %v7974_v2 = vsel %vm11154_vm12, %v9378_v32, %v7973_v18  ;;  %v7975_v60 = vrot.slane %v7973_v18, 4  ;;  %v7511_v59 = vsel %vm11119_vm11, %v7507_v15, %v7510_v55  ;;  %v7520_v28 = vor.u32 %v7519_v1, %v7516_v63  ;;  %v7304_v1 = vld [vmem:[#allocation2 + $0x74] sm:$0x3] }
 0x4e3   : > { %v7831_v25 = vmax.bf16 %v7511_v59, %v7271_v33  ;;  %v8175_v45 = vmax.bf16 %v8143_v54, %v13764_v47  ;;  %v6655_v7 = vshll.u32 %v6393_v3, 16  ;;  %v8176_v23 = vmax.bf16 %v8144_v43, %v13769_v36 }
 0x4e4   : > { %v7977_v50 = vsel %vm11154_vm12, %v7975_v60, %v7976_v11  ;;  %v7521_v42 = vsel %vm11119_vm11, %v7512_v51, %v7520_v28  ;;  %v6654_v31 = vrot.slane %v6652_v5, 4  ;;  %v6661_v39 = vshll.u32 %v13903_v30, 16  ;;  %v7864_v51 = vld [vmem:[#allocation2 + $0x6c] sm:$0xc] }
 0x4e5   : > { %v7832_v56 = vmax.bf16 %v7521_v42, %v7272_v35  ;;  %v13916_v49 = vmax.bf16 %v7974_v2, %v7831_v25  ;;  %v8207_v10 = vmax.bf16 %v8175_v45, %v13802_v8  ;;  %v6657_v17 = vrot.slane %v6655_v7, 5 }
 0x4e6   : > { %v8208_v58 = vmax.bf16 %v8176_v23, %v13806_v48  ;;  %v6663_v52 = vrot.slane %v6661_v39, 5  ;;  %v6665_v16 = vshrl.u32 %v13903_v30, 16  ;;  %v6671_v34 = vshll.u32 %v6424_v14, 16 }
 0x4e7   : > { %v13921_v53 = vmax.bf16 %v7977_v50, %v7832_v56  ;;  %v8239_v57 = vmax.bf16 %v8207_v10, %v13916_v49  ;;  %v6658_v33 = vor.u32 %v6657_v17, %v6654_v31  ;;  %v9359_v13 = vrot.slane %v7004_v12, 9 }
 0x4e8   : > { %v6667_v19 = vrot.slane %v6665_v16, 4  ;;  %v6673_v29 = vrot.slane %v6671_v34, 5  ;;  %v7140_v27 = vrot.slane %v13903_v30, 5  ;;  %v7143_v41 = vrot.slane %v6424_v14, 5 }
 0x4e9   : > { %v8240_v0 = vmax.bf16 %v8208_v58, %v13921_v53  ;;  %v6659_v55 = vrot.slane %v6658_v33, 4  ;;  %v7523_v63 = vshrl.u32 %v7004_v12, 16  ;;  %v7526_v32 = vshll.u32 %v7004_v12, 16  ;;  %v3995_v58 = vld [vmem:[#allocation2 + $0xe4] sm:$0xf] }
 0x4ea   : > { %v6668_v18 = vor.u32 %v6667_v19, %v6663_v52  ;;  %v7141_v35 = vsel %vm11057_vm7, %v9359_v13, %v7140_v27  ;;  %v7142_v15 = vrot.slane %v7140_v27, 4  ;;  %v7531_v11 = vrot.slane %v6665_v16, 5 }
 0x4eb   : > { %v9394_v2 = vcombine.low %v8239_v57, %v8240_v0  ;;  %v6664_v60 = vsel %vm11030_vm4, %v6659_v55, %v6663_v52  ;;  %v7525_v54 = vrot.slane %v7523_v63, 5  ;;  %v7528_v59 = vrot.slane %v7526_v32, 6  ;;  %v13938_v57 = vld [vmem:[#allocation2 + $0xe8] sm:$0xf]  ;;  %v4016_v32 = vld [vmem:[#allocation2 + $0xec] sm:$0x1] }
 0x4ec   : > { %v6669_v28 = vrot.slane %v6668_v18, 4  ;;  %v6973_v43 = vmax.bf16 %v6664_v60, %v6393_v3  ;;  %v7144_v5 = vsel %vm11057_vm7, %v7142_v15, %v7143_v41  ;;  %v7532_v25 = vrot.slane %v6661_v39, 6 }
 0x4ed   : > { %9802 = vmatprep.mubr.bf16.mxu0 %v9394_v2  ;;  %v7529_v50 = vor.u32 %v7528_v59, %v7525_v54  ;;  %v7537_v45 = vshrl.u32 %v7304_v1, 16  ;;  %v7540_v14 = vshll.u32 %v7304_v1, 16  ;;  %v9379_v7 = vrot.slane %v7864_v51, 10  ;;  %v4596_v54 = vld [vmem:[#allocation2 + $0xe4] sm:$0xe] }
 0x4ee   : > { %v6674_v42 = vsel %vm11030_vm4, %v6669_v28, %v6673_v29  ;;  %v7273_v23 = vmax.bf16 %v7141_v35, %v6973_v43  ;;  %v7533_v31 = vor.u32 %v7532_v25, %v7531_v11  ;;  %v7980_v12 = vrot.slane %v13903_v30, 6 }
 0x4ef   : > { %v6974_v56 = vmax.bf16 %v6674_v42, %v13903_v30  ;;  %v7530_v10 = vrot.slane %v7529_v50, 4  ;;  %v7539_v3 = vrot.slane %v7537_v45, 5  ;;  %v7542_v17 = vrot.slane %v7540_v14, 6 }
 0x4f0   : > { %v7535_v52 = vrot.slane %v7533_v31, 4  ;;  %v7981_v39 = vsel %vm11154_vm12, %v9379_v7, %v7980_v12  ;;  %v7982_v16 = vrot.slane %v7980_v12, 4  ;;  %v7983_v34 = vrot.slane %v7304_v1, 6 }
 0x4f1   : > { %v7274_v33 = vmax.bf16 %v7144_v5, %v6974_v56  ;;  %v7534_v13 = vsel %vm11119_vm11, %v7530_v10, %v7533_v31  ;;  %v7543_v19 = vor.u32 %v7542_v17, %v7539_v3  ;;  %v8145_v30 = vmax.bf16 %v13764_v47, %v13653_v20  ;;  %v4896_v17 = vld [vmem:[#allocation2 + $0xec] sm:$0x3] }
 0x4f2   : > { %v7833_v29 = vmax.bf16 %v7534_v13, %v7273_v23  ;;  %v7984_v27 = vsel %vm11154_vm12, %v7982_v16, %v7983_v34  ;;  %v8146_v41 = vmax.bf16 %v13769_v36, %v13655_v21  ;;  %v4474_v0 = vshrl.u32 %v3995_v58, 16 }
 0x4f3   : > { %v7544_v55 = vsel %vm11119_vm11, %v7535_v52, %v7543_v19  ;;  %v8177_v63 = vmax.bf16 %v8145_v30, %v13802_v8  ;;  %v4477_v18 = vshll.u32 %v3995_v58, 16  ;;  %v4483_v35 = vshll.u32 %v13938_v57, 16 }
 0x4f4   : > { %v7834_v15 = vmax.bf16 %v7544_v55, %v7274_v33  ;;  %v13952_v1 = vmax.bf16 %v7981_v39, %v7833_v29  ;;  %v8178_v20 = vmax.bf16 %v8146_v41, %v13806_v48  ;;  %v4476_v11 = vrot.slane %v4474_v0, 4  ;;  %v5456_v33 = vld [vmem:[#allocation2 + $0xe4] sm:$0xc] }
 0x4f5   : > { %v8209_v51 = vmax.bf16 %v8177_v63, %v13916_v49  ;;  %v4479_v2 = vrot.slane %v4477_v18, 5  ;;  %v4485_v21 = vrot.slane %v4483_v35, 5  ;;  %v4487_v60 = vshrl.u32 %v13938_v57, 16 }
 0x4f6   : > { %v13957_v59 = vmax.bf16 %v7984_v27, %v7834_v15  ;;  %v8210_v28 = vmax.bf16 %v8178_v20, %v13921_v53  ;;  %v4493_v43 = vshll.u32 %v4016_v32, 16  ;;  %v9305_v5 = vrot.slane %v4596_v54, 9 }
 0x4f7   : > { %v8241_v25 = vmax.bf16 %v8209_v51, %v13952_v1  ;;  %v4480_v50 = vor.u32 %v4479_v2, %v4476_v11  ;;  %v4489_v45 = vrot.slane %v4487_v60, 4  ;;  %v4792_v14 = vrot.slane %v13938_v57, 5 }
 0x4f8   : > { %v8242_v7 = vmax.bf16 %v8210_v28, %v13957_v59  ;;  %v4495_v42 = vrot.slane %v4493_v43, 5  ;;  %v4795_v23 = vrot.slane %v4016_v32, 5  ;;  %v5335_v31 = vshrl.u32 %v4596_v54, 16  ;;  %v13975_v28 = vld [vmem:[#allocation2 + $0x7c] sm:$0xf] }
 0x4f9   : > { %v4481_v12 = vrot.slane %v4480_v50, 4  ;;  %v4490_v56 = vor.u32 %v4489_v45, %v4485_v21  ;;  %v4793_v10 = vsel %vm11057_vm7, %v9305_v5, %v4792_v14  ;;  %v4794_v3 = vrot.slane %v4792_v14, 4 }
 0x4fa   : > { %v9395_v52 = vcombine.low %v8241_v25, %v8242_v7  ;;  %v5337_v39 = vrot.slane %v5335_v31, 5  ;;  %v5338_v16 = vshll.u32 %v4596_v54, 16  ;;  %v5343_v34 = vrot.slane %v4487_v60, 5 }
 0x4fb   : > { %v4486_v13 = vsel %vm11030_vm4, %v4481_v12, %v4485_v21  ;;  %v4491_v19 = vrot.slane %v4490_v56, 4  ;;  %v4796_v30 = vsel %vm11057_vm7, %v4794_v3, %v4795_v23  ;;  %v5344_v29 = vrot.slane %v4483_v35, 6  ;;  %v6395_v21 = vld [vmem:[#allocation2 + $0x78] sm:$0xf]  ;;  %v6425_v12 = vld [vmem:[#allocation2 + $0x80] sm:$0x1] }
 0x4fc   : > { %9803 = vmatmul.mubr.bf16.gmra.mrb[72].mxu0 %v9395_v52  ;;  %v4575_v27 = vmax.bf16 %v4486_v13, %v3995_v58  ;;  %v5340_v41 = vrot.slane %v5338_v16, 6  ;;  %v5349_v0 = vshrl.u32 %v4896_v17, 16  ;;  %v5352_v55 = vshll.u32 %v4896_v17, 16 }
 0x4fd   : > { %v4496_v63 = vsel %vm11030_vm4, %v4491_v19, %v4495_v42  ;;  %v5345_v32 = vor.u32 %v5344_v29, %v5343_v34  ;;  %v9325_v18 = vrot.slane %v5456_v33, 10  ;;  %v5632_v15 = vrot.slane %v13938_v57, 6 }
 0x4fe   : > { %v4576_v20 = vmax.bf16 %v4496_v63, %v13938_v57  ;;  %v4875_v11 = vmax.bf16 %v4793_v10, %v4575_v27  ;;  %v5341_v51 = vor.u32 %v5340_v41, %v5337_v39  ;;  %v5351_v2 = vrot.slane %v5349_v0, 5 }
 0x4ff   : > { %v5347_v60 = vrot.slane %v5345_v32, 4  ;;  %v5354_v35 = vrot.slane %v5352_v55, 6  ;;  %v5633_v58 = vsel %vm11154_vm12, %v9325_v18, %v5632_v15  ;;  %v5634_v54 = vrot.slane %v5632_v15, 4 }
 0x500   : > { %v4876_v43 = vmax.bf16 %v4796_v30, %v4576_v20  ;;  %v5342_v5 = vrot.slane %v5341_v51, 4  ;;  %v5635_v25 = vrot.slane %v4896_v17, 6  ;;  %v5747_v50 = vmax.bf16 %v13725_v62, %v13687_v9 }
 0x501   : > { %v5355_v45 = vor.u32 %v5354_v35, %v5351_v2  ;;  %v5748_v57 = vmax.bf16 %v13730_v22, %v13691_v37  ;;  %v6676_v14 = vshrl.u32 %v6395_v21, 16  ;;  %v6679_v7 = vshll.u32 %v6395_v21, 16  ;;  %v7005_v22 = vld [vmem:[#allocation2 + $0x78] sm:$0xe]  ;;  %v7305_v35 = vld [vmem:[#allocation2 + $0x80] sm:$0x3] }
 0x502   : > { %v5346_v42 = vsel %vm11119_vm11, %v5342_v5, %v5345_v32  ;;  %v5636_v23 = vsel %vm11154_vm12, %v5634_v54, %v5635_v25  ;;  %v5779_v31 = vmax.bf16 %v5747_v50, %v13838_v6  ;;  %v6685_v56 = vshll.u32 %v13975_v28, 16 }
 0x503   : > { %v5356_v9 = vsel %vm11119_vm11, %v5347_v60, %v5355_v45  ;;  %v5435_v62 = vmax.bf16 %v5346_v42, %v4875_v11  ;;  %v5780_v10 = vmax.bf16 %v5748_v57, %v13843_v40  ;;  %v6678_v37 = vrot.slane %v6676_v14, 4  ;;  %v7865_v14 = vld [vmem:[#allocation2 + $0x78] sm:$0xc] }
 0x504   : > { %v5436_v3 = vmax.bf16 %v5356_v9, %v4876_v43  ;;  %v5811_v17 = vmax.bf16 %v5779_v31, %v13880_v61  ;;  %v6681_v52 = vrot.slane %v6679_v7, 5  ;;  %v6687_v39 = vrot.slane %v6685_v56, 5 }
 0x505   : > { %v5715_v16 = vmax.bf16 %v5633_v58, %v5435_v62  ;;  %v5812_v34 = vmax.bf16 %v5780_v10, %v13882_v44  ;;  %v6689_v6 = vshrl.u32 %v13975_v28, 16  ;;  %v6695_v33 = vshll.u32 %v6425_v12, 16 }
 0x506   : > { %v5716_v13 = vmax.bf16 %v5636_v23, %v5436_v3  ;;  %v6682_v19 = vor.u32 %v6681_v52, %v6678_v37  ;;  %v9360_v30 = vrot.slane %v7005_v22, 9  ;;  %v7147_v29 = vrot.slane %v13975_v28, 5  ;;  %v6397_v3 = vld [vmem:[#allocation2 + $0x84] sm:$0xf] }
 0x507   : > { %v5843_v27 = vmax.bf16 %v5811_v17, %v5715_v16  ;;  %v6691_v40 = vrot.slane %v6689_v6, 4  ;;  %v6697_v41 = vrot.slane %v6695_v33, 5  ;;  %v7150_v0 = vrot.slane %v6425_v12, 5 }
 0x508   : > { %v5844_v55 = vmax.bf16 %v5812_v34, %v5716_v13  ;;  %v6683_v63 = vrot.slane %v6682_v19, 4  ;;  %v7148_v61 = vsel %vm11057_vm7, %v9360_v30, %v7147_v29  ;;  %v7149_v32 = vrot.slane %v7147_v29, 4  ;;  %v14012_v13 = vld [vmem:[#allocation2 + $0x88] sm:$0xf] }
 0x509   : > { %v6274_v18 = vrot.slane %v5843_v27, 7  ;;  %v6692_v44 = vor.u32 %v6691_v40, %v6687_v39  ;;  %v7546_v15 = vshrl.u32 %v7005_v22, 16  ;;  %v7549_v20 = vshll.u32 %v7005_v22, 16 }
 0x50a   : > { %v9341_v11 = vcombine.low %v5843_v27, %v5844_v55  ;;  %v6276_v51 = vrot.slane %v5844_v55, 7  ;;  %v6688_v2 = vsel %vm11030_vm4, %v6683_v63, %v6687_v39  ;;  %v7151_v60 = vsel %vm11057_vm7, %v7149_v32, %v7150_v0  ;;  %v7006_v32 = vld [vmem:[#allocation2 + $0x84] sm:$0xe] }
 0x50b   : > { %v6275_v58 = vrot.slane %v6274_v18, 4  ;;  %6372 = vst [vmem:[#allocation2 + $0xcc] sm:$0xe] %v6274_v18  ;;  %v6693_v54 = vrot.slane %v6692_v44, 4  ;;  %v6975_v43 = vmax.bf16 %v6688_v2, %v6395_v21  ;;  %v7548_v5 = vrot.slane %v7546_v15, 5 }
 0x50c   : > { %9775 = vmatmul.mubr.bf16.gmra.mrb[28].mxu1 %v9341_v11  ;;  %v6278_v25 = vrot.slane %v6276_v51, 4  ;;  %v7551_v50 = vrot.slane %v7549_v20, 6  ;;  %v7554_v45 = vrot.slane %v6689_v6, 5  ;;  %v7555_v57 = vrot.slane %v6685_v56, 6 }
 0x50d   : > { %v6277_v7 = vsel %vm11257_vm15, %v6275_v58, %v6276_v51  ;;  %v6698_v42 = vsel %vm11030_vm4, %v6693_v54, %v6697_v41  ;;  %v7275_v23 = vmax.bf16 %v7148_v61, %v6975_v43  ;;  %v7560_v31 = vshrl.u32 %v7305_v35, 16 }
 0x50e   : > { %6373 = vst [vmem:[#allocation2 + $0xd0] sm:$0xf] %v6277_v7  ;;  %6374 = vst [vmem:[#allocation2 + $0xd4] sm:$0x1] %v6278_v25  ;;  %v6976_v12 = vmax.bf16 %v6698_v42, %v13975_v28  ;;  %v7552_v21 = vor.u32 %v7551_v50, %v7548_v5  ;;  %v7556_v9 = vor.u32 %v7555_v57, %v7554_v45  ;;  %v7563_v62 = vshll.u32 %v7305_v35, 16 }
 0x50f   : > { %v7562_v10 = vrot.slane %v7560_v31, 5  ;;  %v9380_v37 = vrot.slane %v7865_v14, 10  ;;  %v7987_v56 = vrot.slane %v13975_v28, 6  ;;  %v7990_v22 = vrot.slane %v7305_v35, 6  ;;  %v7306_v42 = vld [vmem:[#allocation2 + $0x8c] sm:$0x3] }
 0x510   : > { %v7276_v38 = vmax.bf16 %v7151_v60, %v6976_v12  ;;  %v7553_v17 = vrot.slane %v7552_v21, 4  ;;  %v7558_v52 = vrot.slane %v7556_v9, 4  ;;  %v7565_v39 = vrot.slane %v7563_v62, 6  ;;  %v7866_v62 = vld [vmem:[#allocation2 + $0x84] sm:$0xc] }
 0x511   : > { %v7988_v16 = vsel %vm11154_vm12, %v9380_v37, %v7987_v56  ;;  %v7989_v34 = vrot.slane %v7987_v56, 4  ;;  %v8147_v6 = vmax.bf16 %v13802_v8, %v13764_v47  ;;  %v8148_v33 = vmax.bf16 %v13806_v48, %v13769_v36  ;;  %v6426_v47 = vld [vmem:[#allocation2 + $0x8c] sm:$0x1] }
 0x512   : > { %v7557_v28 = vsel %vm11119_vm11, %v7553_v17, %v7556_v9  ;;  %v7566_v19 = vor.u32 %v7565_v39, %v7562_v10  ;;  %v6700_v30 = vshrl.u32 %v6397_v3, 16  ;;  %v6703_v29 = vshll.u32 %v6397_v3, 16 }
 0x513   : > { %v7835_v27 = vmax.bf16 %v7557_v28, %v7275_v23  ;;  %v7991_v40 = vsel %vm11154_vm12, %v7989_v34, %v7990_v22  ;;  %v8179_v41 = vmax.bf16 %v8147_v6, %v13916_v49  ;;  %v8180_v0 = vmax.bf16 %v8148_v33, %v13921_v53 }
 0x514   : > { %v7567_v36 = vsel %vm11119_vm11, %v7558_v52, %v7566_v19  ;;  %v6702_v55 = vrot.slane %v6700_v30, 4  ;;  %v6705_v63 = vrot.slane %v6703_v29, 5  ;;  %v6709_v61 = vshll.u32 %v14012_v13, 16  ;;  %v6399_v29 = vld [vmem:[#allocation2 + $0x90] sm:$0xf] }
 0x515   : > { %v7836_v18 = vmax.bf16 %v7567_v36, %v7276_v38  ;;  %v14023_v44 = vmax.bf16 %v7988_v16, %v7835_v27  ;;  %v8211_v15 = vmax.bf16 %v8179_v41, %v13952_v1  ;;  %v8212_v20 = vmax.bf16 %v8180_v0, %v13957_v59 }
 0x516   : > { %v6706_v11 = vor.u32 %v6705_v63, %v6702_v55  ;;  %v6711_v51 = vrot.slane %v6709_v61, 5  ;;  %v6713_v2 = vshrl.u32 %v14012_v13, 16  ;;  %v6719_v60 = vshll.u32 %v6426_v47, 16 }
 0x517   : > { %v14028_v35 = vmax.bf16 %v7991_v40, %v7836_v18  ;;  %v8243_v58 = vmax.bf16 %v8211_v15, %v14023_v44  ;;  %v9361_v54 = vrot.slane %v7006_v32, 9  ;;  %v7154_v43 = vrot.slane %v14012_v13, 5  ;;  %v14049_v15 = vld [vmem:[#allocation2 + $0x94] sm:$0xf] }
 0x518   : > { %v6707_v5 = vrot.slane %v6706_v11, 4  ;;  %v6715_v25 = vrot.slane %v6713_v2, 4  ;;  %v6721_v50 = vrot.slane %v6719_v60, 5  ;;  %v7157_v45 = vrot.slane %v6426_v47, 5 }
 0x519   : > { %v8244_v57 = vmax.bf16 %v8212_v20, %v14028_v35  ;;  %v7155_v14 = vsel %vm11057_vm7, %v9361_v54, %v7154_v43  ;;  %v7156_v7 = vrot.slane %v7154_v43, 4  ;;  %v7569_v23 = vshrl.u32 %v7006_v32, 16  ;;  %v7007_v43 = vld [vmem:[#allocation2 + $0x90] sm:$0xe] }
 0x51a   : > { %v6712_v31 = vsel %vm11030_vm4, %v6707_v5, %v6711_v51  ;;  %v6716_v12 = vor.u32 %v6715_v25, %v6711_v51  ;;  %v7572_v21 = vshll.u32 %v7006_v32, 16  ;;  %v7577_v9 = vrot.slane %v6713_v2, 5  ;;  %v6427_v2 = vld [vmem:[#allocation2 + $0x98] sm:$0x1] }
 0x51b   : > { %v9396_v10 = vcombine.low %v8243_v58, %v8244_v57  ;;  %v6977_v37 = vmax.bf16 %v6712_v31, %v6397_v3  ;;  %v7158_v56 = vsel %vm11057_vm7, %v7156_v7, %v7157_v45  ;;  %v7571_v22 = vrot.slane %v7569_v23, 5 }
 0x51c   : > { %v6717_v38 = vrot.slane %v6716_v12, 4  ;;  %v7574_v17 = vrot.slane %v7572_v21, 6  ;;  %v7578_v52 = vrot.slane %v6709_v61, 6  ;;  %v7583_v39 = vshrl.u32 %v7306_v42, 16 }
 0x51d   : > { %9806 = vmatprep.mubr.bf16.mxu0 %v9396_v10  ;;  %v7277_v16 = vmax.bf16 %v7155_v14, %v6977_v37  ;;  %v7586_v34 = vshll.u32 %v7306_v42, 16  ;;  %v9381_v6 = vrot.slane %v7866_v62, 10  ;;  %v7994_v33 = vrot.slane %v14012_v13, 6 }
 0x51e   : > { %v6722_v28 = vsel %vm11030_vm4, %v6717_v38, %v6721_v50  ;;  %v7575_v19 = vor.u32 %v7574_v17, %v7571_v22  ;;  %v7579_v30 = vor.u32 %v7578_v52, %v7577_v9  ;;  %v7585_v3 = vrot.slane %v7583_v39, 5  ;;  %v14070_v39 = vpop.f32.mrb[32].mxu0 }
 0x51f   : > { %v6978_v27 = vmax.bf16 %v6722_v28, %v14012_v13  ;;  %v7588_v40 = vrot.slane %v7586_v34, 6  ;;  %v7995_v41 = vsel %vm11154_vm12, %v9381_v6, %v7994_v33  ;;  %v7996_v0 = vrot.slane %v7994_v33, 4  ;;  %v7307_v28 = vld [vmem:[#allocation2 + $0x98] sm:$0x3] }
 0x520   : > { %v7576_v47 = vrot.slane %v7575_v19, 4  ;;  %v7581_v36 = vrot.slane %v7579_v30, 4  ;;  %v7997_v55 = vrot.slane %v7306_v42, 6  ;;  %v8149_v63 = vmax.bf16 %v13916_v49, %v13802_v8 }
 0x521   : > { %v7278_v61 = vmax.bf16 %v7158_v56, %v6978_v27  ;;  %v7589_v32 = vor.u32 %v7588_v40, %v7585_v3  ;;  %v8150_v18 = vmax.bf16 %v13921_v53, %v13806_v48  ;;  %v6724_v20 = vshrl.u32 %v6399_v29, 16  ;;  %v7867_v56 = vld [vmem:[#allocation2 + $0x90] sm:$0xc] }
 0x522   : > { %v7580_v13 = vsel %vm11119_vm11, %v7576_v47, %v7579_v30  ;;  %v7998_v11 = vsel %vm11154_vm12, %v7996_v0, %v7997_v55  ;;  %v8181_v51 = vmax.bf16 %v8149_v63, %v13952_v1  ;;  %v6727_v60 = vshll.u32 %v6399_v29, 16  ;;  %v14076_v30 = vpop.f32.mrb[33].mxu0 }
 0x523   : > { %v7590_v8 = vsel %vm11119_vm11, %v7581_v36, %v7589_v32  ;;  %v7837_v58 = vmax.bf16 %v7580_v13, %v7277_v16  ;;  %v8182_v54 = vmax.bf16 %v8150_v18, %v13957_v59  ;;  %v6726_v48 = vrot.slane %v6724_v20, 4  ;;  %v14072_v16 = vpop.f32.mrb[0].mxu1  ;;  %v14082_v47 = vpop.f32.mrb[34].mxu0 }
 0x524   : > { %v7838_v5 = vmax.bf16 %v7590_v8, %v7278_v61  ;;  %v8213_v25 = vmax.bf16 %v8181_v51, %v14023_v44  ;;  %v6729_v50 = vrot.slane %v6727_v60, 5  ;;  %v6733_v45 = vshll.u32 %v14049_v15, 16  ;;  %v14078_v3 = vpop.f32.mrb[1].mxu1  ;;  %v14088_v18 = vpop.f32.mrb[35].mxu0 }
 0x525   : > { %v14061_v57 = vmax.bf16 %v7995_v41, %v7837_v58  ;;  %v8214_v14 = vmax.bf16 %v8182_v54, %v14028_v35  ;;  %v6737_v7 = vshrl.u32 %v14049_v15, 16  ;;  %v6743_v42 = vshll.u32 %v6427_v2, 16  ;;  %v14084_v36 = vpop.f32.mrb[2].mxu1  ;;  %v14092_v60 = vpop.f32.mrb[36].mxu0 }
 0x526   : > { %v14065_v23 = vmax.bf16 %v7998_v11, %v7838_v5  ;;  %v6730_v31 = vor.u32 %v6729_v50, %v6726_v48  ;;  %v6735_v12 = vrot.slane %v6733_v45, 5  ;;  %v9362_v21 = vrot.slane %v7007_v43, 9  ;;  %v14090_v20 = vpop.f32.mrb[3].mxu1 }
 0x527   : > { %v8245_v9 = vmax.bf16 %v8213_v25, %v14061_v57  ;;  %v6739_v62 = vrot.slane %v6737_v7, 4  ;;  %v6745_v10 = vrot.slane %v6743_v42, 5  ;;  %v7161_v37 = vrot.slane %v14049_v15, 5  ;;  %v14094_v8 = vpop.f32.mrb[4].mxu1 }
 0x528   : > { %v8246_v22 = vmax.bf16 %v8214_v14, %v14065_v23  ;;  %v6731_v38 = vrot.slane %v6730_v31, 4  ;;  %v7164_v17 = vrot.slane %v6427_v2, 5  ;;  %v7592_v52 = vshrl.u32 %v7007_v43, 16  ;;  %v14101_v5 = vpop.f32.mrb[5].mxu1 }
 0x529   : > { %v6740_v34 = vor.u32 %v6739_v62, %v6735_v12  ;;  %v7162_v6 = vsel %vm11057_vm7, %v9362_v21, %v7161_v37  ;;  %v7163_v33 = vrot.slane %v7161_v37, 4  ;;  %v7595_v19 = vshll.u32 %v7007_v43, 16  ;;  %v14099_v43 = vpop.f32.mrb[37].mxu0  ;;  %v14108_v31 = vpop.f32.mrb[6].mxu1 }
 0x52a   : > { %v9397_v27 = vcombine.low %v8245_v9, %v8246_v22  ;;  %v6736_v40 = vsel %vm11030_vm4, %v6731_v38, %v6735_v12  ;;  %v7594_v41 = vrot.slane %v7592_v52, 5  ;;  %v7600_v0 = vrot.slane %v6737_v7, 5  ;;  %v14104_v7 = vld [vmem:[#allocation2 + $0x9c] sm:$0xf]  ;;  %v14106_v42 = vpop.f32.mrb[38].mxu0  ;;  %v14114_v37 = vpop.f32.mrb[7].mxu1 }
 0x52b   : > { %v6741_v55 = vrot.slane %v6740_v34, 4  ;;  %v6979_v63 = vmax.bf16 %v6736_v40, %v6399_v29  ;;  %v7165_v61 = vsel %vm11057_vm7, %v7163_v33, %v7164_v17  ;;  %v7597_v32 = vrot.slane %v7595_v19, 6  ;;  %v14118_v17 = vld [vmem:[#allocation2 + $0xa0] sm:$0xf]  ;;  %v14122_v34 = vpop.f32.mrb[8].mxu1 }
 0x52c   : > { %9807 = vmatmul.mubr.bf16.gmra.mrb[76].mxu0 %v9397_v27  ;;  %v7601_v13 = vrot.slane %v6733_v45, 6  ;;  %v7606_v11 = vshrl.u32 %v7307_v28, 16  ;;  %v7609_v51 = vshll.u32 %v7307_v28, 16  ;;  %v9382_v2 = vrot.slane %v7867_v56, 10 }
 0x52d   : > { %v6746_v29 = vsel %vm11030_vm4, %v6741_v55, %v6745_v10  ;;  %v7279_v58 = vmax.bf16 %v7162_v6, %v6979_v63  ;;  %v7598_v54 = vor.u32 %v7597_v32, %v7594_v41  ;;  %v8001_v48 = vrot.slane %v14049_v15, 6  ;;  %v14112_v10 = vpop.f32.mrb[39].mxu0  ;;  %v6428_v55 = vld [vmem:[#allocation2 + $0xa4] sm:$0x1] }
 0x52e   : > { %v6980_v25 = vmax.bf16 %v6746_v29, %v14049_v15  ;;  %v7602_v50 = vor.u32 %v7601_v13, %v7600_v0  ;;  %v7608_v45 = vrot.slane %v7606_v11, 5  ;;  %v7611_v14 = vrot.slane %v7609_v51, 6  ;;  %v14120_v52 = vpop.f32.mrb[40].mxu0 }
 0x52f   : > { %v7599_v12 = vrot.slane %v7598_v54, 4  ;;  %v8002_v21 = vsel %vm11154_vm12, %v9382_v2, %v8001_v48  ;;  %v8003_v9 = vrot.slane %v8001_v48, 4  ;;  %v8004_v62 = vrot.slane %v7307_v28, 6  ;;  %v14131_v27 = vpop.f32.mrb[41].mxu0  ;;  %v7008_v2 = vld [vmem:[#allocation2 + $0x9c] sm:$0xe] }
 0x530   : > { %v7280_v15 = vmax.bf16 %v7165_v61, %v6980_v25  ;;  %v7604_v56 = vrot.slane %v7602_v50, 4  ;;  %v7612_v22 = vor.u32 %v7611_v14, %v7608_v45  ;;  %v8151_v38 = vmax.bf16 %v13952_v1, %v13916_v49  ;;  %v14133_v49 = vpop.f32.mrb[9].mxu1  ;;  %v14139_v61 = vpop.f32.mrb[42].mxu0 }
 0x531   : > { %v7603_v6 = vsel %vm11119_vm11, %v7599_v12, %v7602_v50  ;;  %v8005_v33 = vsel %vm11154_vm12, %v8003_v9, %v8004_v62  ;;  %v8152_v28 = vmax.bf16 %v13957_v59, %v13921_v53  ;;  %v6748_v19 = vshrl.u32 %v14104_v7, 16  ;;  %v14141_v32 = vpop.f32.mrb[10].mxu1  ;;  %v14145_v29 = vpop.f32.mrb[43].mxu0 }
 0x532   : > { %v7613_v40 = vsel %vm11119_vm11, %v7604_v56, %v7612_v22  ;;  %v7839_v41 = vmax.bf16 %v7603_v6, %v7279_v58  ;;  %v8183_v0 = vmax.bf16 %v8151_v38, %v14023_v44  ;;  %v6751_v63 = vshll.u32 %v14104_v7, 16  ;;  %14885 = vst [vmem:[#allocation29_spill] sm:$0xff] %v14141_v32  ;;  %14886 = vst [vmem:[#allocation24_spill] sm:$0xff] %v14145_v29  ;;  %v14147_v54 = vpop.f32.mrb[11].mxu1  ;;  %v14153_v45 = vpop.f32.mrb[44].mxu0 }
 0x533   : > { %v7840_v53 = vmax.bf16 %v7613_v40, %v7280_v15  ;;  %v8184_v13 = vmax.bf16 %v8152_v28, %v14028_v35  ;;  %v6750_v11 = vrot.slane %v6748_v19, 4  ;;  %v6757_v51 = vshll.u32 %v14118_v17, 16  ;;  %14887 = vst [vmem:[#allocation22_spill] sm:$0xff] %v14147_v54  ;;  %14888 = vst [vmem:[#allocation23_spill] sm:$0xff] %v14153_v45  ;;  %v14155_v14 = vpop.f32.mrb[12].mxu1  ;;  %v14160_v56 = vpop.f32.mrb[45].mxu0 }
 0x534   : > { %v14149_v58 = vmax.bf16 %v8002_v21, %v7839_v41  ;;  %v8215_v48 = vmax.bf16 %v8183_v0, %v14061_v57  ;;  %v6753_v25 = vrot.slane %v6751_v63, 5  ;;  %v6761_v50 = vshrl.u32 %v14118_v17, 16  ;;  %14889 = vst [vmem:[#allocation25_spill] sm:$0xff] %v14155_v14  ;;  %14890 = vst [vmem:[#allocation26_spill] sm:$0xff] %v14160_v56  ;;  %v14162_v22 = vpop.f32.mrb[13].mxu1  ;;  %v14167_v40 = vpop.f32.mrb[46].mxu0 }
 0x535   : > { %v14157_v12 = vmax.bf16 %v8005_v33, %v7840_v53  ;;  %v8216_v9 = vmax.bf16 %v8184_v13, %v14065_v23  ;;  %v6759_v62 = vrot.slane %v6757_v51, 5  ;;  %v6767_v15 = vshll.u32 %v6428_v55, 16  ;;  %14891 = vst [vmem:[#allocation27_spill] sm:$0xff] %v14162_v22  ;;  %v14165_v19 = vld [vmem:[#allocation2 + $0xa4] sm:$0x3]  ;;  %14892 = vst [vmem:[#allocation28_spill] sm:$0xff] %v14167_v40 }
 0x536   : > { %v8247_v21 = vmax.bf16 %v8215_v48, %v14149_v58  ;;  %v6754_v38 = vor.u32 %v6753_v25, %v6750_v11  ;;  %v6763_v6 = vrot.slane %v6761_v50, 4  ;;  %v9363_v28 = vrot.slane %v7008_v2, 9  ;;  %v14169_v41 = vpop.f32.mrb[14].mxu1  ;;  %v14173_v13 = vpop.f32.mrb[47].mxu0  ;;  %v7868_v54 = vld [vmem:[#allocation2 + $0x9c] sm:$0xc] }
 0x537   : > { %14893 = vst [vmem:[#allocation21_spill] sm:$0xff] %v14169_v41  ;;  %v8248_v33 = vmax.bf16 %v8216_v9, %v14157_v12  ;;  %v6769_v0 = vrot.slane %v6767_v15, 5  ;;  %v7168_v63 = vrot.slane %v14118_v17, 5  ;;  %v7171_v53 = vrot.slane %v6428_v55, 5  ;;  %14894 = vst [vmem:[#allocation30_spill] sm:$0xff] %v14173_v13  ;;  %v14175_v22 = vpop.f32.mrb[15].mxu1 }
 0x538   : > { %14895 = vst [vmem:[#allocation31_spill] sm:$0xff] %v14175_v22  ;;  %v6755_v48 = vrot.slane %v6754_v38, 4  ;;  %v6764_v11 = vor.u32 %v6763_v6, %v6759_v62  ;;  %v7615_v25 = vshrl.u32 %v7008_v2, 16  ;;  %v7618_v56 = vshll.u32 %v7008_v2, 16  ;;  %v14177_v14 = vpop.f32.mrb[48].mxu0  ;;  %v14179_v45 = vpop.f32.mrb[16].mxu1 }
 0x539   : > { %14896 = vst [vmem:[#allocation32_spill] sm:$0xff] %v14177_v14  ;;  %14897 = vst [vmem:[#allocation33_spill] sm:$0xff] %v14179_v45  ;;  %v9398_v40 = vcombine.low %v8247_v21, %v8248_v33  ;;  %v7169_v9 = vsel %vm11057_vm7, %v9363_v28, %v7168_v63  ;;  %v7170_v15 = vrot.slane %v7168_v63, 4  ;;  %v7623_v41 = vrot.slane %v6761_v50, 5  ;;  %v14183_v55 = vpop.f32.mrb[49].mxu0  ;;  %v14185_v13 = vpop.f32.mrb[17].mxu1 }
 0x53a   : > { %14898 = vst [vmem:[#allocation34_spill] sm:$0xff] %v14183_v55  ;;  %14899 = vst [vmem:[#allocation35_spill] sm:$0xff] %v14185_v13  ;;  %v6760_v38 = vsel %vm11030_vm4, %v6755_v48, %v6759_v62  ;;  %v6765_v6 = vrot.slane %v6764_v11, 4  ;;  %v7617_v2 = vrot.slane %v7615_v25, 5  ;;  %v7620_v22 = vrot.slane %v7618_v56, 6  ;;  %v14189_v14 = vpop.f32.mrb[50].mxu0 }
 0x53b   : > { %14900 = vst [vmem:[#allocation36_spill] sm:$0xff] %v14189_v14  ;;  %v14191_v45 = vpop.f32.mrb[18].mxu1  ;;  %9810 = vmatprep.mubr.bf16.mxu0 %v9398_v40  ;;  %v6981_v21 = vmax.bf16 %v6760_v38, %v14104_v7  ;;  %v7172_v50 = vsel %vm11057_vm7, %v7170_v15, %v7171_v53  ;;  %v7624_v28 = vrot.slane %v6757_v51, 6  ;;  %v7629_v33 = vshrl.u32 %v14165_v19, 16  ;;  %v14197_v63 = vpop.f32.mrb[51].mxu0 }
 0x53c   : > { %14901 = vst [vmem:[#allocation37_spill] sm:$0xff] %v14191_v45  ;;  %14902 = vst [vmem:[#allocation38_spill] sm:$0xff] %v14197_v63  ;;  %v14199_v13 = vpop.f32.mrb[19].mxu1  ;;  %v6770_v62 = vsel %vm11030_vm4, %v6765_v6, %v6769_v0  ;;  %v7621_v56 = vor.u32 %v7620_v22, %v7617_v2  ;;  %v7632_v48 = vshll.u32 %v14165_v19, 16  ;;  %v9383_v11 = vrot.slane %v7868_v54, 10  ;;  %v14204_v40 = vpop.f32.mrb[52].mxu0 }
 0x53d   : > { %14903 = vst [vmem:[#allocation39_spill] sm:$0xff] %v14199_v13  ;;  %14904 = vst [vmem:[#allocation40_spill] sm:$0xff] %v14204_v40  ;;  %v6982_v7 = vmax.bf16 %v6770_v62, %v14118_v17  ;;  %v7281_v25 = vmax.bf16 %v7169_v9, %v6981_v21  ;;  %v7625_v53 = vor.u32 %v7624_v28, %v7623_v41  ;;  %v7631_v51 = vrot.slane %v7629_v33, 5  ;;  %v14207_v15 = vld [vmem:[#allocation2 + $0xa8] sm:$0xf]  ;;  %v14209_v38 = vpop.f32.mrb[53].mxu0 }
 0x53e   : > { %14905 = vst [vmem:[#allocation41_spill] sm:$0xff] %v14209_v38  ;;  %v7622_v63 = vrot.slane %v7621_v56, 4  ;;  %v7634_v13 = vrot.slane %v7632_v48, 6  ;;  %v8008_v45 = vrot.slane %v14118_v17, 6  ;;  %v8011_v22 = vrot.slane %v14165_v19, 6  ;;  %v14213_v0 = vpop.f32.mrb[54].mxu0 }
 0x53f   : > { %14906 = vst [vmem:[#allocation42_spill] sm:$0xff] %v14213_v0  ;;  %v7282_v54 = vmax.bf16 %v7172_v50, %v6982_v7  ;;  %v7627_v6 = vrot.slane %v7625_v53, 4  ;;  %v8153_v2 = vmax.bf16 %v14023_v44, %v13952_v1  ;;  %v8154_v41 = vmax.bf16 %v14028_v35, %v13957_v59  ;;  %v14219_v9 = vld [vmem:[#allocation2 + $0xac] sm:$0xf]  ;;  %v14221_v21 = vpop.f32.mrb[55].mxu0 }
 0x540   : > { %14907 = vst [vmem:[#allocation43_spill] sm:$0xff] %v14221_v21  ;;  %v7626_v28 = vsel %vm11119_vm11, %v7622_v63, %v7625_v53  ;;  %v7635_v17 = vor.u32 %v7634_v13, %v7631_v51  ;;  %v8009_v19 = vsel %vm11154_vm12, %v9383_v11, %v8008_v45  ;;  %v8010_v33 = vrot.slane %v8008_v45, 4  ;;  %v14227_v50 = vpop.f32.mrb[56].mxu0  ;;  %v7009_v48 = vld [vmem:[#allocation2 + $0xa8] sm:$0xe] }
 0x541   : > { %14908 = vst [vmem:[#allocation44_spill] sm:$0xff] %v14227_v50  ;;  %v7841_v62 = vmax.bf16 %v7626_v28, %v7281_v25  ;;  %v8185_v1 = vmax.bf16 %v8153_v2, %v14061_v57  ;;  %v8186_v56 = vmax.bf16 %v8154_v41, %v14065_v23  ;;  %v6772_v59 = vshrl.u32 %v14207_v15, 16  ;;  %v14232_v7 = vpop.f32.mrb[57].mxu0  ;;  %v6429_v11 = vld [vmem:[#allocation2 + $0xb0] sm:$0x1] }
 0x542   : > { %14909 = vst [vmem:[#allocation45_spill] sm:$0xff] %v14232_v7  ;;  %v7636_v63 = vsel %vm11119_vm11, %v7627_v6, %v7635_v17  ;;  %v8012_v13 = vsel %vm11154_vm12, %v8010_v33, %v8011_v22  ;;  %v6775_v45 = vshll.u32 %v14207_v15, 16  ;;  %v6781_v25 = vshll.u32 %v14219_v9, 16  ;;  %v14240_v53 = vpop.f32.mrb[58].mxu0  ;;  %v7869_v29 = vld [vmem:[#allocation2 + $0xa8] sm:$0xc] }
 0x543   : > { %14910 = vst [vmem:[#allocation46_spill] sm:$0xff] %v14240_v53  ;;  %v7842_v51 = vmax.bf16 %v7636_v63, %v7282_v54  ;;  %v14242_v2 = vmax.bf16 %v8009_v19, %v7841_v62  ;;  %v8217_v41 = vmax.bf16 %v8185_v1, %v14149_v58  ;;  %v8218_v28 = vmax.bf16 %v8186_v56, %v14157_v12  ;;  %v14246_v7 = vpop.f32.mrb[59].mxu0 }
 0x544   : > { %14911 = vst [vmem:[#allocation47_spill] sm:$0xff] %v14246_v7  ;;  %v6774_v6 = vrot.slane %v6772_v59, 4  ;;  %v6777_v17 = vrot.slane %v6775_v45, 5  ;;  %v6783_v50 = vrot.slane %v6781_v25, 5  ;;  %v6785_v22 = vshrl.u32 %v14219_v9, 16  ;;  %v14249_v33 = vpop.f32.mrb[60].mxu0 }
 0x545   : > { %14912 = vst [vmem:[#allocation48_spill] sm:$0xff] %v14249_v33  ;;  %v14251_v21 = vmax.bf16 %v8012_v13, %v7842_v51  ;;  %v8249_v53 = vmax.bf16 %v8217_v41, %v14242_v2  ;;  %v6791_v54 = vshll.u32 %v6429_v11, 16  ;;  %v9364_v19 = vrot.slane %v7009_v48, 9  ;;  %v14254_v62 = vpop.f32.mrb[61].mxu0 }
 0x546   : > { %14913 = vst [vmem:[#allocation49_spill] sm:$0xff] %v14254_v62  ;;  %v6778_v1 = vor.u32 %v6777_v17, %v6774_v6  ;;  %v6787_v63 = vrot.slane %v6785_v22, 4  ;;  %v7175_v56 = vrot.slane %v14219_v9, 5  ;;  %v7178_v7 = vrot.slane %v6429_v11, 5  ;;  %v14257_v59 = vpop.f32.mrb[62].mxu0 }
 0x547   : > { %14914 = vst [vmem:[#allocation50_spill] sm:$0xff] %v14257_v59  ;;  %v8250_v45 = vmax.bf16 %v8218_v28, %v14251_v21  ;;  %v6793_v0 = vrot.slane %v6791_v54, 5  ;;  %v7638_v38 = vshrl.u32 %v7009_v48, 16  ;;  %v7641_v33 = vshll.u32 %v7009_v48, 16  ;;  %v14260_v13 = vpop.f32.mrb[63].mxu0 }
 0x548   : > { %14915 = vst [vmem:[#allocation51_spill] sm:$0xff] %v14260_v13  ;;  %v6779_v51 = vrot.slane %v6778_v1, 4  ;;  %v6788_v41 = vor.u32 %v6787_v63, %v6783_v50  ;;  %v7176_v40 = vsel %vm11057_vm7, %v9364_v19, %v7175_v56  ;;  %v7177_v62 = vrot.slane %v7175_v56, 4  ;;  %v7309_v6 = vld [vmem:[#allocation2 + $0xb0] sm:$0x3] }
 0x549   : > { %v9399_v17 = vcombine.low %v8249_v53, %v8250_v45  ;;  %v7640_v14 = vrot.slane %v7638_v38, 5  ;;  %v7643_v55 = vrot.slane %v7641_v33, 6  ;;  %v7646_v11 = vrot.slane %v6785_v22, 5 }
 0x54a   : > { %v6784_v28 = vsel %vm11030_vm4, %v6779_v51, %v6783_v50  ;;  %v6789_v54 = vrot.slane %v6788_v41, 4  ;;  %v7179_v48 = vsel %vm11057_vm7, %v7177_v62, %v7178_v7  ;;  %v7647_v13 = vrot.slane %v6781_v25, 6  ;;  %v6405_v7 = vld [vmem:[#allocation2 + $0xb4] sm:$0xf] }
 0x54b   : > { %9811 = vmatmul.mubr.bf16.gmra.mrb[80].mxu0 %v9399_v17  ;;  %v6983_v1 = vmax.bf16 %v6784_v28, %v14207_v15  ;;  %v7644_v63 = vor.u32 %v7643_v55, %v7640_v14  ;;  %v7652_v19 = vshrl.u32 %v7309_v6, 16  ;;  %v7655_v56 = vshll.u32 %v7309_v6, 16  ;;  %v14275_v15 = vld [vmem:[#allocation2 + $0xb8] sm:$0xf] }
 0x54c   : > { %v6794_v38 = vsel %vm11030_vm4, %v6789_v54, %v6793_v0  ;;  %v7648_v53 = vor.u32 %v7647_v13, %v7646_v11  ;;  %v9384_v22 = vrot.slane %v7869_v29, 10  ;;  %v8015_v33 = vrot.slane %v14219_v9, 6 }
 0x54d   : > { %v6984_v50 = vmax.bf16 %v6794_v38, %v14219_v9  ;;  %v7283_v45 = vmax.bf16 %v7176_v40, %v6983_v1  ;;  %v7645_v51 = vrot.slane %v7644_v63, 4  ;;  %v7654_v41 = vrot.slane %v7652_v19, 5  ;;  %v7010_v1 = vld [vmem:[#allocation2 + $0xb4] sm:$0xe] }
 0x54e   : > { %v7650_v25 = vrot.slane %v7648_v53, 4  ;;  %v7657_v62 = vrot.slane %v7655_v56, 6  ;;  %v8016_v14 = vsel %vm11154_vm12, %v9384_v22, %v8015_v33  ;;  %v8017_v55 = vrot.slane %v8015_v33, 4 }
 0x54f   : > { %v7284_v17 = vmax.bf16 %v7179_v48, %v6984_v50  ;;  %v7649_v29 = vsel %vm11119_vm11, %v7645_v51, %v7648_v53  ;;  %v8018_v0 = vrot.slane %v7309_v6, 6  ;;  %v8155_v9 = vmax.bf16 %v14061_v57, %v14023_v44  ;;  %v14281_v40 = vpop.f32.mrb[64].mxu0  ;;  %v6430_v6 = vld [vmem:[#allocation2 + $0xbc] sm:$0x1] }
 0x550   : > { %14916 = vst [vmem:[#allocation52_spill] sm:$0xff] %v14281_v40  ;;  %v7658_v13 = vor.u32 %v7657_v62, %v7654_v41  ;;  %v7843_v11 = vmax.bf16 %v7649_v29, %v7283_v45  ;;  %v8156_v28 = vmax.bf16 %v14065_v23, %v14028_v35  ;;  %v6796_v54 = vshrl.u32 %v6405_v7, 16  ;;  %v14285_v63 = vpop.f32.mrb[65].mxu0 }
 0x551   : > { %14917 = vst [vmem:[#allocation53_spill] sm:$0xff] %v14285_v63  ;;  %v8019_v48 = vsel %vm11154_vm12, %v8017_v55, %v8018_v0  ;;  %v8187_v19 = vmax.bf16 %v8155_v9, %v14149_v58  ;;  %v6799_v56 = vshll.u32 %v6405_v7, 16  ;;  %v6805_v44 = vshll.u32 %v14275_v15, 16  ;;  %v14291_v38 = vpop.f32.mrb[66].mxu0 }
 0x552   : > { %14918 = vst [vmem:[#allocation54_spill] sm:$0xff] %v14291_v38  ;;  %v7659_v53 = vsel %vm11119_vm11, %v7650_v25, %v7658_v13  ;;  %v14295_v22 = vmax.bf16 %v8016_v14, %v7843_v11  ;;  %v8188_v35 = vmax.bf16 %v8156_v28, %v14157_v12  ;;  %v6798_v33 = vrot.slane %v6796_v54, 4  ;;  %v14298_v50 = vpop.f32.mrb[67].mxu0 }
 0x553   : > { %14919 = vst [vmem:[#allocation55_spill] sm:$0xff] %v14298_v50  ;;  %v7844_v45 = vmax.bf16 %v7659_v53, %v7284_v17  ;;  %v8219_v51 = vmax.bf16 %v8187_v19, %v14242_v2  ;;  %v6801_v41 = vrot.slane %v6799_v56, 5  ;;  %v6807_v62 = vrot.slane %v6805_v44, 5  ;;  %v7310_v50 = vld [vmem:[#allocation2 + $0xbc] sm:$0x3] }
 0x554   : > { %v8220_v55 = vmax.bf16 %v8188_v35, %v14251_v21  ;;  %v6809_v29 = vshrl.u32 %v14275_v15, 16  ;;  %v6815_v0 = vshll.u32 %v6430_v6, 16  ;;  %v9365_v9 = vrot.slane %v7010_v1, 9 }
 0x555   : > { %v14303_v59 = vmax.bf16 %v8019_v48, %v7844_v45  ;;  %v8251_v25 = vmax.bf16 %v8219_v51, %v14295_v22  ;;  %v6802_v14 = vor.u32 %v6801_v41, %v6798_v33  ;;  %v7182_v13 = vrot.slane %v14275_v15, 5  ;;  %v7870_v51 = vld [vmem:[#allocation2 + $0xb4] sm:$0xc] }
 0x556   : > { %v6811_v11 = vrot.slane %v6809_v29, 4  ;;  %v6817_v28 = vrot.slane %v6815_v0, 5  ;;  %v7185_v17 = vrot.slane %v6430_v6, 5  ;;  %v7661_v54 = vshrl.u32 %v7010_v1, 16 }
 0x557   : > { %v8252_v19 = vmax.bf16 %v8220_v55, %v14303_v59  ;;  %v6803_v56 = vrot.slane %v6802_v14, 4  ;;  %v7183_v53 = vsel %vm11057_vm7, %v9365_v9, %v7182_v13  ;;  %v7184_v35 = vrot.slane %v7182_v13, 4 }
 0x558   : > { %v6812_v38 = vor.u32 %v6811_v11, %v6807_v62  ;;  %v7663_v48 = vrot.slane %v7661_v54, 5  ;;  %v7664_v45 = vshll.u32 %v7010_v1, 16  ;;  %v7669_v63 = vrot.slane %v6809_v29, 5 }
 0x559   : > { %v9400_v33 = vcombine.low %v8251_v25, %v8252_v19  ;;  %v6808_v41 = vsel %vm11030_vm4, %v6803_v56, %v6807_v62  ;;  %v7186_v6 = vsel %vm11057_vm7, %v7184_v35, %v7185_v17  ;;  %v7670_v0 = vrot.slane %v6805_v44, 6  ;;  %v6407_v19 = vld [vmem:[#allocation2 + $0xc0] sm:$0xf] }
 0x55a   : > { %v6813_v55 = vrot.slane %v6812_v38, 4  ;;  %v6985_v14 = vmax.bf16 %v6808_v41, %v6405_v7  ;;  %v7666_v40 = vrot.slane %v7664_v45, 6  ;;  %v7675_v32 = vshrl.u32 %v7310_v50, 16 }
 0x55b   : > { %9814 = vmatprep.mubr.bf16.mxu1 %v9400_v33  ;;  %v7671_v9 = vor.u32 %v7670_v0, %v7669_v63  ;;  %v7678_v13 = vshll.u32 %v7310_v50, 16  ;;  %v9385_v11 = vrot.slane %v7870_v51, 10  ;;  %v8022_v1 = vrot.slane %v14275_v15, 6 }
 0x55c   : > { %v6818_v29 = vsel %vm11030_vm4, %v6813_v55, %v6817_v28  ;;  %v7285_v25 = vmax.bf16 %v7183_v53, %v6985_v14  ;;  %v7667_v54 = vor.u32 %v7666_v40, %v7663_v48  ;;  %v7677_v62 = vrot.slane %v7675_v32, 5  ;;  %v14324_v32 = vld [vmem:[#allocation2 + $0xc4] sm:$0xf]  ;;  %v7011_v55 = vld [vmem:[#allocation2 + $0xc0] sm:$0xe] }
 0x55d   : > { %v6986_v17 = vmax.bf16 %v6818_v29, %v14275_v15  ;;  %v7673_v44 = vrot.slane %v7671_v9, 4  ;;  %v7680_v38 = vrot.slane %v7678_v13, 6  ;;  %v8023_v7 = vsel %vm11154_vm12, %v9385_v11, %v8022_v1 }
 0x55e   : > { %v7668_v56 = vrot.slane %v7667_v54, 4  ;;  %v8024_v63 = vrot.slane %v8022_v1, 4  ;;  %v8025_v35 = vrot.slane %v7310_v50, 6  ;;  %v8157_v45 = vmax.bf16 %v14149_v58, %v14061_v57  ;;  %v6431_v50 = vld [vmem:[#allocation2 + $0xc8] sm:$0x1] }
 0x55f   : > { %v7286_v51 = vmax.bf16 %v7186_v6, %v6986_v17  ;;  %v7681_v33 = vor.u32 %v7680_v38, %v7677_v62  ;;  %v8158_v40 = vmax.bf16 %v14157_v12, %v14065_v23  ;;  %v6820_v28 = vshrl.u32 %v6407_v19, 16 }
 0x560   : > { %v7672_v15 = vsel %vm11119_vm11, %v7668_v56, %v7671_v9  ;;  %v8026_v53 = vsel %vm11154_vm12, %v8024_v63, %v8025_v35  ;;  %v8189_v48 = vmax.bf16 %v8157_v45, %v14242_v2  ;;  %v6823_v41 = vshll.u32 %v6407_v19, 16 }
 0x561   : > { %v7682_v57 = vsel %vm11119_vm11, %v7673_v44, %v7681_v33  ;;  %v7845_v6 = vmax.bf16 %v7672_v15, %v7285_v25  ;;  %v8190_v0 = vmax.bf16 %v8158_v40, %v14251_v21  ;;  %v6822_v23 = vrot.slane %v6820_v28, 4 }
 0x562   : > { %v7846_v14 = vmax.bf16 %v7682_v57, %v7286_v51  ;;  %v8221_v13 = vmax.bf16 %v8189_v48, %v14295_v22  ;;  %v6825_v11 = vrot.slane %v6823_v41, 5  ;;  %v6829_v9 = vshll.u32 %v14324_v32, 16  ;;  %v7311_v48 = vld [vmem:[#allocation2 + $0xc8] sm:$0x3]  ;;  %v7871_v57 = vld [vmem:[#allocation2 + $0xc0] sm:$0xc] }
 0x563   : > { %v14336_v1 = vmax.bf16 %v8023_v7, %v7845_v6  ;;  %v8222_v29 = vmax.bf16 %v8190_v0, %v14303_v59  ;;  %v6833_v54 = vshrl.u32 %v14324_v32, 16  ;;  %v6839_v62 = vshll.u32 %v6431_v50, 16 }
 0x564   : > { %v14340_v17 = vmax.bf16 %v8026_v53, %v7846_v14  ;;  %v6826_v25 = vor.u32 %v6825_v11, %v6822_v23  ;;  %v6831_v44 = vrot.slane %v6829_v9, 5  ;;  %v9366_v38 = vrot.slane %v7011_v55, 9 }
 0x565   : > { %v8253_v56 = vmax.bf16 %v8221_v13, %v14336_v1  ;;  %v6835_v63 = vrot.slane %v6833_v54, 4  ;;  %v6841_v35 = vrot.slane %v6839_v62, 5  ;;  %v7189_v45 = vrot.slane %v14324_v32, 5 }
 0x566   : > { %v8254_v51 = vmax.bf16 %v8222_v29, %v14340_v17  ;;  %v6827_v7 = vrot.slane %v6826_v25, 4  ;;  %v7192_v33 = vrot.slane %v6431_v50, 5  ;;  %v7684_v40 = vshrl.u32 %v7011_v55, 16 }
 0x567   : > { %v6836_v28 = vor.u32 %v6835_v63, %v6831_v44  ;;  %v7190_v15 = vsel %vm11057_vm7, %v9366_v38, %v7189_v45  ;;  %v7191_v53 = vrot.slane %v7189_v45, 4  ;;  %v7687_v41 = vshll.u32 %v7011_v55, 16 }
 0x568   : > { %v9401_v6 = vcombine.low %v8253_v56, %v8254_v51  ;;  %v6832_v0 = vsel %vm11030_vm4, %v6827_v7, %v6831_v44  ;;  %v7686_v23 = vrot.slane %v7684_v40, 5  ;;  %v7692_v14 = vrot.slane %v6833_v54, 5  ;;  %v6409_v40 = vld [vmem:[#allocation2 + $0xcc] sm:$0xf] }
 0x569   : > { %v6837_v13 = vrot.slane %v6836_v28, 4  ;;  %v6987_v11 = vmax.bf16 %v6832_v0, %v6407_v19  ;;  %v7193_v50 = vsel %vm11057_vm7, %v7191_v53, %v7192_v33  ;;  %v7689_v29 = vrot.slane %v7687_v41, 6 }
 0x56a   : > { %9815 = vmatmul.mubr.bf16.vlgmr.msra.gmra.mrb[20].mxu1 %v9401_v6  ;;  %v7693_v62 = vrot.slane %v6829_v9, 6  ;;  %v7698_v25 = vshrl.u32 %v7311_v48, 16  ;;  %v7701_v38 = vshll.u32 %v7311_v48, 16  ;;  %v9386_v63 = vrot.slane %v7871_v57, 10 }
 0x56b   : > { %v6842_v55 = vsel %vm11030_vm4, %v6837_v13, %v6841_v35  ;;  %v7287_v56 = vmax.bf16 %v7190_v15, %v6987_v11  ;;  %v7690_v45 = vor.u32 %v7689_v29, %v7686_v23  ;;  %v8029_v44 = vrot.slane %v14324_v32, 6  ;;  %v14359_v15 = vld [vmem:[#allocation2 + $0xd0] sm:$0xf] }
 0x56c   : > { %v6988_v54 = vmax.bf16 %v6842_v55, %v14324_v32  ;;  %v7694_v51 = vor.u32 %v7693_v62, %v7692_v14  ;;  %v7700_v19 = vrot.slane %v7698_v25, 5  ;;  %v7703_v7 = vrot.slane %v7701_v38, 6 }
 0x56d   : > { %v7691_v33 = vrot.slane %v7690_v45, 4  ;;  %v8030_v9 = vsel %vm11154_vm12, %v9386_v63, %v8029_v44  ;;  %v8031_v28 = vrot.slane %v8029_v44, 4  ;;  %v8032_v53 = vrot.slane %v7311_v48, 6  ;;  %v7012_v63 = vld [vmem:[#allocation2 + $0xcc] sm:$0xe] }
 0x56e   : > { %v7288_v41 = vmax.bf16 %v7193_v50, %v6988_v54  ;;  %v7696_v57 = vrot.slane %v7694_v51, 4  ;;  %v7704_v6 = vor.u32 %v7703_v7, %v7700_v19  ;;  %v8159_v35 = vmax.bf16 %v14242_v2, %v14149_v58  ;;  %v6432_v50 = vld [vmem:[#allocation2 + $0xd4] sm:$0x1] }
 0x56f   : > { %v7695_v32 = vsel %vm11119_vm11, %v7691_v33, %v7694_v51  ;;  %v8033_v0 = vsel %vm11154_vm12, %v8031_v28, %v8032_v53  ;;  %v8160_v23 = vmax.bf16 %v14251_v21, %v14157_v12  ;;  %v6844_v14 = vshrl.u32 %v6409_v40, 16 }
 0x570   : > { %v7705_v48 = vsel %vm11119_vm11, %v7696_v57, %v7704_v6  ;;  %v7847_v13 = vmax.bf16 %v7695_v32, %v7287_v56  ;;  %v8191_v11 = vmax.bf16 %v8159_v35, %v14295_v22  ;;  %v6847_v58 = vshll.u32 %v6409_v40, 16 }
 0x571   : > { %v7848_v29 = vmax.bf16 %v7705_v48, %v7288_v41  ;;  %v8192_v62 = vmax.bf16 %v8160_v23, %v14303_v59  ;;  %v6846_v25 = vrot.slane %v6844_v14, 4  ;;  %v6853_v38 = vshll.u32 %v14359_v15, 16  ;;  %v7312_v23 = vld [vmem:[#allocation2 + $0xd4] sm:$0x3] }
 0x572   : > { %v14372_v55 = vmax.bf16 %v8030_v9, %v7847_v13  ;;  %v8223_v12 = vmax.bf16 %v8191_v11, %v14336_v1  ;;  %v6849_v45 = vrot.slane %v6847_v58, 5  ;;  %v6857_v44 = vshrl.u32 %v14359_v15, 16 }
 0x573   : > { %v14376_v54 = vmax.bf16 %v8033_v0, %v7848_v29  ;;  %v8224_v56 = vmax.bf16 %v8192_v62, %v14340_v17  ;;  %v6855_v51 = vrot.slane %v6853_v38, 5  ;;  %v6863_v19 = vshll.u32 %v6432_v50, 16  ;;  %v7872_v29 = vld [vmem:[#allocation2 + $0xcc] sm:$0xc] }
 0x574   : > { %v8255_v7 = vmax.bf16 %v8223_v12, %v14372_v55  ;;  %v6850_v33 = vor.u32 %v6849_v45, %v6846_v25  ;;  %v6859_v28 = vrot.slane %v6857_v44, 4  ;;  %v9367_v53 = vrot.slane %v7012_v63, 9 }
 0x575   : > { %v8256_v41 = vmax.bf16 %v8224_v56, %v14376_v54  ;;  %v6865_v9 = vrot.slane %v6863_v19, 5  ;;  %v7196_v57 = vrot.slane %v14359_v15, 5  ;;  %v7199_v6 = vrot.slane %v6432_v50, 5 }
 0x576   : > { %v6851_v35 = vrot.slane %v6850_v33, 4  ;;  %v6860_v32 = vor.u32 %v6859_v28, %v6855_v51  ;;  %v7707_v0 = vshrl.u32 %v7012_v63, 16  ;;  %v7710_v14 = vshll.u32 %v7012_v63, 16 }
 0x577   : > { %v9402_v48 = vcombine.low %v8255_v7, %v8256_v41  ;;  %v7197_v13 = vsel %vm11057_vm7, %v9367_v53, %v7196_v57  ;;  %v7198_v11 = vrot.slane %v7196_v57, 4  ;;  %v7715_v58 = vrot.slane %v6857_v44, 5 }
 0x578   : > { %v6856_v62 = vsel %vm11030_vm4, %v6851_v35, %v6855_v51  ;;  %v6861_v25 = vrot.slane %v6860_v32, 4  ;;  %v7709_v12 = vrot.slane %v7707_v0, 5  ;;  %v7712_v45 = vrot.slane %v7710_v14, 6  ;;  %v6411_v14 = vld [vmem:[#allocation2 + $0xd8] sm:$0xf] }
 0x579   : > { %9818 = vmatprep.mubr.bf16.mxu1 %v9402_v48  ;;  %v6989_v50 = vmax.bf16 %v6856_v62, %v6409_v40  ;;  %v7200_v56 = vsel %vm11057_vm7, %v7198_v11, %v7199_v6  ;;  %v7716_v19 = vrot.slane %v6853_v38, 6  ;;  %v7721_v63 = vshrl.u32 %v7312_v23, 16  ;;  %v14396_v11 = vld [vmem:[#allocation2 + $0xdc] sm:$0xf] }
 0x57a   : > { %v6866_v7 = vsel %vm11030_vm4, %v6861_v25, %v6865_v9  ;;  %v7713_v33 = vor.u32 %v7712_v45, %v7709_v12  ;;  %v7724_v28 = vshll.u32 %v7312_v23, 16  ;;  %v9387_v44 = vrot.slane %v7872_v29, 10  ;;  %v6433_v45 = vld [vmem:[#allocation2 + $0xe0] sm:$0x1] }
 0x57b   : > { %v6990_v53 = vmax.bf16 %v6866_v7, %v14359_v15  ;;  %v7289_v41 = vmax.bf16 %v7197_v13, %v6989_v50  ;;  %v7717_v51 = vor.u32 %v7716_v19, %v7715_v58  ;;  %v7723_v57 = vrot.slane %v7721_v63, 5 }
 0x57c   : > { %v7714_v35 = vrot.slane %v7713_v33, 4  ;;  %v7726_v32 = vrot.slane %v7724_v28, 6  ;;  %v8036_v40 = vrot.slane %v14359_v15, 6  ;;  %v8039_v0 = vrot.slane %v7312_v23, 6 }
 0x57d   : > { %v7290_v6 = vmax.bf16 %v7200_v56, %v6990_v53  ;;  %v7719_v38 = vrot.slane %v7717_v51, 4  ;;  %v8161_v48 = vmax.bf16 %v14295_v22, %v14242_v2  ;;  %v8162_v9 = vmax.bf16 %v14303_v59, %v14251_v21 }
 0x57e   : > { %v7718_v13 = vsel %vm11119_vm11, %v7714_v35, %v7717_v51  ;;  %v7727_v58 = vor.u32 %v7726_v32, %v7723_v57  ;;  %v8037_v29 = vsel %vm11154_vm12, %v9387_v44, %v8036_v40  ;;  %v8038_v15 = vrot.slane %v8036_v40, 4  ;;  %v7013_v51 = vld [vmem:[#allocation2 + $0xd8] sm:$0xe] }
 0x57f   : > { %v7849_v23 = vmax.bf16 %v7718_v13, %v7289_v41  ;;  %v8193_v62 = vmax.bf16 %v8161_v48, %v14336_v1  ;;  %v8194_v25 = vmax.bf16 %v8162_v9, %v14340_v17  ;;  %v6868_v12 = vshrl.u32 %v6411_v14, 16 }
 0x580   : > { %v7728_v2 = vsel %vm11119_vm11, %v7719_v38, %v7727_v58  ;;  %v8040_v21 = vsel %vm11154_vm12, %v8038_v15, %v8039_v0  ;;  %v6871_v50 = vshll.u32 %v6411_v14, 16  ;;  %v6877_v56 = vshll.u32 %v14396_v11, 16 }
 0x581   : > { %v7850_v19 = vmax.bf16 %v7728_v2, %v7290_v6  ;;  %v14409_v63 = vmax.bf16 %v8037_v29, %v7849_v23  ;;  %v8225_v7 = vmax.bf16 %v8193_v62, %v14372_v55  ;;  %v8226_v33 = vmax.bf16 %v8194_v25, %v14376_v54 }
 0x582   : > { %v6870_v28 = vrot.slane %v6868_v12, 4  ;;  %v6873_v44 = vrot.slane %v6871_v50, 5  ;;  %v6879_v53 = vrot.slane %v6877_v56, 5  ;;  %v6881_v41 = vshrl.u32 %v14396_v11, 16  ;;  %v7313_v12 = vld [vmem:[#allocation2 + $0xe0] sm:$0x3] }
 0x583   : > { %v14414_v57 = vmax.bf16 %v8040_v21, %v7850_v19  ;;  %v8257_v35 = vmax.bf16 %v8225_v7, %v14409_v63  ;;  %v6887_v32 = vshll.u32 %v6433_v45, 16  ;;  %v9368_v40 = vrot.slane %v7013_v51, 9  ;;  %v7873_v7 = vld [vmem:[#allocation2 + $0xd8] sm:$0xc] }
 0x584   : > { %v6874_v0 = vor.u32 %v6873_v44, %v6870_v28  ;;  %v6883_v6 = vrot.slane %v6881_v41, 4  ;;  %v7203_v38 = vrot.slane %v14396_v11, 5  ;;  %v7206_v48 = vrot.slane %v6433_v45, 5 }
 0x585   : > { %v8258_v9 = vmax.bf16 %v8226_v33, %v14414_v57  ;;  %v6889_v13 = vrot.slane %v6887_v32, 5  ;;  %v7730_v58 = vshrl.u32 %v7013_v51, 16  ;;  %v7733_v29 = vshll.u32 %v7013_v51, 16 }
 0x586   : > { %v6875_v15 = vrot.slane %v6874_v0, 4  ;;  %v6884_v23 = vor.u32 %v6883_v6, %v6879_v53  ;;  %v7204_v62 = vsel %vm11057_vm7, %v9368_v40, %v7203_v38  ;;  %v7205_v25 = vrot.slane %v7203_v38, 4 }
 0x587   : > { %v9403_v2 = vcombine.low %v8257_v35, %v8258_v9  ;;  %v7732_v21 = vrot.slane %v7730_v58, 5  ;;  %v7735_v50 = vrot.slane %v7733_v29, 6  ;;  %v7738_v19 = vrot.slane %v6881_v41, 5 }
 0x588   : > { %v6880_v45 = vsel %vm11030_vm4, %v6875_v15, %v6879_v53  ;;  %v6885_v28 = vrot.slane %v6884_v23, 4  ;;  %v7207_v33 = vsel %vm11057_vm7, %v7205_v25, %v7206_v48  ;;  %v7739_v44 = vrot.slane %v6877_v56, 6  ;;  %v6413_v15 = vld [vmem:[#allocation2 + $0xe4] sm:$0xf]  ;;  %v14431_v25 = vld [vmem:[#allocation2 + $0xe8] sm:$0xf] }
 0x589   : > { %9819 = vmatmul.mubr.bf16.gmra.mrb[24].mxu1 %v9403_v2  ;;  %v6991_v51 = vmax.bf16 %v6880_v45, %v6411_v14  ;;  %v7736_v32 = vor.u32 %v7735_v50, %v7732_v21  ;;  %v7744_v0 = vshrl.u32 %v7313_v12, 16  ;;  %v7747_v40 = vshll.u32 %v7313_v12, 16 }
 0x58a   : > { %v6890_v35 = vsel %vm11030_vm4, %v6885_v28, %v6889_v13  ;;  %v7740_v6 = vor.u32 %v7739_v44, %v7738_v19  ;;  %v9388_v38 = vrot.slane %v7873_v7, 10  ;;  %v8043_v41 = vrot.slane %v14396_v11, 6  ;;  %v6434_v44 = vld [vmem:[#allocation2 + $0xec] sm:$0x1] }
 0x58b   : > { %v6992_v9 = vmax.bf16 %v6890_v35, %v14396_v11  ;;  %v7291_v53 = vmax.bf16 %v7204_v62, %v6991_v51  ;;  %v7737_v58 = vrot.slane %v7736_v32, 4  ;;  %v7746_v29 = vrot.slane %v7744_v0, 5 }
 0x58c   : > { %v7742_v48 = vrot.slane %v7740_v6, 4  ;;  %v7749_v56 = vrot.slane %v7747_v40, 6  ;;  %v8044_v14 = vsel %vm11154_vm12, %v9388_v38, %v8043_v41  ;;  %v8045_v23 = vrot.slane %v8043_v41, 4 }
 0x58d   : > { %v7292_v2 = vmax.bf16 %v7207_v33, %v6992_v9  ;;  %v7741_v13 = vsel %vm11119_vm11, %v7737_v58, %v7740_v6  ;;  %v8046_v21 = vrot.slane %v7313_v12, 6  ;;  %v8163_v11 = vmax.bf16 %v14336_v1, %v14295_v22  ;;  %v7014_v9 = vld [vmem:[#allocation2 + $0xe4] sm:$0xe] }
 0x58e   : > { %v7750_v62 = vor.u32 %v7749_v56, %v7746_v29  ;;  %v7851_v50 = vmax.bf16 %v7741_v13, %v7291_v53  ;;  %v8164_v19 = vmax.bf16 %v14340_v17, %v14303_v59  ;;  %v6892_v7 = vshrl.u32 %v6413_v15, 16 }
 0x58f   : > { %v8047_v45 = vsel %vm11154_vm12, %v8045_v23, %v8046_v21  ;;  %v8195_v28 = vmax.bf16 %v8163_v11, %v14372_v55  ;;  %v6895_v33 = vshll.u32 %v6413_v15, 16  ;;  %v6901_v51 = vshll.u32 %v14431_v25, 16  ;;  %v14443_v32 = vpop.f32.mrb[68].mxu0 }
 0x590   : > { %14920 = vst [vmem:[#allocation56_spill] sm:$0xff] %v14443_v32  ;;  %v7751_v22 = vsel %vm11119_vm11, %v7742_v48, %v7750_v62  ;;  %v14447_v12 = vmax.bf16 %v8044_v14, %v7851_v50  ;;  %v8196_v0 = vmax.bf16 %v8164_v19, %v14376_v54  ;;  %v6894_v59 = vrot.slane %v6892_v7, 4  ;;  %v14450_v40 = vpop.f32.mrb[69].mxu0 }
 0x591   : > { %14921 = vst [vmem:[#allocation57_spill] sm:$0xff] %v14450_v40  ;;  %v7852_v35 = vmax.bf16 %v7751_v22, %v7292_v2  ;;  %v8227_v6 = vmax.bf16 %v8195_v28, %v14409_v63  ;;  %v6897_v38 = vrot.slane %v6895_v33, 5  ;;  %v6903_v41 = vrot.slane %v6901_v51, 5  ;;  %v14453_v53 = vpop.f32.mrb[70].mxu0 }
 0x592   : > { %14922 = vst [vmem:[#allocation58_spill] sm:$0xff] %v14453_v53  ;;  %v8228_v58 = vmax.bf16 %v8196_v0, %v14414_v57  ;;  %v6905_v29 = vshrl.u32 %v14431_v25, 16  ;;  %v6911_v48 = vshll.u32 %v6434_v44, 16  ;;  %v9369_v56 = vrot.slane %v7014_v9, 9  ;;  %v14457_v14 = vpop.f32.mrb[71].mxu0 }
 0x593   : > { %14923 = vst [vmem:[#allocation59_spill] sm:$0xff] %v14457_v14  ;;  %v14459_v23 = vmax.bf16 %v8047_v45, %v7852_v35  ;;  %v8259_v13 = vmax.bf16 %v8227_v6, %v14447_v12  ;;  %v6898_v2 = vor.u32 %v6897_v38, %v6894_v59  ;;  %v7210_v21 = vrot.slane %v14431_v25, 5  ;;  %v7314_v0 = vld [vmem:[#allocation2 + $0xec] sm:$0x3]  ;;  %v7874_v6 = vld [vmem:[#allocation2 + $0xe4] sm:$0xc] }
 0x594   : > { %v6907_v11 = vrot.slane %v6905_v29, 4  ;;  %v6913_v62 = vrot.slane %v6911_v48, 5  ;;  %v7213_v50 = vrot.slane %v6434_v44, 5  ;;  %v7753_v19 = vshrl.u32 %v7014_v9, 16 }
 0x595   : > { %v8260_v7 = vmax.bf16 %v8228_v58, %v14459_v23  ;;  %v6899_v28 = vrot.slane %v6898_v2, 4  ;;  %v7211_v33 = vsel %vm11057_vm7, %v9369_v56, %v7210_v21  ;;  %v7212_v22 = vrot.slane %v7210_v21, 4 }
 0x596   : > { %v6908_v14 = vor.u32 %v6907_v11, %v6903_v41  ;;  %v7755_v45 = vrot.slane %v7753_v19, 5  ;;  %v7756_v35 = vshll.u32 %v7014_v9, 16  ;;  %v7761_v53 = vrot.slane %v6905_v29, 5 }
 0x597   : > { %v9404_v59 = vcombine.low %v8259_v13, %v8260_v7  ;;  %v6904_v38 = vsel %vm11030_vm4, %v6899_v28, %v6903_v41  ;;  %v7214_v44 = vsel %vm11057_vm7, %v7212_v22, %v7213_v50  ;;  %v7762_v48 = vrot.slane %v6901_v51, 6 }
 0x598   : > { %v6909_v58 = vrot.slane %v6908_v14, 4  ;;  %v6993_v2 = vmax.bf16 %v6904_v38, %v6413_v15  ;;  %v7758_v40 = vrot.slane %v7756_v35, 6  ;;  %v7767_v32 = vshrl.u32 %v7314_v0, 16  ;;  %v14935_v38 = vld [vmem:[#allocation32_spill] sm:$0xff] }
 0x599   : > { %9822 = vmatprep.mubr.bf16.mxu1 %v9404_v59  ;;  %v7763_v56 = vor.u32 %v7762_v48, %v7761_v53  ;;  %v7770_v21 = vshll.u32 %v7314_v0, 16  ;;  %v9389_v11 = vrot.slane %v7874_v6, 10  ;;  %v8050_v9 = vrot.slane %v14431_v25, 6  ;;  %v14933_v6 = vld [vmem:[#allocation30_spill] sm:$0xff] }
 0x59a   : > { %v6914_v29 = vsel %vm11030_vm4, %v6909_v58, %v6913_v62  ;;  %v7293_v13 = vmax.bf16 %v7211_v33, %v6993_v2  ;;  %v7759_v19 = vor.u32 %v7758_v40, %v7755_v45  ;;  %v7769_v41 = vrot.slane %v7767_v32, 5  ;;  %v14937_v58 = vld [vmem:[#allocation34_spill] sm:$0xff]  ;;  %v14938_v2 = vld [vmem:[#allocation35_spill] sm:$0xff] }
 0x59b   : > { %v6994_v26 = vmax.bf16 %v6914_v29, %v14431_v25  ;;  %v7765_v50 = vrot.slane %v7763_v56, 4  ;;  %v7772_v51 = vrot.slane %v7770_v21, 6  ;;  %v8051_v15 = vsel %vm11154_vm12, %v9389_v11, %v8050_v9  ;;  %v14939_v21 = vld [vmem:[#allocation36_spill] sm:$0xff]  ;;  %v14940_v11 = vld [vmem:[#allocation37_spill] sm:$0xff]  ;;  %v14941_v29 = vld [vmem:[#allocation38_spill] sm:$0xff] }
 0x59c   : > { %v7760_v14 = vrot.slane %v7759_v19, 4  ;;  %v8052_v7 = vrot.slane %v8050_v9, 4  ;;  %v8053_v53 = vrot.slane %v7314_v0, 6  ;;  %v8165_v28 = vmax.bf16 %v14372_v55, %v14336_v1 }
 0x59d   : > { %v7294_v22 = vmax.bf16 %v7214_v44, %v6994_v26  ;;  %v7773_v35 = vor.u32 %v7772_v51, %v7769_v41  ;;  %v8166_v4 = vmax.bf16 %v14376_v54, %v14340_v17  ;;  %v9842_v32 = vadd.f32 %v14072_v16, %v14070_v39  ;;  %v14936_v44 = vld [vmem:[#allocation33_spill] sm:$0xff]  ;;  %v14554_v41 = vld [vmem:[#allocation12] ss:$0 sm:$0xff] }
 0x59e   : > { %v7764_v25 = vsel %vm11119_vm11, %v7760_v14, %v7763_v56  ;;  %v8054_v40 = vsel %vm11154_vm12, %v8052_v7, %v8053_v53  ;;  %v8197_v62 = vmax.bf16 %v8165_v28, %v14409_v63  ;;  %v9844_v33 = vadd.f32 %v14078_v3, %v14076_v30  ;;  %v14945_v7 = vld [vmem:[#allocation54_spill] sm:$0xff]  ;;  %v14559_v28 = vld [vmem:[#allocation14] ss:$0 sm:$0xff] }
 0x59f   : > { %v7774_v1 = vsel %vm11119_vm11, %v7765_v50, %v7773_v35  ;;  %v7853_v55 = vmax.bf16 %v7764_v25, %v7293_v13  ;;  %v8198_v17 = vmax.bf16 %v8166_v4, %v14414_v57  ;;  %v9846_v39 = vadd.f32 %v14084_v36, %v14082_v47  ;;  %v14942_v13 = vld [vmem:[#allocation39_spill] sm:$0xff]  ;;  %v14943_v50 = vld [vmem:[#allocation52_spill] sm:$0xff] }
 0x5a0   : > { %v7854_v16 = vmax.bf16 %v7774_v1, %v7294_v22  ;;  %v8229_v54 = vmax.bf16 %v8197_v62, %v14447_v12  ;;  %v9848_v46 = vadd.f32 %v14090_v20, %v14088_v18  ;;  %v9850_v63 = vadd.f32 %v14094_v8, %v14092_v60  ;;  %v14924_v60 = vld [vmem:[#allocation29_spill] sm:$0xff]  ;;  %v14946_v22 = vld [vmem:[#allocation55_spill] sm:$0xff]  ;;  %v14947_v4 = vld [vmem:[#allocation56_spill] sm:$0xff] }
 0x5a1   : > { %v8133_v0 = vmax.bf16 %v8051_v15, %v7853_v55  ;;  %v8230_v30 = vmax.bf16 %v8198_v17, %v14459_v23  ;;  %v9852_v24 = vadd.f32 %v14101_v5, %v14099_v43  ;;  %v9854_v3 = vadd.f32 %v14108_v31, %v14106_v42  ;;  %v14925_v43 = vld [vmem:[#allocation24_spill] sm:$0xff]  ;;  %v14926_v5 = vld [vmem:[#allocation22_spill] sm:$0xff]  ;;  %v14927_v31 = vld [vmem:[#allocation23_spill] sm:$0xff] }
 0x5a2   : > { %v8134_v57 = vmax.bf16 %v8054_v40, %v7854_v16  ;;  %v9856_v47 = vadd.f32 %v14114_v37, %v14112_v10  ;;  %v14508_v36 = vadd.f32 %v14122_v34, %v14120_v52  ;;  %v14512_v18 = vadd.f32 %v14133_v49, %v14131_v27  ;;  %v14928_v12 = vld [vmem:[#allocation25_spill] sm:$0xff]  ;;  %v14929_v52 = vld [vmem:[#allocation26_spill] sm:$0xff]  ;;  %v14930_v34 = vld [vmem:[#allocation27_spill] sm:$0xff] }
 0x5a3   : > { %v8261_v20 = vmax.bf16 %v8229_v54, %v8133_v0  ;;  %v14516_v8 = vadd.f32 %v14924_v60, %v14139_v61  ;;  %v14520_v42 = vadd.f32 %v14926_v5, %v14925_v43  ;;  %v14524_v10 = vadd.f32 %v14928_v12, %v14927_v31  ;;  %v14931_v27 = vld [vmem:[#allocation28_spill] sm:$0xff]  ;;  %v14932_v49 = vld [vmem:[#allocation21_spill] sm:$0xff]  ;;  %v14934_v61 = vld [vmem:[#allocation31_spill] sm:$0xff] }
 0x5a4   : > { %v8262_v37 = vmax.bf16 %v8230_v30, %v8134_v57  ;;  %v14528_v23 = vadd.f32 %v14930_v34, %v14929_v52  ;;  %v14532_v45 = vadd.f32 %v14932_v49, %v14931_v27  ;;  %v14536_v59 = vadd.f32 %v14934_v61, %v14933_v6  ;;  %v14944_v15 = vld [vmem:[#allocation53_spill] sm:$0xff]  ;;  %v14949_v1 = vld [vmem:[#allocation58_spill] sm:$0xff] }
 0x5a5   : > { %v14540_v48 = vadd.f32 %v14936_v44, %v14935_v38  ;;  %v14544_v56 = vadd.f32 %v14938_v2, %v14937_v58  ;;  %v14548_v9 = vadd.f32 %v14940_v11, %v14939_v21  ;;  %v14552_v19 = vadd.f32 %v14942_v13, %v14941_v29  ;;  %v14948_v40 = vld [vmem:[#allocation57_spill] sm:$0xff] }
 0x5a6   : > { %v9405_v26 = vcombine.low %v8261_v20, %v8262_v37  ;;  %v9843_v51 = vadd.f32 %v9842_v32, %v14943_v50  ;;  %v9845_v14 = vadd.f32 %v9844_v33, %v14944_v15  ;;  %v9847_v53 = vadd.f32 %v9846_v39, %v14945_v7  ;;  %v14950_v33 = vld [vmem:[#allocation59_spill] sm:$0xff] }
 0x5a7   : > { %v9849_v35 = vadd.f32 %v9848_v46, %v14946_v22  ;;  %v9851_v25 = vadd.f32 %v9850_v63, %v14947_v4  ;;  %v9853_v62 = vadd.f32 %v9852_v24, %v14948_v40  ;;  %v9855_v55 = vadd.f32 %v9854_v3, %v14949_v1 }
 0x5a8   : > { %9823 = vmatmul.mubr.bf16.gmra.mrb[28].mxu1 %v9405_v26  ;;  %v8626_v17 = vmul.f32 %v9843_v51, %v14554_v41  ;;  %v8624_v16 = vmul.f32 %v9845_v14, %v14554_v41  ;;  %v8627_v32 = vmul.f32 %v9847_v53, %v14554_v41  ;;  %v9857_v54 = vadd.f32 %v9856_v47, %v14950_v33 }
 0x5a9   : > { %v8625_v39 = vmul.f32 %v9849_v35, %v14554_v41  ;;  %v8630_v0 = vmul.f32 %v9851_v25, %v14554_v41  ;;  %v8628_v46 = vmul.f32 %v9853_v62, %v14554_v41  ;;  %v8631_v63 = vmul.f32 %v9855_v55, %v14554_v41 }
 0x5aa   : > { %v8665_v30 = vadd.f32 %v14559_v28, %v8626_v17  ;;  %v8663_v24 = vadd.f32 %v14559_v28, %v8624_v16  ;;  %v8666_v3 = vadd.f32 %v14559_v28, %v8627_v32  ;;  %v8629_v57 = vmul.f32 %v9857_v54, %v14554_v41 }
 0x5ab   : > { %v8664_v20 = vadd.f32 %v14559_v28, %v8625_v39  ;;  %v8669_v47 = vadd.f32 %v14559_v28, %v8630_v0  ;;  %v8667_v60 = vadd.f32 %v14559_v28, %v8628_v46  ;;  %v8670_v12 = vadd.f32 %v14559_v28, %v8631_v63 }
 0x5ac   : > { %v9418_v43 = vmul.f32 -1.442695, %v8665_v30  ;;  %v9416_v5 = vmul.f32 -1.442695, %v8663_v24  ;;  %v9419_v31 = vmul.f32 -1.442695, %v8666_v3  ;;  %v8668_v52 = vadd.f32 %v14559_v28, %v8629_v57 }
 0x5ad   : > { %v9417_v37 = vmul.f32 -1.442695, %v8664_v20  ;;  %v9422_v34 = vmul.f32 -1.442695, %v8669_v47  ;;  %v9420_v27 = vmul.f32 -1.442695, %v8667_v60 }
 0x5ae   : > { %10227 = vpow2.f32 %v9418_v43  ;;  %v9423_v49 = vmul.f32 -1.442695, %v8670_v12  ;;  %v9421_v6 = vmul.f32 -1.442695, %v8668_v52 }
 0x5af   : > { %10229 = vpow2.f32 %v9416_v5 }
 0x5b0   : > { %10231 = vpow2.f32 %v9419_v31 }
 0x5b1   : > { %10233 = vpow2.f32 %v9417_v37 }
 0x5b2   : > { %10235 = vpow2.f32 %v9422_v34 }
 0x5b3   : > { %10237 = vpow2.f32 %v9420_v27 }
 0x5b4   : > { %10239 = vpow2.f32 %v9423_v49 }
 0x5b5   : > { %10241 = vpow2.f32 %v9421_v6 }
 0x5b8   : > { %v10228_v61 = vpop.eup %10227 }
 0x5b9   : > { %v10230_v38 = vpop.eup %10229  ;;  %v8793_v44 = vadd.f32 1.0, %v10228_v61 }
 0x5ba   : > { %v10232_v58 = vpop.eup %10231  ;;  %v8791_v2 = vadd.f32 1.0, %v10230_v38 }
 0x5bb   : > { %v10234_v21 = vpop.eup %10233  ;;  %10243 = vrcp.f32 %v8793_v44  ;;  %v8794_v11 = vadd.f32 1.0, %v10232_v58 }
 0x5bc   : > { %v10236_v29 = vpop.eup %10235  ;;  %10245 = vrcp.f32 %v8791_v2  ;;  %v8792_v13 = vadd.f32 1.0, %v10234_v21 }
 0x5bd   : > { %v10238_v26 = vpop.eup %10237  ;;  %10247 = vrcp.f32 %v8794_v11  ;;  %v8797_v50 = vadd.f32 1.0, %v10236_v29 }
 0x5be   : > { %v10240_v51 = vpop.eup %10239  ;;  %10249 = vrcp.f32 %v8792_v13  ;;  %v8795_v15 = vadd.f32 1.0, %v10238_v26 }
 0x5bf   : > { %v10242_v14 = vpop.eup %10241  ;;  %10251 = vrcp.f32 %v8797_v50  ;;  %v8798_v7 = vadd.f32 1.0, %v10240_v51 }
 0x5c0   : > { %10253 = vrcp.f32 %v8795_v15  ;;  %v8796_v53 = vadd.f32 1.0, %v10242_v14 }
 0x5c1   : > { %10255 = vrcp.f32 %v8798_v7 }
 0x5c2   : > { %10257 = vrcp.f32 %v8796_v53 }
 0x5c5   : > { %v10244_v22 = vpop.eup %10243 }
 0x5c6   : > { %v10246_v35 = vpop.eup %10245  ;;  %v8889_v4 = vmul.f32 %v10244_v22, %v8665_v30 }
 0x5c7   : > { %v10248_v25 = vpop.eup %10247  ;;  %v8887_v40 = vmul.f32 %v10246_v35, %v8663_v24 }
 0x5c8   : > { %v10250_v62 = vpop.eup %10249  ;;  %8921 = vst [vmem:[%s14583_s15 + $0x10] sm:$0xff] %v8889_v4  ;;  %v8890_v1 = vmul.f32 %v10248_v25, %v8666_v3 }
 0x5c9   : > { %v10252_v55 = vpop.eup %10251  ;;  %8919 = vst [vmem:[%s14583_s15] sm:$0xff] %v8887_v40  ;;  %v8888_v17 = vmul.f32 %v10250_v62, %v8664_v20 }
 0x5ca   : > { %v10254_v16 = vpop.eup %10253  ;;  %8922 = vst [vmem:[%s14583_s15 + $0x18] sm:$0xff] %v8890_v1  ;;  %v8893_v32 = vmul.f32 %v10252_v55, %v8669_v47 }
 0x5cb   : > { %v10256_v33 = vpop.eup %10255  ;;  %8920 = vst [vmem:[%s14583_s15 + $0x8] sm:$0xff] %v8888_v17  ;;  %v8891_v54 = vmul.f32 %v10254_v16, %v8667_v60 }
 0x5cc   : > { %v10258_v39 = vpop.eup %10257  ;;  %8925 = vst [vmem:[%s14583_s15 + $0x30] sm:$0xff] %v8893_v32  ;;  %v8894_v0 = vmul.f32 %v10256_v33, %v8670_v12 }
 0x5cd   : > { %8923 = vst [vmem:[%s14583_s15 + $0x20] sm:$0xff] %v8891_v54  ;;  %v8892_v46 = vmul.f32 %v10258_v39, %v8668_v52 }
 0x5ce   : > { %8926 = vst [vmem:[%s14583_s15 + $0x38] sm:$0xff] %v8894_v0 }
 0x5cf   : > { %8924 = vst [vmem:[%s14583_s15 + $0x28] sm:$0xff] %v8892_v46  ;;  %v9804_v63 = vpop.f32.mrb[72].mxu0 }
 0x5d0   : > { %v9859_v30 = vadd.f32 %v14508_v36, %v9804_v63  ;;  %v8490_v24 = vpop.f32.mrb[73].mxu0 }
 0x5d1   : > { %v9861_v3 = vadd.f32 %v14512_v18, %v8490_v24  ;;  %v9805_v57 = vpop.f32.mrb[74].mxu0 }
 0x5d2   : > { %v8634_v20 = vmul.f32 %v9859_v30, %v14554_v41  ;;  %v9863_v47 = vadd.f32 %v14516_v8, %v9805_v57  ;;  %v8493_v43 = vpop.f32.mrb[75].mxu0 }
 0x5d3   : > { %v8632_v60 = vmul.f32 %v9861_v3, %v14554_v41  ;;  %v9865_v5 = vadd.f32 %v14520_v42, %v8493_v43 }
 0x5d4   : > { %v8673_v31 = vadd.f32 %v14559_v28, %v8634_v20  ;;  %v8635_v12 = vmul.f32 %v9863_v47, %v14554_v41 }
 0x5d5   : > { %v8671_v37 = vadd.f32 %v14559_v28, %v8632_v60  ;;  %v8633_v36 = vmul.f32 %v9865_v5, %v14554_v41 }
 0x5d6   : > { %v9426_v52 = vmul.f32 -1.442695, %v8673_v31  ;;  %v8674_v18 = vadd.f32 %v14559_v28, %v8635_v12 }
 0x5d7   : > { %v9424_v34 = vmul.f32 -1.442695, %v8671_v37  ;;  %v8672_v27 = vadd.f32 %v14559_v28, %v8633_v36 }
 0x5d8   : > { %10259 = vpow2.f32 %v9426_v52  ;;  %v9427_v8 = vmul.f32 -1.442695, %v8674_v18 }
 0x5d9   : > { %10261 = vpow2.f32 %v9424_v34  ;;  %v9425_v49 = vmul.f32 -1.442695, %v8672_v27 }
 0x5da   : > { %10263 = vpow2.f32 %v9427_v8 }
 0x5db   : > { %10265 = vpow2.f32 %v9425_v49 }
 0x5e2   : > { %v10260_v42 = vpop.eup %10259 }
 0x5e3   : > { %v10262_v6 = vpop.eup %10261  ;;  %v8801_v61 = vadd.f32 1.0, %v10260_v42 }
 0x5e4   : > { %v10264_v38 = vpop.eup %10263  ;;  %v8799_v44 = vadd.f32 1.0, %v10262_v6 }
 0x5e5   : > { %v10266_v58 = vpop.eup %10265  ;;  %10267 = vrcp.f32 %v8801_v61  ;;  %v8802_v2 = vadd.f32 1.0, %v10264_v38 }
 0x5e6   : > { %10269 = vrcp.f32 %v8799_v44  ;;  %v8800_v21 = vadd.f32 1.0, %v10266_v58 }
 0x5e7   : > { %10271 = vrcp.f32 %v8802_v2 }
 0x5e8   : > { %10273 = vrcp.f32 %v8800_v21 }
 0x5ef   : > { %v10268_v11 = vpop.eup %10267 }
 0x5f0   : > { %v10270_v29 = vpop.eup %10269  ;;  %v8897_v13 = vmul.f32 %v10268_v11, %v8673_v31 }
 0x5f1   : > { %v10272_v26 = vpop.eup %10271  ;;  %v8895_v50 = vmul.f32 %v10270_v29, %v8671_v37 }
 0x5f2   : > { %v10274_v51 = vpop.eup %10273  ;;  %8929 = vst [vmem:[%s14583_s15 + $0x50] sm:$0xff] %v8897_v13  ;;  %v8898_v15 = vmul.f32 %v10272_v26, %v8674_v18 }
 0x5f3   : > { %8927 = vst [vmem:[%s14583_s15 + $0x40] sm:$0xff] %v8895_v50  ;;  %v8896_v14 = vmul.f32 %v10274_v51, %v8672_v27 }
 0x5f4   : > { %8930 = vst [vmem:[%s14583_s15 + $0x58] sm:$0xff] %v8898_v15 }
 0x5f5   : > { %8928 = vst [vmem:[%s14583_s15 + $0x48] sm:$0xff] %v8896_v14 }
 0x5ff   : > { %v9808_v7 = vpop.f32.mrb[76].mxu0 }
 0x600   : > { %v9867_v53 = vadd.f32 %v14524_v10, %v9808_v7  ;;  %v8506_v22 = vpop.f32.mrb[77].mxu0 }
 0x601   : > { %v9869_v35 = vadd.f32 %v14528_v23, %v8506_v22  ;;  %v9809_v4 = vpop.f32.mrb[78].mxu0 }
 0x602   : > { %v8638_v25 = vmul.f32 %v9867_v53, %v14554_v41  ;;  %v9871_v40 = vadd.f32 %v14532_v45, %v9809_v4  ;;  %v8509_v62 = vpop.f32.mrb[79].mxu0  ;;  %v14951_v4 = vld [vmem:[#allocation40_spill] sm:$0xff] }
 0x603   : > { %v8636_v1 = vmul.f32 %v9869_v35, %v14554_v41  ;;  %v9873_v55 = vadd.f32 %v14536_v59, %v8509_v62 }
 0x604   : > { %v8677_v17 = vadd.f32 %v14559_v28, %v8638_v25  ;;  %v8639_v16 = vmul.f32 %v9871_v40, %v14554_v41 }
 0x605   : > { %v8675_v32 = vadd.f32 %v14559_v28, %v8636_v1  ;;  %v8637_v10 = vmul.f32 %v9873_v55, %v14554_v41  ;;  %v14952_v55 = vld [vmem:[#allocation41_spill] sm:$0xff] }
 0x606   : > { %v9430_v33 = vmul.f32 -1.442695, %v8677_v17  ;;  %v8678_v23 = vadd.f32 %v14559_v28, %v8639_v16 }
 0x607   : > { %v9428_v54 = vmul.f32 -1.442695, %v8675_v32  ;;  %v8676_v39 = vadd.f32 %v14559_v28, %v8637_v10 }
 0x608   : > { %10275 = vpow2.f32 %v9430_v33  ;;  %v9431_v45 = vmul.f32 -1.442695, %v8678_v23 }
 0x609   : > { %10277 = vpow2.f32 %v9428_v54  ;;  %v9429_v0 = vmul.f32 -1.442695, %v8676_v39 }
 0x60a   : > { %10279 = vpow2.f32 %v9431_v45 }
 0x60b   : > { %10281 = vpow2.f32 %v9429_v0 }
 0x612   : > { %v10276_v59 = vpop.eup %10275 }
 0x613   : > { %v10278_v46 = vpop.eup %10277  ;;  %v8805_v63 = vadd.f32 1.0, %v10276_v59 }
 0x614   : > { %v10280_v30 = vpop.eup %10279  ;;  %v8803_v24 = vadd.f32 1.0, %v10278_v46  ;;  %v14954_v46 = vld [vmem:[#allocation43_spill] sm:$0xff] }
 0x615   : > { %v10282_v3 = vpop.eup %10281  ;;  %10283 = vrcp.f32 %v8805_v63  ;;  %v8806_v57 = vadd.f32 1.0, %v10280_v30 }
 0x616   : > { %10285 = vrcp.f32 %v8803_v24  ;;  %v8804_v20 = vadd.f32 1.0, %v10282_v3 }
 0x617   : > { %10287 = vrcp.f32 %v8806_v57 }
 0x618   : > { %10289 = vrcp.f32 %v8804_v20 }
 0x61e   : > { %v9812_v47 = vpop.f32.mrb[80].mxu0 }
 0x61f   : > { %v10284_v43 = vpop.eup %10283  ;;  %v9875_v60 = vadd.f32 %v14540_v48, %v9812_v47  ;;  %v8522_v5 = vpop.f32.mrb[81].mxu0 }
 0x620   : > { %v10286_v31 = vpop.eup %10285  ;;  %v8901_v12 = vmul.f32 %v10284_v43, %v8677_v17  ;;  %v9877_v37 = vadd.f32 %v14544_v56, %v8522_v5  ;;  %v9813_v36 = vpop.f32.mrb[82].mxu0 }
 0x621   : > { %v10288_v52 = vpop.eup %10287  ;;  %v8899_v18 = vmul.f32 %v10286_v31, %v8675_v32  ;;  %v8642_v34 = vmul.f32 %v9875_v60, %v14554_v41  ;;  %v9879_v27 = vadd.f32 %v14548_v9, %v9813_v36  ;;  %v8525_v8 = vpop.f32.mrb[83].mxu0 }
 0x622   : > { %v10290_v49 = vpop.eup %10289  ;;  %8933 = vst [vmem:[%s14583_s15 + $0x70] sm:$0xff] %v8901_v12  ;;  %v8902_v42 = vmul.f32 %v10288_v52, %v8678_v23  ;;  %v8640_v48 = vmul.f32 %v9877_v37, %v14554_v41  ;;  %v9881_v6 = vadd.f32 %v14552_v19, %v8525_v8  ;;  %v14953_v23 = vld [vmem:[#allocation42_spill] sm:$0xff] }
 0x623   : > { %8931 = vst [vmem:[%s14583_s15 + $0x60] sm:$0xff] %v8899_v18  ;;  %v8900_v61 = vmul.f32 %v10290_v49, %v8676_v39  ;;  %v8681_v56 = vadd.f32 %v14559_v28, %v8642_v34  ;;  %v8643_v38 = vmul.f32 %v9879_v27, %v14554_v41 }
 0x624   : > { %8934 = vst [vmem:[%s14583_s15 + $0x78] sm:$0xff] %v8902_v42  ;;  %v8679_v44 = vadd.f32 %v14559_v28, %v8640_v48  ;;  %v8641_v58 = vmul.f32 %v9881_v6, %v14554_v41  ;;  %v14955_v6 = vld [vmem:[#allocation44_spill] sm:$0xff] }
 0x625   : > { %8932 = vst [vmem:[%s14583_s15 + $0x68] sm:$0xff] %v8900_v61  ;;  %v9434_v9 = vmul.f32 -1.442695, %v8681_v56  ;;  %v8682_v2 = vadd.f32 %v14559_v28, %v8643_v38 }
 0x626   : > { %v9432_v21 = vmul.f32 -1.442695, %v8679_v44  ;;  %v8680_v11 = vadd.f32 %v14559_v28, %v8641_v58  ;;  %v14956_v58 = vld [vmem:[#allocation45_spill] sm:$0xff] }
 0x627   : > { %10291 = vpow2.f32 %v9434_v9  ;;  %v9435_v19 = vmul.f32 -1.442695, %v8682_v2 }
 0x628   : > { %10293 = vpow2.f32 %v9432_v21  ;;  %v9433_v29 = vmul.f32 -1.442695, %v8680_v11 }
 0x629   : > { %10295 = vpow2.f32 %v9435_v19 }
 0x62a   : > { %10297 = vpow2.f32 %v9433_v29  ;;  %v14957_v29 = vld [vmem:[#allocation46_spill] sm:$0xff] }
 0x631   : > { %v10292_v13 = vpop.eup %10291 }
 0x632   : > { %v10294_v26 = vpop.eup %10293  ;;  %v8809_v50 = vadd.f32 1.0, %v10292_v13 }
 0x633   : > { %v10296_v51 = vpop.eup %10295  ;;  %v8807_v15 = vadd.f32 1.0, %v10294_v26 }
 0x634   : > { %v10298_v14 = vpop.eup %10297  ;;  %10299 = vrcp.f32 %v8809_v50  ;;  %v8810_v7 = vadd.f32 1.0, %v10296_v51 }
 0x635   : > { %10301 = vrcp.f32 %v8807_v15  ;;  %v8808_v53 = vadd.f32 1.0, %v10298_v14  ;;  %v14958_v14 = vld [vmem:[#allocation47_spill] sm:$0xff] }
 0x636   : > { %10303 = vrcp.f32 %v8810_v7 }
 0x637   : > { %10305 = vrcp.f32 %v8808_v53 }
 0x63d   : > { %v9816_v22 = vpop.f32.mrb[20].mxu1 }
 0x63e   : > { %v10300_v35 = vpop.eup %10299  ;;  %v9882_v25 = vadd.f32 %v9816_v22, %v14951_v4  ;;  %v8538_v40 = vpop.f32.mrb[21].mxu1 }
 0x63f   : > { %v10302_v62 = vpop.eup %10301  ;;  %v8905_v1 = vmul.f32 %v10300_v35, %v8681_v56  ;;  %v9883_v17 = vadd.f32 %v8538_v40, %v14952_v55  ;;  %v9817_v16 = vpop.f32.mrb[22].mxu1 }
 0x640   : > { %v10304_v32 = vpop.eup %10303  ;;  %v8903_v10 = vmul.f32 %v10302_v62, %v8679_v44  ;;  %v8646_v33 = vmul.f32 %v9882_v25, %v14554_v41  ;;  %v9884_v54 = vadd.f32 %v9817_v16, %v14953_v23  ;;  %v8541_v39 = vpop.f32.mrb[23].mxu1 }
 0x641   : > { %v10306_v45 = vpop.eup %10305  ;;  %8937 = vst [vmem:[%s14583_s15 + $0x90] sm:$0xff] %v8905_v1  ;;  %v8906_v0 = vmul.f32 %v10304_v32, %v8682_v2  ;;  %v8644_v59 = vmul.f32 %v9883_v17, %v14554_v41  ;;  %v9885_v63 = vadd.f32 %v8541_v39, %v14954_v46 }
 0x642   : > { %8935 = vst [vmem:[%s14583_s15 + $0x80] sm:$0xff] %v8903_v10  ;;  %v8904_v30 = vmul.f32 %v10306_v45, %v8680_v11  ;;  %v8685_v24 = vadd.f32 %v14559_v28, %v8646_v33  ;;  %v8647_v3 = vmul.f32 %v9884_v54, %v14554_v41 }
 0x643   : > { %8938 = vst [vmem:[%s14583_s15 + $0x98] sm:$0xff] %v8906_v0  ;;  %v8683_v57 = vadd.f32 %v14559_v28, %v8644_v59  ;;  %v8645_v20 = vmul.f32 %v9885_v63, %v14554_v41  ;;  %v14959_v63 = vld [vmem:[#allocation48_spill] sm:$0xff] }
 0x644   : > { %8936 = vst [vmem:[%s14583_s15 + $0x88] sm:$0xff] %v8904_v30  ;;  %v9438_v47 = vmul.f32 -1.442695, %v8685_v24  ;;  %v8686_v43 = vadd.f32 %v14559_v28, %v8647_v3 }
 0x645   : > { %v9436_v60 = vmul.f32 -1.442695, %v8683_v57  ;;  %v8684_v5 = vadd.f32 %v14559_v28, %v8645_v20  ;;  %v14960_v20 = vld [vmem:[#allocation49_spill] sm:$0xff] }
 0x646   : > { %10307 = vpow2.f32 %v9438_v47  ;;  %v9439_v31 = vmul.f32 -1.442695, %v8686_v43 }
 0x647   : > { %10309 = vpow2.f32 %v9436_v60  ;;  %v9437_v12 = vmul.f32 -1.442695, %v8684_v5 }
 0x648   : > { %10311 = vpow2.f32 %v9439_v31 }
 0x649   : > { %10313 = vpow2.f32 %v9437_v12  ;;  %v14961_v12 = vld [vmem:[#allocation50_spill] sm:$0xff] }
 0x650   : > { %v10308_v37 = vpop.eup %10307 }
 0x651   : > { %v10310_v36 = vpop.eup %10309  ;;  %v8813_v52 = vadd.f32 1.0, %v10308_v37 }
 0x652   : > { %v10312_v18 = vpop.eup %10311  ;;  %v8811_v34 = vadd.f32 1.0, %v10310_v36 }
 0x653   : > { %v10314_v27 = vpop.eup %10313  ;;  %10315 = vrcp.f32 %v8813_v52  ;;  %v8814_v8 = vadd.f32 1.0, %v10312_v18 }
 0x654   : > { %10317 = vrcp.f32 %v8811_v34  ;;  %v8812_v49 = vadd.f32 1.0, %v10314_v27  ;;  %v14962_v27 = vld [vmem:[#allocation51_spill] sm:$0xff] }
 0x655   : > { %10319 = vrcp.f32 %v8814_v8 }
 0x656   : > { %10321 = vrcp.f32 %v8812_v49 }
 0x65c   : > { %v9820_v42 = vpop.f32.mrb[24].mxu1 }
 0x65d   : > { %v10316_v48 = vpop.eup %10315  ;;  %v9886_v61 = vadd.f32 %v9820_v42, %v14955_v6  ;;  %v8554_v56 = vpop.f32.mrb[25].mxu1 }
 0x65e   : > { %v10318_v38 = vpop.eup %10317  ;;  %v8909_v44 = vmul.f32 %v10316_v48, %v8685_v24  ;;  %v9887_v9 = vadd.f32 %v8554_v56, %v14956_v58  ;;  %v9821_v2 = vpop.f32.mrb[26].mxu1 }
 0x65f   : > { %v10320_v21 = vpop.eup %10319  ;;  %v8907_v11 = vmul.f32 %v10318_v38, %v8683_v57  ;;  %v8650_v19 = vmul.f32 %v9886_v61, %v14554_v41  ;;  %v9888_v13 = vadd.f32 %v9821_v2, %v14957_v29  ;;  %v8557_v26 = vpop.f32.mrb[27].mxu1 }
 0x660   : > { %v10322_v50 = vpop.eup %10321  ;;  %8941 = vst [vmem:[%s14583_s15 + $0xb0] sm:$0xff] %v8909_v44  ;;  %v8910_v51 = vmul.f32 %v10320_v21, %v8686_v43  ;;  %v8648_v15 = vmul.f32 %v9887_v9, %v14554_v41  ;;  %v9889_v7 = vadd.f32 %v8557_v26, %v14958_v14 }
 0x661   : > { %8939 = vst [vmem:[%s14583_s15 + $0xa0] sm:$0xff] %v8907_v11  ;;  %v8908_v53 = vmul.f32 %v10322_v50, %v8684_v5  ;;  %v8689_v22 = vadd.f32 %v14559_v28, %v8650_v19  ;;  %v8651_v35 = vmul.f32 %v9888_v13, %v14554_v41 }
 0x662   : > { %8942 = vst [vmem:[%s14583_s15 + $0xb8] sm:$0xff] %v8910_v51  ;;  %v8687_v4 = vadd.f32 %v14559_v28, %v8648_v15  ;;  %v8649_v25 = vmul.f32 %v9889_v7, %v14554_v41 }
 0x663   : > { %8940 = vst [vmem:[%s14583_s15 + $0xa8] sm:$0xff] %v8908_v53  ;;  %v9442_v40 = vmul.f32 -1.442695, %v8689_v22  ;;  %v8690_v62 = vadd.f32 %v14559_v28, %v8651_v35 }
 0x664   : > { %v9440_v1 = vmul.f32 -1.442695, %v8687_v4  ;;  %v8688_v55 = vadd.f32 %v14559_v28, %v8649_v25 }
 0x665   : > { %10323 = vpow2.f32 %v9442_v40  ;;  %v9443_v17 = vmul.f32 -1.442695, %v8690_v62 }
 0x666   : > { %10325 = vpow2.f32 %v9440_v1  ;;  %v9441_v16 = vmul.f32 -1.442695, %v8688_v55 }
 0x667   : > { %10327 = vpow2.f32 %v9443_v17 }
 0x668   : > { %10329 = vpow2.f32 %v9441_v16 }
 0x66f   : > { %v10324_v32 = vpop.eup %10323 }
 0x670   : > { %v10326_v10 = vpop.eup %10325  ;;  %v8817_v33 = vadd.f32 1.0, %v10324_v32 }
 0x671   : > { %v10328_v23 = vpop.eup %10327  ;;  %v8815_v54 = vadd.f32 1.0, %v10326_v10 }
 0x672   : > { %v10330_v39 = vpop.eup %10329  ;;  %10331 = vrcp.f32 %v8817_v33  ;;  %v8818_v45 = vadd.f32 1.0, %v10328_v23 }
 0x673   : > { %10333 = vrcp.f32 %v8815_v54  ;;  %v8816_v0 = vadd.f32 1.0, %v10330_v39 }
 0x674   : > { %10335 = vrcp.f32 %v8818_v45 }
 0x675   : > { %10337 = vrcp.f32 %v8816_v0 }
 0x67b   : > { %v9824_v59 = vpop.f32.mrb[28].mxu1 }
 0x67c   : > { %v10332_v46 = vpop.eup %10331  ;;  %v9890_v30 = vadd.f32 %v9824_v59, %v14959_v63  ;;  %v8570_v24 = vpop.f32.mrb[29].mxu1 }
 0x67d   : > { %v10334_v3 = vpop.eup %10333  ;;  %v8913_v57 = vmul.f32 %v10332_v46, %v8689_v22  ;;  %v9891_v47 = vadd.f32 %v8570_v24, %v14960_v20  ;;  %v9825_v43 = vpop.f32.mrb[30].mxu1 }
 0x67e   : > { %v10336_v60 = vpop.eup %10335  ;;  %v8911_v5 = vmul.f32 %v10334_v3, %v8687_v4  ;;  %v8654_v31 = vmul.f32 %v9890_v30, %v14554_v41  ;;  %v9892_v37 = vadd.f32 %v9825_v43, %v14961_v12  ;;  %v8573_v36 = vpop.f32.mrb[31].mxu1 }
 0x67f   : > { %v10338_v52 = vpop.eup %10337  ;;  %8945 = vst [vmem:[%s14583_s15 + $0xd0] sm:$0xff] %v8913_v57  ;;  %v8914_v18 = vmul.f32 %v10336_v60, %v8690_v62  ;;  %v8652_v34 = vmul.f32 %v9891_v47, %v14554_v41  ;;  %v9893_v8 = vadd.f32 %v8573_v36, %v14962_v27 }
 0x680   : > { %8943 = vst [vmem:[%s14583_s15 + $0xc0] sm:$0xff] %v8911_v5  ;;  %v8912_v49 = vmul.f32 %v10338_v52, %v8688_v55  ;;  %v8693_v42 = vadd.f32 %v14559_v28, %v8654_v31  ;;  %v8655_v48 = vmul.f32 %v9892_v37, %v14554_v41 }
 0x681   : > { %8946 = vst [vmem:[%s14583_s15 + $0xd8] sm:$0xff] %v8914_v18  ;;  %v8691_v6 = vadd.f32 %v14559_v28, %v8652_v34  ;;  %v8653_v61 = vmul.f32 %v9893_v8, %v14554_v41 }
 0x682   : > { %8944 = vst [vmem:[%s14583_s15 + $0xc8] sm:$0xff] %v8912_v49  ;;  %v9446_v56 = vmul.f32 -1.442695, %v8693_v42  ;;  %v8694_v38 = vadd.f32 %v14559_v28, %v8655_v48 }
 0x683   : > { %v9444_v44 = vmul.f32 -1.442695, %v8691_v6  ;;  %v8692_v58 = vadd.f32 %v14559_v28, %v8653_v61 }
 0x684   : > { %10339 = vpow2.f32 %v9446_v56  ;;  %v9447_v9 = vmul.f32 -1.442695, %v8694_v38 }
 0x685   : > { %10341 = vpow2.f32 %v9444_v44  ;;  %v9445_v2 = vmul.f32 -1.442695, %v8692_v58 }
 0x686   : > { %10343 = vpow2.f32 %v9447_v9 }
 0x687   : > { %10345 = vpow2.f32 %v9445_v2 }
 0x68e   : > { %v10340_v21 = vpop.eup %10339 }
 0x68f   : > { %v10342_v11 = vpop.eup %10341  ;;  %v8821_v19 = vadd.f32 1.0, %v10340_v21 }
 0x690   : > { %v10344_v29 = vpop.eup %10343  ;;  %v8819_v41 = vadd.f32 1.0, %v10342_v11 }
 0x691   : > { %v10346_v13 = vpop.eup %10345  ;;  %10347 = vrcp.f32 %v8821_v19  ;;  %v8822_v26 = vadd.f32 1.0, %v10344_v29 }
 0x692   : > { %10349 = vrcp.f32 %v8819_v41  ;;  %v8820_v28 = vadd.f32 1.0, %v10346_v13 }
 0x693   : > { %10351 = vrcp.f32 %v8822_v26 }
 0x694   : > { %10353 = vrcp.f32 %v8820_v28 }
 0x69b   : > { %v10348_v50 = vpop.eup %10347 }
 0x69c   : > { %v10350_v51 = vpop.eup %10349  ;;  %v8917_v15 = vmul.f32 %v10348_v50, %v8693_v42 }
 0x69d   : > { %v10352_v14 = vpop.eup %10351  ;;  %v8915_v7 = vmul.f32 %v10350_v51, %v8691_v6 }
 0x69e   : > { %v10354_v53 = vpop.eup %10353  ;;  %8949 = vst [vmem:[%s14583_s15 + $0xf0] sm:$0xff] %v8917_v15  ;;  %v8918_v22 = vmul.f32 %v10352_v14, %v8694_v38 }
 0x69f   : > { %8947 = vst [vmem:[%s14583_s15 + $0xe0] sm:$0xff] %v8915_v7  ;;  %v8916_v35 = vmul.f32 %v10354_v53, %v8692_v58 }
 0x6a0   : > { %8950 = vst [vmem:[%s14583_s15 + $0xf8] sm:$0xff] %v8918_v22 }
 0x6a1   : > { %8948 = vst [vmem:[%s14583_s15 + $0xe8] sm:$0xff] %v8916_v35 }
 0x6a2   : > { %10568 = shalt.err (!%p10565_p8)
}
 0x6a3   : > { %s10569_s14 = scalar_lea.hbm %s14691_s23, 4096  ;;  %s10573_s15 = scalar_lea.hbm %s14747_s7, 8192 }
 0x6a4   : > { %p10570_p10 = scmp.ne.s32.totalorder %s14691_s23, %s10569_s14  ;;  %p10574_p0 = scmp.lt.u32.totalorder %s14691_s23, %s14747_s7 }
 0x6a5   : > { %p10575_p5 = scmp.lt.u32.totalorder %s10573_s15, %s10569_s14  ;;  %p10577_p6 = scmp.lt.u32.totalorder %s10569_s14, %s14691_s23 }
 0x6a6   : > { %p10571_p4 = pnand %p10570_p10, %p14963_p9 }
 0x6a7   : > { %p10576_p7 = por %p10575_p5, %p10574_p0 }
 0x6a8   : > { %p10572_p11 = pneg %p10571_p4 }
 0x6a9   : > { %p10578_p12 = por %p10577_p6, %p10576_p7 }
 0x6ab   : > { %p10579_p13 = pnand %p10578_p12, %p10572_p11 }
 0x6ad   : > { %10582 = shalt.err (!%p10579_p13)
}
 0x6ae   : > { %s10646_s22 = smov 128   ;;  %s10647_s9 = smov 8  }
 0x6af   : > { %9965 = dma.vmem_to_hbm [thread:$0]  (%p14963_p9), %s14693_s29, 4096, %s14691_s23, %s8952_s30, %s10646_s22, %s10646_s22, %s10647_s9  }
 0x6b0 PF: > { %s8980_s12 = sand.u32 1, %s10621_s24   ;;  %p14964_p1 = scmp.ne.s32.totalorder %s14800_s17, 0 }
 0x6b1   : > { %p14965_p3 = scmp.ge.s32.totalorder %s10633_s27, 2  ;;  %s8981_s19 = scalar_lea.sflag [#allocation5], %s8980_s12 }
 0x6b3   : > { %p9991_p2 = pnand %p14965_p3, %p14964_p1 }
 0x6b5   : > { %10616 = dma.done.wait (!%p9991_p2), %s8981_s19, 4096  }
 0x6b6   : > { %10618 = vsyncadd (!%p9991_p2), %s8981_s19, 4294963200  ;;  %p23_p8 = scmp.ge.s32.totalorder %s10872_s13, 4   ;;  %s14966_s24 = smov %s10625_s25 }
 0x6b7   : > { %s14967_s25 = smov %s10629_s26  ;;  %s14968_s26 = smov %s10883_s28 }
 0x6b8   : > { %s14969_s27 = smov %s10872_s13  ;;  %25 = sbr.rel (!%p23_p8) target bundleno = 8 (0x8), region = 122 }
 0x6bf   :  { %8986 = vsyncpa [#allocation4], 1 }
 0x6c0   :  { %8988 = vsyncpa [#allocation4 + $0x1], 1 }
 0x6c1   :  { %8989 = vsyncpa [#allocation7], 1 }
 0x6c2   :  { %8990 = vsyncpa [#allocation10], 1 }
 0x6c3   :  { %8991 = vsyncpa [#allocation13], 1 }
 0x6c4   :  { %8992 = vsyncpa [#allocation5], 1 }
 0x6c5   :  { %8994 = vsyncpa [#allocation5 + $0x1], 1 }

</bundles_post_ra>
